<compile_context>
chip_gen: v6e
topology: v6e:2x2x1
jax: 0.10.0
libtpu: 0.0.40
codegen_flags: <defaults>
</compile_context>

<pallas_src>
import functools

import jax
import jax.numpy as jnp
from jax import lax
from jax.experimental import pallas as pl
from jax.experimental.pallas import tpu as pltpu


def _round_up(x, m):
    return ((x + m - 1) // m) * m


def _layer_norm(y, g, b, eps):
    mean = jnp.mean(y, axis=-1, keepdims=True)
    var = jnp.mean(jnp.square(y - mean), axis=-1, keepdims=True)
    return (y - mean) * lax.rsqrt(var + eps) * g + b


# --------------------------------- fused kernel --------------------------------------

def _patch_embed_kernel(x_ref, w1_ref, b1_ref, g1_ref, be1_ref,
                        w2_ref, b2_ref, g2_ref, be2_ref,
                        wp_ref, bp_ref, valid_ref, sel_ref,
                        o_ref, y1_scr,
                        *, gw, gg, pad, seq, group, eps):
    f32 = jnp.float32
    bf16 = jnp.bfloat16

    # ---- conv1: 7x7/s2 conv expressed as 4x4 stride-1 taps over the space-to-depth
    #      input; each tap is a shifted (gg, 4C) x (4C, 32) matmul on the MXU. ----
    acc1 = jnp.zeros((gg, w1_ref.shape[-1]), f32)
    for k in range(16):
        shift = (k // 4) * gw + (k % 4)
        xs = x_ref[pl.ds(shift, gg), :].astype(bf16)
        acc1 = acc1 + jnp.dot(xs, w1_ref[k], preferred_element_type=f32)

    y1 = _layer_norm(acc1 + b1_ref[...], g1_ref[...], be1_ref[...], eps)
    y1 = jnp.maximum(y1, 0.0) * valid_ref[...]   # zero rows outside the OH1 x OW1 grid

    # Stage y1 in a zero-padded VMEM scratch so conv2's 3x3 halo reads zeros at borders.
    y1_scr[...] = jnp.zeros_like(y1_scr)
    y1_scr[pl.ds(pad, gg), :] = y1

    # ---- conv2: 3x3/s1 conv as 9 shifted matmuls over the VMEM-resident padded y1 ----
    acc2 = jnp.zeros((gg, w2_ref.shape[-1]), f32)
    for k in range(9):
        di, dj = k // 3 - 1, k % 3 - 1
        ys = y1_scr[pl.ds(pad + di * gw + dj, gg), :].astype(bf16)
        acc2 = acc2 + jnp.dot(ys, w2_ref[k], preferred_element_type=f32)

    y2 = _layer_norm(acc2 + b2_ref[...], g2_ref[...], be2_ref[...], eps)
    y2 = jnp.maximum(y2, 0.0).astype(bf16)

    # ---- fused reshape(B, -1, patch_dim) + Linear projection:
    #      a 0/1 selection matmul gathers the valid pixels into "group-major" order,
    #      then each group slice is contracted against its slice of wp. ----
    y2p = jnp.dot(sel_ref[...], y2, preferred_element_type=f32).astype(bf16)
    proj = jnp.dot(y2p[0:seq, :], wp_ref[0], preferred_element_type=f32)
    for r in range(1, group):
        proj = proj + jnp.dot(y2p[r * seq:(r + 1) * seq, :], wp_ref[r],
                              preferred_element_type=f32)
    o_ref[...] = (proj + bp_ref[...]).astype(o_ref.dtype)


# ---------------------------------- wrapper -------------------------------------------

def patch_embedding_forward(x_nchw, params, *, patch_size, eps=1e-5):
    B, C, H, W = x_nchw.shape
    assert H % 2 == 0 and W % 2 == 0, "spatial dims must be even"
    oh1, ow1 = H // 2, W // 2                  # conv1 output (k=7, s=2, p=3); conv2 keeps it
    group = (patch_size // 2) ** 2             # conv2 pixels folded into one token
    assert (oh1 * ow1) % group == 0
    seq = (oh1 * ow1) // group
    e_dim = params["wp"].shape[0]

    # ---- space-to-depth input prep: stride-2 7x7 conv -> stride-1 4x4 conv ----
    gh, gw = (H + 8) // 2, (W + 8) // 2
    gg = gh * gw
    xs = jnp.transpose(x_nchw, (0, 2, 3, 1))                       # NHWC
    xs = jnp.pad(xs, ((0, 0), (3, 5), (3, 5), (0, 0)))             # conv1 pad (3 + extra)
    xs = (xs.reshape(B, gh, 2, gw, 2, C)
            .transpose(0, 1, 3, 2, 4, 5)
            .reshape(B, gg, 4 * C))                                # flat (gh*gw, 4C) per batch
    npad = _round_up(gg + 3 * gw + 3, 8)                           # all 16 shifts in-bounds
    xs = jnp.pad(xs, ((0, 0), (0, npad - gg), (0, 0))).astype(jnp.float32)

    # ---- weights: rearranged once and cast to bf16 (MXU-native) ----
    c_out1 = params["w1"].shape[0]
    c_out2 = params["w2"].shape[0]
    w1p = jnp.pad(params["w1"], ((0, 0), (0, 0), (0, 1), (0, 1)))  # 7x7 -> 8x8 (zero tap)
    w1s = (w1p.reshape(c_out1, C, 4, 2, 4, 2)
              .transpose(2, 4, 3, 5, 1, 0)                         # (R, S, dr, dc, c, o)
              .reshape(16, 4 * C, c_out1).astype(jnp.bfloat16))
    w2s = (jnp.transpose(params["w2"], (2, 3, 1, 0))               # (ki, kj, cin, cout)
              .reshape(9, c_out1, c_out2).astype(jnp.bfloat16))
    wps = (jnp.transpose(params["wp"], (1, 0))                     # pre-transposed, no .T/call
              .reshape(group, c_out2, e_dim).astype(jnp.bfloat16))

    b1 = params["b1"].reshape(1, -1).astype(jnp.float32)
    g1 = params["g1"].reshape(1, -1).astype(jnp.float32)
    be1 = params["be1"].reshape(1, -1).astype(jnp.float32)
    b2 = params["b2"].reshape(1, -1).astype(jnp.float32)
    g2 = params["g2"].reshape(1, -1).astype(jnp.float32)
    be2 = params["be2"].reshape(1, -1).astype(jnp.float32)
    bp = params["bp"].reshape(1, -1).astype(jnp.float32)

    # ---- static tables: validity of grid rows; token/pixel selection matrix ----
    ridx = jnp.arange(gg)
    valid = ((ridx // gw < oh1) & (ridx % gw < ow1)).astype(jnp.float32)[:, None]
    jidx = jnp.arange(group * seq)[:, None]                        # j = g*seq + q
    g_i, q_i = jidx // seq, jidx % seq
    p8 = q_i * group + g_i                                         # flattened (oh1*ow1) pixel
    target = (p8 // ow1) * gw + (p8 % ow1)                         # its row on the gh x gw grid
    sel = (jnp.arange(gg)[None, :] == target).astype(jnp.bfloat16)

    pad = _round_up(gw + 1, 8)
    kernel = functools.partial(_patch_embed_kernel, gw=gw, gg=gg, pad=pad,
                               seq=seq, group=group, eps=eps)
    return pl.pallas_call(
        kernel,
        out_shape=jax.ShapeDtypeStruct((B, seq, e_dim), jnp.float32),
        grid=(B,),
        in_specs=[
            pl.BlockSpec((None, npad, 4 * C), lambda b: (b, 0, 0)),      # x (space-to-depth)
            pl.BlockSpec((16, 4 * C, c_out1), lambda b: (0, 0, 0)),      # conv1 weights
            pl.BlockSpec((1, c_out1), lambda b: (0, 0)),                 # conv1 bias
            pl.BlockSpec((1, c_out1), lambda b: (0, 0)),                 # ln1 gamma
            pl.BlockSpec((1, c_out1), lambda b: (0, 0)),                 # ln1 beta
            pl.BlockSpec((9, c_out1, c_out2), lambda b: (0, 0, 0)),      # conv2 weights
            pl.BlockSpec((1, c_out2), lambda b: (0, 0)),                 # conv2 bias
            pl.BlockSpec((1, c_out2), lambda b: (0, 0)),                 # ln2 gamma
            pl.BlockSpec((1, c_out2), lambda b: (0, 0)),                 # ln2 beta
            pl.BlockSpec((group, c_out2, e_dim), lambda b: (0, 0, 0)),   # proj weight (pre-T)
            pl.BlockSpec((1, e_dim), lambda b: (0, 0)),                  # proj bias
            pl.BlockSpec((gg, 1), lambda b: (0, 0)),                     # validity mask
            pl.BlockSpec((group * seq, gg), lambda b: (0, 0)),           # selection matrix
        ],
        out_specs=pl.BlockSpec((None, seq, e_dim), lambda b: (b, 0, 0)),
        scratch_shapes=[pltpu.VMEM((gg + 2 * pad, c_out1), jnp.float32)],
        compiler_params=pltpu.CompilerParams(
            dimension_semantics=("parallel",),
            vmem_limit_bytes=32 * 1024 * 1024),
    )(xs, w1s, b1, g1, be1, w2s, b2, g2, be2, wps, bp, valid, sel)


# ----------------------------- pure-JAX reference -------------------------------------
# Mirrors the kernel's numerics: bf16 matmul operands, f32 accumulation / LN / ReLU.

def ref_forward(x, p, *, patch_size, eps=1e-5):
    B = x.shape[0]
    bf = jnp.bfloat16
    y = lax.conv_general_dilated(x.astype(bf), p["w1"].astype(bf), (2, 2),
                                 ((3, 3), (3, 3)),
                                 dimension_numbers=("NCHW", "OIHW", "NCHW"),
                                 preferred_element_type=jnp.float32)
    y = y + p["b1"][None, :, None, None]
    y = jnp.transpose(y, (0, 2, 3, 1))
    y = jnp.maximum(_layer_norm(y, p["g1"], p["be1"], eps), 0.0)
    y = jnp.transpose(y, (0, 3, 1, 2)).astype(bf)
    y = lax.conv_general_dilated(y, p["w2"].astype(bf), (1, 1), ((1, 1), (1, 1)),
                                 dimension_numbers=("NCHW", "OIHW", "NCHW"),
                                 preferred_element_type=jnp.float32)
    y = y + p["b2"][None, :, None, None]
    y = jnp.transpose(y, (0, 2, 3, 1))
    y = jnp.maximum(_layer_norm(y, p["g2"], p["be2"], eps), 0.0)
    patch_dim = (patch_size // 2) ** 2 * 64
    y = y.reshape(B, -1, patch_dim).astype(bf)
    out = jnp.einsum("bnk,ok->bno", y, p["wp"].astype(bf),
                     preferred_element_type=jnp.float32)
    return out + p["bp"]


# ------------------------------------- main --------------------------------------------

if __name__ == "__main__":
    # Small shapes consistent with the module: img_size=16, patch_size=4,
    # in_channels=4, img_embd_dim=32.
    B, C, H, W = 2, 4, 16, 16
    patch_size = 4
    img_embd_dim = 32
    patch_dim = (patch_size // 2) ** 2 * 64  # 256
    n_patches = (H // patch_size) ** 2       # 16

    key = jax.random.PRNGKey(0)
    ks = jax.random.split(key, 11)
    x = jax.random.normal(ks[0], (B, C, H, W), jnp.float32)

    params = {
        "w1": 0.05 * jax.random.normal(ks[1], (32, C, 7, 7), jnp.float32),
        "b1": 0.05 * jax.random.normal(ks[2], (32,), jnp.float32),
        "g1": 1.0 + 0.05 * jax.random.normal(ks[3], (32,), jnp.float32),
        "be1": 0.05 * jax.random.normal(ks[4], (32,), jnp.float32),
        "w2": 0.05 * jax.random.normal(ks[5], (64, 32, 3, 3), jnp.float32),
        "b2": 0.05 * jax.random.normal(ks[6], (64,), jnp.float32),
        "g2": 1.0 + 0.05 * jax.random.normal(ks[7], (64,), jnp.float32),
        "be2": 0.05 * jax.random.normal(ks[8], (64,), jnp.float32),
        "wp": 0.05 * jax.random.normal(ks[9], (img_embd_dim, patch_dim), jnp.float32),
        "bp": 0.05 * jax.random.normal(ks[10], (img_embd_dim,), jnp.float32),
    }

    fwd = jax.jit(functools.partial(patch_embedding_forward, patch_size=patch_size))
    out = jax.block_until_ready(fwd(x, params))
    assert out.shape == (B, n_patches, img_embd_dim), out.shape

    ref = jax.block_until_ready(ref_forward(x, params, patch_size=patch_size))
    err = float(jnp.max(jnp.abs(out - ref)))
    assert jnp.allclose(out, ref, atol=2e-2, rtol=2e-2), f"max abs diff {err}"

    print("KERNEL_OK")
</pallas_src>

<mosaic_0001>
module attributes {stable_mosaic.version = 11 : i64} {
  func.func @_patch_embed_kernel(%arg0: i32, %arg1: memref<1x184x16xf32, #tpu.memory_space<vmem>>, %arg2: memref<16x16x32xbf16, #tpu.memory_space<vmem>>, %arg3: memref<1x32xf32, #tpu.memory_space<vmem>>, %arg4: memref<1x32xf32, #tpu.memory_space<vmem>>, %arg5: memref<1x32xf32, #tpu.memory_space<vmem>>, %arg6: memref<9x32x64xbf16, #tpu.memory_space<vmem>>, %arg7: memref<1x64xf32, #tpu.memory_space<vmem>>, %arg8: memref<1x64xf32, #tpu.memory_space<vmem>>, %arg9: memref<1x64xf32, #tpu.memory_space<vmem>>, %arg10: memref<4x64x32xbf16, #tpu.memory_space<vmem>>, %arg11: memref<1x32xf32, #tpu.memory_space<vmem>>, %arg12: memref<144x1xf32, #tpu.memory_space<vmem>>, %arg13: memref<64x144xbf16, #tpu.memory_space<vmem>>, %arg14: memref<1x16x32xf32, #tpu.memory_space<vmem>>, %arg15: memref<176x32xf32, #tpu.memory_space<vmem>>) attributes {dimension_semantics = [#tpu.dimension_semantics<parallel>], iteration_bounds = array<i64: 2>, scalar_prefetch = 0 : i64, scratch_operands = 1 : i64, tpu.core_type = #tpu.core_type<tc>, window_params = [{transform_indices = @transform_0, window_bounds = array<i64: 1, 184, 16>}, {pipeline_mode = #tpu.pipeline_mode<synchronous>, transform_indices = @transform_1, window_bounds = array<i64: 16, 16, 32>}, {pipeline_mode = #tpu.pipeline_mode<synchronous>, transform_indices = @transform_2, window_bounds = array<i64: 1, 32>}, {pipeline_mode = #tpu.pipeline_mode<synchronous>, transform_indices = @transform_3, window_bounds = array<i64: 1, 32>}, {pipeline_mode = #tpu.pipeline_mode<synchronous>, transform_indices = @transform_4, window_bounds = array<i64: 1, 32>}, {pipeline_mode = #tpu.pipeline_mode<synchronous>, transform_indices = @transform_5, window_bounds = array<i64: 9, 32, 64>}, {pipeline_mode = #tpu.pipeline_mode<synchronous>, transform_indices = @transform_6, window_bounds = array<i64: 1, 64>}, {pipeline_mode = #tpu.pipeline_mode<synchronous>, transform_indices = @transform_7, window_bounds = array<i64: 1, 64>}, {pipeline_mode = #tpu.pipeline_mode<synchronous>, transform_indices = @transform_8, window_bounds = array<i64: 1, 64>}, {pipeline_mode = #tpu.pipeline_mode<synchronous>, transform_indices = @transform_9, window_bounds = array<i64: 4, 64, 32>}, {pipeline_mode = #tpu.pipeline_mode<synchronous>, transform_indices = @transform_10, window_bounds = array<i64: 1, 32>}, {pipeline_mode = #tpu.pipeline_mode<synchronous>, transform_indices = @transform_11, window_bounds = array<i64: 144, 1>}, {pipeline_mode = #tpu.pipeline_mode<synchronous>, transform_indices = @transform_12, window_bounds = array<i64: 64, 144>}, {transform_indices = @transform_13, window_bounds = array<i64: 1, 16, 32>}]} {
    %cst = arith.constant 0.000000e+00 : f32
    %0 = vector.broadcast %cst : f32 to vector<144x32xf32>
    %c0 = arith.constant 0 : index
    %c0_0 = arith.constant 0 : index
    %c0_1 = arith.constant 0 : index
    %1 = vector.load %arg1[%c0, %c0_0, %c0_1] : memref<1x184x16xf32, #tpu.memory_space<vmem>>, vector<1x144x16xf32>
    %2 = vector.shape_cast %1 : vector<1x144x16xf32> to vector<144x16xf32>
    %3 = arith.truncf %2 : vector<144x16xf32> to vector<144x16xbf16>
    %c0_2 = arith.constant 0 : index
    %c0_3 = arith.constant 0 : index
    %c0_4 = arith.constant 0 : index
    %4 = vector.load %arg2[%c0_2, %c0_3, %c0_4] : memref<16x16x32xbf16, #tpu.memory_space<vmem>>, vector<1x16x32xbf16>
    %5 = vector.shape_cast %4 : vector<1x16x32xbf16> to vector<16x32xbf16>
    %cst_5 = arith.constant dense<0.000000e+00> : vector<144x32xf32>
    %6 = tpu.matmul %3, %5, %cst_5 {dimension_numbers = #tpu.dot_dimension_numbers<[1], [0], [0], [1], [0, 0, 1, 1], [], []>} : vector<144x16xbf16>, vector<16x32xbf16>, vector<144x32xf32> -> vector<144x32xf32>
    %7 = arith.addf %0, %6 : vector<144x32xf32>
    %c0_6 = arith.constant 0 : index
    %c1 = arith.constant 1 : index
    %c0_7 = arith.constant 0 : index
    %8 = vector.load %arg1[%c0_6, %c1, %c0_7] : memref<1x184x16xf32, #tpu.memory_space<vmem>>, vector<1x144x16xf32>
    %9 = vector.shape_cast %8 : vector<1x144x16xf32> to vector<144x16xf32>
    %10 = arith.truncf %9 : vector<144x16xf32> to vector<144x16xbf16>
    %c1_8 = arith.constant 1 : index
    %c0_9 = arith.constant 0 : index
    %c0_10 = arith.constant 0 : index
    %11 = vector.load %arg2[%c1_8, %c0_9, %c0_10] : memref<16x16x32xbf16, #tpu.memory_space<vmem>>, vector<1x16x32xbf16>
    %12 = vector.shape_cast %11 : vector<1x16x32xbf16> to vector<16x32xbf16>
    %cst_11 = arith.constant dense<0.000000e+00> : vector<144x32xf32>
    %13 = tpu.matmul %10, %12, %cst_11 {dimension_numbers = #tpu.dot_dimension_numbers<[1], [0], [0], [1], [0, 0, 1, 1], [], []>} : vector<144x16xbf16>, vector<16x32xbf16>, vector<144x32xf32> -> vector<144x32xf32>
    %14 = arith.addf %7, %13 : vector<144x32xf32>
    %c0_12 = arith.constant 0 : index
    %c2 = arith.constant 2 : index
    %c0_13 = arith.constant 0 : index
    %15 = vector.load %arg1[%c0_12, %c2, %c0_13] : memref<1x184x16xf32, #tpu.memory_space<vmem>>, vector<1x144x16xf32>
    %16 = vector.shape_cast %15 : vector<1x144x16xf32> to vector<144x16xf32>
    %17 = arith.truncf %16 : vector<144x16xf32> to vector<144x16xbf16>
    %c2_14 = arith.constant 2 : index
    %c0_15 = arith.constant 0 : index
    %c0_16 = arith.constant 0 : index
    %18 = vector.load %arg2[%c2_14, %c0_15, %c0_16] : memref<16x16x32xbf16, #tpu.memory_space<vmem>>, vector<1x16x32xbf16>
    %19 = vector.shape_cast %18 : vector<1x16x32xbf16> to vector<16x32xbf16>
    %cst_17 = arith.constant dense<0.000000e+00> : vector<144x32xf32>
    %20 = tpu.matmul %17, %19, %cst_17 {dimension_numbers = #tpu.dot_dimension_numbers<[1], [0], [0], [1], [0, 0, 1, 1], [], []>} : vector<144x16xbf16>, vector<16x32xbf16>, vector<144x32xf32> -> vector<144x32xf32>
    %21 = arith.addf %14, %20 : vector<144x32xf32>
    %c0_18 = arith.constant 0 : index
    %c3 = arith.constant 3 : index
    %c0_19 = arith.constant 0 : index
    %22 = vector.load %arg1[%c0_18, %c3, %c0_19] : memref<1x184x16xf32, #tpu.memory_space<vmem>>, vector<1x144x16xf32>
    %23 = vector.shape_cast %22 : vector<1x144x16xf32> to vector<144x16xf32>
    %24 = arith.truncf %23 : vector<144x16xf32> to vector<144x16xbf16>
    %c3_20 = arith.constant 3 : index
    %c0_21 = arith.constant 0 : index
    %c0_22 = arith.constant 0 : index
    %25 = vector.load %arg2[%c3_20, %c0_21, %c0_22] : memref<16x16x32xbf16, #tpu.memory_space<vmem>>, vector<1x16x32xbf16>
    %26 = vector.shape_cast %25 : vector<1x16x32xbf16> to vector<16x32xbf16>
    %cst_23 = arith.constant dense<0.000000e+00> : vector<144x32xf32>
    %27 = tpu.matmul %24, %26, %cst_23 {dimension_numbers = #tpu.dot_dimension_numbers<[1], [0], [0], [1], [0, 0, 1, 1], [], []>} : vector<144x16xbf16>, vector<16x32xbf16>, vector<144x32xf32> -> vector<144x32xf32>
    %28 = arith.addf %21, %27 : vector<144x32xf32>
    %c0_24 = arith.constant 0 : index
    %c12 = arith.constant 12 : index
    %c0_25 = arith.constant 0 : index
    %29 = vector.load %arg1[%c0_24, %c12, %c0_25] : memref<1x184x16xf32, #tpu.memory_space<vmem>>, vector<1x144x16xf32>
    %30 = vector.shape_cast %29 : vector<1x144x16xf32> to vector<144x16xf32>
    %31 = arith.truncf %30 : vector<144x16xf32> to vector<144x16xbf16>
    %c4 = arith.constant 4 : index
    %c0_26 = arith.constant 0 : index
    %c0_27 = arith.constant 0 : index
    %32 = vector.load %arg2[%c4, %c0_26, %c0_27] : memref<16x16x32xbf16, #tpu.memory_space<vmem>>, vector<1x16x32xbf16>
    %33 = vector.shape_cast %32 : vector<1x16x32xbf16> to vector<16x32xbf16>
    %cst_28 = arith.constant dense<0.000000e+00> : vector<144x32xf32>
    %34 = tpu.matmul %31, %33, %cst_28 {dimension_numbers = #tpu.dot_dimension_numbers<[1], [0], [0], [1], [0, 0, 1, 1], [], []>} : vector<144x16xbf16>, vector<16x32xbf16>, vector<144x32xf32> -> vector<144x32xf32>
    %35 = arith.addf %28, %34 : vector<144x32xf32>
    %c0_29 = arith.constant 0 : index
    %c13 = arith.constant 13 : index
    %c0_30 = arith.constant 0 : index
    %36 = vector.load %arg1[%c0_29, %c13, %c0_30] : memref<1x184x16xf32, #tpu.memory_space<vmem>>, vector<1x144x16xf32>
    %37 = vector.shape_cast %36 : vector<1x144x16xf32> to vector<144x16xf32>
    %38 = arith.truncf %37 : vector<144x16xf32> to vector<144x16xbf16>
    %c5 = arith.constant 5 : index
    %c0_31 = arith.constant 0 : index
    %c0_32 = arith.constant 0 : index
    %39 = vector.load %arg2[%c5, %c0_31, %c0_32] : memref<16x16x32xbf16, #tpu.memory_space<vmem>>, vector<1x16x32xbf16>
    %40 = vector.shape_cast %39 : vector<1x16x32xbf16> to vector<16x32xbf16>
    %cst_33 = arith.constant dense<0.000000e+00> : vector<144x32xf32>
    %41 = tpu.matmul %38, %40, %cst_33 {dimension_numbers = #tpu.dot_dimension_numbers<[1], [0], [0], [1], [0, 0, 1, 1], [], []>} : vector<144x16xbf16>, vector<16x32xbf16>, vector<144x32xf32> -> vector<144x32xf32>
    %42 = arith.addf %35, %41 : vector<144x32xf32>
    %c0_34 = arith.constant 0 : index
    %c14 = arith.constant 14 : index
    %c0_35 = arith.constant 0 : index
    %43 = vector.load %arg1[%c0_34, %c14, %c0_35] : memref<1x184x16xf32, #tpu.memory_space<vmem>>, vector<1x144x16xf32>
    %44 = vector.shape_cast %43 : vector<1x144x16xf32> to vector<144x16xf32>
    %45 = arith.truncf %44 : vector<144x16xf32> to vector<144x16xbf16>
    %c6 = arith.constant 6 : index
    %c0_36 = arith.constant 0 : index
    %c0_37 = arith.constant 0 : index
    %46 = vector.load %arg2[%c6, %c0_36, %c0_37] : memref<16x16x32xbf16, #tpu.memory_space<vmem>>, vector<1x16x32xbf16>
    %47 = vector.shape_cast %46 : vector<1x16x32xbf16> to vector<16x32xbf16>
    %cst_38 = arith.constant dense<0.000000e+00> : vector<144x32xf32>
    %48 = tpu.matmul %45, %47, %cst_38 {dimension_numbers = #tpu.dot_dimension_numbers<[1], [0], [0], [1], [0, 0, 1, 1], [], []>} : vector<144x16xbf16>, vector<16x32xbf16>, vector<144x32xf32> -> vector<144x32xf32>
    %49 = arith.addf %42, %48 : vector<144x32xf32>
    %c0_39 = arith.constant 0 : index
    %c15 = arith.constant 15 : index
    %c0_40 = arith.constant 0 : index
    %50 = vector.load %arg1[%c0_39, %c15, %c0_40] : memref<1x184x16xf32, #tpu.memory_space<vmem>>, vector<1x144x16xf32>
    %51 = vector.shape_cast %50 : vector<1x144x16xf32> to vector<144x16xf32>
    %52 = arith.truncf %51 : vector<144x16xf32> to vector<144x16xbf16>
    %c7 = arith.constant 7 : index
    %c0_41 = arith.constant 0 : index
    %c0_42 = arith.constant 0 : index
    %53 = vector.load %arg2[%c7, %c0_41, %c0_42] : memref<16x16x32xbf16, #tpu.memory_space<vmem>>, vector<1x16x32xbf16>
    %54 = vector.shape_cast %53 : vector<1x16x32xbf16> to vector<16x32xbf16>
    %cst_43 = arith.constant dense<0.000000e+00> : vector<144x32xf32>
    %55 = tpu.matmul %52, %54, %cst_43 {dimension_numbers = #tpu.dot_dimension_numbers<[1], [0], [0], [1], [0, 0, 1, 1], [], []>} : vector<144x16xbf16>, vector<16x32xbf16>, vector<144x32xf32> -> vector<144x32xf32>
    %56 = arith.addf %49, %55 : vector<144x32xf32>
    %c0_44 = arith.constant 0 : index
    %c24 = arith.constant 24 : index
    %c0_45 = arith.constant 0 : index
    %57 = vector.load %arg1[%c0_44, %c24, %c0_45] : memref<1x184x16xf32, #tpu.memory_space<vmem>>, vector<1x144x16xf32>
    %58 = vector.shape_cast %57 : vector<1x144x16xf32> to vector<144x16xf32>
    %59 = arith.truncf %58 : vector<144x16xf32> to vector<144x16xbf16>
    %c8 = arith.constant 8 : index
    %c0_46 = arith.constant 0 : index
    %c0_47 = arith.constant 0 : index
    %60 = vector.load %arg2[%c8, %c0_46, %c0_47] : memref<16x16x32xbf16, #tpu.memory_space<vmem>>, vector<1x16x32xbf16>
    %61 = vector.shape_cast %60 : vector<1x16x32xbf16> to vector<16x32xbf16>
    %cst_48 = arith.constant dense<0.000000e+00> : vector<144x32xf32>
    %62 = tpu.matmul %59, %61, %cst_48 {dimension_numbers = #tpu.dot_dimension_numbers<[1], [0], [0], [1], [0, 0, 1, 1], [], []>} : vector<144x16xbf16>, vector<16x32xbf16>, vector<144x32xf32> -> vector<144x32xf32>
    %63 = arith.addf %56, %62 : vector<144x32xf32>
    %c0_49 = arith.constant 0 : index
    %c25 = arith.constant 25 : index
    %c0_50 = arith.constant 0 : index
    %64 = vector.load %arg1[%c0_49, %c25, %c0_50] : memref<1x184x16xf32, #tpu.memory_space<vmem>>, vector<1x144x16xf32>
    %65 = vector.shape_cast %64 : vector<1x144x16xf32> to vector<144x16xf32>
    %66 = arith.truncf %65 : vector<144x16xf32> to vector<144x16xbf16>
    %c9 = arith.constant 9 : index
    %c0_51 = arith.constant 0 : index
    %c0_52 = arith.constant 0 : index
    %67 = vector.load %arg2[%c9, %c0_51, %c0_52] : memref<16x16x32xbf16, #tpu.memory_space<vmem>>, vector<1x16x32xbf16>
    %68 = vector.shape_cast %67 : vector<1x16x32xbf16> to vector<16x32xbf16>
    %cst_53 = arith.constant dense<0.000000e+00> : vector<144x32xf32>
    %69 = tpu.matmul %66, %68, %cst_53 {dimension_numbers = #tpu.dot_dimension_numbers<[1], [0], [0], [1], [0, 0, 1, 1], [], []>} : vector<144x16xbf16>, vector<16x32xbf16>, vector<144x32xf32> -> vector<144x32xf32>
    %70 = arith.addf %63, %69 : vector<144x32xf32>
    %c0_54 = arith.constant 0 : index
    %c26 = arith.constant 26 : index
    %c0_55 = arith.constant 0 : index
    %71 = vector.load %arg1[%c0_54, %c26, %c0_55] : memref<1x184x16xf32, #tpu.memory_space<vmem>>, vector<1x144x16xf32>
    %72 = vector.shape_cast %71 : vector<1x144x16xf32> to vector<144x16xf32>
    %73 = arith.truncf %72 : vector<144x16xf32> to vector<144x16xbf16>
    %c10 = arith.constant 10 : index
    %c0_56 = arith.constant 0 : index
    %c0_57 = arith.constant 0 : index
    %74 = vector.load %arg2[%c10, %c0_56, %c0_57] : memref<16x16x32xbf16, #tpu.memory_space<vmem>>, vector<1x16x32xbf16>
    %75 = vector.shape_cast %74 : vector<1x16x32xbf16> to vector<16x32xbf16>
    %cst_58 = arith.constant dense<0.000000e+00> : vector<144x32xf32>
    %76 = tpu.matmul %73, %75, %cst_58 {dimension_numbers = #tpu.dot_dimension_numbers<[1], [0], [0], [1], [0, 0, 1, 1], [], []>} : vector<144x16xbf16>, vector<16x32xbf16>, vector<144x32xf32> -> vector<144x32xf32>
    %77 = arith.addf %70, %76 : vector<144x32xf32>
    %c0_59 = arith.constant 0 : index
    %c27 = arith.constant 27 : index
    %c0_60 = arith.constant 0 : index
    %78 = vector.load %arg1[%c0_59, %c27, %c0_60] : memref<1x184x16xf32, #tpu.memory_space<vmem>>, vector<1x144x16xf32>
    %79 = vector.shape_cast %78 : vector<1x144x16xf32> to vector<144x16xf32>
    %80 = arith.truncf %79 : vector<144x16xf32> to vector<144x16xbf16>
    %c11 = arith.constant 11 : index
    %c0_61 = arith.constant 0 : index
    %c0_62 = arith.constant 0 : index
    %81 = vector.load %arg2[%c11, %c0_61, %c0_62] : memref<16x16x32xbf16, #tpu.memory_space<vmem>>, vector<1x16x32xbf16>
    %82 = vector.shape_cast %81 : vector<1x16x32xbf16> to vector<16x32xbf16>
    %cst_63 = arith.constant dense<0.000000e+00> : vector<144x32xf32>
    %83 = tpu.matmul %80, %82, %cst_63 {dimension_numbers = #tpu.dot_dimension_numbers<[1], [0], [0], [1], [0, 0, 1, 1], [], []>} : vector<144x16xbf16>, vector<16x32xbf16>, vector<144x32xf32> -> vector<144x32xf32>
    %84 = arith.addf %77, %83 : vector<144x32xf32>
    %c0_64 = arith.constant 0 : index
    %c36 = arith.constant 36 : index
    %c0_65 = arith.constant 0 : index
    %85 = vector.load %arg1[%c0_64, %c36, %c0_65] : memref<1x184x16xf32, #tpu.memory_space<vmem>>, vector<1x144x16xf32>
    %86 = vector.shape_cast %85 : vector<1x144x16xf32> to vector<144x16xf32>
    %87 = arith.truncf %86 : vector<144x16xf32> to vector<144x16xbf16>
    %c12_66 = arith.constant 12 : index
    %c0_67 = arith.constant 0 : index
    %c0_68 = arith.constant 0 : index
    %88 = vector.load %arg2[%c12_66, %c0_67, %c0_68] : memref<16x16x32xbf16, #tpu.memory_space<vmem>>, vector<1x16x32xbf16>
    %89 = vector.shape_cast %88 : vector<1x16x32xbf16> to vector<16x32xbf16>
    %cst_69 = arith.constant dense<0.000000e+00> : vector<144x32xf32>
    %90 = tpu.matmul %87, %89, %cst_69 {dimension_numbers = #tpu.dot_dimension_numbers<[1], [0], [0], [1], [0, 0, 1, 1], [], []>} : vector<144x16xbf16>, vector<16x32xbf16>, vector<144x32xf32> -> vector<144x32xf32>
    %91 = arith.addf %84, %90 : vector<144x32xf32>
    %c0_70 = arith.constant 0 : index
    %c37 = arith.constant 37 : index
    %c0_71 = arith.constant 0 : index
    %92 = vector.load %arg1[%c0_70, %c37, %c0_71] : memref<1x184x16xf32, #tpu.memory_space<vmem>>, vector<1x144x16xf32>
    %93 = vector.shape_cast %92 : vector<1x144x16xf32> to vector<144x16xf32>
    %94 = arith.truncf %93 : vector<144x16xf32> to vector<144x16xbf16>
    %c13_72 = arith.constant 13 : index
    %c0_73 = arith.constant 0 : index
    %c0_74 = arith.constant 0 : index
    %95 = vector.load %arg2[%c13_72, %c0_73, %c0_74] : memref<16x16x32xbf16, #tpu.memory_space<vmem>>, vector<1x16x32xbf16>
    %96 = vector.shape_cast %95 : vector<1x16x32xbf16> to vector<16x32xbf16>
    %cst_75 = arith.constant dense<0.000000e+00> : vector<144x32xf32>
    %97 = tpu.matmul %94, %96, %cst_75 {dimension_numbers = #tpu.dot_dimension_numbers<[1], [0], [0], [1], [0, 0, 1, 1], [], []>} : vector<144x16xbf16>, vector<16x32xbf16>, vector<144x32xf32> -> vector<144x32xf32>
    %98 = arith.addf %91, %97 : vector<144x32xf32>
    %c0_76 = arith.constant 0 : index
    %c38 = arith.constant 38 : index
    %c0_77 = arith.constant 0 : index
    %99 = vector.load %arg1[%c0_76, %c38, %c0_77] : memref<1x184x16xf32, #tpu.memory_space<vmem>>, vector<1x144x16xf32>
    %100 = vector.shape_cast %99 : vector<1x144x16xf32> to vector<144x16xf32>
    %101 = arith.truncf %100 : vector<144x16xf32> to vector<144x16xbf16>
    %c14_78 = arith.constant 14 : index
    %c0_79 = arith.constant 0 : index
    %c0_80 = arith.constant 0 : index
    %102 = vector.load %arg2[%c14_78, %c0_79, %c0_80] : memref<16x16x32xbf16, #tpu.memory_space<vmem>>, vector<1x16x32xbf16>
    %103 = vector.shape_cast %102 : vector<1x16x32xbf16> to vector<16x32xbf16>
    %cst_81 = arith.constant dense<0.000000e+00> : vector<144x32xf32>
    %104 = tpu.matmul %101, %103, %cst_81 {dimension_numbers = #tpu.dot_dimension_numbers<[1], [0], [0], [1], [0, 0, 1, 1], [], []>} : vector<144x16xbf16>, vector<16x32xbf16>, vector<144x32xf32> -> vector<144x32xf32>
    %105 = arith.addf %98, %104 : vector<144x32xf32>
    %c0_82 = arith.constant 0 : index
    %c39 = arith.constant 39 : index
    %c0_83 = arith.constant 0 : index
    %106 = vector.load %arg1[%c0_82, %c39, %c0_83] : memref<1x184x16xf32, #tpu.memory_space<vmem>>, vector<1x144x16xf32>
    %107 = vector.shape_cast %106 : vector<1x144x16xf32> to vector<144x16xf32>
    %108 = arith.truncf %107 : vector<144x16xf32> to vector<144x16xbf16>
    %c15_84 = arith.constant 15 : index
    %c0_85 = arith.constant 0 : index
    %c0_86 = arith.constant 0 : index
    %109 = vector.load %arg2[%c15_84, %c0_85, %c0_86] : memref<16x16x32xbf16, #tpu.memory_space<vmem>>, vector<1x16x32xbf16>
    %110 = vector.shape_cast %109 : vector<1x16x32xbf16> to vector<16x32xbf16>
    %cst_87 = arith.constant dense<0.000000e+00> : vector<144x32xf32>
    %111 = tpu.matmul %108, %110, %cst_87 {dimension_numbers = #tpu.dot_dimension_numbers<[1], [0], [0], [1], [0, 0, 1, 1], [], []>} : vector<144x16xbf16>, vector<16x32xbf16>, vector<144x32xf32> -> vector<144x32xf32>
    %112 = arith.addf %105, %111 : vector<144x32xf32>
    %c0_88 = arith.constant 0 : index
    %c0_89 = arith.constant 0 : index
    %113 = vector.load %arg3[%c0_88, %c0_89] : memref<1x32xf32, #tpu.memory_space<vmem>>, vector<1x32xf32>
    %114 = vector.broadcast %113 : vector<1x32xf32> to vector<144x32xf32>
    %115 = arith.addf %112, %114 : vector<144x32xf32>
    %c0_90 = arith.constant 0 : index
    %c0_91 = arith.constant 0 : index
    %116 = vector.load %arg4[%c0_90, %c0_91] : memref<1x32xf32, #tpu.memory_space<vmem>>, vector<1x32xf32>
    %c0_92 = arith.constant 0 : index
    %c0_93 = arith.constant 0 : index
    %117 = vector.load %arg5[%c0_92, %c0_93] : memref<1x32xf32, #tpu.memory_space<vmem>>, vector<1x32xf32>
    %cst_94 = arith.constant dense<0.000000e+00> : vector<144xf32>
    %118 = vector.multi_reduction <add>, %115, %cst_94 [1] : vector<144x32xf32> to vector<144xf32>
    %119 = vector.shape_cast %118 : vector<144xf32> to vector<144x1xf32>
    %cst_95 = arith.constant 3.200000e+01 : f32
    %120 = vector.broadcast %cst_95 : f32 to vector<144x1xf32>
    %121 = arith.divf %119, %120 : vector<144x1xf32>
    %122 = vector.broadcast %121 : vector<144x1xf32> to vector<144x32xf32>
    %123 = arith.subf %115, %122 : vector<144x32xf32>
    %124 = arith.mulf %123, %123 : vector<144x32xf32>
    %cst_96 = arith.constant dense<0.000000e+00> : vector<144xf32>
    %125 = vector.multi_reduction <add>, %124, %cst_96 [1] : vector<144x32xf32> to vector<144xf32>
    %126 = vector.shape_cast %125 : vector<144xf32> to vector<144x1xf32>
    %cst_97 = arith.constant 3.200000e+01 : f32
    %127 = vector.broadcast %cst_97 : f32 to vector<144x1xf32>
    %128 = arith.divf %126, %127 : vector<144x1xf32>
    %129 = vector.broadcast %121 : vector<144x1xf32> to vector<144x32xf32>
    %130 = arith.subf %115, %129 : vector<144x32xf32>
    %cst_98 = arith.constant 9.99999974E-6 : f32
    %131 = vector.broadcast %cst_98 : f32 to vector<144x1xf32>
    %132 = arith.addf %128, %131 : vector<144x1xf32>
    %133 = math.rsqrt %132 : vector<144x1xf32>
    %134 = vector.broadcast %133 : vector<144x1xf32> to vector<144x32xf32>
    %135 = arith.mulf %130, %134 : vector<144x32xf32>
    %136 = vector.broadcast %116 : vector<1x32xf32> to vector<144x32xf32>
    %137 = arith.mulf %135, %136 : vector<144x32xf32>
    %138 = vector.broadcast %117 : vector<1x32xf32> to vector<144x32xf32>
    %139 = arith.addf %137, %138 : vector<144x32xf32>
    %cst_99 = arith.constant 0.000000e+00 : f32
    %140 = vector.broadcast %cst_99 : f32 to vector<144x32xf32>
    %141 = arith.maximumf %139, %140 : vector<144x32xf32>
    %c0_100 = arith.constant 0 : index
    %c0_101 = arith.constant 0 : index
    %142 = vector.load %arg12[%c0_100, %c0_101] : memref<144x1xf32, #tpu.memory_space<vmem>>, vector<144x1xf32>
    %143 = vector.broadcast %142 : vector<144x1xf32> to vector<144x32xf32>
    %144 = arith.mulf %141, %143 : vector<144x32xf32>
    %cst_102 = arith.constant 0.000000e+00 : f32
    %145 = vector.broadcast %cst_102 : f32 to vector<176x32xf32>
    %c0_103 = arith.constant 0 : index
    %c0_104 = arith.constant 0 : index
    %146 = vector.load %arg15[%c0_103, %c0_104] : memref<176x32xf32, #tpu.memory_space<vmem>>, vector<176x32xf32>
    tpu.vector_store %arg15[%c0_103, %c0_104], %145 {strides = array<i32>} : memref<176x32xf32, #tpu.memory_space<vmem>>, vector<176x32xf32>,
    %c16 = arith.constant 16 : index
    %c0_105 = arith.constant 0 : index
    %147 = vector.load %arg15[%c16, %c0_105] : memref<176x32xf32, #tpu.memory_space<vmem>>, vector<144x32xf32>
    tpu.vector_store %arg15[%c16, %c0_105], %144 {strides = array<i32>} : memref<176x32xf32, #tpu.memory_space<vmem>>, vector<144x32xf32>,
    %cst_106 = arith.constant 0.000000e+00 : f32
    %148 = vector.broadcast %cst_106 : f32 to vector<144x64xf32>
    %c3_107 = arith.constant 3 : index
    %c0_108 = arith.constant 0 : index
    %149 = vector.load %arg15[%c3_107, %c0_108] : memref<176x32xf32, #tpu.memory_space<vmem>>, vector<144x32xf32>
    %150 = arith.truncf %149 : vector<144x32xf32> to vector<144x32xbf16>
    %c0_109 = arith.constant 0 : index
    %c0_110 = arith.constant 0 : index
    %c0_111 = arith.constant 0 : index
    %151 = vector.load %arg6[%c0_109, %c0_110, %c0_111] : memref<9x32x64xbf16, #tpu.memory_space<vmem>>, vector<1x32x64xbf16>
    %152 = vector.shape_cast %151 : vector<1x32x64xbf16> to vector<32x64xbf16>
    %cst_112 = arith.constant dense<0.000000e+00> : vector<144x64xf32>
    %153 = tpu.matmul %150, %152, %cst_112 {dimension_numbers = #tpu.dot_dimension_numbers<[1], [0], [0], [1], [0, 0, 1, 1], [], []>} : vector<144x32xbf16>, vector<32x64xbf16>, vector<144x64xf32> -> vector<144x64xf32>
    %154 = arith.addf %148, %153 : vector<144x64xf32>
    %c4_113 = arith.constant 4 : index
    %c0_114 = arith.constant 0 : index
    %155 = vector.load %arg15[%c4_113, %c0_114] : memref<176x32xf32, #tpu.memory_space<vmem>>, vector<144x32xf32>
    %156 = arith.truncf %155 : vector<144x32xf32> to vector<144x32xbf16>
    %c1_115 = arith.constant 1 : index
    %c0_116 = arith.constant 0 : index
    %c0_117 = arith.constant 0 : index
    %157 = vector.load %arg6[%c1_115, %c0_116, %c0_117] : memref<9x32x64xbf16, #tpu.memory_space<vmem>>, vector<1x32x64xbf16>
    %158 = vector.shape_cast %157 : vector<1x32x64xbf16> to vector<32x64xbf16>
    %cst_118 = arith.constant dense<0.000000e+00> : vector<144x64xf32>
    %159 = tpu.matmul %156, %158, %cst_118 {dimension_numbers = #tpu.dot_dimension_numbers<[1], [0], [0], [1], [0, 0, 1, 1], [], []>} : vector<144x32xbf16>, vector<32x64xbf16>, vector<144x64xf32> -> vector<144x64xf32>
    %160 = arith.addf %154, %159 : vector<144x64xf32>
    %c5_119 = arith.constant 5 : index
    %c0_120 = arith.constant 0 : index
    %161 = vector.load %arg15[%c5_119, %c0_120] : memref<176x32xf32, #tpu.memory_space<vmem>>, vector<144x32xf32>
    %162 = arith.truncf %161 : vector<144x32xf32> to vector<144x32xbf16>
    %c2_121 = arith.constant 2 : index
    %c0_122 = arith.constant 0 : index
    %c0_123 = arith.constant 0 : index
    %163 = vector.load %arg6[%c2_121, %c0_122, %c0_123] : memref<9x32x64xbf16, #tpu.memory_space<vmem>>, vector<1x32x64xbf16>
    %164 = vector.shape_cast %163 : vector<1x32x64xbf16> to vector<32x64xbf16>
    %cst_124 = arith.constant dense<0.000000e+00> : vector<144x64xf32>
    %165 = tpu.matmul %162, %164, %cst_124 {dimension_numbers = #tpu.dot_dimension_numbers<[1], [0], [0], [1], [0, 0, 1, 1], [], []>} : vector<144x32xbf16>, vector<32x64xbf16>, vector<144x64xf32> -> vector<144x64xf32>
    %166 = arith.addf %160, %165 : vector<144x64xf32>
    %c15_125 = arith.constant 15 : index
    %c0_126 = arith.constant 0 : index
    %167 = vector.load %arg15[%c15_125, %c0_126] : memref<176x32xf32, #tpu.memory_space<vmem>>, vector<144x32xf32>
    %168 = arith.truncf %167 : vector<144x32xf32> to vector<144x32xbf16>
    %c3_127 = arith.constant 3 : index
    %c0_128 = arith.constant 0 : index
    %c0_129 = arith.constant 0 : index
    %169 = vector.load %arg6[%c3_127, %c0_128, %c0_129] : memref<9x32x64xbf16, #tpu.memory_space<vmem>>, vector<1x32x64xbf16>
    %170 = vector.shape_cast %169 : vector<1x32x64xbf16> to vector<32x64xbf16>
    %cst_130 = arith.constant dense<0.000000e+00> : vector<144x64xf32>
    %171 = tpu.matmul %168, %170, %cst_130 {dimension_numbers = #tpu.dot_dimension_numbers<[1], [0], [0], [1], [0, 0, 1, 1], [], []>} : vector<144x32xbf16>, vector<32x64xbf16>, vector<144x64xf32> -> vector<144x64xf32>
    %172 = arith.addf %166, %171 : vector<144x64xf32>
    %c16_131 = arith.constant 16 : index
    %c0_132 = arith.constant 0 : index
    %173 = vector.load %arg15[%c16_131, %c0_132] : memref<176x32xf32, #tpu.memory_space<vmem>>, vector<144x32xf32>
    %174 = arith.truncf %173 : vector<144x32xf32> to vector<144x32xbf16>
    %c4_133 = arith.constant 4 : index
    %c0_134 = arith.constant 0 : index
    %c0_135 = arith.constant 0 : index
    %175 = vector.load %arg6[%c4_133, %c0_134, %c0_135] : memref<9x32x64xbf16, #tpu.memory_space<vmem>>, vector<1x32x64xbf16>
    %176 = vector.shape_cast %175 : vector<1x32x64xbf16> to vector<32x64xbf16>
    %cst_136 = arith.constant dense<0.000000e+00> : vector<144x64xf32>
    %177 = tpu.matmul %174, %176, %cst_136 {dimension_numbers = #tpu.dot_dimension_numbers<[1], [0], [0], [1], [0, 0, 1, 1], [], []>} : vector<144x32xbf16>, vector<32x64xbf16>, vector<144x64xf32> -> vector<144x64xf32>
    %178 = arith.addf %172, %177 : vector<144x64xf32>
    %c17 = arith.constant 17 : index
    %c0_137 = arith.constant 0 : index
    %179 = vector.load %arg15[%c17, %c0_137] : memref<176x32xf32, #tpu.memory_space<vmem>>, vector<144x32xf32>
    %180 = arith.truncf %179 : vector<144x32xf32> to vector<144x32xbf16>
    %c5_138 = arith.constant 5 : index
    %c0_139 = arith.constant 0 : index
    %c0_140 = arith.constant 0 : index
    %181 = vector.load %arg6[%c5_138, %c0_139, %c0_140] : memref<9x32x64xbf16, #tpu.memory_space<vmem>>, vector<1x32x64xbf16>
    %182 = vector.shape_cast %181 : vector<1x32x64xbf16> to vector<32x64xbf16>
    %cst_141 = arith.constant dense<0.000000e+00> : vector<144x64xf32>
    %183 = tpu.matmul %180, %182, %cst_141 {dimension_numbers = #tpu.dot_dimension_numbers<[1], [0], [0], [1], [0, 0, 1, 1], [], []>} : vector<144x32xbf16>, vector<32x64xbf16>, vector<144x64xf32> -> vector<144x64xf32>
    %184 = arith.addf %178, %183 : vector<144x64xf32>
    %c27_142 = arith.constant 27 : index
    %c0_143 = arith.constant 0 : index
    %185 = vector.load %arg15[%c27_142, %c0_143] : memref<176x32xf32, #tpu.memory_space<vmem>>, vector<144x32xf32>
    %186 = arith.truncf %185 : vector<144x32xf32> to vector<144x32xbf16>
    %c6_144 = arith.constant 6 : index
    %c0_145 = arith.constant 0 : index
    %c0_146 = arith.constant 0 : index
    %187 = vector.load %arg6[%c6_144, %c0_145, %c0_146] : memref<9x32x64xbf16, #tpu.memory_space<vmem>>, vector<1x32x64xbf16>
    %188 = vector.shape_cast %187 : vector<1x32x64xbf16> to vector<32x64xbf16>
    %cst_147 = arith.constant dense<0.000000e+00> : vector<144x64xf32>
    %189 = tpu.matmul %186, %188, %cst_147 {dimension_numbers = #tpu.dot_dimension_numbers<[1], [0], [0], [1], [0, 0, 1, 1], [], []>} : vector<144x32xbf16>, vector<32x64xbf16>, vector<144x64xf32> -> vector<144x64xf32>
    %190 = arith.addf %184, %189 : vector<144x64xf32>
    %c28 = arith.constant 28 : index
    %c0_148 = arith.constant 0 : index
    %191 = vector.load %arg15[%c28, %c0_148] : memref<176x32xf32, #tpu.memory_space<vmem>>, vector<144x32xf32>
    %192 = arith.truncf %191 : vector<144x32xf32> to vector<144x32xbf16>
    %c7_149 = arith.constant 7 : index
    %c0_150 = arith.constant 0 : index
    %c0_151 = arith.constant 0 : index
    %193 = vector.load %arg6[%c7_149, %c0_150, %c0_151] : memref<9x32x64xbf16, #tpu.memory_space<vmem>>, vector<1x32x64xbf16>
    %194 = vector.shape_cast %193 : vector<1x32x64xbf16> to vector<32x64xbf16>
    %cst_152 = arith.constant dense<0.000000e+00> : vector<144x64xf32>
    %195 = tpu.matmul %192, %194, %cst_152 {dimension_numbers = #tpu.dot_dimension_numbers<[1], [0], [0], [1], [0, 0, 1, 1], [], []>} : vector<144x32xbf16>, vector<32x64xbf16>, vector<144x64xf32> -> vector<144x64xf32>
    %196 = arith.addf %190, %195 : vector<144x64xf32>
    %c29 = arith.constant 29 : index
    %c0_153 = arith.constant 0 : index
    %197 = vector.load %arg15[%c29, %c0_153] : memref<176x32xf32, #tpu.memory_space<vmem>>, vector<144x32xf32>
    %198 = arith.truncf %197 : vector<144x32xf32> to vector<144x32xbf16>
    %c8_154 = arith.constant 8 : index
    %c0_155 = arith.constant 0 : index
    %c0_156 = arith.constant 0 : index
    %199 = vector.load %arg6[%c8_154, %c0_155, %c0_156] : memref<9x32x64xbf16, #tpu.memory_space<vmem>>, vector<1x32x64xbf16>
    %200 = vector.shape_cast %199 : vector<1x32x64xbf16> to vector<32x64xbf16>
    %cst_157 = arith.constant dense<0.000000e+00> : vector<144x64xf32>
    %201 = tpu.matmul %198, %200, %cst_157 {dimension_numbers = #tpu.dot_dimension_numbers<[1], [0], [0], [1], [0, 0, 1, 1], [], []>} : vector<144x32xbf16>, vector<32x64xbf16>, vector<144x64xf32> -> vector<144x64xf32>
    %202 = arith.addf %196, %201 : vector<144x64xf32>
    %c0_158 = arith.constant 0 : index
    %c0_159 = arith.constant 0 : index
    %203 = vector.load %arg7[%c0_158, %c0_159] : memref<1x64xf32, #tpu.memory_space<vmem>>, vector<1x64xf32>
    %204 = vector.broadcast %203 : vector<1x64xf32> to vector<144x64xf32>
    %205 = arith.addf %202, %204 : vector<144x64xf32>
    %c0_160 = arith.constant 0 : index
    %c0_161 = arith.constant 0 : index
    %206 = vector.load %arg8[%c0_160, %c0_161] : memref<1x64xf32, #tpu.memory_space<vmem>>, vector<1x64xf32>
    %c0_162 = arith.constant 0 : index
    %c0_163 = arith.constant 0 : index
    %207 = vector.load %arg9[%c0_162, %c0_163] : memref<1x64xf32, #tpu.memory_space<vmem>>, vector<1x64xf32>
    %cst_164 = arith.constant dense<0.000000e+00> : vector<144xf32>
    %208 = vector.multi_reduction <add>, %205, %cst_164 [1] : vector<144x64xf32> to vector<144xf32>
    %209 = vector.shape_cast %208 : vector<144xf32> to vector<144x1xf32>
    %cst_165 = arith.constant 6.400000e+01 : f32
    %210 = vector.broadcast %cst_165 : f32 to vector<144x1xf32>
    %211 = arith.divf %209, %210 : vector<144x1xf32>
    %212 = vector.broadcast %211 : vector<144x1xf32> to vector<144x64xf32>
    %213 = arith.subf %205, %212 : vector<144x64xf32>
    %214 = arith.mulf %213, %213 : vector<144x64xf32>
    %cst_166 = arith.constant dense<0.000000e+00> : vector<144xf32>
    %215 = vector.multi_reduction <add>, %214, %cst_166 [1] : vector<144x64xf32> to vector<144xf32>
    %216 = vector.shape_cast %215 : vector<144xf32> to vector<144x1xf32>
    %cst_167 = arith.constant 6.400000e+01 : f32
    %217 = vector.broadcast %cst_167 : f32 to vector<144x1xf32>
    %218 = arith.divf %216, %217 : vector<144x1xf32>
    %219 = vector.broadcast %211 : vector<144x1xf32> to vector<144x64xf32>
    %220 = arith.subf %205, %219 : vector<144x64xf32>
    %cst_168 = arith.constant 9.99999974E-6 : f32
    %221 = vector.broadcast %cst_168 : f32 to vector<144x1xf32>
    %222 = arith.addf %218, %221 : vector<144x1xf32>
    %223 = math.rsqrt %222 : vector<144x1xf32>
    %224 = vector.broadcast %223 : vector<144x1xf32> to vector<144x64xf32>
    %225 = arith.mulf %220, %224 : vector<144x64xf32>
    %226 = vector.broadcast %206 : vector<1x64xf32> to vector<144x64xf32>
    %227 = arith.mulf %225, %226 : vector<144x64xf32>
    %228 = vector.broadcast %207 : vector<1x64xf32> to vector<144x64xf32>
    %229 = arith.addf %227, %228 : vector<144x64xf32>
    %cst_169 = arith.constant 0.000000e+00 : f32
    %230 = vector.broadcast %cst_169 : f32 to vector<144x64xf32>
    %231 = arith.maximumf %229, %230 : vector<144x64xf32>
    %232 = arith.truncf %231 : vector<144x64xf32> to vector<144x64xbf16>
    %c0_170 = arith.constant 0 : index
    %c0_171 = arith.constant 0 : index
    %233 = vector.load %arg13[%c0_170, %c0_171] : memref<64x144xbf16, #tpu.memory_space<vmem>>, vector<64x144xbf16>
    %cst_172 = arith.constant dense<0.000000e+00> : vector<64x64xf32>
    %234 = tpu.matmul %233, %232, %cst_172 {dimension_numbers = #tpu.dot_dimension_numbers<[1], [0], [0], [1], [0, 0, 1, 1], [], []>} : vector<64x144xbf16>, vector<144x64xbf16>, vector<64x64xf32> -> vector<64x64xf32>
    %235 = arith.truncf %234 : vector<64x64xf32> to vector<64x64xbf16>
    %236 = vector.extract_strided_slice %235 {offsets = [0, 0], sizes = [16, 64], strides = [1, 1]} : vector<64x64xbf16> to vector<16x64xbf16>
    %c0_173 = arith.constant 0 : index
    %c0_174 = arith.constant 0 : index
    %c0_175 = arith.constant 0 : index
    %237 = vector.load %arg10[%c0_173, %c0_174, %c0_175] : memref<4x64x32xbf16, #tpu.memory_space<vmem>>, vector<1x64x32xbf16>
    %238 = vector.shape_cast %237 : vector<1x64x32xbf16> to vector<64x32xbf16>
    %cst_176 = arith.constant dense<0.000000e+00> : vector<16x32xf32>
    %239 = tpu.matmul %236, %238, %cst_176 {dimension_numbers = #tpu.dot_dimension_numbers<[1], [0], [0], [1], [0, 0, 1, 1], [], []>} : vector<16x64xbf16>, vector<64x32xbf16>, vector<16x32xf32> -> vector<16x32xf32>
    %240 = vector.extract_strided_slice %235 {offsets = [16, 0], sizes = [16, 64], strides = [1, 1]} : vector<64x64xbf16> to vector<16x64xbf16>
    %c1_177 = arith.constant 1 : index
    %c0_178 = arith.constant 0 : index
    %c0_179 = arith.constant 0 : index
    %241 = vector.load %arg10[%c1_177, %c0_178, %c0_179] : memref<4x64x32xbf16, #tpu.memory_space<vmem>>, vector<1x64x32xbf16>
    %242 = vector.shape_cast %241 : vector<1x64x32xbf16> to vector<64x32xbf16>
    %cst_180 = arith.constant dense<0.000000e+00> : vector<16x32xf32>
    %243 = tpu.matmul %240, %242, %cst_180 {dimension_numbers = #tpu.dot_dimension_numbers<[1], [0], [0], [1], [0, 0, 1, 1], [], []>} : vector<16x64xbf16>, vector<64x32xbf16>, vector<16x32xf32> -> vector<16x32xf32>
    %244 = arith.addf %239, %243 : vector<16x32xf32>
    %245 = vector.extract_strided_slice %235 {offsets = [32, 0], sizes = [16, 64], strides = [1, 1]} : vector<64x64xbf16> to vector<16x64xbf16>
    %c2_181 = arith.constant 2 : index
    %c0_182 = arith.constant 0 : index
    %c0_183 = arith.constant 0 : index
    %246 = vector.load %arg10[%c2_181, %c0_182, %c0_183] : memref<4x64x32xbf16, #tpu.memory_space<vmem>>, vector<1x64x32xbf16>
    %247 = vector.shape_cast %246 : vector<1x64x32xbf16> to vector<64x32xbf16>
    %cst_184 = arith.constant dense<0.000000e+00> : vector<16x32xf32>
    %248 = tpu.matmul %245, %247, %cst_184 {dimension_numbers = #tpu.dot_dimension_numbers<[1], [0], [0], [1], [0, 0, 1, 1], [], []>} : vector<16x64xbf16>, vector<64x32xbf16>, vector<16x32xf32> -> vector<16x32xf32>
    %249 = arith.addf %244, %248 : vector<16x32xf32>
    %250 = vector.extract_strided_slice %235 {offsets = [48, 0], sizes = [16, 64], strides = [1, 1]} : vector<64x64xbf16> to vector<16x64xbf16>
    %c3_185 = arith.constant 3 : index
    %c0_186 = arith.constant 0 : index
    %c0_187 = arith.constant 0 : index
    %251 = vector.load %arg10[%c3_185, %c0_186, %c0_187] : memref<4x64x32xbf16, #tpu.memory_space<vmem>>, vector<1x64x32xbf16>
    %252 = vector.shape_cast %251 : vector<1x64x32xbf16> to vector<64x32xbf16>
    %cst_188 = arith.constant dense<0.000000e+00> : vector<16x32xf32>
    %253 = tpu.matmul %250, %252, %cst_188 {dimension_numbers = #tpu.dot_dimension_numbers<[1], [0], [0], [1], [0, 0, 1, 1], [], []>} : vector<16x64xbf16>, vector<64x32xbf16>, vector<16x32xf32> -> vector<16x32xf32>
    %254 = arith.addf %249, %253 : vector<16x32xf32>
    %c0_189 = arith.constant 0 : index
    %c0_190 = arith.constant 0 : index
    %255 = vector.load %arg11[%c0_189, %c0_190] : memref<1x32xf32, #tpu.memory_space<vmem>>, vector<1x32xf32>
    %256 = vector.broadcast %255 : vector<1x32xf32> to vector<16x32xf32>
    %257 = arith.addf %254, %256 : vector<16x32xf32>
    %c0_191 = arith.constant 0 : index
    %c0_192 = arith.constant 0 : index
    %c0_193 = arith.constant 0 : index
    %258 = vector.load %arg14[%c0_191, %c0_192, %c0_193] : memref<1x16x32xf32, #tpu.memory_space<vmem>>, vector<1x16x32xf32>
    %259 = vector.shape_cast %258 : vector<1x16x32xf32> to vector<16x32xf32>
    %260 = vector.shape_cast %257 : vector<16x32xf32> to vector<1x16x32xf32>
    tpu.vector_store %arg14[%c0_191, %c0_192, %c0_193], %260 {strides = array<i32>} : memref<1x16x32xf32, #tpu.memory_space<vmem>>, vector<1x16x32xf32>,
    return
  }
  func.func @transform_0(%arg0: i32) -> (i32, i32, i32) {
    %c0_i32 = arith.constant 0 : i32
    %c0_i32_0 = arith.constant 0 : i32
    %c0_i32_1 = arith.constant 0 : i32
    return %arg0, %c0_i32, %c0_i32_0 : i32, i32, i32
  }
  func.func @transform_1(%arg0: i32) -> (i32, i32, i32) {
    %c0_i32 = arith.constant 0 : i32
    %c0_i32_0 = arith.constant 0 : i32
    %c0_i32_1 = arith.constant 0 : i32
    %c0_i32_2 = arith.constant 0 : i32
    return %c0_i32, %c0_i32_0, %c0_i32_1 : i32, i32, i32
  }
  func.func @transform_2(%arg0: i32) -> (i32, i32) {
    %c0_i32 = arith.constant 0 : i32
    %c0_i32_0 = arith.constant 0 : i32
    %c0_i32_1 = arith.constant 0 : i32
    return %c0_i32, %c0_i32_0 : i32, i32
  }
  func.func @transform_3(%arg0: i32) -> (i32, i32) {
    %c0_i32 = arith.constant 0 : i32
    %c0_i32_0 = arith.constant 0 : i32
    %c0_i32_1 = arith.constant 0 : i32
    return %c0_i32, %c0_i32_0 : i32, i32
  }
  func.func @transform_4(%arg0: i32) -> (i32, i32) {
    %c0_i32 = arith.constant 0 : i32
    %c0_i32_0 = arith.constant 0 : i32
    %c0_i32_1 = arith.constant 0 : i32
    return %c0_i32, %c0_i32_0 : i32, i32
  }
  func.func @transform_5(%arg0: i32) -> (i32, i32, i32) {
    %c0_i32 = arith.constant 0 : i32
    %c0_i32_0 = arith.constant 0 : i32
    %c0_i32_1 = arith.constant 0 : i32
    %c0_i32_2 = arith.constant 0 : i32
    return %c0_i32, %c0_i32_0, %c0_i32_1 : i32, i32, i32
  }
  func.func @transform_6(%arg0: i32) -> (i32, i32) {
    %c0_i32 = arith.constant 0 : i32
    %c0_i32_0 = arith.constant 0 : i32
    %c0_i32_1 = arith.constant 0 : i32
    return %c0_i32, %c0_i32_0 : i32, i32
  }
  func.func @transform_7(%arg0: i32) -> (i32, i32) {
    %c0_i32 = arith.constant 0 : i32
    %c0_i32_0 = arith.constant 0 : i32
    %c0_i32_1 = arith.constant 0 : i32
    return %c0_i32, %c0_i32_0 : i32, i32
  }
  func.func @transform_8(%arg0: i32) -> (i32, i32) {
    %c0_i32 = arith.constant 0 : i32
    %c0_i32_0 = arith.constant 0 : i32
    %c0_i32_1 = arith.constant 0 : i32
    return %c0_i32, %c0_i32_0 : i32, i32
  }
  func.func @transform_9(%arg0: i32) -> (i32, i32, i32) {
    %c0_i32 = arith.constant 0 : i32
    %c0_i32_0 = arith.constant 0 : i32
    %c0_i32_1 = arith.constant 0 : i32
    %c0_i32_2 = arith.constant 0 : i32
    return %c0_i32, %c0_i32_0, %c0_i32_1 : i32, i32, i32
  }
  func.func @transform_10(%arg0: i32) -> (i32, i32) {
    %c0_i32 = arith.constant 0 : i32
    %c0_i32_0 = arith.constant 0 : i32
    %c0_i32_1 = arith.constant 0 : i32
    return %c0_i32, %c0_i32_0 : i32, i32
  }
  func.func @transform_11(%arg0: i32) -> (i32, i32) {
    %c0_i32 = arith.constant 0 : i32
    %c0_i32_0 = arith.constant 0 : i32
    %c0_i32_1 = arith.constant 0 : i32
    return %c0_i32, %c0_i32_0 : i32, i32
  }
  func.func @transform_12(%arg0: i32) -> (i32, i32) {
    %c0_i32 = arith.constant 0 : i32
    %c0_i32_0 = arith.constant 0 : i32
    %c0_i32_1 = arith.constant 0 : i32
    return %c0_i32, %c0_i32_0 : i32, i32
  }
  func.func @transform_13(%arg0: i32) -> (i32, i32, i32) {
    %c0_i32 = arith.constant 0 : i32
    %c0_i32_0 = arith.constant 0 : i32
    %c0_i32_1 = arith.constant 0 : i32
    return %arg0, %c0_i32, %c0_i32_0 : i32, i32, i32
  }
}

</mosaic_0001>

<bundles_post_ra>
// kernel: patch_embedding_forward.1
= control target key start
LH: loop header
LB: loop body
LE: loop exit
PB: predicated region body
PF: predicated region fallthrough
CT: control target
= control target key end

     0   :  { %s11247_s0 = inlined_call_operand.vmem [shape: f32[2,184,16], index: 0, kind: input, shape index: {}]   ;;  %s11248_s1 = inlined_call_operand.vmem [shape: bf16[16,16,32], index: 1, kind: input, shape index: {}]   ;;  %s11249_s2 = inlined_call_operand.vmem [shape: f32[1,32], index: 2, kind: input, shape index: {}]   ;;  %s11250_s3 = inlined_call_operand.vmem [shape: f32[1,32], index: 3, kind: input, shape index: {}]   ;;  %s11251_s4 = inlined_call_operand.vmem [shape: f32[1,32], index: 4, kind: input, shape index: {}]   ;;  %s11252_s5 = inlined_call_operand.vmem [shape: bf16[9,32,64], index: 5, kind: input, shape index: {}]   ;;  %s11253_s6 = inlined_call_operand.vmem [shape: f32[1,64], index: 6, kind: input, shape index: {}]   ;;  %s11254_s7 = inlined_call_operand.vmem [shape: f32[1,64], index: 7, kind: input, shape index: {}]   ;;  %s11255_s8 = inlined_call_operand.vmem [shape: f32[1,64], index: 8, kind: input, shape index: {}]   ;;  %s11256_s9 = inlined_call_operand.vmem [shape: bf16[4,64,32], index: 9, kind: input, shape index: {}]   ;;  %s11257_s10 = inlined_call_operand.vmem [shape: f32[1,32], index: 10, kind: input, shape index: {}]   ;;  %s11258_s11 = inlined_call_operand.vmem [shape: f32[144,1], index: 11, kind: input, shape index: {}]   ;;  %s11259_s12 = inlined_call_operand.vmem [shape: bf16[64,144], index: 12, kind: input, shape index: {}]   ;;  %s11260_s13 = inlined_call_operand.hbm [shape: f32[2,16,32], index: 13, kind: output, shape index: {}]  }
   0x1   :  { %11263 = sst [smem:[#allocation6_spill]] %s11247_s0 }
   0x2   :  { %11264 = sst [smem:[#allocation7_spill]] %s11248_s1 }
   0x3   :  { %11265 = sst [smem:[#allocation8_spill]] %s11249_s2 }
   0x4   :  { %18 = vsyncpa [#allocation4], 0 }
   0x5   :  { %20 = vsyncpa [#allocation4 + $0x1], 0  ;;  %s8458_s25 = smov 0   ;;  %s8460_s26 = smov 0  }
   0x6   :  { %s8462_s27 = smov 0   ;;  %s8464_s28 = smov 0  }
   0x7 LB: > { %s8479_s29 = sadd.s32 4294967295, %s8380_s28   ;;  %s6445_s30 = sadd.s32 4294967294, %s8380_s28   ;;  %s8380_s28 = sphi %s8464_s28, %s11288_s28   ;;  %s8376_s27 = sphi %s8462_s27, %s11287_s27   ;;  %s8372_s26 = sphi %s8460_s26, %s11286_s26   ;;  %s8368_s25 = sphi %s8458_s25, %s11285_s25  }
   0x8   : > { %s8483_s14 = sadd.s32 1, %s8380_s28   ;;  %s311_s15 = sadd.s32 1, %s8376_s27 }
   0x9   : > { %s308_s16 = ssub.s32 %s8380_s28, %s8483_s14  ;;  %p321_p0 = scmp.ne.s32.totalorder %s8376_s27, %s8372_s26 }
   0xa   : > { %p309_p1 = scmp.eq.s32.totalorder %s308_s16, 0  ;;  %p322_p2 = scmp.eq.s32.totalorder %s8479_s29, 1 }
   0xb   : > { %p327_p3 = scmp.ne.s32.totalorder %s8372_s26, %s8368_s25  ;;  %p328_p4 = scmp.eq.s32.totalorder %s6445_s30, 1 }
   0xc   : > { %s8494_s17 = scalar_select %p309_p1, %s8376_s27, %s311_s15  }
   0xd   : > { %p8496_p5 = por %p322_p2, %p321_p0  ;;  %p8500_p6 = por %p328_p4, %p327_p3 }
   0xe   : > { %p6448_p7 = scmp.ge.s32.totalorder %s8380_s28, 1  ;;  %p390_p8 = scmp.lt.s32.totalorder %s8380_s28, 3 }
  0x10   : > { %p391_p9 = pnand %p6448_p7, %p390_p8 }
  0x11   : > { %s11268_s1 = sld [smem:[#allocation7_spill]] (!%p391_p9)  ;;  %p434_p10 = scmp.lt.s32.totalorder (!%p391_p9), %s8479_s29, 1 }
  0x12   : > { %394 = sbr.rel (%p391_p9) target bundleno = 2506 (0x9ca), region = 72  ;;  %s11269_s0 = sld [smem:[#allocation6_spill]] (!%p391_p9) }
  0x13   : > { %s11270_s2 = sld [smem:[#allocation8_spill]] (!%p391_p9)  ;;  %s6840_s16 = sshll.u32 (!%p391_p9), %s8479_s29, 8 }
  0x14   : > { %s11202_s23 = scalar_lea.hbm (!%p391_p9), %s11260_s13, %s6840_s16 }
  0x17   : > { %v8183_v0 = vld [vmem:[%s11268_s1 + $0x8] sm:$0xff]   ;;  %v8382_v1 = vmov 0.0   ;;  %v8184_v2 = vld [vmem:[%s11268_s1] sm:$0xff]   ;;  %vm8383_vm0 = vmmov 0   ;;  %s435_s24 = scalar_select %p434_p10, %s8479_s29, 1  ;;  %vm505_vm1 = vcmask 130048  }
  0x18   : > { %7120 = vmatprep.subr.bf16.mxu0 %v8382_v1  ;;  %7158 = vmatprep.subr.bf16.mxu1 %v8382_v1  ;;  %v8185_v8 = vld [vmem:[%s11268_s1 + $0x10] sm:$0xff]   ;;  %v8186_v10 = vld [vmem:[%s11268_s1 + $0x18] sm:$0xff]   ;;  %vm3407_vm2 = vcmask 261120   ;;  %vm5611_vm3 = vcmask 523264  }
  0x19   : > { %7121 = vmatpush3.bf16.msra.mxu0 %v8183_v0  ;;  %7122 = vmatprep.mubr.msk.bf16.mxu0 %vm8383_vm0, %v8382_v1  ;;  %s8136_s30 = smul.u32 184, %s435_s24  ;;  %3835 = vst.msk [vmem:[#allocation2] sm:$0xff] %vm3407_vm2, %v8382_v1  ;;  %3836 = vst.msk [vmem:[#allocation2 + $0x8] sm:$0xff] %vm3407_vm2, %v8382_v1  ;;  %s8385_s24 = smov [#allocation3]  }
  0x1a   : > { %7159 = vmatpush3.bf16.msra.mxu1 %v8184_v2  ;;  %7160 = vmatprep.mubr.msk.bf16.mxu1 %vm8383_vm0, %v8382_v1  ;;  %v8187_v2 = vld [vmem:[%s11268_s1 + $0x20] sm:$0xff]   ;;  %3837 = vst.msk [vmem:[#allocation2 + $0x10] sm:$0xff] %vm3407_vm2, %v8382_v1  ;;  %3838 = vst.msk [vmem:[#allocation2 + $0x18] sm:$0xff] %vm3407_vm2, %v8382_v1 }
  0x1b   : > { %7196 = vmatprep.subr.bf16.mxu0 %v8382_v1  ;;  %7234 = vmatprep.subr.bf16.mxu1 %v8382_v1  ;;  %s8525_s20 = scalar_lea.vmem %s11269_s0, %s8136_s30  ;;  %3839 = vst.msk [vmem:[#allocation2 + $0x20] sm:$0xff] %vm3407_vm2, %v8382_v1  ;;  %3840 = vst.msk [vmem:[#allocation2 + $0x28] sm:$0xff] %vm3407_vm2, %v8382_v1  ;;  %s431_s0 = sand.u32 1, %s8372_s26  }
  0x1c   : > { %v469_v3 = vld [vmem:[%s8525_s20 + $0x1] sm:$0xff]  ;;  %v470_v4 = vld [vmem:[%s8525_s20 + $0x9] sm:$0xff]  ;;  %v471_v11 = vld [vmem:[%s8525_s20 + $0x11] sm:$0xff]  ;;  %3841 = vst.msk [vmem:[#allocation2 + $0x30] sm:$0xff] %vm3407_vm2, %v8382_v1  ;;  %s8324_s30 = sshll.u32 %s8385_s24, 4  ;;  %s8325_s30 = int_to_ptr.vmem [resolvable:$false] %s8324_s30 }
  0x1d   : > { %v440_v5 = vld [vmem:[%s8525_s20] sm:$0xff]  ;;  %v487_v6 = vpack.c.bf16 %v470_v4, %v469_v3  ;;  %v441_v7 = vld [vmem:[%s8525_s20 + $0x8] sm:$0xff]  ;;  %v442_v13 = vld [vmem:[%s8525_s20 + $0x10] sm:$0xff]  ;;  %3842 = vst.msk [vmem:[#allocation2 + $0x38] sm:$0xff] %vm3407_vm2, %v8382_v1  ;;  %s8326_s16 = scalar_lea.vmem %s8325_s30, 512 }
  0x1e   : > { %v458_v9 = vpack.c.bf16 %v441_v7, %v440_v5  ;;  %v472_v12 = vld [vmem:[%s8525_s20 + $0x19] sm:$0xff]  ;;  %v473_v17 = vld [vmem:[%s8525_s20 + $0x21] sm:$0xff]  ;;  %v474_v18 = vld [vmem:[%s8525_s20 + $0x29] sm:$0xff]  ;;  %3843 = vst.msk [vmem:[#allocation2 + $0x40] sm:$0xff] %vm3407_vm2, %v8382_v1 }
  0x1f   : > { %7123 = vmatmul.mubr.msk.bf16.vlgmr.msra.gmra.mxu0 %vm505_vm1, %v487_v6  ;;  %v443_v14 = vld [vmem:[%s8525_s20 + $0x18] sm:$0xff]  ;;  %v488_v15 = vpack.c.bf16 %v472_v12, %v471_v11  ;;  %v444_v19 = vld [vmem:[%s8525_s20 + $0x20] sm:$0xff]  ;;  %v445_v20 = vld [vmem:[%s8525_s20 + $0x28] sm:$0xff]  ;;  %v489_v21 = vpack.c.bf16 %v474_v18, %v473_v17  ;;  %3844 = vst.msk [vmem:[#allocation2 + $0x48] sm:$0xff] %vm3407_vm2, %v8382_v1 }
  0x20   : > { %7161 = vmatmul.mubr.msk.bf16.vlgmr.msra.gmra.mxu1 %vm505_vm1, %v458_v9  ;;  %7126 = vmatprep.mubr.msk.bf16.mxu0 %vm8383_vm0, %v8382_v1  ;;  %v459_v16 = vpack.c.bf16 %v443_v14, %v442_v13  ;;  %v460_v22 = vpack.c.bf16 %v445_v20, %v444_v19  ;;  %v475_v23 = vld [vmem:[%s8525_s20 + $0x31] sm:$0xff]  ;;  %v476_v24 = vld [vmem:[%s8525_s20 + $0x39] sm:$0xff]  ;;  %v477_v29 = vld [vmem:[%s8525_s20 + $0x41] sm:$0xff]  ;;  %3845 = vst.msk [vmem:[#allocation2 + $0x50] sm:$0xff] %vm3407_vm2, %v8382_v1 }
  0x21   : > { %7164 = vmatprep.mubr.msk.bf16.mxu1 %vm8383_vm0, %v8382_v1  ;;  %7197 = vmatpush3.bf16.msra.mxu0 %v8185_v8  ;;  %v446_v25 = vld [vmem:[%s8525_s20 + $0x30] sm:$0xff]  ;;  %v447_v26 = vld [vmem:[%s8525_s20 + $0x38] sm:$0xff]  ;;  %v490_v27 = vpack.c.bf16 %v476_v24, %v475_v23  ;;  %v448_v31 = vld [vmem:[%s8525_s20 + $0x40] sm:$0xff]  ;;  %3846 = vst.msk [vmem:[#allocation2 + $0x58] sm:$0xff] %vm3407_vm2, %v8382_v1 }
  0x22   : > { %7235 = vmatpush3.bf16.msra.mxu1 %v8186_v10  ;;  %7272 = vmatprep.subr.bf16.mxu0 %v8382_v1  ;;  %v461_v28 = vpack.c.bf16 %v447_v26, %v446_v25  ;;  %v478_v30 = vld [vmem:[%s8525_s20 + $0x49] sm:$0xff]  ;;  %v479_v35 = vld [vmem:[%s8525_s20 + $0x51] sm:$0xff]  ;;  %v480_v36 = vld [vmem:[%s8525_s20 + $0x59] sm:$0xff]  ;;  %3847 = vst.msk [vmem:[#allocation2 + $0x60] sm:$0xff] %vm3407_vm2, %v8382_v1 }
  0x23   : > { %7310 = vmatprep.subr.bf16.mxu1 %v8382_v1  ;;  %v449_v32 = vld [vmem:[%s8525_s20 + $0x48] sm:$0xff]  ;;  %v491_v33 = vpack.c.bf16 %v478_v30, %v477_v29  ;;  %v450_v37 = vld [vmem:[%s8525_s20 + $0x50] sm:$0xff]  ;;  %v451_v38 = vld [vmem:[%s8525_s20 + $0x58] sm:$0xff]  ;;  %v492_v39 = vpack.c.bf16 %v480_v36, %v479_v35  ;;  %3848 = vst.msk [vmem:[#allocation2 + $0x68] sm:$0xff] %vm3407_vm2, %v8382_v1 }
  0x24   : > { %v462_v34 = vpack.c.bf16 %v449_v32, %v448_v31  ;;  %v463_v40 = vpack.c.bf16 %v451_v38, %v450_v37  ;;  %v481_v41 = vld [vmem:[%s8525_s20 + $0x61] sm:$0xff]  ;;  %v482_v42 = vld [vmem:[%s8525_s20 + $0x69] sm:$0xff]  ;;  %v483_v47 = vld [vmem:[%s8525_s20 + $0x71] sm:$0xff]  ;;  %3849 = vst.msk [vmem:[#allocation2 + $0x70] sm:$0xff] %vm3407_vm2, %v8382_v1 }
  0x25   : > { %v452_v43 = vld [vmem:[%s8525_s20 + $0x60] sm:$0xff]  ;;  %v453_v44 = vld [vmem:[%s8525_s20 + $0x68] sm:$0xff]  ;;  %v493_v45 = vpack.c.bf16 %v482_v42, %v481_v41  ;;  %v454_v49 = vld [vmem:[%s8525_s20 + $0x70] sm:$0xff]  ;;  %3850 = vst.msk [vmem:[#allocation2 + $0x78] sm:$0xff] %vm3407_vm2, %v8382_v1 }
  0x26   : > { %v464_v46 = vpack.c.bf16 %v453_v44, %v452_v43  ;;  %v484_v48 = vld [vmem:[%s8525_s20 + $0x79] sm:$0xff]  ;;  %v485_v53 = vld [vmem:[%s8525_s20 + $0x81] sm:$0xff]  ;;  %v486_v54 = vld [vmem:[%s8525_s20 + $0x89] sm:$0xff]  ;;  %3851 = vst.msk [vmem:[#allocation2 + $0x80] sm:$0xff] %vm3407_vm2, %v8382_v1 }
  0x27   : > { %7127 = vmatmul.mubr.msk.bf16.gmra.mxu0 %vm505_vm1, %v488_v15  ;;  %v455_v50 = vld [vmem:[%s8525_s20 + $0x78] sm:$0xff]  ;;  %v494_v51 = vpack.c.bf16 %v484_v48, %v483_v47  ;;  %v456_v55 = vld [vmem:[%s8525_s20 + $0x80] sm:$0xff]  ;;  %v457_v56 = vld [vmem:[%s8525_s20 + $0x88] sm:$0xff]  ;;  %v495_v57 = vpack.c.bf16 %v486_v54, %v485_v53  ;;  %3852 = vst.msk [vmem:[#allocation2 + $0x88] sm:$0xff] %vm3407_vm2, %v8382_v1 }
  0x28   : > { %7165 = vmatmul.mubr.msk.bf16.gmra.mxu1 %vm505_vm1, %v459_v16  ;;  %7130 = vmatprep.mubr.msk.bf16.mxu0 %vm8383_vm0, %v8382_v1  ;;  %v465_v52 = vpack.c.bf16 %v455_v50, %v454_v49  ;;  %v466_v58 = vpack.c.bf16 %v457_v56, %v456_v55  ;;  %v776_v59 = vld [vmem:[%s8525_s20 + $0x2] sm:$0xff]  ;;  %v777_v60 = vld [vmem:[%s8525_s20 + $0xa] sm:$0xff]  ;;  %v778_v4 = vld [vmem:[%s8525_s20 + $0x12] sm:$0xff]  ;;  %3853 = vst.msk [vmem:[#allocation2 + $0x90] sm:$0xff] %vm3407_vm2, %v8382_v1 }
  0x29   : > { %7168 = vmatprep.mubr.msk.bf16.mxu1 %vm8383_vm0, %v8382_v1  ;;  %v962_v61 = vld [vmem:[%s8525_s20 + $0x3] sm:$0xff]  ;;  %v963_v62 = vld [vmem:[%s8525_s20 + $0xb] sm:$0xff]  ;;  %v794_v63 = vpack.c.bf16 %v777_v60, %v776_v59  ;;  %v779_v5 = vld [vmem:[%s8525_s20 + $0x1a] sm:$0xff]  ;;  %3854 = vst.msk [vmem:[#allocation2 + $0x98] sm:$0xff] %vm3407_vm2, %v8382_v1 }
  0x2a   : > { %v980_v0 = vpack.c.bf16 %v963_v62, %v962_v61  ;;  %v8188_v3 = vld [vmem:[%s11268_s1 + $0x28] sm:$0xff]   ;;  %v964_v6 = vld [vmem:[%s8525_s20 + $0x13] sm:$0xff]  ;;  %v965_v7 = vld [vmem:[%s8525_s20 + $0x1b] sm:$0xff]  ;;  %v795_v8 = vpack.c.bf16 %v779_v5, %v778_v4  ;;  %3855 = vst.msk [vmem:[#allocation2 + $0xa0] sm:$0xff] %vm3407_vm2, %v8382_v1 }
  0x2b   : > { %v981_v9 = vpack.c.bf16 %v965_v7, %v964_v6  ;;  %v780_v10 = vld [vmem:[%s8525_s20 + $0x22] sm:$0xff]  ;;  %v781_v11 = vld [vmem:[%s8525_s20 + $0x2a] sm:$0xff]  ;;  %v782_v16 = vld [vmem:[%s8525_s20 + $0x32] sm:$0xff]  ;;  %3856 = vst.msk [vmem:[#allocation2 + $0xa8] sm:$0xff] %vm3407_vm2, %v8382_v1 }
  0x2c   : > { %v966_v12 = vld [vmem:[%s8525_s20 + $0x23] sm:$0xff]  ;;  %v967_v13 = vld [vmem:[%s8525_s20 + $0x2b] sm:$0xff]  ;;  %v796_v14 = vpack.c.bf16 %v781_v11, %v780_v10  ;;  %v783_v17 = vld [vmem:[%s8525_s20 + $0x3a] sm:$0xff] }
  0x2d   : > { %v982_v15 = vpack.c.bf16 %v967_v13, %v966_v12  ;;  %v968_v18 = vld [vmem:[%s8525_s20 + $0x33] sm:$0xff]  ;;  %v969_v19 = vld [vmem:[%s8525_s20 + $0x3b] sm:$0xff]  ;;  %v797_v20 = vpack.c.bf16 %v783_v17, %v782_v16  ;;  %v785_v23 = vld [vmem:[%s8525_s20 + $0x4a] sm:$0xff] }
  0x2e   : > { %v970_v24 = vld [vmem:[%s8525_s20 + $0x43] sm:$0xff]  ;;  %v971_v25 = vld [vmem:[%s8525_s20 + $0x4b] sm:$0xff]  ;;  %v787_v29 = vld [vmem:[%s8525_s20 + $0x5a] sm:$0xff] }
  0x2f   : > { %7131 = vmatmul.mubr.msk.bf16.gmra.mxu0 %vm505_vm1, %v489_v21  ;;  %v983_v21 = vpack.c.bf16 %v969_v19, %v968_v18  ;;  %v972_v30 = vld [vmem:[%s8525_s20 + $0x53] sm:$0xff]  ;;  %v973_v31 = vld [vmem:[%s8525_s20 + $0x5b] sm:$0xff]  ;;  %v789_v35 = vld [vmem:[%s8525_s20 + $0x6a] sm:$0xff] }
  0x30   : > { %7169 = vmatmul.mubr.msk.bf16.gmra.mxu1 %vm505_vm1, %v460_v22  ;;  %7134 = vmatprep.mubr.msk.bf16.mxu0 %vm8383_vm0, %v8382_v1  ;;  %v784_v22 = vld [vmem:[%s8525_s20 + $0x42] sm:$0xff]  ;;  %v975_v37 = vld [vmem:[%s8525_s20 + $0x6b] sm:$0xff]  ;;  %v791_v41 = vld [vmem:[%s8525_s20 + $0x7a] sm:$0xff] }
  0x31   : > { %7172 = vmatprep.mubr.msk.bf16.mxu1 %vm8383_vm0, %v8382_v1  ;;  %v798_v26 = vpack.c.bf16 %v785_v23, %v784_v22  ;;  %v974_v36 = vld [vmem:[%s8525_s20 + $0x63] sm:$0xff]  ;;  %v976_v42 = vld [vmem:[%s8525_s20 + $0x73] sm:$0xff]  ;;  %v977_v43 = vld [vmem:[%s8525_s20 + $0x7b] sm:$0xff] }
  0x32   : > { %v793_v47 = vld [vmem:[%s8525_s20 + $0x8a] sm:$0xff]  ;;  %v1149_v53 = vld [vmem:[%s8525_s20 + $0x14] sm:$0xff]  ;;  %v1150_v60 = vld [vmem:[%s8525_s20 + $0x1c] sm:$0xff] }
  0x33   : > { %v978_v48 = vld [vmem:[%s8525_s20 + $0x83] sm:$0xff]  ;;  %v979_v49 = vld [vmem:[%s8525_s20 + $0x8b] sm:$0xff]  ;;  %v1335_v55 = vld [vmem:[%s8525_s20 + $0x15] sm:$0xff] }
  0x34   : > { %v1334_v54 = vld [vmem:[%s8525_s20 + $0xd] sm:$0xff]  ;;  %v8190_v59 = vld [vmem:[%s11268_s1 + $0x38] sm:$0xff]   ;;  %v1151_v61 = vld [vmem:[%s8525_s20 + $0x24] sm:$0xff] }
  0x35   : > { %v1336_v62 = vld [vmem:[%s8525_s20 + $0x1d] sm:$0xff]  ;;  %v1153_v4 = vld [vmem:[%s8525_s20 + $0x34] sm:$0xff]  ;;  %v1341_v12 = vld [vmem:[%s8525_s20 + $0x45] sm:$0xff] }
  0x36   : > { %v1338_v5 = vld [vmem:[%s8525_s20 + $0x2d] sm:$0xff]  ;;  %v1339_v6 = vld [vmem:[%s8525_s20 + $0x35] sm:$0xff]  ;;  %v1155_v10 = vld [vmem:[%s8525_s20 + $0x44] sm:$0xff] }
  0x37   : > { %7135 = vmatmul.mubr.msk.bf16.gmra.mxu0 %vm505_vm1, %v490_v27  ;;  %v984_v27 = vpack.c.bf16 %v971_v25, %v970_v24  ;;  %v1340_v11 = vld [vmem:[%s8525_s20 + $0x3d] sm:$0xff]  ;;  %v1157_v16 = vld [vmem:[%s8525_s20 + $0x54] sm:$0xff]  ;;  %v1345_v24 = vld [vmem:[%s8525_s20 + $0x65] sm:$0xff] }
  0x38   : > { %7173 = vmatmul.mubr.msk.bf16.gmra.mxu1 %vm505_vm1, %v461_v28  ;;  %7138 = vmatprep.mubr.msk.bf16.mxu0 %vm8383_vm0, %v8382_v1  ;;  %v786_v28 = vld [vmem:[%s8525_s20 + $0x52] sm:$0xff]  ;;  %v1159_v22 = vld [vmem:[%s8525_s20 + $0x64] sm:$0xff] }
  0x39   : > { %7176 = vmatprep.mubr.msk.bf16.mxu1 %vm8383_vm0, %v8382_v1  ;;  %v799_v32 = vpack.c.bf16 %v787_v29, %v786_v28  ;;  %v1342_v17 = vld [vmem:[%s8525_s20 + $0x4d] sm:$0xff]  ;;  %v1343_v18 = vld [vmem:[%s8525_s20 + $0x55] sm:$0xff]  ;;  %v1344_v23 = vld [vmem:[%s8525_s20 + $0x5d] sm:$0xff] }
  0x3a   : > { %v1161_v28 = vld [vmem:[%s8525_s20 + $0x74] sm:$0xff] }
  0x3b   : > { %v1346_v29 = vld [vmem:[%s8525_s20 + $0x6d] sm:$0xff] }
  0x3f   : > { %7139 = vmatmul.mubr.msk.bf16.gmra.mxu0 %vm505_vm1, %v491_v33  ;;  %v985_v33 = vpack.c.bf16 %v973_v31, %v972_v30  ;;  %v1347_v30 = vld [vmem:[%s8525_s20 + $0x75] sm:$0xff] }
  0x40   : > { %7177 = vmatmul.mubr.msk.bf16.gmra.mxu1 %vm505_vm1, %v462_v34  ;;  %7142 = vmatprep.mubr.msk.bf16.mxu0 %vm8383_vm0, %v8382_v1  ;;  %v788_v34 = vld [vmem:[%s8525_s20 + $0x62] sm:$0xff] }
  0x41   : > { %7180 = vmatprep.mubr.msk.bf16.mxu1 %vm8383_vm0, %v8382_v1  ;;  %v800_v38 = vpack.c.bf16 %v789_v35, %v788_v34  ;;  %v1162_v35 = vld [vmem:[%s8525_s20 + $0x7c] sm:$0xff] }
  0x47   : > { %7143 = vmatmul.mubr.msk.bf16.gmra.mxu0 %vm505_vm1, %v492_v39  ;;  %v986_v39 = vpack.c.bf16 %v975_v37, %v974_v36  ;;  %v1163_v36 = vld [vmem:[%s8525_s20 + $0x84] sm:$0xff] }
  0x48   : > { %7181 = vmatmul.mubr.msk.bf16.gmra.mxu1 %vm505_vm1, %v463_v40  ;;  %7146 = vmatprep.mubr.msk.bf16.mxu0 %vm8383_vm0, %v8382_v1  ;;  %v790_v40 = vld [vmem:[%s8525_s20 + $0x72] sm:$0xff] }
  0x49   : > { %7184 = vmatprep.mubr.msk.bf16.mxu1 %vm8383_vm0, %v8382_v1  ;;  %v801_v44 = vpack.c.bf16 %v791_v41, %v790_v40  ;;  %v1349_v40 = vld [vmem:[%s8525_s20 + $0x85] sm:$0xff] }
  0x4f   : > { %7147 = vmatmul.mubr.msk.bf16.gmra.mxu0 %vm505_vm1, %v493_v45  ;;  %v987_v45 = vpack.c.bf16 %v977_v43, %v976_v42  ;;  %v1173_v43 = vpack.c.bf16 %v1163_v36, %v1162_v35 }
  0x50   : > { %7185 = vmatmul.mubr.msk.bf16.gmra.mxu1 %vm505_vm1, %v464_v46  ;;  %7150 = vmatprep.mubr.msk.bf16.mxu0 %vm8383_vm0, %v8382_v1  ;;  %v792_v46 = vld [vmem:[%s8525_s20 + $0x82] sm:$0xff] }
  0x51   : > { %7188 = vmatprep.mubr.msk.bf16.mxu1 %vm8383_vm0, %v8382_v1  ;;  %v802_v50 = vpack.c.bf16 %v793_v47, %v792_v46 }
  0x57   : > { %7151 = vmatmul.mubr.msk.bf16.gmra.mxu0 %vm505_vm1, %v494_v51  ;;  %v988_v51 = vpack.c.bf16 %v979_v49, %v978_v48 }
  0x58   : > { %7189 = vmatmul.mubr.msk.bf16.gmra.mxu1 %vm505_vm1, %v465_v52  ;;  %7154 = vmatprep.mubr.msk.bf16.mxu0 %vm8383_vm0, %v8382_v1  ;;  %v1148_v52 = vld [vmem:[%s8525_s20 + $0xc] sm:$0xff] }
  0x59   : > { %7192 = vmatprep.mubr.msk.bf16.mxu1 %vm8383_vm0, %v8382_v1  ;;  %v1166_v56 = vpack.c.bf16 %v1149_v53, %v1148_v52  ;;  %v1165_v52 = vld [vmem:[%s8525_s20 + $0x94] sm:$0xff] }
  0x5f   : > { %7155 = vmatmul.mubr.msk.bf16.gmra.mxu0 %vm505_vm1, %v495_v57  ;;  %v1352_v57 = vpack.c.bf16 %v1335_v55, %v1334_v54  ;;  %v1350_v55 = vld [vmem:[%s8525_s20 + $0x8d] sm:$0xff] }
  0x60   : > { %7193 = vmatmul.mubr.msk.bf16.gmra.mxu1 %vm505_vm1, %v466_v58  ;;  %7198 = vmatprep.mubr.msk.bf16.mxu0 %vm8383_vm0, %v8382_v1  ;;  %v8189_v58 = vld [vmem:[%s11268_s1 + $0x30] sm:$0xff]  }
  0x61   : > { %7236 = vmatprep.mubr.msk.bf16.mxu1 %vm8383_vm0, %v8382_v1 }
  0x67   : > { %7199 = vmatmul.mubr.msk.bf16.vlgmr.msra.gmra.mxu0 %vm505_vm1, %v794_v63  ;;  %v1337_v63 = vld [vmem:[%s8525_s20 + $0x25] sm:$0xff] }
  0x68   : > { %7237 = vmatmul.mubr.msk.bf16.vlgmr.msra.gmra.mxu1 %vm505_vm1, %v980_v0  ;;  %7202 = vmatprep.mubr.msk.bf16.mxu0 %vm8383_vm0, %v8382_v1  ;;  %v1167_v0 = vpack.c.bf16 %v1151_v61, %v1150_v60 }
  0x69   : > { %7240 = vmatprep.mubr.msk.bf16.mxu1 %vm8383_vm0, %v8382_v1  ;;  %7273 = vmatpush3.bf16.msra.mxu0 %v8187_v2  ;;  %v1353_v2 = vpack.c.bf16 %v1337_v63, %v1336_v62 }
  0x6a   : > { %7311 = vmatpush3.bf16.msra.mxu1 %v8188_v3  ;;  %7348 = vmatprep.subr.bf16.mxu0 %v8382_v1  ;;  %v1152_v3 = vld [vmem:[%s8525_s20 + $0x2c] sm:$0xff] }
  0x6b   : > { %7386 = vmatprep.subr.bf16.mxu1 %v8382_v1  ;;  %v1168_v7 = vpack.c.bf16 %v1153_v4, %v1152_v3  ;;  %v1520_v4 = vld [vmem:[%s8525_s20 + $0xe] sm:$0xff] }
  0x6f   : > { %7203 = vmatmul.mubr.msk.bf16.gmra.mxu0 %vm505_vm1, %v795_v8  ;;  %v1354_v8 = vpack.c.bf16 %v1339_v6, %v1338_v5  ;;  %v1521_v5 = vld [vmem:[%s8525_s20 + $0x16] sm:$0xff] }
  0x70   : > { %7241 = vmatmul.mubr.msk.bf16.gmra.mxu1 %vm505_vm1, %v981_v9  ;;  %7206 = vmatprep.mubr.msk.bf16.mxu0 %vm8383_vm0, %v8382_v1  ;;  %v1154_v9 = vld [vmem:[%s8525_s20 + $0x3c] sm:$0xff] }
  0x71   : > { %7244 = vmatprep.mubr.msk.bf16.mxu1 %vm8383_vm0, %v8382_v1  ;;  %v1169_v13 = vpack.c.bf16 %v1155_v10, %v1154_v9  ;;  %v1707_v9 = vld [vmem:[%s8525_s20 + $0x17] sm:$0xff] }
  0x77   : > { %7207 = vmatmul.mubr.msk.bf16.gmra.mxu0 %vm505_vm1, %v796_v14  ;;  %v1355_v14 = vpack.c.bf16 %v1341_v12, %v1340_v11  ;;  %v1538_v12 = vpack.c.bf16 %v1521_v5, %v1520_v4 }
  0x78   : > { %7245 = vmatmul.mubr.msk.bf16.gmra.mxu1 %vm505_vm1, %v982_v15  ;;  %7210 = vmatprep.mubr.msk.bf16.mxu0 %vm8383_vm0, %v8382_v1  ;;  %v1156_v15 = vld [vmem:[%s8525_s20 + $0x4c] sm:$0xff] }
  0x79   : > { %7248 = vmatprep.mubr.msk.bf16.mxu1 %vm8383_vm0, %v8382_v1  ;;  %v1170_v19 = vpack.c.bf16 %v1157_v16, %v1156_v15 }
  0x7f   : > { %7211 = vmatmul.mubr.msk.bf16.gmra.mxu0 %vm505_vm1, %v797_v20  ;;  %v1356_v20 = vpack.c.bf16 %v1343_v18, %v1342_v17  ;;  %v8191_v17 = vld [vmem:[%s11268_s1 + $0x40] sm:$0xff]  }
  0x80   : > { %7249 = vmatmul.mubr.msk.bf16.gmra.mxu1 %vm505_vm1, %v983_v21  ;;  %7214 = vmatprep.mubr.msk.bf16.mxu0 %vm8383_vm0, %v8382_v1  ;;  %v1158_v21 = vld [vmem:[%s8525_s20 + $0x5c] sm:$0xff] }
  0x81   : > { %7252 = vmatprep.mubr.msk.bf16.mxu1 %vm8383_vm0, %v8382_v1  ;;  %v1171_v25 = vpack.c.bf16 %v1159_v22, %v1158_v21  ;;  %v1522_v22 = vld [vmem:[%s8525_s20 + $0x1e] sm:$0xff] }
  0x87   : > { %7215 = vmatmul.mubr.msk.bf16.gmra.mxu0 %vm505_vm1, %v798_v26  ;;  %v1357_v26 = vpack.c.bf16 %v1345_v24, %v1344_v23  ;;  %v1523_v23 = vld [vmem:[%s8525_s20 + $0x26] sm:$0xff] }
  0x88   : > { %7253 = vmatmul.mubr.msk.bf16.gmra.mxu1 %vm505_vm1, %v984_v27  ;;  %7218 = vmatprep.mubr.msk.bf16.mxu0 %vm8383_vm0, %v8382_v1  ;;  %v1160_v27 = vld [vmem:[%s8525_s20 + $0x6c] sm:$0xff] }
  0x89   : > { %7256 = vmatprep.mubr.msk.bf16.mxu1 %vm8383_vm0, %v8382_v1  ;;  %v1172_v31 = vpack.c.bf16 %v1161_v28, %v1160_v27  ;;  %v1709_v27 = vld [vmem:[%s8525_s20 + $0x27] sm:$0xff] }
  0x8f   : > { %7219 = vmatmul.mubr.msk.bf16.gmra.mxu0 %vm505_vm1, %v799_v32  ;;  %v1358_v32 = vpack.c.bf16 %v1347_v30, %v1346_v29  ;;  %v1539_v30 = vpack.c.bf16 %v1523_v23, %v1522_v22 }
  0x90   : > { %7257 = vmatmul.mubr.msk.bf16.gmra.mxu1 %vm505_vm1, %v985_v33  ;;  %7222 = vmatprep.mubr.msk.bf16.mxu0 %vm8383_vm0, %v8382_v1 }
  0x91   : > { %7260 = vmatprep.mubr.msk.bf16.mxu1 %vm8383_vm0, %v8382_v1 }
  0x97   : > { %7223 = vmatmul.mubr.msk.bf16.gmra.mxu0 %vm505_vm1, %v800_v38 }
  0x98   : > { %7261 = vmatmul.mubr.msk.bf16.gmra.mxu1 %vm505_vm1, %v986_v39  ;;  %7226 = vmatprep.mubr.msk.bf16.mxu0 %vm8383_vm0, %v8382_v1  ;;  %v1348_v39 = vld [vmem:[%s8525_s20 + $0x7d] sm:$0xff] }
  0x99   : > { %7264 = vmatprep.mubr.msk.bf16.mxu1 %vm8383_vm0, %v8382_v1 }
  0x9f   : > { %7227 = vmatmul.mubr.msk.bf16.gmra.mxu0 %vm505_vm1, %v801_v44 }
  0xa0   : > { %7265 = vmatmul.mubr.msk.bf16.gmra.mxu1 %vm505_vm1, %v987_v45  ;;  %7230 = vmatprep.mubr.msk.bf16.mxu0 %vm8383_vm0, %v8382_v1  ;;  %v1359_v45 = vpack.c.bf16 %v1349_v40, %v1348_v39  ;;  %v1524_v39 = vld [vmem:[%s8525_s20 + $0x2e] sm:$0xff]  ;;  %v1525_v40 = vld [vmem:[%s8525_s20 + $0x36] sm:$0xff] }
  0xa1   : > { %7268 = vmatprep.mubr.msk.bf16.mxu1 %vm8383_vm0, %v8382_v1 }
  0xa7   : > { %7231 = vmatmul.mubr.msk.bf16.gmra.mxu0 %vm505_vm1, %v802_v50 }
  0xa8   : > { %7269 = vmatmul.mubr.msk.bf16.gmra.mxu1 %vm505_vm1, %v988_v51  ;;  %7274 = vmatprep.mubr.msk.bf16.mxu0 %vm8383_vm0, %v8382_v1  ;;  %v1164_v51 = vld [vmem:[%s8525_s20 + $0x8c] sm:$0xff] }
  0xa9   : > { %7312 = vmatprep.mubr.msk.bf16.mxu1 %vm8383_vm0, %v8382_v1 }
  0xaf   : > { %7275 = vmatmul.mubr.msk.bf16.vlgmr.msra.gmra.mxu0 %vm505_vm1, %v1166_v56  ;;  %v1351_v56 = vld [vmem:[%s8525_s20 + $0x95] sm:$0xff] }
  0xb0   : > { %7313 = vmatmul.mubr.msk.bf16.vlgmr.msra.gmra.mxu1 %vm505_vm1, %v1352_v57  ;;  %7278 = vmatprep.mubr.msk.bf16.mxu0 %vm8383_vm0, %v8382_v1  ;;  %v1360_v61 = vpack.c.bf16 %v1351_v56, %v1350_v55 }
  0xb1   : > { %7316 = vmatprep.mubr.msk.bf16.mxu1 %vm8383_vm0, %v8382_v1  ;;  %7349 = vmatpush3.bf16.msra.mxu0 %v8189_v58 }
  0xb2   : > { %7387 = vmatpush3.bf16.msra.mxu1 %v8190_v59  ;;  %7424 = vmatprep.subr.bf16.mxu0 %v8382_v1  ;;  %v1174_v59 = vpack.c.bf16 %v1165_v52, %v1164_v51 }
  0xb3   : > { %7462 = vmatprep.subr.bf16.mxu1 %v8382_v1 }
  0xb7   : > { %7279 = vmatmul.mubr.msk.bf16.gmra.mxu0 %vm505_vm1, %v1167_v0 }
  0xb8   : > { %7317 = vmatmul.mubr.msk.bf16.gmra.mxu1 %vm505_vm1, %v1353_v2  ;;  %7282 = vmatprep.mubr.msk.bf16.mxu0 %vm8383_vm0, %v8382_v1 }
  0xb9   : > { %7320 = vmatprep.mubr.msk.bf16.mxu1 %vm8383_vm0, %v8382_v1 }
  0xbf   : > { %7283 = vmatmul.mubr.msk.bf16.gmra.mxu0 %vm505_vm1, %v1168_v7 }
  0xc0   : > { %7321 = vmatmul.mubr.msk.bf16.gmra.mxu1 %vm505_vm1, %v1354_v8  ;;  %7286 = vmatprep.mubr.msk.bf16.mxu0 %vm8383_vm0, %v8382_v1  ;;  %v1706_v8 = vld [vmem:[%s8525_s20 + $0xf] sm:$0xff] }
  0xc1   : > { %7324 = vmatprep.mubr.msk.bf16.mxu1 %vm8383_vm0, %v8382_v1 }
  0xc7   : > { %7287 = vmatmul.mubr.msk.bf16.gmra.mxu0 %vm505_vm1, %v1169_v13 }
  0xc8   : > { %7325 = vmatmul.mubr.msk.bf16.gmra.mxu1 %vm505_vm1, %v1355_v14  ;;  %7290 = vmatprep.mubr.msk.bf16.mxu0 %vm8383_vm0, %v8382_v1  ;;  %v1724_v14 = vpack.c.bf16 %v1707_v9, %v1706_v8 }
  0xc9   : > { %7328 = vmatprep.mubr.msk.bf16.mxu1 %vm8383_vm0, %v8382_v1 }
  0xcf   : > { %7291 = vmatmul.mubr.msk.bf16.gmra.mxu0 %vm505_vm1, %v1170_v19  ;;  %v8192_v19 = vld [vmem:[%s11268_s1 + $0x48] sm:$0xff]  }
  0xd0   : > { %7329 = vmatmul.mubr.msk.bf16.gmra.mxu1 %vm505_vm1, %v1356_v20  ;;  %7294 = vmatprep.mubr.msk.bf16.mxu0 %vm8383_vm0, %v8382_v1 }
  0xd1   : > { %7332 = vmatprep.mubr.msk.bf16.mxu1 %vm8383_vm0, %v8382_v1 }
  0xd7   : > { %7295 = vmatmul.mubr.msk.bf16.gmra.mxu0 %vm505_vm1, %v1171_v25 }
  0xd8   : > { %7333 = vmatmul.mubr.msk.bf16.gmra.mxu1 %vm505_vm1, %v1357_v26  ;;  %7298 = vmatprep.mubr.msk.bf16.mxu0 %vm8383_vm0, %v8382_v1  ;;  %v1708_v26 = vld [vmem:[%s8525_s20 + $0x1f] sm:$0xff] }
  0xd9   : > { %7336 = vmatprep.mubr.msk.bf16.mxu1 %vm8383_vm0, %v8382_v1 }
  0xdf   : > { %v567_v33 = vpop.f32.mrf.mxu0  ;;  %7299 = vmatmul.mubr.msk.bf16.gmra.mxu0 %vm505_vm1, %v1172_v31 }
  0xe0   : > { %v705_v34 = vpop.f32.mrf.mxu1  ;;  %7337 = vmatmul.mubr.msk.bf16.gmra.mxu1 %vm505_vm1, %v1358_v32  ;;  %7302 = vmatprep.mubr.msk.bf16.mxu0 %vm8383_vm0, %v8382_v1  ;;  %v1725_v32 = vpack.c.bf16 %v1709_v27, %v1708_v26 }
  0xe1   : > { %v8801_v37 = vadd.f32 %v705_v34, %v567_v33  ;;  %v7124_v38 = vpop.f32.mrf.mxu0  ;;  %7340 = vmatprep.mubr.msk.bf16.mxu1 %vm8383_vm0, %v8382_v1 }
  0xe2   : > { %v7162_v41 = vpop.f32.mrf.mxu1 }
  0xe3   : > { %v570_v42 = vpop.f32.mrf.mxu0 }
  0xe4   : > { %v708_v44 = vpop.f32.mrf.mxu1 }
  0xe5   : > { %v8807_v46 = vadd.f32 %v708_v44, %v570_v42  ;;  %v7125_v47 = vpop.f32.mrf.mxu0  ;;  %v1711_v44 = vld [vmem:[%s8525_s20 + $0x37] sm:$0xff] }
  0xe6   : > { %v7163_v48 = vpop.f32.mrf.mxu1 }
  0xe7   : > { %v575_v49 = vpop.f32.mrf.mxu0  ;;  %7303 = vmatmul.mubr.msk.bf16.gmra.mxu0 %vm505_vm1, %v1173_v43  ;;  %v1710_v43 = vld [vmem:[%s8525_s20 + $0x2f] sm:$0xff]  ;;  %v1540_v48 = vpack.c.bf16 %v1525_v40, %v1524_v39 }
  0xe8   : > { %v713_v50 = vpop.f32.mrf.mxu1  ;;  %7341 = vmatmul.mubr.msk.bf16.gmra.mxu1 %vm505_vm1, %v1359_v45  ;;  %7306 = vmatprep.mubr.msk.bf16.mxu0 %vm8383_vm0, %v8382_v1 }
  0xe9   : > { %v8815_v53 = vadd.f32 %v713_v50, %v575_v49  ;;  %v7128_v54 = vpop.f32.mrf.mxu0  ;;  %7344 = vmatprep.mubr.msk.bf16.mxu1 %vm8383_vm0, %v8382_v1  ;;  %v1726_v50 = vpack.c.bf16 %v1711_v44, %v1710_v43 }
  0xea   : > { %v7166_v57 = vpop.f32.mrf.mxu1 }
  0xeb   : > { %v578_v58 = vpop.f32.mrf.mxu0  ;;  %v1526_v57 = vld [vmem:[%s8525_s20 + $0x3e] sm:$0xff] }
  0xec   : > { %v716_v60 = vpop.f32.mrf.mxu1 }
  0xed   : > { %v8821_v62 = vadd.f32 %v716_v60, %v578_v58  ;;  %v7129_v63 = vpop.f32.mrf.mxu0  ;;  %v1527_v58 = vld [vmem:[%s8525_s20 + $0x46] sm:$0xff] }
  0xee   : > { %v7167_v0 = vpop.f32.mrf.mxu1  ;;  %v1713_v63 = vld [vmem:[%s8525_s20 + $0x47] sm:$0xff] }
  0xef   : > { %v583_v2 = vpop.f32.mrf.mxu0  ;;  %7307 = vmatmul.mubr.msk.bf16.gmra.mxu0 %vm505_vm1, %v1174_v59 }
  0xf0   : > { %v721_v3 = vpop.f32.mrf.mxu1  ;;  %7345 = vmatmul.mubr.msk.bf16.gmra.mxu1 %vm505_vm1, %v1360_v61  ;;  %7350 = vmatprep.mubr.msk.bf16.mxu0 %vm8383_vm0, %v8382_v1  ;;  %v1712_v61 = vld [vmem:[%s8525_s20 + $0x3f] sm:$0xff] }
  0xf1   : > { %v8829_v6 = vadd.f32 %v721_v3, %v583_v2  ;;  %v7132_v7 = vpop.f32.mrf.mxu0  ;;  %7388 = vmatprep.mubr.msk.bf16.mxu1 %vm8383_vm0, %v8382_v1  ;;  %v1541_v3 = vpack.c.bf16 %v1527_v58, %v1526_v57  ;;  %v1727_v5 = vpack.c.bf16 %v1713_v63, %v1712_v61  ;;  %v1719_v57 = vld [vmem:[%s8525_s20 + $0x77] sm:$0xff] }
  0xf2   : > { %v7170_v10 = vpop.f32.mrf.mxu1 }
  0xf3   : > { %v586_v11 = vpop.f32.mrf.mxu0 }
  0xf4   : > { %v724_v13 = vpop.f32.mrf.mxu1 }
  0xf5   : > { %v8835_v15 = vadd.f32 %v724_v13, %v586_v11  ;;  %v7133_v16 = vpop.f32.mrf.mxu0  ;;  %v1529_v13 = vld [vmem:[%s8525_s20 + $0x56] sm:$0xff] }
  0xf6   : > { %v7171_v18 = vpop.f32.mrf.mxu1 }
  0xf7   : > { %v591_v20 = vpop.f32.mrf.mxu0  ;;  %7351 = vmatmul.mubr.msk.bf16.vlgmr.msra.gmra.mxu0 %vm505_vm1, %v1538_v12  ;;  %v1528_v12 = vld [vmem:[%s8525_s20 + $0x4e] sm:$0xff]  ;;  %v1715_v18 = vld [vmem:[%s8525_s20 + $0x57] sm:$0xff] }
  0xf8   : > { %v729_v21 = vpop.f32.mrf.mxu1  ;;  %7389 = vmatmul.mubr.msk.bf16.vlgmr.msra.gmra.mxu1 %vm505_vm1, %v1724_v14  ;;  %7354 = vmatprep.mubr.msk.bf16.mxu0 %vm8383_vm0, %v8382_v1 }
  0xf9   : > { %v8849_v24 = vadd.f32 %v729_v21, %v591_v20  ;;  %v7136_v25 = vpop.f32.mrf.mxu0  ;;  %7392 = vmatprep.mubr.msk.bf16.mxu1 %vm8383_vm0, %v8382_v1  ;;  %7425 = vmatpush3.bf16.msra.mxu0 %v8191_v17  ;;  %v1714_v17 = vld [vmem:[%s8525_s20 + $0x4f] sm:$0xff]  ;;  %v1542_v21 = vpack.c.bf16 %v1529_v13, %v1528_v12  ;;  %v1720_v13 = vld [vmem:[%s8525_s20 + $0x7f] sm:$0xff] }
  0xfa   : > { %v7174_v28 = vpop.f32.mrf.mxu1  ;;  %7463 = vmatpush3.bf16.msra.mxu1 %v8192_v19  ;;  %7500 = vmatprep.subr.bf16.mxu0 %v8382_v1  ;;  %v1728_v23 = vpack.c.bf16 %v1715_v18, %v1714_v17 }
  0xfb   : > { %v594_v29 = vpop.f32.mrf.mxu0  ;;  %7538 = vmatprep.subr.bf16.mxu1 %v8382_v1 }
  0xfc   : > { %v732_v31 = vpop.f32.mrf.mxu1 }
  0xfd   : > { %v8857_v33 = vadd.f32 %v732_v31, %v594_v29  ;;  %v7137_v34 = vpop.f32.mrf.mxu0  ;;  %v1531_v31 = vld [vmem:[%s8525_s20 + $0x66] sm:$0xff] }
  0xfe   : > { %v7175_v35 = vpop.f32.mrf.mxu1 }
  0xff   : > { %v599_v36 = vpop.f32.mrf.mxu0  ;;  %7355 = vmatmul.mubr.msk.bf16.gmra.mxu0 %vm505_vm1, %v1539_v30  ;;  %v1530_v30 = vld [vmem:[%s8525_s20 + $0x5e] sm:$0xff] }
 0x100   : > { %v737_v38 = vpop.f32.mrf.mxu1  ;;  %7393 = vmatmul.mubr.msk.bf16.gmra.mxu1 %vm505_vm1, %v1725_v32  ;;  %7358 = vmatprep.mubr.msk.bf16.mxu0 %vm8383_vm0, %v8382_v1  ;;  %v1716_v35 = vld [vmem:[%s8525_s20 + $0x5f] sm:$0xff]  ;;  %v1543_v40 = vpack.c.bf16 %v1531_v31, %v1530_v30  ;;  %v1537_v31 = vld [vmem:[%s8525_s20 + $0x96] sm:$0xff] }
 0x101   : > { %v8865_v41 = vadd.f32 %v737_v38, %v599_v36  ;;  %v7140_v42 = vpop.f32.mrf.mxu0  ;;  %7396 = vmatprep.mubr.msk.bf16.mxu1 %vm8383_vm0, %v8382_v1  ;;  %v1717_v36 = vld [vmem:[%s8525_s20 + $0x67] sm:$0xff] }
 0x102   : > { %v7178_v45 = vpop.f32.mrf.mxu1  ;;  %v1729_v43 = vpack.c.bf16 %v1717_v36, %v1716_v35  ;;  %v1722_v35 = vld [vmem:[%s8525_s20 + $0x8f] sm:$0xff]  ;;  %v1723_v36 = vld [vmem:[%s8525_s20 + $0x97] sm:$0xff] }
 0x103   : > { %v602_v47 = vpop.f32.mrf.mxu0 }
 0x104   : > { %v740_v49 = vpop.f32.mrf.mxu1 }
 0x105   : > { %v8871_v51 = vadd.f32 %v740_v49, %v602_v47  ;;  %v7141_v52 = vpop.f32.mrf.mxu0 }
 0x106   : > { %v7179_v54 = vpop.f32.mrf.mxu1  ;;  %v1533_v52 = vld [vmem:[%s8525_s20 + $0x76] sm:$0xff] }
 0x107   : > { %v607_v55 = vpop.f32.mrf.mxu0  ;;  %7359 = vmatmul.mubr.msk.bf16.gmra.mxu0 %vm505_vm1, %v1540_v48 }
 0x108   : > { %v745_v56 = vpop.f32.mrf.mxu1  ;;  %7397 = vmatmul.mubr.msk.bf16.gmra.mxu1 %vm505_vm1, %v1726_v50  ;;  %7362 = vmatprep.mubr.msk.bf16.mxu0 %vm8383_vm0, %v8382_v1  ;;  %v1532_v50 = vld [vmem:[%s8525_s20 + $0x6e] sm:$0xff] }
 0x109   : > { %v8879_v59 = vadd.f32 %v745_v56, %v607_v55  ;;  %v7144_v60 = vpop.f32.mrf.mxu0  ;;  %7400 = vmatprep.mubr.msk.bf16.mxu1 %vm8383_vm0, %v8382_v1  ;;  %v1718_v56 = vld [vmem:[%s8525_s20 + $0x6f] sm:$0xff]  ;;  %v1544_v61 = vpack.c.bf16 %v1533_v52, %v1532_v50 }
 0x10a   : > { %v7182_v0 = vpop.f32.mrf.mxu1 }
 0x10b   : > { %v610_v2 = vpop.f32.mrf.mxu0  ;;  %v1730_v0 = vpack.c.bf16 %v1719_v57, %v1718_v56  ;;  %v2078_v57 = vld [vmem:[%s8525_s20 + $0x19] sm:$0xff] }
 0x10c   : > { %v748_v4 = vpop.f32.mrf.mxu1 }
 0x10d   : > { %v8885_v7 = vadd.f32 %v748_v4, %v610_v2  ;;  %v7145_v8 = vpop.f32.mrf.mxu0 }
 0x10e   : > { %v7183_v9 = vpop.f32.mrf.mxu1 }
 0x10f   : > { %v615_v10 = vpop.f32.mrf.mxu0  ;;  %7363 = vmatmul.mubr.msk.bf16.gmra.mxu0 %vm505_vm1, %v1541_v3 }
 0x110   : > { %v753_v11 = vpop.f32.mrf.mxu1  ;;  %7401 = vmatmul.mubr.msk.bf16.gmra.mxu1 %vm505_vm1, %v1727_v5  ;;  %7366 = vmatprep.mubr.msk.bf16.mxu0 %vm8383_vm0, %v8382_v1 }
 0x111   : > { %v8893_v14 = vadd.f32 %v753_v11, %v615_v10  ;;  %v7148_v16 = vpop.f32.mrf.mxu0  ;;  %7404 = vmatprep.mubr.msk.bf16.mxu1 %vm8383_vm0, %v8382_v1  ;;  %v1534_v10 = vld [vmem:[%s8525_s20 + $0x7e] sm:$0xff]  ;;  %v1535_v11 = vld [vmem:[%s8525_s20 + $0x86] sm:$0xff] }
 0x112   : > { %v7186_v19 = vpop.f32.mrf.mxu1  ;;  %v1721_v16 = vld [vmem:[%s8525_s20 + $0x87] sm:$0xff] }
 0x113   : > { %v618_v20 = vpop.f32.mrf.mxu0  ;;  %v1545_v19 = vpack.c.bf16 %v1535_v11, %v1534_v10 }
 0x114   : > { %v756_v22 = vpop.f32.mrf.mxu1 }
 0x115   : > { %v8899_v25 = vadd.f32 %v756_v22, %v618_v20  ;;  %v7149_v26 = vpop.f32.mrf.mxu0  ;;  %v1731_v22 = vpack.c.bf16 %v1721_v16, %v1720_v13 }
 0x116   : > { %v7187_v27 = vpop.f32.mrf.mxu1 }
 0x117   : > { %v623_v28 = vpop.f32.mrf.mxu0  ;;  %7367 = vmatmul.mubr.msk.bf16.gmra.mxu0 %vm505_vm1, %v1542_v21 }
 0x118   : > { %v761_v29 = vpop.f32.mrf.mxu1  ;;  %7405 = vmatmul.mubr.msk.bf16.gmra.mxu1 %vm505_vm1, %v1728_v23  ;;  %7370 = vmatprep.mubr.msk.bf16.mxu0 %vm8383_vm0, %v8382_v1 }
 0x119   : > { %v8907_v32 = vadd.f32 %v761_v29, %v623_v28  ;;  %v7152_v34 = vpop.f32.mrf.mxu0  ;;  %7408 = vmatprep.mubr.msk.bf16.mxu1 %vm8383_vm0, %v8382_v1 }
 0x11a   : > { %v7190_v38 = vpop.f32.mrf.mxu1 }
 0x11b   : > { %v626_v39 = vpop.f32.mrf.mxu0 }
 0x11c   : > { %v764_v42 = vpop.f32.mrf.mxu1 }
 0x11d   : > { %v8913_v44 = vadd.f32 %v764_v42, %v626_v39  ;;  %v7153_v45 = vpop.f32.mrf.mxu0 }
 0x11e   : > { %v7191_v47 = vpop.f32.mrf.mxu1  ;;  %v1732_v45 = vpack.c.bf16 %v1723_v36, %v1722_v35 }
 0x11f   : > { %v631_v48 = vpop.f32.mrf.mxu0  ;;  %7371 = vmatmul.mubr.msk.bf16.gmra.mxu0 %vm505_vm1, %v1543_v40 }
 0x120   : > { %v769_v49 = vpop.f32.mrf.mxu1  ;;  %7409 = vmatmul.mubr.msk.bf16.gmra.mxu1 %vm505_vm1, %v1729_v43  ;;  %7374 = vmatprep.mubr.msk.bf16.mxu0 %vm8383_vm0, %v8382_v1 }
 0x121   : > { %v8921_v54 = vadd.f32 %v769_v49, %v631_v48  ;;  %v7156_v55 = vpop.f32.mrf.mxu0  ;;  %7412 = vmatprep.mubr.msk.bf16.mxu1 %vm8383_vm0, %v8382_v1 }
 0x122   : > { %v7194_v58 = vpop.f32.mrf.mxu1 }
 0x123   : > { %v634_v60 = vpop.f32.mrf.mxu0  ;;  %v2079_v58 = vld [vmem:[%s8525_s20 + $0x21] sm:$0xff] }
 0x124   : > { %v772_v63 = vpop.f32.mrf.mxu1 }
 0x125   : > { %v8927_v2 = vadd.f32 %v772_v63, %v634_v60  ;;  %v7157_v3 = vpop.f32.mrf.mxu0 }
 0x126   : > { %v7195_v4 = vpop.f32.mrf.mxu1 }
 0x127   : > { %v873_v5 = vpop.f32.mrf.mxu0  ;;  %7375 = vmatmul.mubr.msk.bf16.gmra.mxu0 %vm505_vm1, %v1544_v61 }
 0x128   : > { %v944_v8 = vadd.f32 %v873_v5, %v8801_v37  ;;  %v1059_v9 = vpop.f32.mrf.mxu1  ;;  %7413 = vmatmul.mubr.msk.bf16.gmra.mxu1 %vm505_vm1, %v1730_v0  ;;  %7378 = vmatprep.mubr.msk.bf16.mxu0 %vm8383_vm0, %v8382_v1  ;;  %v8317_v0 = vld [vmem:[%s8525_s20 + $0x20] sm:$0xff]  ;;  %v2096_v5 = vpack.c.bf16 %v2079_v58, %v2078_v57 }
 0x129   : > { %v7200_v12 = vpop.f32.mrf.mxu0  ;;  %7416 = vmatprep.mubr.msk.bf16.mxu1 %vm8383_vm0, %v8382_v1 }
 0x12a   : > { %v8940_v17 = vadd.f32 %v1059_v9, %v944_v8  ;;  %v7238_v18 = vpop.f32.mrf.mxu1  ;;  %v8193_v9 = vld [vmem:[%s11268_s1 + $0x50] sm:$0xff]   ;;  %v8194_v12 = vld [vmem:[%s11268_s1 + $0x58] sm:$0xff]  }
 0x12b   : > { %v876_v37 = vpop.f32.mrf.mxu0  ;;  %v1894_v18 = vld [vmem:[%s8525_s20 + $0x28] sm:$0xff] }
 0x12c   : > { %v945_v20 = vadd.f32 %v876_v37, %v8807_v46  ;;  %v1062_v21 = vpop.f32.mrf.mxu1  ;;  %v1536_v46 = vld [vmem:[%s8525_s20 + $0x8e] sm:$0xff] }
 0x12d   : > { %v7201_v23 = vpop.f32.mrf.mxu0  ;;  %v1895_v37 = vld [vmem:[%s8525_s20 + $0x30] sm:$0xff] }
 0x12e   : > { %v8943_v26 = vadd.f32 %v1062_v21, %v945_v20  ;;  %v7239_v27 = vpop.f32.mrf.mxu1  ;;  %v2080_v20 = vld [vmem:[%s8525_s20 + $0x29] sm:$0xff]  ;;  %v2081_v21 = vld [vmem:[%s8525_s20 + $0x31] sm:$0xff] }
 0x12f   : > { %v881_v28 = vpop.f32.mrf.mxu0  ;;  %7379 = vmatmul.mubr.msk.bf16.gmra.mxu0 %vm505_vm1, %v1545_v19  ;;  %v1911_v27 = vpack.c.bf16 %v1895_v37, %v1894_v18 }
 0x130   : > { %v946_v29 = vadd.f32 %v881_v28, %v8815_v53  ;;  %v1067_v30 = vpop.f32.mrf.mxu1  ;;  %7417 = vmatmul.mubr.msk.bf16.gmra.mxu1 %vm505_vm1, %v1731_v22  ;;  %7382 = vmatprep.mubr.msk.bf16.mxu0 %vm8383_vm0, %v8382_v1  ;;  %v1546_v53 = vpack.c.bf16 %v1537_v31, %v1536_v46 }
 0x131   : > { %v7204_v34 = vpop.f32.mrf.mxu0  ;;  %7420 = vmatprep.mubr.msk.bf16.mxu1 %vm8383_vm0, %v8382_v1 }
 0x132   : > { %v8956_v38 = vadd.f32 %v1067_v30, %v946_v29  ;;  %v7242_v39 = vpop.f32.mrf.mxu1  ;;  %v2097_v30 = vpack.c.bf16 %v2081_v21, %v2080_v20  ;;  %v1901_v21 = vld [vmem:[%s8525_s20 + $0x60] sm:$0xff] }
 0x133   : > { %v884_v40 = vpop.f32.mrf.mxu0 }
 0x134   : > { %v947_v42 = vadd.f32 %v884_v40, %v8821_v62  ;;  %v1070_v43 = vpop.f32.mrf.mxu1  ;;  %v1892_v62 = vld [vmem:[%s8525_s20 + $0x18] sm:$0xff]  ;;  %v1897_v40 = vld [vmem:[%s8525_s20 + $0x40] sm:$0xff] }
 0x135   : > { %v7205_v47 = vpop.f32.mrf.mxu0 }
 0x136   : > { %v8959_v48 = vadd.f32 %v1070_v43, %v947_v42  ;;  %v7243_v49 = vpop.f32.mrf.mxu1  ;;  %v2082_v42 = vld [vmem:[%s8525_s20 + $0x39] sm:$0xff]  ;;  %v2083_v43 = vld [vmem:[%s8525_s20 + $0x41] sm:$0xff] }
 0x137   : > { %v889_v50 = vpop.f32.mrf.mxu0  ;;  %7383 = vmatmul.mubr.msk.bf16.gmra.mxu0 %vm505_vm1, %v1546_v53 }
 0x138   : > { %v948_v52 = vadd.f32 %v889_v50, %v8829_v6  ;;  %v1075_v55 = vpop.f32.mrf.mxu1  ;;  %7421 = vmatmul.mubr.msk.bf16.gmra.mxu1 %vm505_vm1, %v1732_v45  ;;  %7426 = vmatprep.mubr.msk.bf16.mxu0 %vm8383_vm0, %v8382_v1  ;;  %v1910_v6 = vpack.c.bf16 %v8317_v0, %v1892_v62  ;;  %v1899_v0 = vld [vmem:[%s8525_s20 + $0x50] sm:$0xff] }
 0x139   : > { %v7208_v56 = vpop.f32.mrf.mxu0  ;;  %7464 = vmatprep.mubr.msk.bf16.mxu1 %vm8383_vm0, %v8382_v1 }
 0x13a   : > { %v8971_v60 = vadd.f32 %v1075_v55, %v948_v52  ;;  %v7246_v61 = vpop.f32.mrf.mxu1  ;;  %v2098_v55 = vpack.c.bf16 %v2083_v43, %v2082_v42  ;;  %v1903_v43 = vld [vmem:[%s8525_s20 + $0x70] sm:$0xff] }
 0x13b   : > { %v892_v63 = vpop.f32.mrf.mxu0 }
 0x13c   : > { %v949_v3 = vadd.f32 %v892_v63, %v8835_v15  ;;  %v1078_v4 = vpop.f32.mrf.mxu1 }
 0x13d   : > { %v7209_v8 = vpop.f32.mrf.mxu0 }
 0x13e   : > { %v8978_v10 = vadd.f32 %v1078_v4, %v949_v3  ;;  %v7247_v11 = vpop.f32.mrf.mxu1  ;;  %v2084_v3 = vld [vmem:[%s8525_s20 + $0x49] sm:$0xff]  ;;  %v2085_v4 = vld [vmem:[%s8525_s20 + $0x51] sm:$0xff] }
 0x13f   : > { %v897_v13 = vpop.f32.mrf.mxu0  ;;  %7427 = vmatmul.mubr.msk.bf16.vlgmr.msra.gmra.mxu0 %vm505_vm1, %v1910_v6 }
 0x140   : > { %v950_v15 = vadd.f32 %v897_v13, %v8849_v24  ;;  %v1083_v16 = vpop.f32.mrf.mxu1  ;;  %7465 = vmatmul.mubr.msk.bf16.vlgmr.msra.gmra.mxu1 %vm505_vm1, %v2096_v5  ;;  %7430 = vmatprep.mubr.msk.bf16.mxu0 %vm8383_vm0, %v8382_v1  ;;  %v2099_v13 = vpack.c.bf16 %v2085_v4, %v2084_v3  ;;  %v1905_v4 = vld [vmem:[%s8525_s20 + $0x80] sm:$0xff] }
 0x141   : > { %v7212_v19 = vpop.f32.mrf.mxu0  ;;  %7468 = vmatprep.mubr.msk.bf16.mxu1 %vm8383_vm0, %v8382_v1  ;;  %7501 = vmatpush3.bf16.msra.mxu0 %v8193_v9 }
 0x142   : > { %v8994_v22 = vadd.f32 %v1083_v16, %v950_v15  ;;  %v7250_v23 = vpop.f32.mrf.mxu1  ;;  %7539 = vmatpush3.bf16.msra.mxu1 %v8194_v12  ;;  %7576 = vmatprep.subr.bf16.mxu0 %v8382_v1 }
 0x143   : > { %v900_v24 = vpop.f32.mrf.mxu0  ;;  %7614 = vmatprep.subr.bf16.mxu1 %v8382_v1 }
 0x144   : > { %v951_v28 = vadd.f32 %v900_v24, %v8857_v33  ;;  %v1086_v29 = vpop.f32.mrf.mxu1  ;;  %v1896_v33 = vld [vmem:[%s8525_s20 + $0x38] sm:$0xff] }
 0x145   : > { %v7213_v46 = vpop.f32.mrf.mxu0  ;;  %v1912_v49 = vpack.c.bf16 %v1897_v40, %v1896_v33  ;;  %v2086_v24 = vld [vmem:[%s8525_s20 + $0x59] sm:$0xff] }
 0x146   : > { %v8999_v31 = vadd.f32 %v1086_v29, %v951_v28  ;;  %v7251_v34 = vpop.f32.mrf.mxu1 }
 0x147   : > { %v905_v35 = vpop.f32.mrf.mxu0  ;;  %7431 = vmatmul.mubr.msk.bf16.gmra.mxu0 %vm505_vm1, %v1911_v27  ;;  %v2087_v27 = vld [vmem:[%s8525_s20 + $0x61] sm:$0xff] }
 0x148   : > { %v952_v36 = vadd.f32 %v905_v35, %v8865_v41  ;;  %v1091_v39 = vpop.f32.mrf.mxu1  ;;  %7469 = vmatmul.mubr.msk.bf16.gmra.mxu1 %vm505_vm1, %v2097_v30  ;;  %7434 = vmatprep.mubr.msk.bf16.mxu0 %vm8383_vm0, %v8382_v1  ;;  %v2100_v35 = vpack.c.bf16 %v2087_v27, %v2086_v24  ;;  %v1907_v27 = vld [vmem:[%s8525_s20 + $0x90] sm:$0xff] }
 0x149   : > { %v7216_v53 = vpop.f32.mrf.mxu0  ;;  %7472 = vmatprep.mubr.msk.bf16.mxu1 %vm8383_vm0, %v8382_v1 }
 0x14a   : > { %v9012_v45 = vadd.f32 %v1091_v39, %v952_v36  ;;  %v7254_v47 = vpop.f32.mrf.mxu1 }
 0x14b   : > { %v908_v41 = vpop.f32.mrf.mxu0 }
 0x14c   : > { %v953_v50 = vadd.f32 %v908_v41, %v8871_v51  ;;  %v1094_v52 = vpop.f32.mrf.mxu1  ;;  %v1898_v51 = vld [vmem:[%s8525_s20 + $0x48] sm:$0xff] }
 0x14d   : > { %v7217_v62 = vpop.f32.mrf.mxu0  ;;  %v1913_v9 = vpack.c.bf16 %v1899_v0, %v1898_v51  ;;  %v2088_v41 = vld [vmem:[%s8525_s20 + $0x69] sm:$0xff] }
 0x14e   : > { %v9015_v56 = vadd.f32 %v1094_v52, %v953_v50  ;;  %v7255_v57 = vpop.f32.mrf.mxu1 }
 0x14f   : > { %v913_v58 = vpop.f32.mrf.mxu0  ;;  %7435 = vmatmul.mubr.msk.bf16.gmra.mxu0 %vm505_vm1, %v1912_v49  ;;  %v2089_v49 = vld [vmem:[%s8525_s20 + $0x71] sm:$0xff] }
 0x150   : > { %v954_v61 = vadd.f32 %v913_v58, %v8879_v59  ;;  %v1099_v63 = vpop.f32.mrf.mxu1  ;;  %7473 = vmatmul.mubr.msk.bf16.gmra.mxu1 %vm505_vm1, %v2098_v55  ;;  %7438 = vmatprep.mubr.msk.bf16.mxu0 %vm8383_vm0, %v8382_v1  ;;  %v2101_v58 = vpack.c.bf16 %v2089_v49, %v2088_v41  ;;  %v1909_v49 = vld [vmem:[%s8525_s20 + $0xa0] sm:$0xff] }
 0x151   : > { %v7220_v6 = vpop.f32.mrf.mxu0  ;;  %7476 = vmatprep.mubr.msk.bf16.mxu1 %vm8383_vm0, %v8382_v1 }
 0x152   : > { %v9028_v5 = vadd.f32 %v1099_v63, %v954_v61  ;;  %v7258_v8 = vpop.f32.mrf.mxu1 }
 0x153   : > { %v916_v59 = vpop.f32.mrf.mxu0 }
 0x154   : > { %v955_v11 = vadd.f32 %v916_v59, %v8885_v7  ;;  %v1102_v12 = vpop.f32.mrf.mxu1  ;;  %v1900_v7 = vld [vmem:[%s8525_s20 + $0x58] sm:$0xff] }
 0x155   : > { %v7221_v15 = vpop.f32.mrf.mxu0  ;;  %v1914_v30 = vpack.c.bf16 %v1901_v21, %v1900_v7  ;;  %v2090_v59 = vld [vmem:[%s8525_s20 + $0x79] sm:$0xff] }
 0x156   : > { %v9031_v16 = vadd.f32 %v1102_v12, %v955_v11  ;;  %v7259_v18 = vpop.f32.mrf.mxu1 }
 0x157   : > { %v921_v37 = vpop.f32.mrf.mxu0  ;;  %7439 = vmatmul.mubr.msk.bf16.gmra.mxu0 %vm505_vm1, %v1913_v9  ;;  %v2091_v9 = vld [vmem:[%s8525_s20 + $0x81] sm:$0xff] }
 0x158   : > { %v956_v19 = vadd.f32 %v921_v37, %v8893_v14  ;;  %v1107_v20 = vpop.f32.mrf.mxu1  ;;  %7477 = vmatmul.mubr.msk.bf16.gmra.mxu1 %vm505_vm1, %v2099_v13  ;;  %7442 = vmatprep.mubr.msk.bf16.mxu0 %vm8383_vm0, %v8382_v1  ;;  %v2102_v37 = vpack.c.bf16 %v2091_v9, %v2090_v59  ;;  %v2265_v9 = vld [vmem:[%s8525_s20 + $0x22] sm:$0xff] }
 0x159   : > { %v7224_v23 = vpop.f32.mrf.mxu0  ;;  %7480 = vmatprep.mubr.msk.bf16.mxu1 %vm8383_vm0, %v8382_v1 }
 0x15a   : > { %v9044_v28 = vadd.f32 %v1107_v20, %v956_v19  ;;  %v7262_v29 = vpop.f32.mrf.mxu1 }
 0x15b   : > { %v924_v14 = vpop.f32.mrf.mxu0 }
 0x15c   : > { %v957_v46 = vadd.f32 %v924_v14, %v8899_v25  ;;  %v1110_v34 = vpop.f32.mrf.mxu1  ;;  %v1902_v25 = vld [vmem:[%s8525_s20 + $0x68] sm:$0xff] }
 0x15d   : > { %v7225_v36 = vpop.f32.mrf.mxu0  ;;  %v1915_v55 = vpack.c.bf16 %v1903_v43, %v1902_v25  ;;  %v2092_v14 = vld [vmem:[%s8525_s20 + $0x89] sm:$0xff] }
 0x15e   : > { %v9047_v39 = vadd.f32 %v1110_v34, %v957_v46  ;;  %v7263_v33 = vpop.f32.mrf.mxu1 }
 0x15f   : > { %v929_v40 = vpop.f32.mrf.mxu0  ;;  %7443 = vmatmul.mubr.msk.bf16.gmra.mxu0 %vm505_vm1, %v1914_v30  ;;  %v2093_v30 = vld [vmem:[%s8525_s20 + $0x91] sm:$0xff] }
 0x160   : > { %v958_v53 = vadd.f32 %v929_v40, %v8907_v32  ;;  %v1115_v42 = vpop.f32.mrf.mxu1  ;;  %7481 = vmatmul.mubr.msk.bf16.gmra.mxu1 %vm505_vm1, %v2100_v35  ;;  %7446 = vmatprep.mubr.msk.bf16.mxu0 %vm8383_vm0, %v8382_v1  ;;  %v2103_v40 = vpack.c.bf16 %v2093_v30, %v2092_v14 }
 0x161   : > { %v7228_v47 = vpop.f32.mrf.mxu0  ;;  %7484 = vmatprep.mubr.msk.bf16.mxu1 %vm8383_vm0, %v8382_v1 }
 0x162   : > { %v9060_v50 = vadd.f32 %v1115_v42, %v958_v53  ;;  %v7266_v52 = vpop.f32.mrf.mxu1 }
 0x163   : > { %v932_v32 = vpop.f32.mrf.mxu0 }
 0x164   : > { %v959_v62 = vadd.f32 %v932_v32, %v8913_v44  ;;  %v1118_v57 = vpop.f32.mrf.mxu1  ;;  %v1904_v44 = vld [vmem:[%s8525_s20 + $0x78] sm:$0xff] }
 0x165   : > { %v7229_v61 = vpop.f32.mrf.mxu0  ;;  %v1916_v13 = vpack.c.bf16 %v1905_v4, %v1904_v44  ;;  %v2094_v32 = vld [vmem:[%s8525_s20 + $0x99] sm:$0xff] }
 0x166   : > { %v9063_v63 = vadd.f32 %v1118_v57, %v959_v62  ;;  %v7267_v51 = vpop.f32.mrf.mxu1 }
 0x167   : > { %v937_v0 = vpop.f32.mrf.mxu0  ;;  %7447 = vmatmul.mubr.msk.bf16.gmra.mxu0 %vm505_vm1, %v1915_v55  ;;  %v2095_v55 = vld [vmem:[%s8525_s20 + $0xa1] sm:$0xff] }
 0x168   : > { %v960_v6 = vadd.f32 %v937_v0, %v8921_v54  ;;  %v1123_v3 = vpop.f32.mrf.mxu1  ;;  %7485 = vmatmul.mubr.msk.bf16.gmra.mxu1 %vm505_vm1, %v2101_v58  ;;  %7450 = vmatprep.mubr.msk.bf16.mxu0 %vm8383_vm0, %v8382_v1  ;;  %v2104_v0 = vpack.c.bf16 %v2095_v55, %v2094_v32 }
 0x169   : > { %v7232_v8 = vpop.f32.mrf.mxu0  ;;  %7488 = vmatprep.mubr.msk.bf16.mxu1 %vm8383_vm0, %v8382_v1 }
 0x16a   : > { %v9076_v11 = vadd.f32 %v1123_v3, %v960_v6  ;;  %v7270_v12 = vpop.f32.mrf.mxu1 }
 0x16b   : > { %v940_v54 = vpop.f32.mrf.mxu0 }
 0x16c   : > { %v961_v15 = vadd.f32 %v940_v54, %v8927_v2  ;;  %v1126_v18 = vpop.f32.mrf.mxu1  ;;  %v1906_v2 = vld [vmem:[%s8525_s20 + $0x88] sm:$0xff]  ;;  %v2450_v54 = vld [vmem:[%s8525_s20 + $0x1b] sm:$0xff] }
 0x16d   : > { %v7233_v19 = vpop.f32.mrf.mxu0  ;;  %v1917_v35 = vpack.c.bf16 %v1907_v27, %v1906_v2 }
 0x16e   : > { %v9079_v20 = vadd.f32 %v1126_v18, %v961_v15  ;;  %v7271_v7 = vpop.f32.mrf.mxu1 }
 0x16f   : > { %v1245_v21 = vpop.f32.mrf.mxu0  ;;  %7451 = vmatmul.mubr.msk.bf16.gmra.mxu0 %vm505_vm1, %v1916_v13  ;;  %v2451_v13 = vld [vmem:[%s8525_s20 + $0x23] sm:$0xff] }
 0x170   : > { %v1316_v23 = vadd.f32 %v1245_v21, %v8940_v17  ;;  %v1431_v24 = vpop.f32.mrf.mxu1  ;;  %7489 = vmatmul.mubr.msk.bf16.gmra.mxu1 %vm505_vm1, %v2102_v37  ;;  %7454 = vmatprep.mubr.msk.bf16.mxu0 %vm8383_vm0, %v8382_v1  ;;  %v2468_v21 = vpack.c.bf16 %v2451_v13, %v2450_v54 }
 0x171   : > { %v7276_v29 = vpop.f32.mrf.mxu0  ;;  %7492 = vmatprep.mubr.msk.bf16.mxu1 %vm8383_vm0, %v8382_v1 }
 0x172   : > { %v9092_v46 = vadd.f32 %v1431_v24, %v1316_v23  ;;  %v7314_v34 = vpop.f32.mrf.mxu1  ;;  %v8195_v24 = vld [vmem:[%s11268_s1 + $0x60] sm:$0xff]   ;;  %v8196_v29 = vld [vmem:[%s11268_s1 + $0x68] sm:$0xff]  }
 0x173   : > { %v1248_v17 = vpop.f32.mrf.mxu0  ;;  %v2266_v34 = vld [vmem:[%s8525_s20 + $0x2a] sm:$0xff] }
 0x174   : > { %v1317_v36 = vadd.f32 %v1248_v17, %v8943_v26  ;;  %v1434_v33 = vpop.f32.mrf.mxu1  ;;  %v1908_v26 = vld [vmem:[%s8525_s20 + $0x98] sm:$0xff] }
 0x175   : > { %v7277_v53 = vpop.f32.mrf.mxu0  ;;  %v1918_v58 = vpack.c.bf16 %v1909_v49, %v1908_v26  ;;  %v2267_v17 = vld [vmem:[%s8525_s20 + $0x32] sm:$0xff] }
 0x176   : > { %v9095_v42 = vadd.f32 %v1434_v33, %v1317_v36  ;;  %v7315_v25 = vpop.f32.mrf.mxu1  ;;  %v2452_v36 = vld [vmem:[%s8525_s20 + $0x2b] sm:$0xff]  ;;  %v2453_v33 = vld [vmem:[%s8525_s20 + $0x33] sm:$0xff] }
 0x177   : > { %v1253_v43 = vpop.f32.mrf.mxu0  ;;  %7455 = vmatmul.mubr.msk.bf16.gmra.mxu0 %vm505_vm1, %v1917_v35  ;;  %v2283_v25 = vpack.c.bf16 %v2267_v17, %v2266_v34 }
 0x178   : > { %v1318_v47 = vadd.f32 %v1253_v43, %v8956_v38  ;;  %v1439_v41 = vpop.f32.mrf.mxu1  ;;  %7493 = vmatmul.mubr.msk.bf16.gmra.mxu1 %vm505_vm1, %v2103_v40  ;;  %7458 = vmatprep.mubr.msk.bf16.mxu0 %vm8383_vm0, %v8382_v1 }
 0x179   : > { %v7280_v52 = vpop.f32.mrf.mxu0  ;;  %7496 = vmatprep.mubr.msk.bf16.mxu1 %vm8383_vm0, %v8382_v1 }
 0x17a   : > { %v9108_v62 = vadd.f32 %v1439_v41, %v1318_v47  ;;  %v7318_v57 = vpop.f32.mrf.mxu1  ;;  %v2469_v41 = vpack.c.bf16 %v2453_v33, %v2452_v36  ;;  %v2273_v33 = vld [vmem:[%s8525_s20 + $0x62] sm:$0xff] }
 0x17b   : > { %v1256_v38 = vpop.f32.mrf.mxu0 }
 0x17c   : > { %v1319_v61 = vadd.f32 %v1256_v38, %v8959_v48  ;;  %v1442_v51 = vpop.f32.mrf.mxu1  ;;  %v2264_v48 = vld [vmem:[%s8525_s20 + $0x1a] sm:$0xff]  ;;  %v2269_v38 = vld [vmem:[%s8525_s20 + $0x42] sm:$0xff] }
 0x17d   : > { %v7281_v6 = vpop.f32.mrf.mxu0 }
 0x17e   : > { %v9111_v3 = vadd.f32 %v1442_v51, %v1319_v61  ;;  %v7319_v44 = vpop.f32.mrf.mxu1  ;;  %v2454_v61 = vld [vmem:[%s8525_s20 + $0x3b] sm:$0xff]  ;;  %v2455_v51 = vld [vmem:[%s8525_s20 + $0x43] sm:$0xff] }
 0x17f   : > { %v1261_v4 = vpop.f32.mrf.mxu0  ;;  %7459 = vmatmul.mubr.msk.bf16.gmra.mxu0 %vm505_vm1, %v1918_v58 }
 0x180   : > { %v1320_v8 = vadd.f32 %v1261_v4, %v8971_v60  ;;  %v1447_v59 = vpop.f32.mrf.mxu1  ;;  %7497 = vmatmul.mubr.msk.bf16.gmra.mxu1 %vm505_vm1, %v2104_v0  ;;  %7502 = vmatprep.mubr.msk.bf16.mxu0 %vm8383_vm0, %v8382_v1  ;;  %v2282_v60 = vpack.c.bf16 %v2265_v9, %v2264_v48 }
 0x181   : > { %v7284_v12 = vpop.f32.mrf.mxu0  ;;  %7540 = vmatprep.mubr.msk.bf16.mxu1 %vm8383_vm0, %v8382_v1 }
 0x182   : > { %v9124_v15 = vadd.f32 %v1447_v59, %v1320_v8  ;;  %v7322_v18 = vpop.f32.mrf.mxu1  ;;  %v2470_v59 = vpack.c.bf16 %v2455_v51, %v2454_v61  ;;  %v2275_v51 = vld [vmem:[%s8525_s20 + $0x72] sm:$0xff] }
 0x183   : > { %v1264_v37 = vpop.f32.mrf.mxu0 }
 0x184   : > { %v1321_v19 = vadd.f32 %v1264_v37, %v8978_v10  ;;  %v1450_v7 = vpop.f32.mrf.mxu1  ;;  %v2271_v37 = vld [vmem:[%s8525_s20 + $0x52] sm:$0xff] }
 0x185   : > { %v7285_v23 = vpop.f32.mrf.mxu0 }
 0x186   : > { %v9130_v2 = vadd.f32 %v1450_v7, %v1321_v19  ;;  %v7323_v27 = vpop.f32.mrf.mxu1  ;;  %v2456_v19 = vld [vmem:[%s8525_s20 + $0x4b] sm:$0xff]  ;;  %v2457_v7 = vld [vmem:[%s8525_s20 + $0x53] sm:$0xff] }
 0x187   : > { %v1269_v14 = vpop.f32.mrf.mxu0  ;;  %7503 = vmatmul.mubr.msk.bf16.vlgmr.msra.gmra.mxu0 %vm505_vm1, %v2282_v60 }
 0x188   : > { %v1322_v10 = vadd.f32 %v1269_v14, %v8994_v22  ;;  %v1455_v30 = vpop.f32.mrf.mxu1  ;;  %7541 = vmatmul.mubr.msk.bf16.vlgmr.msra.gmra.mxu1 %vm505_vm1, %v2468_v21  ;;  %7506 = vmatprep.mubr.msk.bf16.mxu0 %vm8383_vm0, %v8382_v1  ;;  %v2471_v14 = vpack.c.bf16 %v2457_v7, %v2456_v19  ;;  %v2277_v7 = vld [vmem:[%s8525_s20 + $0x82] sm:$0xff] }
 0x189   : > { %v7288_v35 = vpop.f32.mrf.mxu0  ;;  %7544 = vmatprep.mubr.msk.bf16.mxu1 %vm8383_vm0, %v8382_v1  ;;  %7577 = vmatpush3.bf16.msra.mxu0 %v8195_v24 }
 0x18a   : > { %v9146_v40 = vadd.f32 %v1455_v30, %v1322_v10  ;;  %v7326_v53 = vpop.f32.mrf.mxu1  ;;  %7615 = vmatpush3.bf16.msra.mxu1 %v8196_v29  ;;  %7652 = vmatprep.subr.bf16.mxu0 %v8382_v1 }
 0x18b   : > { %v1272_v22 = vpop.f32.mrf.mxu0  ;;  %7690 = vmatprep.subr.bf16.mxu1 %v8382_v1 }
 0x18c   : > { %v1323_v43 = vadd.f32 %v1272_v22, %v8999_v31  ;;  %v1458_v47 = vpop.f32.mrf.mxu1  ;;  %v2268_v31 = vld [vmem:[%s8525_s20 + $0x3a] sm:$0xff] }
 0x18d   : > { %v7289_v26 = vpop.f32.mrf.mxu0  ;;  %v2284_v44 = vpack.c.bf16 %v2269_v38, %v2268_v31  ;;  %v2458_v22 = vld [vmem:[%s8525_s20 + $0x5b] sm:$0xff] }
 0x18e   : > { %v9151_v49 = vadd.f32 %v1458_v47, %v1323_v43  ;;  %v7327_v52 = vpop.f32.mrf.mxu1 }
 0x18f   : > { %v1277_v32 = vpop.f32.mrf.mxu0  ;;  %7507 = vmatmul.mubr.msk.bf16.gmra.mxu0 %vm505_vm1, %v2283_v25  ;;  %v2459_v25 = vld [vmem:[%s8525_s20 + $0x63] sm:$0xff] }
 0x190   : > { %v1324_v55 = vadd.f32 %v1277_v32, %v9012_v45  ;;  %v1463_v57 = vpop.f32.mrf.mxu1  ;;  %7545 = vmatmul.mubr.msk.bf16.gmra.mxu1 %vm505_vm1, %v2469_v41  ;;  %7510 = vmatprep.mubr.msk.bf16.mxu0 %vm8383_vm0, %v8382_v1  ;;  %v2472_v32 = vpack.c.bf16 %v2459_v25, %v2458_v22  ;;  %v2279_v25 = vld [vmem:[%s8525_s20 + $0x92] sm:$0xff] }
 0x191   : > { %v7292_v58 = vpop.f32.mrf.mxu0  ;;  %7548 = vmatprep.mubr.msk.bf16.mxu1 %vm8383_vm0, %v8382_v1 }
 0x192   : > { %v9164_v0 = vadd.f32 %v1463_v57, %v1324_v55  ;;  %v7330_v6 = vpop.f32.mrf.mxu1 }
 0x193   : > { %v1280_v45 = vpop.f32.mrf.mxu0 }
 0x194   : > { %v1325_v4 = vadd.f32 %v1280_v45, %v9015_v56  ;;  %v1466_v8 = vpop.f32.mrf.mxu1  ;;  %v2270_v56 = vld [vmem:[%s8525_s20 + $0x4a] sm:$0xff] }
 0x195   : > { %v7293_v48 = vpop.f32.mrf.mxu0  ;;  %v2285_v24 = vpack.c.bf16 %v2271_v37, %v2270_v56  ;;  %v2460_v45 = vld [vmem:[%s8525_s20 + $0x6b] sm:$0xff] }
 0x196   : > { %v9167_v9 = vadd.f32 %v1466_v8, %v1325_v4  ;;  %v7331_v12 = vpop.f32.mrf.mxu1 }
 0x197   : > { %v1285_v54 = vpop.f32.mrf.mxu0  ;;  %7511 = vmatmul.mubr.msk.bf16.gmra.mxu0 %vm505_vm1, %v2284_v44  ;;  %v2461_v44 = vld [vmem:[%s8525_s20 + $0x73] sm:$0xff] }
 0x198   : > { %v1326_v13 = vadd.f32 %v1285_v54, %v9028_v5  ;;  %v1471_v18 = vpop.f32.mrf.mxu1  ;;  %7549 = vmatmul.mubr.msk.bf16.gmra.mxu1 %vm505_vm1, %v2470_v59  ;;  %7514 = vmatprep.mubr.msk.bf16.mxu0 %vm8383_vm0, %v8382_v1  ;;  %v2473_v54 = vpack.c.bf16 %v2461_v44, %v2460_v45  ;;  %v2281_v44 = vld [vmem:[%s8525_s20 + $0xa2] sm:$0xff] }
 0x199   : > { %v7296_v60 = vpop.f32.mrf.mxu0  ;;  %7552 = vmatprep.mubr.msk.bf16.mxu1 %vm8383_vm0, %v8382_v1 }
 0x19a   : > { %v9180_v21 = vadd.f32 %v1471_v18, %v1326_v13  ;;  %v7334_v23 = vpop.f32.mrf.mxu1 }
 0x19b   : > { %v1288_v5 = vpop.f32.mrf.mxu0 }
 0x19c   : > { %v1327_v27 = vadd.f32 %v1288_v5, %v9031_v16  ;;  %v1474_v29 = vpop.f32.mrf.mxu1  ;;  %v2272_v16 = vld [vmem:[%s8525_s20 + $0x5a] sm:$0xff] }
 0x19d   : > { %v7297_v10 = vpop.f32.mrf.mxu0  ;;  %v2286_v41 = vpack.c.bf16 %v2273_v33, %v2272_v16  ;;  %v2462_v5 = vld [vmem:[%s8525_s20 + $0x7b] sm:$0xff] }
 0x19e   : > { %v9183_v30 = vadd.f32 %v1474_v29, %v1327_v27  ;;  %v7335_v34 = vpop.f32.mrf.mxu1 }
 0x19f   : > { %v1293_v17 = vpop.f32.mrf.mxu0  ;;  %7515 = vmatmul.mubr.msk.bf16.gmra.mxu0 %vm505_vm1, %v2285_v24  ;;  %v2463_v24 = vld [vmem:[%s8525_s20 + $0x83] sm:$0xff] }
 0x1a0   : > { %v1328_v35 = vadd.f32 %v1293_v17, %v9044_v28  ;;  %v1479_v36 = vpop.f32.mrf.mxu1  ;;  %7553 = vmatmul.mubr.msk.bf16.gmra.mxu1 %vm505_vm1, %v2471_v14  ;;  %7518 = vmatprep.mubr.msk.bf16.mxu0 %vm8383_vm0, %v8382_v1  ;;  %v2474_v17 = vpack.c.bf16 %v2463_v24, %v2462_v5  ;;  %v2637_v24 = vld [vmem:[%s8525_s20 + $0x2c] sm:$0xff] }
 0x1a1   : > { %v7300_v53 = vpop.f32.mrf.mxu0  ;;  %7556 = vmatprep.mubr.msk.bf16.mxu1 %vm8383_vm0, %v8382_v1 }
 0x1a2   : > { %v9196_v43 = vadd.f32 %v1479_v36, %v1328_v35  ;;  %v7338_v47 = vpop.f32.mrf.mxu1 }
 0x1a3   : > { %v1296_v28 = vpop.f32.mrf.mxu0 }
 0x1a4   : > { %v1329_v26 = vadd.f32 %v1296_v28, %v9047_v39  ;;  %v1482_v52 = vpop.f32.mrf.mxu1  ;;  %v2274_v39 = vld [vmem:[%s8525_s20 + $0x6a] sm:$0xff] }
 0x1a5   : > { %v7301_v55 = vpop.f32.mrf.mxu0  ;;  %v2287_v59 = vpack.c.bf16 %v2275_v51, %v2274_v39  ;;  %v2464_v28 = vld [vmem:[%s8525_s20 + $0x8b] sm:$0xff] }
 0x1a6   : > { %v9199_v57 = vadd.f32 %v1482_v52, %v1329_v26  ;;  %v7339_v31 = vpop.f32.mrf.mxu1 }
 0x1a7   : > { %v1301_v38 = vpop.f32.mrf.mxu0  ;;  %7519 = vmatmul.mubr.msk.bf16.gmra.mxu0 %vm505_vm1, %v2286_v41  ;;  %v2465_v41 = vld [vmem:[%s8525_s20 + $0x93] sm:$0xff] }
 0x1a8   : > { %v1330_v58 = vadd.f32 %v1301_v38, %v9060_v50  ;;  %v1487_v61 = vpop.f32.mrf.mxu1  ;;  %7557 = vmatmul.mubr.msk.bf16.gmra.mxu1 %vm505_vm1, %v2472_v32  ;;  %7522 = vmatprep.mubr.msk.bf16.mxu0 %vm8383_vm0, %v8382_v1  ;;  %v2475_v38 = vpack.c.bf16 %v2465_v41, %v2464_v28 }
 0x1a9   : > { %v7304_v6 = vpop.f32.mrf.mxu0  ;;  %7560 = vmatprep.mubr.msk.bf16.mxu1 %vm8383_vm0, %v8382_v1 }
 0x1aa   : > { %v9212_v4 = vadd.f32 %v1487_v61, %v1330_v58  ;;  %v7342_v8 = vpop.f32.mrf.mxu1 }
 0x1ab   : > { %v1304_v50 = vpop.f32.mrf.mxu0 }
 0x1ac   : > { %v1331_v48 = vadd.f32 %v1304_v50, %v9063_v63  ;;  %v1490_v12 = vpop.f32.mrf.mxu1  ;;  %v2276_v63 = vld [vmem:[%s8525_s20 + $0x7a] sm:$0xff] }
 0x1ad   : > { %v7305_v13 = vpop.f32.mrf.mxu0  ;;  %v2288_v14 = vpack.c.bf16 %v2277_v7, %v2276_v63  ;;  %v2466_v50 = vld [vmem:[%s8525_s20 + $0x9b] sm:$0xff] }
 0x1ae   : > { %v9215_v18 = vadd.f32 %v1490_v12, %v1331_v48  ;;  %v7343_v56 = vpop.f32.mrf.mxu1 }
 0x1af   : > { %v1309_v37 = vpop.f32.mrf.mxu0  ;;  %7523 = vmatmul.mubr.msk.bf16.gmra.mxu0 %vm505_vm1, %v2287_v59  ;;  %v2467_v59 = vld [vmem:[%s8525_s20 + $0xa3] sm:$0xff] }
 0x1b0   : > { %v1332_v60 = vadd.f32 %v1309_v37, %v9076_v11  ;;  %v1495_v19 = vpop.f32.mrf.mxu1  ;;  %7561 = vmatmul.mubr.msk.bf16.gmra.mxu1 %vm505_vm1, %v2473_v54  ;;  %7526 = vmatprep.mubr.msk.bf16.mxu0 %vm8383_vm0, %v8382_v1  ;;  %v2476_v37 = vpack.c.bf16 %v2467_v59, %v2466_v50 }
 0x1b1   : > { %v7308_v23 = vpop.f32.mrf.mxu0  ;;  %7564 = vmatprep.mubr.msk.bf16.mxu1 %vm8383_vm0, %v8382_v1 }
 0x1b2   : > { %v9228_v27 = vadd.f32 %v1495_v19, %v1332_v60  ;;  %v7346_v29 = vpop.f32.mrf.mxu1 }
 0x1b3   : > { %v1312_v11 = vpop.f32.mrf.mxu0 }
 0x1b4   : > { %v1333_v10 = vadd.f32 %v1312_v11, %v9079_v20  ;;  %v1498_v34 = vpop.f32.mrf.mxu1  ;;  %v2278_v20 = vld [vmem:[%s8525_s20 + $0x8a] sm:$0xff] }
 0x1b5   : > { %v7309_v35 = vpop.f32.mrf.mxu0  ;;  %v2289_v32 = vpack.c.bf16 %v2279_v25, %v2278_v20  ;;  %v2822_v11 = vld [vmem:[%s8525_s20 + $0x25] sm:$0xff] }
 0x1b6   : > { %v9231_v36 = vadd.f32 %v1498_v34, %v1333_v10  ;;  %v7347_v16 = vpop.f32.mrf.mxu1 }
 0x1b7   : > { %v1617_v33 = vpop.f32.mrf.mxu0  ;;  %7527 = vmatmul.mubr.msk.bf16.gmra.mxu0 %vm505_vm1, %v2288_v14  ;;  %v2823_v14 = vld [vmem:[%s8525_s20 + $0x2d] sm:$0xff] }
 0x1b8   : > { %v1688_v53 = vadd.f32 %v1617_v33, %v9092_v46  ;;  %v1803_v22 = vpop.f32.mrf.mxu1  ;;  %7565 = vmatmul.mubr.msk.bf16.gmra.mxu1 %vm505_vm1, %v2474_v17  ;;  %7530 = vmatprep.mubr.msk.bf16.mxu0 %vm8383_vm0, %v8382_v1  ;;  %v2840_v33 = vpack.c.bf16 %v2823_v14, %v2822_v11 }
 0x1b9   : > { %v7352_v47 = vpop.f32.mrf.mxu0  ;;  %7568 = vmatprep.mubr.msk.bf16.mxu1 %vm8383_vm0, %v8382_v1 }
 0x1ba   : > { %v9244_v26 = vadd.f32 %v1803_v22, %v1688_v53  ;;  %v7390_v52 = vpop.f32.mrf.mxu1  ;;  %v8197_v22 = vld [vmem:[%s11268_s1 + $0x70] sm:$0xff]   ;;  %v8198_v47 = vld [vmem:[%s11268_s1 + $0x78] sm:$0xff]   ;;  %s6449_s1 = sshll.u32 %s431_s0, 4 }
 0x1bb   : > { %v1620_v46 = vpop.f32.mrf.mxu0  ;;  %v2638_v52 = vld [vmem:[%s8525_s20 + $0x34] sm:$0xff] }
 0x1bc   : > { %v1689_v55 = vadd.f32 %v1620_v46, %v9095_v42  ;;  %v1806_v31 = vpop.f32.mrf.mxu1  ;;  %v2280_v42 = vld [vmem:[%s8525_s20 + $0x9a] sm:$0xff] }
 0x1bd   : > { %v7353_v58 = vpop.f32.mrf.mxu0  ;;  %v2290_v54 = vpack.c.bf16 %v2281_v44, %v2280_v42  ;;  %v2639_v46 = vld [vmem:[%s8525_s20 + $0x3c] sm:$0xff] }
 0x1be   : > { %v9247_v61 = vadd.f32 %v1806_v31, %v1689_v55  ;;  %v7391_v39 = vpop.f32.mrf.mxu1  ;;  %v2824_v55 = vld [vmem:[%s8525_s20 + $0x35] sm:$0xff]  ;;  %v2825_v31 = vld [vmem:[%s8525_s20 + $0x3d] sm:$0xff] }
 0x1bf   : > { %v1625_v51 = vpop.f32.mrf.mxu0  ;;  %7531 = vmatmul.mubr.msk.bf16.gmra.mxu0 %vm505_vm1, %v2289_v32  ;;  %v2655_v39 = vpack.c.bf16 %v2639_v46, %v2638_v52 }
 0x1c0   : > { %v1690_v6 = vadd.f32 %v1625_v51, %v9108_v62  ;;  %v1811_v45 = vpop.f32.mrf.mxu1  ;;  %7569 = vmatmul.mubr.msk.bf16.gmra.mxu1 %vm505_vm1, %v2475_v38  ;;  %7534 = vmatprep.mubr.msk.bf16.mxu0 %vm8383_vm0, %v8382_v1 }
 0x1c1   : > { %v7356_v8 = vpop.f32.mrf.mxu0  ;;  %7572 = vmatprep.mubr.msk.bf16.mxu1 %vm8383_vm0, %v8382_v1 }
 0x1c2   : > { %v9260_v48 = vadd.f32 %v1811_v45, %v1690_v6  ;;  %v7394_v12 = vpop.f32.mrf.mxu1  ;;  %v2841_v45 = vpack.c.bf16 %v2825_v31, %v2824_v55  ;;  %v2645_v31 = vld [vmem:[%s8525_s20 + $0x6c] sm:$0xff] }
 0x1c3   : > { %v1628_v62 = vpop.f32.mrf.mxu0 }
 0x1c4   : > { %v1691_v13 = vadd.f32 %v1628_v62, %v9111_v3  ;;  %v1814_v56 = vpop.f32.mrf.mxu1  ;;  %v2636_v3 = vld [vmem:[%s8525_s20 + $0x24] sm:$0xff]  ;;  %v2641_v62 = vld [vmem:[%s8525_s20 + $0x4c] sm:$0xff] }
 0x1c5   : > { %v7357_v60 = vpop.f32.mrf.mxu0 }
 0x1c6   : > { %v9263_v19 = vadd.f32 %v1814_v56, %v1691_v13  ;;  %v7395_v63 = vpop.f32.mrf.mxu1  ;;  %v2826_v13 = vld [vmem:[%s8525_s20 + $0x45] sm:$0xff]  ;;  %v2827_v56 = vld [vmem:[%s8525_s20 + $0x4d] sm:$0xff] }
 0x1c7   : > { %v1633_v7 = vpop.f32.mrf.mxu0  ;;  %7535 = vmatmul.mubr.msk.bf16.gmra.mxu0 %vm505_vm1, %v2290_v54 }
 0x1c8   : > { %v1692_v23 = vadd.f32 %v1633_v7, %v9124_v15  ;;  %v1819_v5 = vpop.f32.mrf.mxu1  ;;  %7573 = vmatmul.mubr.msk.bf16.gmra.mxu1 %vm505_vm1, %v2476_v37  ;;  %7578 = vmatprep.mubr.msk.bf16.mxu0 %vm8383_vm0, %v8382_v1  ;;  %v2654_v15 = vpack.c.bf16 %v2637_v24, %v2636_v3 }
 0x1c9   : > { %v7360_v29 = vpop.f32.mrf.mxu0  ;;  %7616 = vmatprep.mubr.msk.bf16.mxu1 %vm8383_vm0, %v8382_v1 }
 0x1ca   : > { %v9276_v10 = vadd.f32 %v1819_v5, %v1692_v23  ;;  %v7398_v34 = vpop.f32.mrf.mxu1  ;;  %v2842_v5 = vpack.c.bf16 %v2827_v56, %v2826_v13  ;;  %v2647_v56 = vld [vmem:[%s8525_s20 + $0x7c] sm:$0xff] }
 0x1cb   : > { %v1636_v17 = vpop.f32.mrf.mxu0 }
 0x1cc   : > { %v1693_v35 = vadd.f32 %v1636_v17, %v9130_v2  ;;  %v1822_v16 = vpop.f32.mrf.mxu1  ;;  %v2643_v17 = vld [vmem:[%s8525_s20 + $0x5c] sm:$0xff] }
 0x1cd   : > { %v7361_v53 = vpop.f32.mrf.mxu0 }
 0x1ce   : > { %v9282_v20 = vadd.f32 %v1822_v16, %v1693_v35  ;;  %v7399_v25 = vpop.f32.mrf.mxu1  ;;  %v2828_v35 = vld [vmem:[%s8525_s20 + $0x55] sm:$0xff]  ;;  %v2829_v16 = vld [vmem:[%s8525_s20 + $0x5d] sm:$0xff] }
 0x1cf   : > { %v1641_v28 = vpop.f32.mrf.mxu0  ;;  %7579 = vmatmul.mubr.msk.bf16.vlgmr.msra.gmra.mxu0 %vm505_vm1, %v2654_v15 }
 0x1d0   : > { %v1694_v2 = vadd.f32 %v1641_v28, %v9146_v40  ;;  %v1827_v41 = vpop.f32.mrf.mxu1  ;;  %7617 = vmatmul.mubr.msk.bf16.vlgmr.msra.gmra.mxu1 %vm505_vm1, %v2840_v33  ;;  %7582 = vmatprep.mubr.msk.bf16.mxu0 %vm8383_vm0, %v8382_v1  ;;  %v2843_v28 = vpack.c.bf16 %v2829_v16, %v2828_v35  ;;  %v2649_v16 = vld [vmem:[%s8525_s20 + $0x8c] sm:$0xff] }
 0x1d1   : > { %v7364_v32 = vpop.f32.mrf.mxu0  ;;  %7620 = vmatprep.mubr.msk.bf16.mxu1 %vm8383_vm0, %v8382_v1  ;;  %7653 = vmatpush3.bf16.msra.mxu0 %v8197_v22 }
 0x1d2   : > { %v9298_v38 = vadd.f32 %v1827_v41, %v1694_v2  ;;  %v7402_v58 = vpop.f32.mrf.mxu1  ;;  %7691 = vmatpush3.bf16.msra.mxu1 %v8198_v47  ;;  %7728 = vmatprep.subr.bf16.mxu0 %v8382_v1 }
 0x1d3   : > { %v1644_v40 = vpop.f32.mrf.mxu0  ;;  %7768 = vmatprep.subr.bf16.mxu1 %v8382_v1 }
 0x1d4   : > { %v1695_v51 = vadd.f32 %v1644_v40, %v9151_v49  ;;  %v1830_v6 = vpop.f32.mrf.mxu1  ;;  %v2640_v49 = vld [vmem:[%s8525_s20 + $0x44] sm:$0xff] }
 0x1d5   : > { %v7365_v42 = vpop.f32.mrf.mxu0  ;;  %v2656_v63 = vpack.c.bf16 %v2641_v62, %v2640_v49  ;;  %v2830_v40 = vld [vmem:[%s8525_s20 + $0x65] sm:$0xff] }
 0x1d6   : > { %v9303_v44 = vadd.f32 %v1830_v6, %v1695_v51  ;;  %v7403_v8 = vpop.f32.mrf.mxu1 }
 0x1d7   : > { %v1649_v50 = vpop.f32.mrf.mxu0  ;;  %7583 = vmatmul.mubr.msk.bf16.gmra.mxu0 %vm505_vm1, %v2655_v39  ;;  %v2831_v39 = vld [vmem:[%s8525_s20 + $0x6d] sm:$0xff] }
 0x1d8   : > { %v1696_v59 = vadd.f32 %v1649_v50, %v9164_v0  ;;  %v1835_v12 = vpop.f32.mrf.mxu1  ;;  %7621 = vmatmul.mubr.msk.bf16.gmra.mxu1 %vm505_vm1, %v2841_v45  ;;  %7586 = vmatprep.mubr.msk.bf16.mxu0 %vm8383_vm0, %v8382_v1  ;;  %v2844_v50 = vpack.c.bf16 %v2831_v39, %v2830_v40  ;;  %v2651_v39 = vld [vmem:[%s8525_s20 + $0x9c] sm:$0xff] }
 0x1d9   : > { %v7368_v54 = vpop.f32.mrf.mxu0  ;;  %7624 = vmatprep.mubr.msk.bf16.mxu1 %vm8383_vm0, %v8382_v1 }
 0x1da   : > { %v9316_v37 = vadd.f32 %v1835_v12, %v1696_v59  ;;  %v7406_v60 = vpop.f32.mrf.mxu1 }
 0x1db   : > { %v1652_v0 = vpop.f32.mrf.mxu0 }
 0x1dc   : > { %v1697_v7 = vadd.f32 %v1652_v0, %v9167_v9  ;;  %v1838_v23 = vpop.f32.mrf.mxu1  ;;  %v2642_v9 = vld [vmem:[%s8525_s20 + $0x54] sm:$0xff] }
 0x1dd   : > { %v7369_v3 = vpop.f32.mrf.mxu0  ;;  %v2657_v22 = vpack.c.bf16 %v2643_v17, %v2642_v9  ;;  %v2832_v0 = vld [vmem:[%s8525_s20 + $0x75] sm:$0xff] }
 0x1de   : > { %v9319_v24 = vadd.f32 %v1838_v23, %v1697_v7  ;;  %v7407_v29 = vpop.f32.mrf.mxu1 }
 0x1df   : > { %v1657_v11 = vpop.f32.mrf.mxu0  ;;  %7587 = vmatmul.mubr.msk.bf16.gmra.mxu0 %vm505_vm1, %v2656_v63  ;;  %v2833_v63 = vld [vmem:[%s8525_s20 + $0x7d] sm:$0xff] }
 0x1e0   : > { %v1698_v14 = vadd.f32 %v1657_v11, %v9180_v21  ;;  %v1843_v34 = vpop.f32.mrf.mxu1  ;;  %7625 = vmatmul.mubr.msk.bf16.gmra.mxu1 %vm505_vm1, %v2842_v5  ;;  %7590 = vmatprep.mubr.msk.bf16.mxu0 %vm8383_vm0, %v8382_v1  ;;  %v2845_v11 = vpack.c.bf16 %v2833_v63, %v2832_v0  ;;  %v2653_v63 = vld [vmem:[%s8525_s20 + $0xac] sm:$0xff] }
 0x1e1   : > { %v7372_v15 = vpop.f32.mrf.mxu0  ;;  %7628 = vmatprep.mubr.msk.bf16.mxu1 %vm8383_vm0, %v8382_v1 }
 0x1e2   : > { %v9332_v33 = vadd.f32 %v1843_v34, %v1698_v14  ;;  %v7410_v53 = vpop.f32.mrf.mxu1 }
 0x1e3   : > { %v1660_v21 = vpop.f32.mrf.mxu0 }
 0x1e4   : > { %v1699_v25 = vadd.f32 %v1660_v21, %v9183_v30  ;;  %v1846_v47 = vpop.f32.mrf.mxu1  ;;  %v2644_v30 = vld [vmem:[%s8525_s20 + $0x64] sm:$0xff] }
 0x1e5   : > { %v7373_v2 = vpop.f32.mrf.mxu0  ;;  %v2658_v45 = vpack.c.bf16 %v2645_v31, %v2644_v30  ;;  %v2834_v21 = vld [vmem:[%s8525_s20 + $0x85] sm:$0xff] }
 0x1e6   : > { %v9335_v41 = vadd.f32 %v1846_v47, %v1699_v25  ;;  %v7411_v52 = vpop.f32.mrf.mxu1 }
 0x1e7   : > { %v1665_v46 = vpop.f32.mrf.mxu0  ;;  %7591 = vmatmul.mubr.msk.bf16.gmra.mxu0 %vm505_vm1, %v2657_v22  ;;  %v2835_v22 = vld [vmem:[%s8525_s20 + $0x8d] sm:$0xff] }
 0x1e8   : > { %v1700_v32 = vadd.f32 %v1665_v46, %v9196_v43  ;;  %v1851_v55 = vpop.f32.mrf.mxu1  ;;  %7629 = vmatmul.mubr.msk.bf16.gmra.mxu1 %vm505_vm1, %v2843_v28  ;;  %7594 = vmatprep.mubr.msk.bf16.mxu0 %vm8383_vm0, %v8382_v1  ;;  %v2846_v46 = vpack.c.bf16 %v2835_v22, %v2834_v21  ;;  %v3009_v22 = vld [vmem:[%s8525_s20 + $0x2e] sm:$0xff] }
 0x1e9   : > { %v7376_v58 = vpop.f32.mrf.mxu0  ;;  %7632 = vmatprep.mubr.msk.bf16.mxu1 %vm8383_vm0, %v8382_v1 }
 0x1ea   : > { %v9348_v51 = vadd.f32 %v1851_v55, %v1700_v32  ;;  %v7414_v6 = vpop.f32.mrf.mxu1 }
 0x1eb   : > { %v1668_v43 = vpop.f32.mrf.mxu0 }
 0x1ec   : > { %v1701_v42 = vadd.f32 %v1668_v43, %v9199_v57  ;;  %v1854_v8 = vpop.f32.mrf.mxu1  ;;  %v2646_v57 = vld [vmem:[%s8525_s20 + $0x74] sm:$0xff] }
 0x1ed   : > { %v7377_v59 = vpop.f32.mrf.mxu0  ;;  %v2659_v5 = vpack.c.bf16 %v2647_v56, %v2646_v57  ;;  %v2836_v43 = vld [vmem:[%s8525_s20 + $0x95] sm:$0xff] }
 0x1ee   : > { %v9351_v12 = vadd.f32 %v1854_v8, %v1701_v42  ;;  %v7415_v49 = vpop.f32.mrf.mxu1 }
 0x1ef   : > { %v1673_v62 = vpop.f32.mrf.mxu0  ;;  %7595 = vmatmul.mubr.msk.bf16.gmra.mxu0 %vm505_vm1, %v2658_v45  ;;  %v2837_v45 = vld [vmem:[%s8525_s20 + $0x9d] sm:$0xff] }
 0x1f0   : > { %v1702_v54 = vadd.f32 %v1673_v62, %v9212_v4  ;;  %v1859_v13 = vpop.f32.mrf.mxu1  ;;  %7633 = vmatmul.mubr.msk.bf16.gmra.mxu1 %vm505_vm1, %v2844_v50  ;;  %7598 = vmatprep.mubr.msk.bf16.mxu0 %vm8383_vm0, %v8382_v1  ;;  %v2847_v62 = vpack.c.bf16 %v2837_v45, %v2836_v43  ;;  %v3011_v45 = vld [vmem:[%s8525_s20 + $0x3e] sm:$0xff] }
 0x1f1   : > { %v7380_v60 = vpop.f32.mrf.mxu0  ;;  %7636 = vmatprep.mubr.msk.bf16.mxu1 %vm8383_vm0, %v8382_v1 }
 0x1f2   : > { %v9364_v7 = vadd.f32 %v1859_v13, %v1702_v54  ;;  %v7418_v23 = vpop.f32.mrf.mxu1 }
 0x1f3   : > { %v1676_v4 = vpop.f32.mrf.mxu0 }
 0x1f4   : > { %v1703_v3 = vadd.f32 %v1676_v4, %v9215_v18  ;;  %v1862_v29 = vpop.f32.mrf.mxu1  ;;  %v2648_v18 = vld [vmem:[%s8525_s20 + $0x84] sm:$0xff] }
 0x1f5   : > { %v7381_v14 = vpop.f32.mrf.mxu0  ;;  %v2660_v28 = vpack.c.bf16 %v2649_v16, %v2648_v18  ;;  %v2838_v4 = vld [vmem:[%s8525_s20 + $0xa5] sm:$0xff] }
 0x1f6   : > { %v9367_v34 = vadd.f32 %v1862_v29, %v1703_v3  ;;  %v7419_v9 = vpop.f32.mrf.mxu1 }
 0x1f7   : > { %v1681_v17 = vpop.f32.mrf.mxu0  ;;  %7599 = vmatmul.mubr.msk.bf16.gmra.mxu0 %vm505_vm1, %v2659_v5  ;;  %v2839_v5 = vld [vmem:[%s8525_s20 + $0xad] sm:$0xff] }
 0x1f8   : > { %v1704_v15 = vadd.f32 %v1681_v17, %v9228_v27  ;;  %v1867_v35 = vpop.f32.mrf.mxu1  ;;  %7637 = vmatmul.mubr.msk.bf16.gmra.mxu1 %vm505_vm1, %v2845_v11  ;;  %7602 = vmatprep.mubr.msk.bf16.mxu0 %vm8383_vm0, %v8382_v1  ;;  %v2848_v17 = vpack.c.bf16 %v2839_v5, %v2838_v4  ;;  %v3013_v5 = vld [vmem:[%s8525_s20 + $0x4e] sm:$0xff] }
 0x1f9   : > { %v7384_v53 = vpop.f32.mrf.mxu0  ;;  %7640 = vmatprep.mubr.msk.bf16.mxu1 %vm8383_vm0, %v8382_v1 }
 0x1fa   : > { %v9380_v25 = vadd.f32 %v1867_v35, %v1704_v15  ;;  %v7422_v47 = vpop.f32.mrf.mxu1 }
 0x1fb   : > { %v1684_v27 = vpop.f32.mrf.mxu0 }
 0x1fc   : > { %v1705_v2 = vadd.f32 %v1684_v27, %v9231_v36  ;;  %v1870_v52 = vpop.f32.mrf.mxu1  ;;  %v2650_v36 = vld [vmem:[%s8525_s20 + $0x94] sm:$0xff]  ;;  %v3194_v27 = vld [vmem:[%s8525_s20 + $0x27] sm:$0xff] }
 0x1fd   : > { %v7385_v32 = vpop.f32.mrf.mxu0  ;;  %v2661_v50 = vpack.c.bf16 %v2651_v39, %v2650_v36 }
 0x1fe   : > { %v9383_v55 = vadd.f32 %v1870_v52, %v1705_v2  ;;  %v7423_v30 = vpop.f32.mrf.mxu1 }
 0x1ff   : > { %v1989_v31 = vpop.f32.mrf.mxu0  ;;  %7603 = vmatmul.mubr.msk.bf16.gmra.mxu0 %vm505_vm1, %v2660_v28  ;;  %v3195_v28 = vld [vmem:[%s8525_s20 + $0x2f] sm:$0xff] }
 0x200   : > { %v2060_v58 = vadd.f32 %v1989_v31, %v9244_v26  ;;  %v2175_v40 = vpop.f32.mrf.mxu1  ;;  %7641 = vmatmul.mubr.msk.bf16.gmra.mxu1 %vm505_vm1, %v2846_v46  ;;  %7606 = vmatprep.mubr.msk.bf16.mxu0 %vm8383_vm0, %v8382_v1  ;;  %v3212_v31 = vpack.c.bf16 %v3195_v28, %v3194_v27  ;;  %v3015_v28 = vld [vmem:[%s8525_s20 + $0x5e] sm:$0xff] }
 0x201   : > { %v7428_v6 = vpop.f32.mrf.mxu0  ;;  %7644 = vmatprep.mubr.msk.bf16.mxu1 %vm8383_vm0, %v8382_v1 }
 0x202   : > { %v9396_v42 = vadd.f32 %v2175_v40, %v2060_v58  ;;  %v7466_v8 = vpop.f32.mrf.mxu1 }
 0x203   : > { %v1992_v26 = vpop.f32.mrf.mxu0 }
 0x204   : > { %v2061_v59 = vadd.f32 %v1992_v26, %v9247_v61  ;;  %v2178_v49 = vpop.f32.mrf.mxu1  ;;  %v2652_v61 = vld [vmem:[%s8525_s20 + $0xa4] sm:$0xff]  ;;  %v3196_v26 = vld [vmem:[%s8525_s20 + $0x37] sm:$0xff] }
 0x205   : > { %v7429_v54 = vpop.f32.mrf.mxu0  ;;  %v2662_v11 = vpack.c.bf16 %v2653_v63, %v2652_v61 }
 0x206   : > { %v9399_v13 = vadd.f32 %v2178_v49, %v2061_v59  ;;  %v7467_v57 = vpop.f32.mrf.mxu1 }
 0x207   : > { %v1997_v56 = vpop.f32.mrf.mxu0  ;;  %7607 = vmatmul.mubr.msk.bf16.gmra.mxu0 %vm505_vm1, %v2661_v50  ;;  %v3197_v50 = vld [vmem:[%s8525_s20 + $0x3f] sm:$0xff] }
 0x208   : > { %v2062_v60 = vadd.f32 %v1997_v56, %v9260_v48  ;;  %v2183_v0 = vpop.f32.mrf.mxu1  ;;  %7645 = vmatmul.mubr.msk.bf16.gmra.mxu1 %vm505_vm1, %v2847_v62  ;;  %7610 = vmatprep.mubr.msk.bf16.mxu0 %vm8383_vm0, %v8382_v1  ;;  %v3213_v56 = vpack.c.bf16 %v3197_v50, %v3196_v26  ;;  %v3017_v50 = vld [vmem:[%s8525_s20 + $0x6e] sm:$0xff] }
 0x209   : > { %v7432_v23 = vpop.f32.mrf.mxu0  ;;  %7648 = vmatprep.mubr.msk.bf16.mxu1 %vm8383_vm0, %v8382_v1 }
 0x20a   : > { %v9412_v3 = vadd.f32 %v2183_v0, %v2062_v60  ;;  %v7470_v29 = vpop.f32.mrf.mxu1 }
 0x20b   : > { %v2000_v48 = vpop.f32.mrf.mxu0 }
 0x20c   : > { %v2063_v14 = vadd.f32 %v2000_v48, %v9263_v19  ;;  %v2186_v9 = vpop.f32.mrf.mxu1  ;;  %v3008_v19 = vld [vmem:[%s8525_s20 + $0x26] sm:$0xff] }
 0x20d   : > { %v7433_v15 = vpop.f32.mrf.mxu0  ;;  %v3026_v46 = vpack.c.bf16 %v3009_v22, %v3008_v19  ;;  %v3198_v48 = vld [vmem:[%s8525_s20 + $0x47] sm:$0xff] }
 0x20e   : > { %v9415_v35 = vadd.f32 %v2186_v9, %v2063_v14  ;;  %v7471_v18 = vpop.f32.mrf.mxu1 }
 0x20f   : > { %v2005_v16 = vpop.f32.mrf.mxu0  ;;  %7611 = vmatmul.mubr.msk.bf16.gmra.mxu0 %vm505_vm1, %v2662_v11  ;;  %v3199_v11 = vld [vmem:[%s8525_s20 + $0x4f] sm:$0xff] }
 0x210   : > { %v2064_v53 = vadd.f32 %v2005_v16, %v9276_v10  ;;  %v2191_v21 = vpop.f32.mrf.mxu1  ;;  %7649 = vmatmul.mubr.msk.bf16.gmra.mxu1 %vm505_vm1, %v2848_v17  ;;  %7654 = vmatprep.mubr.msk.bf16.mxu0 %vm8383_vm0, %v8382_v1  ;;  %v3214_v16 = vpack.c.bf16 %v3199_v11, %v3198_v48  ;;  %v11261_v48 = vmov 0  }
 0x211   : > { %v7436_v47 = vpop.f32.mrf.mxu0  ;;  %7692 = vmatprep.mubr.msk.bf16.mxu1 %vm8383_vm0, %v8382_v1  ;;  %8182 = vset.pattern.permute.xlu1 %v11261_v48 }
 0x212   : > { %v9428_v2 = vadd.f32 %v2191_v21, %v2064_v53  ;;  %v7474_v52 = vpop.f32.mrf.mxu1  ;;  %8181 = vset.pattern.permute.xlu0 %v11261_v48 }
 0x213   : > { %v2008_v10 = vpop.f32.mrf.mxu0 }
 0x214   : > { %v2065_v32 = vadd.f32 %v2008_v10, %v9282_v20  ;;  %v2194_v30 = vpop.f32.mrf.mxu1  ;;  %v3010_v20 = vld [vmem:[%s8525_s20 + $0x36] sm:$0xff] }
 0x215   : > { %v7437_v58 = vpop.f32.mrf.mxu0  ;;  %v3027_v62 = vpack.c.bf16 %v3011_v45, %v3010_v20  ;;  %v3200_v10 = vld [vmem:[%s8525_s20 + $0x57] sm:$0xff] }
 0x216   : > { %v9431_v40 = vadd.f32 %v2194_v30, %v2065_v32  ;;  %v7475_v36 = vpop.f32.mrf.mxu1 }
 0x217   : > { %v2013_v39 = vpop.f32.mrf.mxu0  ;;  %7655 = vmatmul.mubr.msk.bf16.vlgmr.msra.gmra.mxu0 %vm505_vm1, %v3026_v46  ;;  %v3201_v46 = vld [vmem:[%s8525_s20 + $0x5f] sm:$0xff] }
 0x218   : > { %v2066_v6 = vadd.f32 %v2013_v39, %v9298_v38  ;;  %v2199_v43 = vpop.f32.mrf.mxu1  ;;  %7693 = vmatmul.mubr.msk.bf16.vlgmr.msra.gmra.mxu1 %vm505_vm1, %v3212_v31  ;;  %7658 = vmatprep.mubr.msk.bf16.mxu0 %vm8383_vm0, %v8382_v1  ;;  %v3215_v39 = vpack.c.bf16 %v3201_v46, %v3200_v10 }
 0x219   : > { %v7440_v8 = vpop.f32.mrf.mxu0  ;;  %7696 = vmatprep.mubr.msk.bf16.mxu1 %vm8383_vm0, %v8382_v1 }
 0x21a   : > { %v9444_v59 = vadd.f32 %v2199_v43, %v2066_v6  ;;  %v7478_v49 = vpop.f32.mrf.mxu1 }
 0x21b   : > { %v2016_v38 = vpop.f32.mrf.mxu0 }
 0x21c   : > { %v2067_v54 = vadd.f32 %v2016_v38, %v9303_v44  ;;  %v2202_v57 = vpop.f32.mrf.mxu1  ;;  %v3012_v44 = vld [vmem:[%s8525_s20 + $0x46] sm:$0xff] }
 0x21d   : > { %v7441_v60 = vpop.f32.mrf.mxu0  ;;  %v3028_v17 = vpack.c.bf16 %v3013_v5, %v3012_v44  ;;  %v3202_v38 = vld [vmem:[%s8525_s20 + $0x67] sm:$0xff] }
 0x21e   : > { %v9447_v0 = vadd.f32 %v2202_v57, %v2067_v54  ;;  %v7479_v61 = vpop.f32.mrf.mxu1  ;;  %v3710_v5 = vld [vmem:[%s11258_s11 + $0x8] sm:$0xff] }
 0x21f   : > { %v2021_v63 = vpop.f32.mrf.mxu0  ;;  %7659 = vmatmul.mubr.msk.bf16.gmra.mxu0 %vm505_vm1, %v3027_v62  ;;  %v3203_v62 = vld [vmem:[%s8525_s20 + $0x6f] sm:$0xff]  ;;  %3734 = vperm.xlu1 %8182, %v3710_v5   ;;  %v3208_v5 = vld [vmem:[%s8525_s20 + $0x97] sm:$0xff] }
 0x220   : > { %v2068_v23 = vadd.f32 %v2021_v63, %v9316_v37  ;;  %v2207_v4 = vpop.f32.mrf.mxu1  ;;  %7697 = vmatmul.mubr.msk.bf16.gmra.mxu1 %vm505_vm1, %v3213_v56  ;;  %7662 = vmatprep.mubr.msk.bf16.mxu0 %vm8383_vm0, %v8382_v1  ;;  %v3216_v63 = vpack.c.bf16 %v3203_v62, %v3202_v38 }
 0x221   : > { %v7444_v29 = vpop.f32.mrf.mxu0  ;;  %7700 = vmatprep.mubr.msk.bf16.mxu1 %vm8383_vm0, %v8382_v1 }
 0x222   : > { %v9460_v14 = vadd.f32 %v2207_v4, %v2068_v23  ;;  %v7482_v9 = vpop.f32.mrf.mxu1 }
 0x223   : > { %v2024_v37 = vpop.f32.mrf.mxu0  ;;  %v3018_v9 = vld [vmem:[%s8525_s20 + $0x76] sm:$0xff] }
 0x224   : > { %v2069_v15 = vadd.f32 %v2024_v37, %v9319_v24  ;;  %v2210_v18 = vpop.f32.mrf.mxu1  ;;  %v3014_v24 = vld [vmem:[%s8525_s20 + $0x56] sm:$0xff]  ;;  %v3019_v37 = vld [vmem:[%s8525_s20 + $0x7e] sm:$0xff] }
 0x225   : > { %v7445_v53 = vpop.f32.mrf.mxu0  ;;  %v3029_v31 = vpack.c.bf16 %v3015_v28, %v3014_v24  ;;  %v3709_v28 = vld [vmem:[%s11258_s11] sm:$0xff] }
 0x226   : > { %v9463_v21 = vadd.f32 %v2210_v18, %v2069_v15  ;;  %v7483_v19 = vpop.f32.mrf.mxu1  ;;  %v3204_v15 = vld [vmem:[%s8525_s20 + $0x77] sm:$0xff]  ;;  %v3205_v18 = vld [vmem:[%s8525_s20 + $0x7f] sm:$0xff]  ;;  %3729 = vperm.xlu0 %8181, %v3709_v28   ;;  %v3210_v28 = vld [vmem:[%s8525_s20 + $0xa7] sm:$0xff] }
 0x227   : > { %v2029_v22 = vpop.f32.mrf.mxu0  ;;  %7663 = vmatmul.mubr.msk.bf16.gmra.mxu0 %vm505_vm1, %v3028_v17  ;;  %v3217_v24 = vpack.c.bf16 %v3205_v18, %v3204_v15 }
 0x228   : > { %v2070_v47 = vadd.f32 %v2029_v22, %v9332_v33  ;;  %v2215_v27 = vpop.f32.mrf.mxu1  ;;  %7701 = vmatmul.mubr.msk.bf16.gmra.mxu1 %vm505_vm1, %v3214_v16  ;;  %7666 = vmatprep.mubr.msk.bf16.mxu0 %vm8383_vm0, %v8382_v1  ;;  %v3031_v22 = vpack.c.bf16 %v3019_v37, %v3018_v9 }
 0x229   : > { %v7448_v52 = vpop.f32.mrf.mxu0  ;;  %7704 = vmatprep.mubr.msk.bf16.mxu1 %vm8383_vm0, %v8382_v1 }
 0x22a   : > { %v9476_v32 = vadd.f32 %v2215_v27, %v2070_v47  ;;  %v7486_v30 = vpop.f32.mrf.mxu1 }
 0x22b   : > { %v2032_v33 = vpop.f32.mrf.mxu0 }
 0x22c   : > { %v2071_v58 = vadd.f32 %v2032_v33, %v9335_v41  ;;  %v2218_v36 = vpop.f32.mrf.mxu1  ;;  %v3016_v41 = vld [vmem:[%s8525_s20 + $0x66] sm:$0xff] }
 0x22d   : > { %v7449_v6 = vpop.f32.mrf.mxu0  ;;  %v3030_v60 = vpack.c.bf16 %v3017_v50, %v3016_v41 }
 0x22e   : > { %v9479_v43 = vadd.f32 %v2218_v36, %v2071_v58  ;;  %v7487_v20 = vpop.f32.mrf.mxu1  ;;  %v3020_v58 = vld [vmem:[%s8525_s20 + $0x86] sm:$0xff]  ;;  %v3021_v36 = vld [vmem:[%s8525_s20 + $0x8e] sm:$0xff] }
 0x22f   : > { %v2037_v45 = vpop.f32.mrf.mxu0  ;;  %7667 = vmatmul.mubr.msk.bf16.gmra.mxu0 %vm505_vm1, %v3029_v31  ;;  %v3206_v20 = vld [vmem:[%s8525_s20 + $0x87] sm:$0xff]  ;;  %v3032_v50 = vpack.c.bf16 %v3021_v36, %v3020_v58 }
 0x230   : > { %v2072_v8 = vadd.f32 %v2037_v45, %v9348_v51  ;;  %v2223_v26 = vpop.f32.mrf.mxu1  ;;  %7705 = vmatmul.mubr.msk.bf16.gmra.mxu1 %vm505_vm1, %v3215_v39  ;;  %7670 = vmatprep.mubr.msk.bf16.mxu0 %vm8383_vm0, %v8382_v1  ;;  %v3713_v39 = vld [vmem:[%s11258_s11 + $0x20] sm:$0xff]  ;;  %v3207_v45 = vld [vmem:[%s8525_s20 + $0x8f] sm:$0xff] }
 0x231   : > { %v7452_v49 = vpop.f32.mrf.mxu0  ;;  %7708 = vmatprep.mubr.msk.bf16.mxu1 %vm8383_vm0, %v8382_v1  ;;  %3749 = vperm.xlu0 %8181, %v3713_v39   ;;  %v3218_v62 = vpack.c.bf16 %v3207_v45, %v3206_v20 }
 0x232   : > { %v9492_v54 = vadd.f32 %v2223_v26, %v2072_v8  ;;  %v7490_v57 = vpop.f32.mrf.mxu1  ;;  %v3714_v26 = vld [vmem:[%s11258_s11 + $0x28] sm:$0xff] }
 0x233   : > { %v2040_v56 = vpop.f32.mrf.mxu0 }
 0x234   : > { %v2073_v51 = vadd.f32 %v2040_v56, %v9351_v12  ;;  %v2226_v61 = vpop.f32.mrf.mxu1 }
 0x235   : > { %v7453_v23 = vpop.f32.mrf.mxu0 }
 0x236   : > { %v9495_v4 = vadd.f32 %v2226_v61, %v2073_v51  ;;  %v7491_v44 = vpop.f32.mrf.mxu1  ;;  %v3023_v23 = vld [vmem:[%s8525_s20 + $0x9e] sm:$0xff] }
 0x237   : > { %v2045_v29 = vpop.f32.mrf.mxu0  ;;  %7671 = vmatmul.mubr.msk.bf16.gmra.mxu0 %vm505_vm1, %v3030_v60 }
 0x238   : > { %v2074_v12 = vadd.f32 %v2045_v29, %v9364_v7  ;;  %v2231_v11 = vpop.f32.mrf.mxu1  ;;  %7709 = vmatmul.mubr.msk.bf16.gmra.mxu1 %vm505_vm1, %v3216_v63  ;;  %7674 = vmatprep.mubr.msk.bf16.mxu0 %vm8383_vm0, %v8382_v1  ;;  %v3711_v7 = vld [vmem:[%s11258_s11 + $0x10] sm:$0xff]  ;;  %v3209_v29 = vld [vmem:[%s8525_s20 + $0x9f] sm:$0xff] }
 0x239   : > { %v7456_v17 = vpop.f32.mrf.mxu0  ;;  %7712 = vmatprep.mubr.msk.bf16.mxu1 %vm8383_vm0, %v8382_v1  ;;  %3739 = vperm.xlu1 %8182, %v3711_v7   ;;  %v3219_v15 = vpack.c.bf16 %v3209_v29, %v3208_v5 }
 0x23a   : > { %v9512_v16 = vadd.f32 %v2231_v11, %v2074_v12  ;;  %v7494_v53 = vpop.f32.mrf.mxu1 }
 0x23b   : > { %v2048_v19 = vpop.f32.mrf.mxu0 }
 0x23c   : > { %v2075_v47 = vadd.f32 %v2048_v19, %v9367_v34  ;;  %v2234_v27 = vpop.f32.mrf.mxu1  ;;  %v3712_v34 = vld [vmem:[%s11258_s11 + $0x18] sm:$0xff] }
 0x23d   : > { %v7457_v52 = vpop.f32.mrf.mxu0  ;;  %3744 = vperm.xlu1 %8182, %v3712_v34  }
 0x23e   : > { %v9522_v10 = vadd.f32 %v2234_v27, %v2075_v47  ;;  %v7495_v46 = vpop.f32.mrf.mxu1  ;;  %v3025_v27 = vld [vmem:[%s8525_s20 + $0xae] sm:$0xff] }
 0x23f   : > { %v2053_v30 = vpop.f32.mrf.mxu0  ;;  %7675 = vmatmul.mubr.msk.bf16.gmra.mxu0 %vm505_vm1, %v3031_v22  ;;  %v3211_v52 = vld [vmem:[%s8525_s20 + $0xaf] sm:$0xff] }
 0x240   : > { %v2076_v33 = vadd.f32 %v2053_v30, %v9380_v25  ;;  %v2239_v31 = vpop.f32.mrf.mxu1  ;;  %7713 = vmatmul.mubr.msk.bf16.gmra.mxu1 %vm505_vm1, %v3217_v24  ;;  %7678 = vmatprep.mubr.msk.bf16.mxu0 %vm8383_vm0, %v8382_v1  ;;  %v3220_v58 = vpack.c.bf16 %v3211_v52, %v3210_v28 }
 0x241   : > { %v7460_v6 = vpop.f32.mrf.mxu0  ;;  %7716 = vmatprep.mubr.msk.bf16.mxu1 %vm8383_vm0, %v8382_v1  ;;  %3754 = vperm.xlu1 %8182, %v3714_v26  }
 0x242   : > { %v9541_v25 = vadd.f32 %v2239_v31, %v2076_v33  ;;  %v7498_v8 = vpop.f32.mrf.mxu1 }
 0x243   : > { %v2056_v41 = vpop.f32.mrf.mxu0 }
 0x244   : > { %v2077_v49 = vadd.f32 %v2056_v41, %v9383_v55  ;;  %v2242_v38 = vpop.f32.mrf.mxu1  ;;  %v3022_v55 = vld [vmem:[%s8525_s20 + $0x96] sm:$0xff] }
 0x245   : > { %v7461_v57 = vpop.f32.mrf.mxu0  ;;  %v3033_v9 = vpack.c.bf16 %v3023_v23, %v3022_v55 }
 0x246   : > { %v9547_v56 = vadd.f32 %v2242_v38, %v2077_v49  ;;  %v7499_v60 = vpop.f32.mrf.mxu1 }
 0x247   : > { %v2361_v51 = vpop.f32.mrf.mxu0  ;;  %7679 = vmatmul.mubr.msk.bf16.gmra.mxu0 %vm505_vm1, %v3032_v50 }
 0x248   : > { %v2432_v61 = vadd.f32 %v2361_v51, %v9396_v42  ;;  %v2547_v63 = vpop.f32.mrf.mxu1  ;;  %7717 = vmatmul.mubr.msk.bf16.gmra.mxu1 %vm505_vm1, %v3218_v62  ;;  %7682 = vmatprep.mubr.msk.bf16.mxu0 %vm8383_vm0, %v8382_v1 }
 0x249   : > { %v7504_v44 = vpop.f32.mrf.mxu0  ;;  %7720 = vmatprep.mubr.msk.bf16.mxu1 %vm8383_vm0, %v8382_v1 }
 0x24a   : > { %v9560_v12 = vadd.f32 %v2547_v63, %v2432_v61  ;;  %v7542_v11 = vpop.f32.mrf.mxu1 }
 0x24b   : > { %v2364_v42 = vpop.f32.mrf.mxu0 }
 0x24c   : > { %v2433_v37 = vadd.f32 %v2364_v42, %v9399_v13  ;;  %v2550_v17 = vpop.f32.mrf.mxu1  ;;  %v3024_v13 = vld [vmem:[%s8525_s20 + $0xa6] sm:$0xff]  ;;  %s433_s20 = scalar_lea.vmem [#allocation3], %s6449_s1  ;;  %s11207_s1 = scalar_lea.sflag [#allocation4], %s431_s0 }
 0x24d   : > { %v7505_v18 = vpop.f32.mrf.mxu0  ;;  %v3034_v33 = vpack.c.bf16 %v3025_v27, %v3024_v13  ;;  %s6383_s15 = sshll.u32 %s433_s20, 4  ;;  %s11204_s15 = int_to_ptr.vmem [resolvable:$true] %s6383_s15 }
 0x24e   : > { %v9563_v53 = vadd.f32 %v2550_v17, %v2433_v37  ;;  %v7543_v7 = vpop.f32.mrf.mxu1  ;;  %s8320_s29 = scalar_lea.vmem %s11204_s15, 256  ;;  %p8327_p0 = scmp.lt.s32.totalorder %s11204_s15, %s8325_s30 }
 0x24f   : > { %v2369_v19 = vpop.f32.mrf.mxu0  ;;  %7683 = vmatmul.mubr.msk.bf16.gmra.mxu0 %vm505_vm1, %v3033_v9  ;;  %p8321_p11 = scmp.ne.s32.totalorder %s11204_s15, %s8320_s29  ;;  %p8328_p1 = scmp.lt.s32.totalorder %s8326_s16, %s8320_s29 }
 0x250   : > { %v2434_v22 = vadd.f32 %v2369_v19, %v9412_v3  ;;  %v2555_v47 = vpop.f32.mrf.mxu1  ;;  %7721 = vmatmul.mubr.msk.bf16.gmra.mxu1 %vm505_vm1, %v3219_v15  ;;  %7686 = vmatprep.mubr.msk.bf16.mxu0 %vm8383_vm0, %v8382_v1 }
 0x251   : > { %v7508_v24 = vpop.f32.mrf.mxu0  ;;  %7724 = vmatprep.mubr.msk.bf16.mxu1 %vm8383_vm0, %v8382_v1  ;;  %p8322_p12 = pnand %p8321_p11, %p8496_p5  ;;  %p8329_p2 = por %p8328_p1, %p8327_p0 }
 0x252   : > { %v9576_v46 = vadd.f32 %v2555_v47, %v2434_v22  ;;  %v7546_v34 = vpop.f32.mrf.mxu1 }
 0x253   : > { %v2372_v30 = vpop.f32.mrf.mxu0  ;;  %p8323_p13 = pneg %p8322_p12 }
 0x254   : > { %v2435_v3 = vadd.f32 %v2372_v30, %v9415_v35  ;;  %v2558_v31 = vpop.f32.mrf.mxu1 }
 0x255   : > { %v7509_v36 = vpop.f32.mrf.mxu0  ;;  %p8330_p3 = pnand %p8329_p2, %p8323_p13 }
 0x256   : > { %v9579_v39 = vadd.f32 %v2558_v31, %v2435_v3  ;;  %v7547_v6 = vpop.f32.mrf.mxu1 }
 0x257   : > { %v2377_v20 = vpop.f32.mrf.mxu0  ;;  %7687 = vmatmul.mubr.msk.bf16.gmra.mxu0 %vm505_vm1, %v3034_v33 }
 0x258   : > { %v2436_v45 = vadd.f32 %v2377_v20, %v9428_v2  ;;  %v2563_v8 = vpop.f32.mrf.mxu1  ;;  %7725 = vmatmul.mubr.msk.bf16.gmra.mxu1 %vm505_vm1, %v3220_v58  ;;  %7732 = vmatprep.mubr.msk.bf16.mxu0 %vm8383_vm0, %v8382_v1 }
 0x259   : > { %v7512_v26 = vpop.f32.mrf.mxu0  ;;  %7772 = vmatprep.mubr.msk.bf16.mxu1 %vm8383_vm0, %v8382_v1 }
 0x25a   : > { %v9588_v35 = vadd.f32 %v2563_v8, %v2436_v45  ;;  %v7550_v41 = vpop.f32.mrf.mxu1 }
 0x25b   : > { %v2380_v50 = vpop.f32.mrf.mxu0 }
 0x25c   : > { %v2437_v49 = vadd.f32 %v2380_v50, %v9431_v40  ;;  %v2566_v38 = vpop.f32.mrf.mxu1 }
 0x25d   : > { %v7513_v62 = vpop.f32.mrf.mxu0 }
 0x25e   : > { %v9591_v57 = vadd.f32 %v2566_v38, %v2437_v49  ;;  %v7551_v2 = vpop.f32.mrf.mxu1 }
 0x25f   : > { %v2385_v60 = vpop.f32.mrf.mxu0 }
 0x260   : > { %v2438_v40 = vadd.f32 %v2385_v60, %v9444_v59  ;;  %v2571_v51 = vpop.f32.mrf.mxu1 }
 0x261   : > { %v7516_v61 = vpop.f32.mrf.mxu0 }
 0x262   : > { %v9638_v63 = vadd.f32 %v2571_v51, %v2438_v40  ;;  %v7554_v55 = vpop.f32.mrf.mxu1 }
 0x263   : > { %v2388_v23 = vpop.f32.mrf.mxu0 }
 0x264   : > { %v2439_v44 = vadd.f32 %v2388_v23, %v9447_v0  ;;  %v2574_v5 = vpop.f32.mrf.mxu1 }
 0x265   : > { %v7517_v29 = vpop.f32.mrf.mxu0 }
 0x266   : > { %v9641_v11 = vadd.f32 %v2574_v5, %v2439_v44  ;;  %v7555_v42 = vpop.f32.mrf.mxu1 }
 0x267   : > { %v2393_v9 = vpop.f32.mrf.mxu0 }
 0x268   : > { %v2440_v37 = vadd.f32 %v2393_v9, %v9460_v14  ;;  %v2579_v17 = vpop.f32.mrf.mxu1 }
 0x269   : > { %v7520_v15 = vpop.f32.mrf.mxu0 }
 0x26a   : > { %v9644_v18 = vadd.f32 %v2579_v17, %v2440_v37  ;;  %v7558_v59 = vpop.f32.mrf.mxu1 }
 0x26b   : > { %v2396_v7 = vpop.f32.mrf.mxu0 }
 0x26c   : > { %v2441_v19 = vadd.f32 %v2396_v7, %v9463_v21  ;;  %v2582_v22 = vpop.f32.mrf.mxu1 }
 0x26d   : > { %v7521_v47 = vpop.f32.mrf.mxu0 }
 0x26e   : > { %v9647_v13 = vadd.f32 %v2582_v22, %v2441_v19  ;;  %v7559_v0 = vpop.f32.mrf.mxu1 }
 0x26f   : > { %v2401_v27 = vpop.f32.mrf.mxu0 }
 0x270   : > { %v2442_v24 = vadd.f32 %v2401_v27, %v9476_v32  ;;  %v2587_v28 = vpop.f32.mrf.mxu1 }
 0x271   : > { %v7524_v52 = vpop.f32.mrf.mxu0 }
 0x272   : > { %v9650_v34 = vadd.f32 %v2587_v28, %v2442_v24  ;;  %v7562_v14 = vpop.f32.mrf.mxu1 }
 0x273   : > { %v2404_v30 = vpop.f32.mrf.mxu0 }
 0x274   : > { %v2443_v33 = vadd.f32 %v2404_v30, %v9479_v43  ;;  %v2590_v3 = vpop.f32.mrf.mxu1 }
 0x275   : > { %v7525_v31 = vpop.f32.mrf.mxu0 }
 0x276   : > { %v9653_v58 = vadd.f32 %v2590_v3, %v2443_v33  ;;  %v7563_v21 = vpop.f32.mrf.mxu1 }
 0x277   : > { %v2409_v36 = vpop.f32.mrf.mxu0 }
 0x278   : > { %v2444_v6 = vadd.f32 %v2409_v36, %v9492_v54  ;;  %v2595_v20 = vpop.f32.mrf.mxu1 }
 0x279   : > { %v7528_v45 = vpop.f32.mrf.mxu0 }
 0x27a   : > { %v9656_v8 = vadd.f32 %v2595_v20, %v2444_v6  ;;  %v7566_v32 = vpop.f32.mrf.mxu1 }
 0x27b   : > { %v2412_v26 = vpop.f32.mrf.mxu0 }
 0x27c   : > { %v2445_v41 = vadd.f32 %v2412_v26, %v9495_v4  ;;  %v2598_v50 = vpop.f32.mrf.mxu1 }
 0x27d   : > { %v7529_v49 = vpop.f32.mrf.mxu0 }
 0x27e   : > { %v9659_v38 = vadd.f32 %v2598_v50, %v2445_v41  ;;  %v7567_v43 = vpop.f32.mrf.mxu1 }
 0x27f   : > { %v2417_v62 = vpop.f32.mrf.mxu0 }
 0x280   : > { %v2446_v2 = vadd.f32 %v2417_v62, %v9512_v16  ;;  %v2603_v60 = vpop.f32.mrf.mxu1 }
 0x281   : > { %v7532_v40 = vpop.f32.mrf.mxu0 }
 0x282   : > { %v9662_v51 = vadd.f32 %v2603_v60, %v2446_v2  ;;  %v7570_v54 = vpop.f32.mrf.mxu1 }
 0x283   : > { %v2420_v61 = vpop.f32.mrf.mxu0 }
 0x284   : > { %v2447_v55 = vadd.f32 %v2420_v61, %v9522_v10  ;;  %v2606_v23 = vpop.f32.mrf.mxu1 }
 0x285   : > { %v7533_v44 = vpop.f32.mrf.mxu0 }
 0x286   : > { %v9665_v5 = vadd.f32 %v2606_v23, %v2447_v55  ;;  %v7571_v4 = vpop.f32.mrf.mxu1 }
 0x287   : > { %v2425_v29 = vpop.f32.mrf.mxu0 }
 0x288   : > { %v2448_v42 = vadd.f32 %v2425_v29, %v9541_v25  ;;  %v2611_v9 = vpop.f32.mrf.mxu1 }
 0x289   : > { %v7536_v37 = vpop.f32.mrf.mxu0 }
 0x28a   : > { %v9668_v17 = vadd.f32 %v2611_v9, %v2448_v42  ;;  %v7574_v16 = vpop.f32.mrf.mxu1 }
 0x28b   : > { %v2428_v15 = vpop.f32.mrf.mxu0 }
 0x28c   : > { %v2449_v59 = vadd.f32 %v2428_v15, %v9547_v56  ;;  %v2614_v7 = vpop.f32.mrf.mxu1 }
 0x28d   : > { %v7537_v19 = vpop.f32.mrf.mxu0 }
 0x28e   : > { %v9671_v22 = vadd.f32 %v2614_v7, %v2449_v59  ;;  %v7575_v10 = vpop.f32.mrf.mxu1 }
 0x28f   : > { %v2733_v47 = vpop.f32.mrf.mxu0 }
 0x290   : > { %v2804_v0 = vadd.f32 %v2733_v47, %v9560_v12  ;;  %v2919_v27 = vpop.f32.mrf.mxu1 }
 0x291   : > { %v7580_v24 = vpop.f32.mrf.mxu0 }
 0x292   : > { %v9674_v28 = vadd.f32 %v2919_v27, %v2804_v0  ;;  %v7618_v25 = vpop.f32.mrf.mxu1 }
 0x293   : > { %v2736_v52 = vpop.f32.mrf.mxu0 }
 0x294   : > { %v2805_v14 = vadd.f32 %v2736_v52, %v9563_v53  ;;  %v2922_v30 = vpop.f32.mrf.mxu1 }
 0x295   : > { %v7581_v33 = vpop.f32.mrf.mxu0 }
 0x296   : > { %v9677_v3 = vadd.f32 %v2922_v30, %v2805_v14  ;;  %v7619_v56 = vpop.f32.mrf.mxu1 }
 0x297   : > { %v2741_v31 = vpop.f32.mrf.mxu0 }
 0x298   : > { %v2806_v21 = vadd.f32 %v2741_v31, %v9576_v46  ;;  %v2927_v36 = vpop.f32.mrf.mxu1 }
 0x299   : > { %v7584_v6 = vpop.f32.mrf.mxu0 }
 0x29a   : > { %v9680_v20 = vadd.f32 %v2927_v36, %v2806_v21  ;;  %v7622_v12 = vpop.f32.mrf.mxu1 }
 0x29b   : > { %v2744_v45 = vpop.f32.mrf.mxu0 }
 0x29c   : > { %v2807_v32 = vadd.f32 %v2744_v45, %v9579_v39  ;;  %v2930_v26 = vpop.f32.mrf.mxu1 }
 0x29d   : > { %v7585_v41 = vpop.f32.mrf.mxu0 }
 0x29e   : > { %v9683_v50 = vadd.f32 %v2930_v26, %v2807_v32  ;;  %v7623_v53 = vpop.f32.mrf.mxu1 }
 0x29f   : > { %v2749_v49 = vpop.f32.mrf.mxu0 }
 0x2a0   : > { %v2808_v43 = vadd.f32 %v2749_v49, %v9588_v35  ;;  %v2935_v62 = vpop.f32.mrf.mxu1 }
 0x2a1   : > { %v7588_v2 = vpop.f32.mrf.mxu0 }
 0x2a2   : > { %v9686_v60 = vadd.f32 %v2935_v62, %v2808_v43  ;;  %v7626_v46 = vpop.f32.mrf.mxu1 }
 0x2a3   : > { %v2752_v40 = vpop.f32.mrf.mxu0 }
 0x2a4   : > { %v2809_v54 = vadd.f32 %v2752_v40, %v9591_v57  ;;  %v2938_v61 = vpop.f32.mrf.mxu1 }
 0x2a5   : > { %v7589_v55 = vpop.f32.mrf.mxu0 }
 0x2a6   : > { %v9689_v23 = vadd.f32 %v2938_v61, %v2809_v54  ;;  %v7627_v39 = vpop.f32.mrf.mxu1 }
 0x2a7   : > { %v2757_v44 = vpop.f32.mrf.mxu0 }
 0x2a8   : > { %v2810_v4 = vadd.f32 %v2757_v44, %v9638_v63  ;;  %v2943_v29 = vpop.f32.mrf.mxu1 }
 0x2a9   : > { %v7592_v42 = vpop.f32.mrf.mxu0 }
 0x2aa   : > { %v9692_v9 = vadd.f32 %v2943_v29, %v2810_v4  ;;  %v7630_v35 = vpop.f32.mrf.mxu1 }
 0x2ab   : > { %v2760_v37 = vpop.f32.mrf.mxu0 }
 0x2ac   : > { %v2811_v16 = vadd.f32 %v2760_v37, %v9641_v11  ;;  %v2946_v15 = vpop.f32.mrf.mxu1 }
 0x2ad   : > { %v7593_v59 = vpop.f32.mrf.mxu0 }
 0x2ae   : > { %v9695_v7 = vadd.f32 %v2946_v15, %v2811_v16  ;;  %v7631_v57 = vpop.f32.mrf.mxu1 }
 0x2af   : > { %v2765_v19 = vpop.f32.mrf.mxu0 }
 0x2b0   : > { %v2812_v10 = vadd.f32 %v2765_v19, %v9644_v18  ;;  %v2951_v47 = vpop.f32.mrf.mxu1 }
 0x2b1   : > { %v7596_v0 = vpop.f32.mrf.mxu0 }
 0x2b2   : > { %v9698_v27 = vadd.f32 %v2951_v47, %v2812_v10  ;;  %v7634_v63 = vpop.f32.mrf.mxu1 }
 0x2b3   : > { %v2768_v24 = vpop.f32.mrf.mxu0 }
 0x2b4   : > { %v2813_v25 = vadd.f32 %v2768_v24, %v9647_v13  ;;  %v2954_v52 = vpop.f32.mrf.mxu1 }
 0x2b5   : > { %v7597_v14 = vpop.f32.mrf.mxu0 }
 0x2b6   : > { %v9701_v30 = vadd.f32 %v2954_v52, %v2813_v25  ;;  %v7635_v11 = vpop.f32.mrf.mxu1 }
 0x2b7   : > { %v2773_v33 = vpop.f32.mrf.mxu0 }
 0x2b8   : > { %v2814_v56 = vadd.f32 %v2773_v33, %v9650_v34  ;;  %v2959_v31 = vpop.f32.mrf.mxu1 }
 0x2b9   : > { %v7600_v21 = vpop.f32.mrf.mxu0 }
 0x2ba   : > { %v9704_v36 = vadd.f32 %v2959_v31, %v2814_v56  ;;  %v7638_v18 = vpop.f32.mrf.mxu1 }
 0x2bb   : > { %v2776_v6 = vpop.f32.mrf.mxu0 }
 0x2bc   : > { %v2815_v12 = vadd.f32 %v2776_v6, %v9653_v58  ;;  %v2962_v45 = vpop.f32.mrf.mxu1 }
 0x2bd   : > { %v7601_v32 = vpop.f32.mrf.mxu0 }
 0x2be   : > { %v9707_v26 = vadd.f32 %v2962_v45, %v2815_v12  ;;  %v7639_v13 = vpop.f32.mrf.mxu1 }
 0x2bf   : > { %v2781_v41 = vpop.f32.mrf.mxu0 }
 0x2c0   : > { %v2816_v53 = vadd.f32 %v2781_v41, %v9656_v8  ;;  %v2967_v49 = vpop.f32.mrf.mxu1 }
 0x2c1   : > { %v7604_v43 = vpop.f32.mrf.mxu0 }
 0x2c2   : > { %v9710_v62 = vadd.f32 %v2967_v49, %v2816_v53  ;;  %v7642_v34 = vpop.f32.mrf.mxu1 }
 0x2c3   : > { %v2784_v2 = vpop.f32.mrf.mxu0 }
 0x2c4   : > { %v2817_v46 = vadd.f32 %v2784_v2, %v9659_v38  ;;  %v2970_v40 = vpop.f32.mrf.mxu1 }
 0x2c5   : > { %v7605_v54 = vpop.f32.mrf.mxu0 }
 0x2c6   : > { %v9713_v61 = vadd.f32 %v2970_v40, %v2817_v46  ;;  %v7643_v58 = vpop.f32.mrf.mxu1 }
 0x2c7   : > { %v2789_v55 = vpop.f32.mrf.mxu0 }
 0x2c8   : > { %v2818_v39 = vadd.f32 %v2789_v55, %v9662_v51  ;;  %v2975_v44 = vpop.f32.mrf.mxu1 }
 0x2c9   : > { %v7608_v4 = vpop.f32.mrf.mxu0 }
 0x2ca   : > { %v9716_v29 = vadd.f32 %v2975_v44, %v2818_v39  ;;  %v7646_v8 = vpop.f32.mrf.mxu1 }
 0x2cb   : > { %v2792_v42 = vpop.f32.mrf.mxu0 }
 0x2cc   : > { %v2819_v35 = vadd.f32 %v2792_v42, %v9665_v5  ;;  %v2978_v37 = vpop.f32.mrf.mxu1 }
 0x2cd   : > { %v7609_v16 = vpop.f32.mrf.mxu0 }
 0x2ce   : > { %v9719_v15 = vadd.f32 %v2978_v37, %v2819_v35  ;;  %v7647_v38 = vpop.f32.mrf.mxu1 }
 0x2cf   : > { %v2797_v59 = vpop.f32.mrf.mxu0 }
 0x2d0   : > { %v2820_v57 = vadd.f32 %v2797_v59, %v9668_v17  ;;  %v2983_v19 = vpop.f32.mrf.mxu1  ;;  %v9731_v17 = vld [vmem:[%s11270_s2] ss:$0 sm:$0xff] }
 0x2d1   : > { %v7612_v10 = vpop.f32.mrf.mxu0 }
 0x2d2   : > { %v9722_v47 = vadd.f32 %v2983_v19, %v2820_v57  ;;  %v7650_v51 = vpop.f32.mrf.mxu1 }
 0x2d3   : > { %v2800_v0 = vpop.f32.mrf.mxu0 }
 0x2d4   : > { %v2821_v63 = vadd.f32 %v2800_v0, %v9671_v22  ;;  %v2986_v24 = vpop.f32.mrf.mxu1 }
 0x2d5   : > { %v7613_v25 = vpop.f32.mrf.mxu0 }
 0x2d6   : > { %v9725_v52 = vadd.f32 %v2986_v24, %v2821_v63  ;;  %v7651_v5 = vpop.f32.mrf.mxu1 }
 0x2d7   : > { %v3105_v14 = vpop.f32.mrf.mxu0 }
 0x2d8   : > { %v3176_v11 = vadd.f32 %v3105_v14, %v9674_v28  ;;  %v3291_v33 = vpop.f32.mrf.mxu1 }
 0x2d9   : > { %v7656_v56 = vpop.f32.mrf.mxu0 }
 0x2da   : > { %v3362_v31 = vadd.f32 %v3291_v33, %v3176_v11  ;;  %v7694_v21 = vpop.f32.mrf.mxu1 }
 0x2db   : > { %v3108_v18 = vpop.f32.mrf.mxu0 }
 0x2dc   : > { %v3177_v22 = vadd.f32 %v3108_v18, %v9677_v3  ;;  %v3294_v6 = vpop.f32.mrf.mxu1  ;;  %v9735_v12 = vadd.f32 %v9731_v17, %v3362_v31 }
 0x2dd   : > { %v7657_v45 = vpop.f32.mrf.mxu0 }
 0x2de   : > { %v3363_v32 = vadd.f32 %v3294_v6, %v3177_v22  ;;  %v7695_v13 = vpop.f32.mrf.mxu1  ;;  %v3408_v28 = vsel %vm3407_vm2, %v9735_v12, 0.0 }
 0x2df   : > { %v3113_v41 = vpop.f32.mrf.mxu0  ;;  %3409 = vadd.xlane.f32.xlu0 %v3408_v28 }
 0x2e0   : > { %v3178_v53 = vadd.f32 %v3113_v41, %v9680_v20  ;;  %v3299_v49 = vpop.f32.mrf.mxu1  ;;  %v9741_v43 = vadd.f32 %v9731_v17, %v3363_v32 }
 0x2e1   : > { %v7660_v34 = vpop.f32.mrf.mxu0 }
 0x2e2   : > { %v3364_v3 = vadd.f32 %v3299_v49, %v3178_v53  ;;  %v7698_v2 = vpop.f32.mrf.mxu1  ;;  %v3411_v46 = vsel %vm3407_vm2, %v9741_v43, 0.0 }
 0x2e3   : > { %v3116_v40 = vpop.f32.mrf.mxu0  ;;  %3412 = vadd.xlane.f32.xlu0 %v3411_v46 }
 0x2e4   : > { %v3179_v54 = vadd.f32 %v3116_v40, %v9683_v50  ;;  %v3302_v58 = vpop.f32.mrf.mxu1  ;;  %v9747_v55 = vadd.f32 %v9731_v17, %v3364_v3 }
 0x2e5   : > { %v7661_v39 = vpop.f32.mrf.mxu0 }
 0x2e6   : > { %v3365_v20 = vadd.f32 %v3302_v58, %v3179_v54  ;;  %v7699_v44 = vpop.f32.mrf.mxu1  ;;  %v3414_v4 = vsel %vm3407_vm2, %v9747_v55, 0.0 }
 0x2e7   : > { %v3121_v8 = vpop.f32.mrf.mxu0  ;;  %3415 = vadd.xlane.f32.xlu1 %v3414_v4 }
 0x2e8   : > { %v3180_v42 = vadd.f32 %v3121_v8, %v9686_v60  ;;  %v3307_v35 = vpop.f32.mrf.mxu1  ;;  %v9753_v37 = vadd.f32 %v9731_v17, %v3365_v20 }
 0x2e9   : > { %v7664_v16 = vpop.f32.mrf.mxu0 }
 0x2ea   : > { %v3366_v50 = vadd.f32 %v3307_v35, %v3180_v42  ;;  %v7702_v38 = vpop.f32.mrf.mxu1  ;;  %v3417_v59 = vsel %vm3407_vm2, %v9753_v37, 0.0 }
 0x2eb   : > { %v3124_v57 = vpop.f32.mrf.mxu0  ;;  %3418 = vadd.xlane.f32.xlu1 %v3417_v59 }
 0x2ec   : > { %v3181_v19 = vadd.f32 %v3124_v57, %v9689_v23  ;;  %v3310_v10 = vpop.f32.mrf.mxu1  ;;  %v9759_v51 = vadd.f32 %v9731_v17, %v3366_v50 }
 0x2ed   : > { %v7665_v0 = vpop.f32.mrf.mxu0 }
 0x2ee   : > { %v3367_v60 = vadd.f32 %v3310_v10, %v3181_v19  ;;  %v7703_v63 = vpop.f32.mrf.mxu1  ;;  %v3420_v24 = vsel %vm3407_vm2, %v9759_v51, 0.0 }
 0x2ef   : > { %v3129_v25 = vpop.f32.mrf.mxu0  ;;  %3421 = vadd.xlane.f32.xlu0 %v3420_v24 }
 0x2f0   : > { %v3182_v5 = vadd.f32 %v3129_v25, %v9692_v9  ;;  %v3315_v14 = vpop.f32.mrf.mxu1  ;;  %v9765_v11 = vadd.f32 %v9731_v17, %v3367_v60 }
 0x2f1   : > { %v7668_v33 = vpop.f32.mrf.mxu0 }
 0x2f2   : > { %v3368_v23 = vadd.f32 %v3315_v14, %v3182_v5  ;;  %v7706_v56 = vpop.f32.mrf.mxu1  ;;  %v3423_v31 = vsel %vm3407_vm2, %v9765_v11, 0.0 }
 0x2f3   : > { %v3132_v21 = vpop.f32.mrf.mxu0  ;;  %3424 = vadd.xlane.f32.xlu1 %v3423_v31 }
 0x2f4   : > { %v3183_v18 = vadd.f32 %v3132_v21, %v9695_v7  ;;  %v3318_v22 = vpop.f32.mrf.mxu1  ;;  %v9771_v6 = vadd.f32 %v9731_v17, %v3368_v23 }
 0x2f5   : > { %v7669_v45 = vpop.f32.mrf.mxu0 }
 0x2f6   : > { %v3369_v9 = vadd.f32 %v3318_v22, %v3183_v18  ;;  %v7707_v32 = vpop.f32.mrf.mxu1  ;;  %v3426_v13 = vsel %vm3407_vm2, %v9771_v6, 0.0 }
 0x2f7   : > { %v3137_v28 = vpop.f32.mrf.mxu0  ;;  %3427 = vadd.xlane.f32.xlu0 %v3426_v13 }
 0x2f8   : > { %v3184_v41 = vadd.f32 %v3137_v28, %v9698_v27  ;;  %v3323_v53 = vpop.f32.mrf.mxu1  ;;  %v9777_v49 = vadd.f32 %v9731_v17, %v3369_v9 }
 0x2f9   : > { %v7672_v34 = vpop.f32.mrf.mxu0 }
 0x2fa   : > { %v3370_v7 = vadd.f32 %v3323_v53, %v3184_v41  ;;  %v7710_v3 = vpop.f32.mrf.mxu1  ;;  %v3429_v2 = vsel %vm3407_vm2, %v9777_v49, 0.0 }
 0x2fb   : > { %v3140_v46 = vpop.f32.mrf.mxu0  ;;  %3430 = vadd.xlane.f32.xlu1 %v3429_v2 }
 0x2fc   : > { %v3185_v40 = vadd.f32 %v3140_v46, %v9701_v30  ;;  %v3326_v54 = vpop.f32.mrf.mxu1  ;;  %v9783_v58 = vadd.f32 %v9731_v17, %v3370_v7 }
 0x2fd   : > { %v7673_v39 = vpop.f32.mrf.mxu0 }
 0x2fe   : > { %v3371_v27 = vadd.f32 %v3326_v54, %v3185_v40  ;;  %v7711_v20 = vpop.f32.mrf.mxu1  ;;  %v3432_v44 = vsel %vm3407_vm2, %v9783_v58, 0.0  ;;  %v3716_v40 = vld [vmem:[%s11258_s11 + $0x38] sm:$0xff] }
 0x2ff   : > { %v3145_v4 = vpop.f32.mrf.mxu0  ;;  %3433 = vadd.xlane.f32.xlu0 %v3432_v44 }
 0x300   : > { %v3186_v8 = vadd.f32 %v3145_v4, %v9704_v36  ;;  %v3331_v42 = vpop.f32.mrf.mxu1  ;;  %v9789_v35 = vadd.f32 %v9731_v17, %v3371_v27 }
 0x301   : > { %v7676_v16 = vpop.f32.mrf.mxu0 }
 0x302   : > { %v3372_v30 = vadd.f32 %v3331_v42, %v3186_v8  ;;  %v7714_v50 = vpop.f32.mrf.mxu1  ;;  %v3435_v38 = vsel %vm3407_vm2, %v9789_v35, 0.0  ;;  %v3715_v42 = vld [vmem:[%s11258_s11 + $0x30] sm:$0xff] }
 0x303   : > { %v3148_v59 = vpop.f32.mrf.mxu0  ;;  %3436 = vadd.xlane.f32.xlu1 %v3435_v38 }
 0x304   : > { %v3187_v57 = vadd.f32 %v3148_v59, %v9707_v26  ;;  %v3334_v19 = vpop.f32.mrf.mxu1  ;;  %v9795_v10 = vadd.f32 %v9731_v17, %v3372_v30 }
 0x305   : > { %v7677_v0 = vpop.f32.mrf.mxu0 }
 0x306   : > { %v3373_v36 = vadd.f32 %v3334_v19, %v3187_v57  ;;  %v7715_v60 = vpop.f32.mrf.mxu1  ;;  %v3438_v63 = vsel %vm3407_vm2, %v9795_v10, 0.0 }
 0x307   : > { %v3153_v24 = vpop.f32.mrf.mxu0  ;;  %3439 = vadd.xlane.f32.xlu0 %v3438_v63 }
 0x308   : > { %v3188_v25 = vadd.f32 %v3153_v24, %v9710_v62  ;;  %v3339_v5 = vpop.f32.mrf.mxu1  ;;  %v9801_v14 = vadd.f32 %v9731_v17, %v3373_v36  ;;  %v9843_v24 = vpop.permute.xlu1 %3734 }
 0x309   : > { %v7680_v33 = vpop.f32.mrf.mxu0 }
 0x30a   : > { %v3374_v26 = vadd.f32 %v3339_v5, %v3188_v25  ;;  %v7718_v23 = vpop.f32.mrf.mxu1  ;;  %v3441_v56 = vsel %vm3407_vm2, %v9801_v14, 0.0  ;;  %v9845_v25 = vpop.permute.xlu0 %3729 }
 0x30b   : > { %v3156_v31 = vpop.f32.mrf.mxu0  ;;  %3442 = vadd.xlane.f32.xlu1 %v3441_v56 }
 0x30c   : > { %v3342_v21 = vpop.f32.mrf.mxu1  ;;  %v9806_v18 = vadd.f32 %v9731_v17, %v3374_v26  ;;  %v3189_v16 = vadd.f32 %v3156_v31, %v9713_v61  ;;  %v9847_v5 = vpop.permute.xlu1 %3739 }
 0x30d   : > { %v7681_v22 = vpop.f32.mrf.mxu0 }
 0x30e   : > { %v7719_v45 = vpop.f32.mrf.mxu1  ;;  %v3444_v62 = vsel %vm3407_vm2, %v9806_v18, 0.0  ;;  %v3375_v30 = vadd.f32 %v3342_v21, %v3189_v16  ;;  %v9849_v33 = vpop.permute.xlu0 %3749 }
 0x30f   : > { %v3161_v9 = vpop.f32.mrf.mxu0  ;;  %3445 = vadd.xlane.f32.xlu0 %v3444_v62 }
 0x310   : > { %v3347_v32 = vpop.f32.mrf.mxu1  ;;  %v3190_v50 = vadd.f32 %v3161_v9, %v9716_v29  ;;  %v9824_v19 = vadd.f32 %v9731_v17, %v3375_v30  ;;  %v9851_v26 = vpop.permute.xlu1 %3744 }
 0x311   : > { %v7684_v13 = vpop.f32.mrf.mxu0 }
 0x312   : > { %v7722_v28 = vpop.f32.mrf.mxu1  ;;  %v3376_v59 = vadd.f32 %v3347_v32, %v3190_v50  ;;  %v3447_v36 = vsel %vm3407_vm2, %v9824_v19, 0.0 }
 0x313   : > { %v3164_v41 = vpop.f32.mrf.mxu0 }
 0x314   : > { %v3350_v53 = vpop.f32.mrf.mxu1  ;;  %v3191_v38 = vadd.f32 %v3164_v41, %v9719_v15  ;;  %v9829_v60 = vadd.f32 %v9731_v17, %v3376_v59  ;;  %v9856_v21 = vpop.permute.xlu1 %3754 }
 0x315   : > { %v7685_v34 = vpop.f32.mrf.mxu0 }
 0x316   : > { %v7723_v7 = vpop.f32.mrf.mxu1  ;;  %v3450_v29 = vsel %vm3407_vm2, %v9829_v60, 0.0 }
 0x317   : > { %v3169_v3 = vpop.f32.mrf.mxu0 }
 0x318   : > { %v3355_v2 = vpop.f32.mrf.mxu1  ;;  %v3192_v57 = vadd.f32 %v3169_v3, %v9722_v47 }
 0x319   : > { %v7688_v46 = vpop.f32.mrf.mxu0 }
 0x31a   : > { %v7726_v54 = vpop.f32.mrf.mxu1  ;;  %v3378_v0 = vadd.f32 %v3355_v2, %v3192_v57 }
 0x31b   : > { %v3172_v39 = vpop.f32.mrf.mxu0 }
 0x31c   : > { %v3193_v27 = vadd.f32 %v3172_v39, %v9725_v52  ;;  %3764 = vperm.xlu1 %8182, %v3716_v40   ;;  %v3358_v20 = vpop.f32.mrf.mxu1  ;;  %v3377_v52 = vadd.f32 %v3350_v53, %v3191_v38  ;;  %v9839_v47 = vadd.f32 %v9731_v17, %v3378_v0 }
 0x31d   : > { %v7689_v44 = vpop.f32.mrf.mxu0 }
 0x31e   : > { %v9814_v4 = vadd.f32 %v3358_v20, %v3193_v27  ;;  %v7727_v8 = vpop.f32.mrf.mxu1  ;;  %v9832_v61 = vadd.f32 %v9731_v17, %v3377_v52  ;;  %v3456_v63 = vsel %vm3407_vm2, %v9839_v47, 0.0 }
 0x320   : > { %v3453_v15 = vsel %vm3407_vm2, %v9832_v61, 0.0 }
 0x325   : > { %3759 = vperm.xlu0 %8181, %v3715_v42  }
 0x340   : > { %3448 = vadd.xlane.f32.xlu1 %v3447_v36 }
 0x344   : > { %3451 = vadd.xlane.f32.xlu0 %v3450_v29  ;;  %3454 = vadd.xlane.f32.xlu1 %v3453_v15 }
 0x348   : > { %3457 = vadd.xlane.f32.xlu0 %v3456_v63 }
 0x368   : > { %v3410_v23 = vpop.xlane.xlu0 %3409 }
 0x369   : > { %v3463_v56 = vmul.f32 0.03125, %v3410_v23 }
 0x36b   : > { %v9854_v31 = vsub.f32 %v9735_v12, %v3463_v56 }
 0x36c   : > { %v3413_v22 = vpop.xlane.xlu0 %3412 }
 0x36d   : > { %v3464_v45 = vmul.f32 0.03125, %v3413_v22  ;;  %v3499_v62 = vmul.f32 %v9854_v31, %v9854_v31 }
 0x36f   : > { %v9861_v9 = vsub.f32 %v9741_v43, %v3464_v45  ;;  %v3517_v32 = vsel %vm3407_vm2, %v3499_v62, 0.0 }
 0x370   : > { %v3416_v13 = vpop.xlane.xlu1 %3415  ;;  %3518 = vadd.xlane.f32.xlu1 %v3517_v32 }
 0x371   : > { %v3465_v28 = vmul.f32 0.03125, %v3416_v13  ;;  %v3500_v41 = vmul.f32 %v9861_v9, %v9861_v9 }
 0x373   : > { %v9867_v12 = vsub.f32 %v9747_v55, %v3465_v28  ;;  %v3520_v53 = vsel %vm3407_vm2, %v3500_v41, 0.0 }
 0x374   : > { %v3419_v34 = vpop.xlane.xlu1 %3418  ;;  %3521 = vadd.xlane.f32.xlu0 %v3520_v53 }
 0x375   : > { %v3466_v7 = vmul.f32 0.03125, %v3419_v34  ;;  %v3501_v43 = vmul.f32 %v9867_v12, %v9867_v12 }
 0x377   : > { %v9873_v3 = vsub.f32 %v9753_v37, %v3466_v7  ;;  %v3523_v2 = vsel %vm3407_vm2, %v3501_v43, 0.0  ;;  %v8200_v43 = vld [vmem:[%s11252_s5 + $0x8] sm:$0xff]  }
 0x378   : > { %v3422_v46 = vpop.xlane.xlu0 %3421  ;;  %3524 = vadd.xlane.f32.xlu1 %v3523_v2  ;;  %7769 = vmatpush3.bf16.msra.mxu1 %v8200_v43 }
 0x379   : > { %v3467_v40 = vmul.f32 0.03125, %v3422_v46  ;;  %v3502_v55 = vmul.f32 %v9873_v3, %v9873_v3  ;;  %7770 = vmatprep.subr.bf16.mxu1 %v8382_v1 }
 0x37b   : > { %v9879_v54 = vsub.f32 %v9759_v51, %v3467_v40  ;;  %v3526_v39 = vsel %vm3407_vm2, %v3502_v55, 0.0  ;;  %v8201_v55 = vld [vmem:[%s11252_s5 + $0x10] sm:$0xff]  }
 0x37c   : > { %v3425_v27 = vpop.xlane.xlu1 %3424  ;;  %3527 = vadd.xlane.f32.xlu0 %v3526_v39  ;;  %v8202_v39 = vld [vmem:[%s11252_s5] sm:$0xff]  }
 0x37d   : > { %v3468_v20 = vmul.f32 0.03125, %v3425_v27  ;;  %v3503_v37 = vmul.f32 %v9879_v54, %v9879_v54  ;;  %7771 = vmatpush3.bf16.msra.mxu1 %v8202_v39 }
 0x37e   : > { %7848 = vmatprep.subr.bf16.mxu1 %v8382_v1 }
 0x37f   : > { %v9885_v44 = vsub.f32 %v9765_v11, %v3468_v20  ;;  %v3529_v8 = vsel %vm3407_vm2, %v3503_v37, 0.0  ;;  %v3718_v20 = vld [vmem:[%s11258_s11 + $0x48] sm:$0xff]  ;;  %v3719_v37 = vld [vmem:[%s11258_s11 + $0x50] sm:$0xff] }
 0x380   : > { %v3428_v42 = vpop.xlane.xlu0 %3427  ;;  %3530 = vadd.xlane.f32.xlu1 %v3529_v8  ;;  %v3720_v8 = vld [vmem:[%s11258_s11 + $0x58] sm:$0xff] }
 0x381   : > { %v3469_v16 = vmul.f32 0.03125, %v3428_v42  ;;  %v3504_v51 = vmul.f32 %v9885_v44, %v9885_v44  ;;  %v3717_v42 = vld [vmem:[%s11258_s11 + $0x40] sm:$0xff] }
 0x383   : > { %v9891_v30 = vsub.f32 %v9771_v6, %v3469_v16  ;;  %v3532_v50 = vsel %vm3407_vm2, %v3504_v51, 0.0  ;;  %v3721_v16 = vld [vmem:[%s11258_s11 + $0x60] sm:$0xff] }
 0x384   : > { %v3431_v38 = vpop.xlane.xlu1 %3430  ;;  %3533 = vadd.xlane.f32.xlu0 %v3532_v50 }
 0x385   : > { %v3470_v59 = vmul.f32 0.03125, %v3431_v38  ;;  %v3505_v11 = vmul.f32 %v9891_v30, %v9891_v30 }
 0x387   : > { %v9897_v52 = vsub.f32 %v9777_v49, %v3470_v59  ;;  %v3535_v57 = vsel %vm3407_vm2, %v3505_v11, 0.0 }
 0x388   : > { %v3434_v0 = vpop.xlane.xlu0 %3433  ;;  %3536 = vadd.xlane.f32.xlu1 %v3535_v57 }
 0x389   : > { %v3471_v36 = vmul.f32 0.03125, %v3434_v0  ;;  %v3506_v6 = vmul.f32 %v9897_v52, %v9897_v52 }
 0x38b   : > { %v9903_v29 = vsub.f32 %v9783_v58, %v3471_v36  ;;  %v3538_v15 = vsel %vm3407_vm2, %v3506_v6, 0.0 }
 0x38c   : > { %v3437_v63 = vpop.xlane.xlu1 %3436  ;;  %3539 = vadd.xlane.f32.xlu0 %v3538_v15 }
 0x38d   : > { %v3472_v23 = vmul.f32 0.03125, %v3437_v63  ;;  %v3507_v49 = vmul.f32 %v9903_v29, %v9903_v29 }
 0x38f   : > { %v9909_v56 = vsub.f32 %v9789_v35, %v3472_v23  ;;  %v3541_v22 = vsel %vm3407_vm2, %v3507_v49, 0.0 }
 0x390   : > { %v3440_v45 = vpop.xlane.xlu0 %3439  ;;  %3542 = vadd.xlane.f32.xlu1 %v3541_v22 }
 0x391   : > { %v3473_v62 = vmul.f32 0.03125, %v3440_v45  ;;  %v3508_v58 = vmul.f32 %v9909_v56, %v9909_v56 }
 0x393   : > { %v9915_v32 = vsub.f32 %v9795_v10, %v3473_v62  ;;  %v3544_v13 = vsel %vm3407_vm2, %v3508_v58, 0.0  ;;  %v8199_v10 = vld [vmem:[%s11252_s5 + $0x18] sm:$0xff]  }
 0x394   : > { %v3443_v28 = vpop.xlane.xlu1 %3442  ;;  %3545 = vadd.xlane.f32.xlu1 %v3544_v13  ;;  %7729 = vmatpush3.bf16.msra.mxu0 %v8199_v10 }
 0x395   : > { %v3474_v41 = vmul.f32 0.03125, %v3443_v28  ;;  %v3509_v35 = vmul.f32 %v9915_v32, %v9915_v32  ;;  %7730 = vmatprep.subr.bf16.mxu0 %v8382_v1 }
 0x397   : > { %v9921_v53 = vsub.f32 %v9801_v14, %v3474_v41  ;;  %v3547_v34 = vsel %vm3407_vm2, %v3509_v35, 0.0  ;;  %v3723_v41 = vld [vmem:[%s11258_s11 + $0x70] sm:$0xff]  ;;  %v3724_v35 = vld [vmem:[%s11258_s11 + $0x78] sm:$0xff] }
 0x398   : > { %v3446_v7 = vpop.xlane.xlu0 %3445  ;;  %3548 = vadd.xlane.f32.xlu1 %v3547_v34  ;;  %7731 = vmatpush3.bf16.msra.mxu0 %v8201_v55  ;;  %v9964_v51 = vpop.permute.xlu1 %3764  ;;  %v3725_v34 = vld [vmem:[%s11258_s11 + $0x80] sm:$0xff] }
 0x399   : > { %v3475_v2 = vmul.f32 0.03125, %v3446_v7  ;;  %v3510_v46 = vmul.f32 %v9921_v53, %v9921_v53  ;;  %7808 = vmatprep.subr.bf16.mxu0 %v8382_v1 }
 0x39b   : > { %v9933_v14 = vsub.f32 %v9806_v18, %v3475_v2  ;;  %v3550_v40 = vsel %vm3407_vm2, %v3510_v46, 0.0 }
 0x39c   : > { %3551 = vadd.xlane.f32.xlu1 %v3550_v40 }
 0x39d   : > { %v3511_v27 = vmul.f32 %v9933_v14, %v9933_v14 }
 0x39f   : > { %v3553_v18 = vsel %vm3407_vm2, %v3511_v27, 0.0 }
 0x3a0   : > { %3554 = vadd.xlane.f32.xlu0 %v3553_v18  ;;  %v9966_v50 = vpop.permute.xlu0 %3759 }
 0x3ad   : > { %3774 = vperm.xlu1 %8182, %v3718_v20  }
 0x3b1   : > { %3779 = vperm.xlu1 %8182, %v3719_v37  }
 0x3b5   : > { %3784 = vperm.xlu1 %8182, %v3720_v8  }
 0x3b6   : > { %3769 = vperm.xlu0 %8181, %v3717_v42  }
 0x3b9   : > { %3789 = vperm.xlu1 %8182, %v3721_v16  }
 0x3c9   : > { %v3449_v38 = vpop.xlane.xlu1 %3448 }
 0x3ca   : > { %v3476_v57 = vmul.f32 0.03125, %v3449_v38  ;;  %v10007_v38 = vld [vmem:[%s11250_s3] ss:$0 sm:$0xff] }
 0x3cc   : > { %v9974_v23 = vsub.f32 %v9824_v19, %v3476_v57  ;;  %v10013_v57 = vld [vmem:[%s11251_s4] ss:$0 sm:$0xff] }
 0x3cd   : > { %v3452_v59 = vpop.xlane.xlu0 %3451  ;;  %v3455_v36 = vpop.xlane.xlu1 %3454 }
 0x3ce   : > { %v3477_v11 = vmul.f32 0.03125, %v3452_v59  ;;  %v3478_v49 = vmul.f32 0.03125, %v3455_v36  ;;  %v3512_v13 = vmul.f32 %v9974_v23, %v9974_v23 }
 0x3d0   : > { %v9969_v0 = vsub.f32 %v9829_v60, %v3477_v11  ;;  %v9983_v62 = vsub.f32 %v9832_v61, %v3478_v49  ;;  %v3556_v19 = vsel %vm3407_vm2, %v3512_v13, 0.0  ;;  %v3722_v61 = vld [vmem:[%s11258_s11 + $0x68] sm:$0xff] }
 0x3d1   : > { %v3458_v6 = vpop.xlane.xlu0 %3457 }
 0x3d2   : > { %v3479_v15 = vmul.f32 0.03125, %v3458_v6  ;;  %v3513_v63 = vmul.f32 %v9969_v0, %v9969_v0  ;;  %v10017_v6 = vadd.f32 %v9731_v17, %v9814_v4 }
 0x3d4   : > { %v9977_v22 = vsub.f32 %v9839_v47, %v3479_v15  ;;  %v3559_v45 = vsel %vm3407_vm2, %v3513_v63, 0.0  ;;  %v3514_v47 = vmul.f32 %v9983_v62, %v9983_v62  ;;  %v3459_v13 = vsel %vm3407_vm2, %v10017_v6, 0.0 }
 0x3d5   : > { %3560 = vadd.xlane.f32.xlu0 %v3559_v45 }
 0x3d6   : > { %v3515_v60 = vmul.f32 %v9977_v22, %v9977_v22  ;;  %v3562_v28 = vsel %vm3407_vm2, %v3514_v47, 0.0 }
 0x3d8   : > { %v3565_v58 = vsel %vm3407_vm2, %v3515_v60, 0.0 }
 0x3d9   : > { %3566 = vadd.xlane.f32.xlu0 %v3565_v58 }
 0x3dd   : > { %3557 = vadd.xlane.f32.xlu1 %v3556_v19 }
 0x3e1   : > { %3563 = vadd.xlane.f32.xlu1 %v3562_v28 }
 0x3ef   : > { %3794 = vperm.xlu0 %8181, %v3722_v61  }
 0x3f2   : > { %3799 = vperm.xlu1 %8182, %v3723_v41  }
 0x3f3   : > { %3804 = vperm.xlu0 %8181, %v3724_v35  }
 0x3f6   : > { %3809 = vperm.xlu1 %8182, %v3725_v34  }
 0x3f9   : > { %v3519_v7 = vpop.xlane.xlu1 %3518 }
 0x3fa   : > { %v3571_v10 = vmul.f32 0.03125, %v3519_v7 }
 0x3fc   : > { %v3589_v43 = vadd.f32 1e-05, %v3571_v10 }
 0x3fd   : > { %v3522_v2 = vpop.xlane.xlu0 %3521 }
 0x3fe   : > { %8245 = vrsqrt.f32 %v3589_v43  ;;  %v3572_v46 = vmul.f32 0.03125, %v3522_v2 }
 0x400   : > { %v3590_v40 = vadd.f32 1e-05, %v3572_v46 }
 0x401   : > { %v3525_v55 = vpop.xlane.xlu1 %3524 }
 0x402   : > { %8247 = vrsqrt.f32 %v3590_v40  ;;  %v3573_v39 = vmul.f32 0.03125, %v3525_v55 }
 0x404   : > { %v3591_v27 = vadd.f32 1e-05, %v3573_v39 }
 0x405   : > { %v3528_v18 = vpop.xlane.xlu0 %3527 }
 0x406   : > { %8249 = vrsqrt.f32 %v3591_v27  ;;  %v3574_v20 = vmul.f32 0.03125, %v3528_v18 }
 0x408   : > { %v3592_v37 = vadd.f32 1e-05, %v3574_v20 }
 0x409   : > { %v3531_v8 = vpop.xlane.xlu1 %3530 }
 0x40a   : > { %8251 = vrsqrt.f32 %v3592_v37  ;;  %v3575_v42 = vmul.f32 0.03125, %v3531_v8 }
 0x40b   : > { %v8246_v16 = vpop.eup %8245 }
 0x40c   : > { %v3625_v59 = vmul.f32 %v8246_v16, %v9854_v31  ;;  %v3593_v11 = vadd.f32 1e-05, %v3575_v42  ;;  %v3906_v42 = vld [vmem:[#allocation2 + $0x4] sm:$0xff] }
 0x40d   : > { %v3534_v36 = vpop.xlane.xlu0 %3533  ;;  %v3875_v16 = vld [vmem:[#allocation2 + $0x3] sm:$0xff] }
 0x40e   : > { %v3649_v15 = vmul.f32 %v10007_v38, %v3625_v59  ;;  %8253 = vrsqrt.f32 %v3593_v11  ;;  %v3576_v63 = vmul.f32 0.03125, %v3534_v36 }
 0x40f   : > { %v8248_v49 = vpop.eup %8247 }
 0x410   : > { %v3673_v45 = vadd.f32 %v10013_v57, %v3649_v15  ;;  %v3626_v31 = vmul.f32 %v8248_v49, %v9861_v9  ;;  %v3594_v60 = vadd.f32 1e-05, %v3576_v63 }
 0x411   : > { %v3537_v58 = vpop.xlane.xlu1 %3536 }
 0x412   : > { %v3691_v19 = vmax.f32 %v3673_v45, 0.0  ;;  %v3650_v47 = vmul.f32 %v10007_v38, %v3626_v31  ;;  %8255 = vrsqrt.f32 %v3594_v60  ;;  %v3577_v17 = vmul.f32 0.03125, %v3537_v58  ;;  %3460 = vadd.xlane.f32.xlu0 %v3459_v13  ;;  %v8204_v31 = vld [vmem:[%s11252_s5 + $0x38] sm:$0xff]  }
 0x413   : > { %v8250_v4 = vpop.eup %8249 }
 0x414   : > { %v3817_v28 = vmul.f32 %v9845_v25, %v3691_v19  ;;  %v3674_v61 = vadd.f32 %v10013_v57, %v3650_v47  ;;  %v3627_v41 = vmul.f32 %v8250_v4, %v9867_v12  ;;  %v3595_v35 = vadd.f32 1e-05, %v3577_v17 }
 0x415   : > { %v3540_v9 = vpop.xlane.xlu0 %3539 }
 0x416   : > { %3857 = vst.msk [vmem:[#allocation2 + $0x10] sm:$0xff] %vm3407_vm2, %v3817_v28  ;;  %v3692_v34 = vmax.f32 %v3674_v61, 0.0  ;;  %v3651_v7 = vmul.f32 %v10007_v38, %v3627_v41  ;;  %8257 = vrsqrt.f32 %v3595_v35  ;;  %v3578_v10 = vmul.f32 0.03125, %v3540_v9  ;;  %v8206_v61 = vld [vmem:[%s11252_s5 + $0x30] sm:$0xff]  }
 0x417   : > { %v8252_v43 = vpop.eup %8251 }
 0x418   : > { %v3818_v2 = vmul.f32 %v9843_v24, %v3692_v34  ;;  %v3675_v46 = vadd.f32 %v10013_v57, %v3651_v7  ;;  %v3628_v25 = vmul.f32 %v8252_v43, %v9873_v3  ;;  %v3596_v40 = vadd.f32 1e-05, %v3578_v10 }
 0x419   : > { %v3543_v55 = vpop.xlane.xlu1 %3542 }
 0x41a   : > { %3858 = vst.msk [vmem:[#allocation2 + $0x18] sm:$0xff] %vm3407_vm2, %v3818_v2  ;;  %v3693_v12 = vmax.f32 %v3675_v46, 0.0  ;;  %v3652_v39 = vmul.f32 %v10007_v38, %v3628_v25  ;;  %8259 = vrsqrt.f32 %v3596_v40  ;;  %v3579_v27 = vmul.f32 0.03125, %v3543_v55  ;;  %v3726_v2 = vld [vmem:[%s11258_s11 + $0x88] sm:$0xff] }
 0x41b   : > { %v8254_v18 = vpop.eup %8253 }
 0x41c   : > { %v3819_v20 = vmul.f32 %v9847_v5, %v3693_v12  ;;  %v3676_v37 = vadd.f32 %v10013_v57, %v3652_v39  ;;  %v3629_v24 = vmul.f32 %v8254_v18, %v9879_v54  ;;  %v3597_v8 = vadd.f32 1e-05, %v3579_v27  ;;  %v8203_v54 = vld [vmem:[%s11252_s5 + $0x28] sm:$0xff]  }
 0x41d   : > { %v3546_v3 = vpop.xlane.xlu1 %3545  ;;  %v3907_v59 = vld [vmem:[#allocation2 + $0xc] sm:$0xff] }
 0x41e   : > { %v3876_v11 = vld [vmem:[#allocation2 + $0xb] sm:$0xff]  ;;  %3859 = vst.msk [vmem:[#allocation2 + $0x20] sm:$0xff] %vm3407_vm2, %v3819_v20  ;;  %v3694_v36 = vmax.f32 %v3676_v37, 0.0  ;;  %v3653_v15 = vmul.f32 %v10007_v38, %v3629_v24  ;;  %8261 = vrsqrt.f32 %v3597_v8  ;;  %v3580_v63 = vmul.f32 0.03125, %v3546_v3 }
 0x41f   : > { %v8256_v49 = vpop.eup %8255  ;;  %v3924_v45 = vpack.c.bf16 %v3907_v59, %v3906_v42  ;;  %v3893_v5 = vpack.c.bf16 %v3876_v11, %v3875_v16 }
 0x420   : > { %v3820_v60 = vmul.f32 %v9851_v26, %v3694_v36  ;;  %v3677_v58 = vadd.f32 %v10013_v57, %v3653_v15  ;;  %v3630_v13 = vmul.f32 %v8256_v49, %v9885_v44  ;;  %v3598_v19 = vadd.f32 1e-05, %v3580_v63  ;;  %v8205_v44 = vld [vmem:[%s11252_s5 + $0x20] sm:$0xff]  }
 0x421   : > { %7733 = vmatmul.mubr.msk.bf16.vlgmr.msra.gmra.mxu0 %vm3407_vm2, %v3924_v45  ;;  %7773 = vmatmul.mubr.msk.bf16.vlgmr.msra.gmra.mxu1 %vm3407_vm2, %v3893_v5  ;;  %v3549_v47 = vpop.xlane.xlu1 %3548  ;;  %v3908_v25 = vld [vmem:[#allocation2 + $0x14] sm:$0xff] }
 0x422   : > { %3860 = vst.msk [vmem:[#allocation2 + $0x28] sm:$0xff] %vm3407_vm2, %v3820_v60  ;;  %v3695_v17 = vmax.f32 %v3677_v58, 0.0  ;;  %v3654_v4 = vmul.f32 %v10007_v38, %v3630_v13  ;;  %8263 = vrsqrt.f32 %v3598_v19  ;;  %v3581_v28 = vmul.f32 0.03125, %v3549_v47  ;;  %7736 = vmatprep.mubr.msk.bf16.mxu0 %vm8383_vm0, %v8382_v1  ;;  %7776 = vmatprep.mubr.msk.bf16.mxu1 %vm8383_vm0, %v8382_v1  ;;  %v3877_v40 = vld [vmem:[#allocation2 + $0x13] sm:$0xff] }
 0x423   : > { %v8258_v26 = vpop.eup %8257  ;;  %7809 = vmatpush3.bf16.msra.mxu0 %v8203_v54  ;;  %7849 = vmatpush3.bf16.msra.mxu1 %v8204_v31 }
 0x424   : > { %v3821_v41 = vmul.f32 %v9849_v33, %v3695_v17  ;;  %v3678_v35 = vadd.f32 %v10013_v57, %v3654_v4  ;;  %v3631_v9 = vmul.f32 %v8258_v26, %v9891_v30  ;;  %v3599_v34 = vadd.f32 1e-05, %v3581_v28  ;;  %7810 = vmatprep.subr.bf16.mxu0 %v8382_v1  ;;  %7850 = vmatprep.subr.bf16.mxu1 %v8382_v1 }
 0x425   : > { %v3552_v7 = vpop.xlane.xlu1 %3551  ;;  %v3909_v10 = vld [vmem:[#allocation2 + $0x1c] sm:$0xff] }
 0x426   : > { %v10068_v43 = vld [vmem:[#allocation2 + $0x1b] sm:$0xff]  ;;  %3861 = vst.msk [vmem:[#allocation2 + $0x30] sm:$0xff] %vm3407_vm2, %v3821_v41  ;;  %v3696_v33 = vmax.f32 %v3678_v35, 0.0  ;;  %v3655_v46 = vmul.f32 %v10007_v38, %v3631_v9  ;;  %8265 = vrsqrt.f32 %v3599_v34  ;;  %v3582_v30 = vmul.f32 0.03125, %v3552_v7 }
 0x427   : > { %v8260_v55 = vpop.eup %8259  ;;  %v3925_v12 = vpack.c.bf16 %v3909_v10, %v3908_v25  ;;  %v3894_v39 = vpack.c.bf16 %v10068_v43, %v3877_v40  ;;  %7811 = vmatpush3.bf16.msra.mxu0 %v8205_v44  ;;  %7851 = vmatpush3.bf16.msra.mxu1 %v8206_v61 }
 0x428   : > { %v3822_v27 = vmul.f32 %v9856_v21, %v3696_v33  ;;  %v3679_v18 = vadd.f32 %v10013_v57, %v3655_v46  ;;  %v3632_v20 = vmul.f32 %v8260_v55, %v9897_v52  ;;  %v3600_v37 = vadd.f32 1e-05, %v3582_v30  ;;  %3814 = vperm.xlu0 %8181, %v3726_v2   ;;  %7888 = vmatprep.subr.bf16.mxu0 %v8382_v1  ;;  %v10090_v52 = vld [vmem:[#allocation2 + $0x1d] sm:$0xff] }
 0x429   : > { %7737 = vmatmul.mubr.msk.bf16.gmra.mxu0 %vm3407_vm2, %v3925_v12  ;;  %7777 = vmatmul.mubr.msk.bf16.gmra.mxu1 %vm3407_vm2, %v3894_v39  ;;  %v3555_v24 = vpop.xlane.xlu0 %3554  ;;  %v10082_v8 = vld [vmem:[#allocation2 + $0x23] sm:$0xff] }
 0x42a   : > { %3862 = vst.msk [vmem:[#allocation2 + $0x38] sm:$0xff] %vm3407_vm2, %v3822_v27  ;;  %v3697_v42 = vmax.f32 %v3679_v18, 0.0  ;;  %v3656_v21 = vmul.f32 %v10007_v38, %v3632_v20  ;;  %8267 = vrsqrt.f32 %v3600_v37  ;;  %v3583_v16 = vmul.f32 0.03125, %v3555_v24  ;;  %7740 = vmatprep.mubr.msk.bf16.mxu0 %vm8383_vm0, %v8382_v1  ;;  %7780 = vmatprep.mubr.msk.bf16.mxu1 %vm8383_vm0, %v8382_v1  ;;  %v10092_v3 = vld [vmem:[#allocation2 + $0x25] sm:$0xff] }
 0x42b   : > { %v8262_v59 = vpop.eup %8261  ;;  %7928 = vmatprep.subr.bf16.mxu1 %v8382_v1  ;;  %v5020_v11 = vpack.c.bf16 %v10082_v8, %v10068_v43  ;;  %v3910_v5 = vld [vmem:[#allocation2 + $0x24] sm:$0xff] }
 0x42c   : > { %v3823_v15 = vmul.f32 %v9966_v50, %v3697_v42  ;;  %v3680_v63 = vadd.f32 %v10013_v57, %v3656_v21  ;;  %v3601_v49 = vadd.f32 1e-05, %v3583_v16  ;;  %v3633_v45 = vmul.f32 %v8262_v59, %v9903_v29  ;;  %v3775_v29 = vpop.permute.xlu1 %3774  ;;  %v8216_v43 = vld [vmem:[%s11252_s5 + $0x80] sm:$0xff]  }
 0x42d   : > { %v3911_v54 = vld [vmem:[#allocation2 + $0x2c] sm:$0xff] }
 0x42e   : > { %v10102_v31 = vld [vmem:[#allocation2 + $0x2b] sm:$0xff]  ;;  %3863 = vst.msk [vmem:[#allocation2 + $0x40] sm:$0xff] %vm3407_vm2, %v3823_v15  ;;  %v3698_v60 = vmax.f32 %v3680_v63, 0.0  ;;  %8269 = vrsqrt.f32 %v3601_v49  ;;  %v3926_v58 = vpack.c.bf16 %v3911_v54, %v3910_v5  ;;  %v3657_v50 = vmul.f32 %v10007_v38, %v3633_v45 }
 0x42f   : > { %v3895_v13 = vpack.c.bf16 %v10102_v31, %v10082_v8  ;;  %v8264_v19 = vpop.eup %8263 }
 0x430   : > { %v3824_v47 = vmul.f32 %v9964_v51, %v3698_v60  ;;  %v3634_v17 = vmul.f32 %v8264_v19, %v9909_v56  ;;  %v3681_v4 = vadd.f32 %v10013_v57, %v3657_v50  ;;  %v10121_v56 = vld [vmem:[#allocation2 + $0x2d] sm:$0xff]  ;;  %v3780_v39 = vpop.permute.xlu1 %3779 }
 0x431   : > { %7741 = vmatmul.mubr.msk.bf16.gmra.mxu0 %vm3407_vm2, %v3926_v58  ;;  %7781 = vmatmul.mubr.msk.bf16.gmra.mxu1 %vm3407_vm2, %v3895_v13  ;;  %v10113_v28 = vld [vmem:[#allocation2 + $0x33] sm:$0xff]  ;;  %v3770_v7 = vpop.permute.xlu0 %3769 }
 0x432   : > { %3864 = vst.msk [vmem:[#allocation2 + $0x48] sm:$0xff] %vm3407_vm2, %v3824_v47  ;;  %v3658_v26 = vmul.f32 %v10007_v38, %v3634_v17  ;;  %7744 = vmatprep.mubr.msk.bf16.mxu0 %vm8383_vm0, %v8382_v1  ;;  %7784 = vmatprep.mubr.msk.bf16.mxu1 %vm8383_vm0, %v8382_v1  ;;  %v10123_v51 = vld [vmem:[#allocation2 + $0x35] sm:$0xff]  ;;  %v3699_v41 = vmax.f32 %v3681_v4, 0.0 }
 0x433   : > { %v8266_v61 = vpop.eup %8265  ;;  %v3912_v2 = vld [vmem:[#allocation2 + $0x34] sm:$0xff] }
 0x434   : > { %v3682_v9 = vadd.f32 %v10013_v57, %v3658_v26  ;;  %v3635_v34 = vmul.f32 %v8266_v61, %v9915_v32  ;;  %v3825_v10 = vmul.f32 %v3770_v7, %v3699_v41  ;;  %v3785_v45 = vpop.permute.xlu1 %3784 }
 0x435   : > { %v3913_v33 = vld [vmem:[#allocation2 + $0x3c] sm:$0xff] }
 0x436   : > { %v10131_v46 = vld [vmem:[#allocation2 + $0x3b] sm:$0xff]  ;;  %v3700_v30 = vmax.f32 %v3682_v9, 0.0  ;;  %v3659_v25 = vmul.f32 %v10007_v38, %v3635_v34  ;;  %v3927_v40 = vpack.c.bf16 %v3913_v33, %v3912_v2  ;;  %3865 = vst.msk [vmem:[#allocation2 + $0x50] sm:$0xff] %vm3407_vm2, %v3825_v10 }
 0x437   : > { %v3896_v55 = vpack.c.bf16 %v10131_v46, %v10113_v28  ;;  %v8268_v12 = vpop.eup %8267  ;;  %v10149_v42 = vld [vmem:[#allocation2 + $0x3d] sm:$0xff] }
 0x438   : > { %v3826_v27 = vmul.f32 %v3775_v29, %v3700_v30  ;;  %v3683_v32 = vadd.f32 %v10013_v57, %v3659_v25  ;;  %v3636_v18 = vmul.f32 %v8268_v12, %v9921_v53  ;;  %v3790_v41 = vpop.permute.xlu1 %3789 }
 0x439   : > { %7745 = vmatmul.mubr.msk.bf16.gmra.mxu0 %vm3407_vm2, %v3927_v40  ;;  %7785 = vmatmul.mubr.msk.bf16.gmra.mxu1 %vm3407_vm2, %v3896_v55  ;;  %v10141_v20 = vld [vmem:[#allocation2 + $0x43] sm:$0xff] }
 0x43a   : > { %3866 = vst.msk [vmem:[#allocation2 + $0x58] sm:$0xff] %vm3407_vm2, %v3826_v27  ;;  %v3701_v37 = vmax.f32 %v3683_v32, 0.0  ;;  %v3660_v24 = vmul.f32 %v10007_v38, %v3636_v18  ;;  %7748 = vmatprep.mubr.msk.bf16.mxu0 %vm8383_vm0, %v8382_v1  ;;  %7788 = vmatprep.mubr.msk.bf16.mxu1 %vm8383_vm0, %v8382_v1  ;;  %v10151_v53 = vld [vmem:[#allocation2 + $0x45] sm:$0xff] }
 0x43b   : > { %v8270_v16 = vpop.eup %8269  ;;  %v3914_v60 = vld [vmem:[#allocation2 + $0x44] sm:$0xff] }
 0x43c   : > { %v3827_v15 = vmul.f32 %v3780_v39, %v3701_v37  ;;  %v3684_v63 = vadd.f32 %v10013_v57, %v3660_v24  ;;  %v3637_v49 = vmul.f32 %v8270_v16, %v9933_v14 }
 0x43d   : > { %v3915_v58 = vld [vmem:[#allocation2 + $0x4c] sm:$0xff] }
 0x43e   : > { %3867 = vst.msk [vmem:[#allocation2 + $0x60] sm:$0xff] %vm3407_vm2, %v3827_v15  ;;  %v3702_v5 = vmax.f32 %v3684_v63, 0.0  ;;  %v3661_v54 = vmul.f32 %v10007_v38, %v3637_v49  ;;  %v10161_v13 = vld [vmem:[#allocation2 + $0x4b] sm:$0xff]  ;;  %v3928_v19 = vpack.c.bf16 %v3915_v58, %v3914_v60 }
 0x43f   : > { %v3897_v50 = vpack.c.bf16 %v10161_v13, %v10141_v20  ;;  %v10175_v4 = vld [vmem:[#allocation2 + $0x4d] sm:$0xff] }
 0x440   : > { %v3828_v47 = vmul.f32 %v3785_v45, %v3702_v5  ;;  %v3685_v17 = vadd.f32 %v10013_v57, %v3661_v54 }
 0x441   : > { %7749 = vmatmul.mubr.msk.bf16.gmra.mxu0 %vm3407_vm2, %v3928_v19  ;;  %7789 = vmatmul.mubr.msk.bf16.gmra.mxu1 %vm3407_vm2, %v3897_v50  ;;  %v10168_v14 = vld [vmem:[#allocation2 + $0x53] sm:$0xff] }
 0x442   : > { %3868 = vst.msk [vmem:[#allocation2 + $0x68] sm:$0xff] %vm3407_vm2, %v3828_v47  ;;  %v3703_v29 = vmax.f32 %v3685_v17, 0.0  ;;  %7752 = vmatprep.mubr.msk.bf16.mxu0 %vm8383_vm0, %v8382_v1  ;;  %7792 = vmatprep.mubr.msk.bf16.mxu1 %vm8383_vm0, %v8382_v1  ;;  %v10177_v26 = vld [vmem:[#allocation2 + $0x55] sm:$0xff] }
 0x443   : > { %v3916_v7 = vld [vmem:[#allocation2 + $0x54] sm:$0xff] }
 0x444   : > { %v3829_v34 = vmul.f32 %v3790_v41, %v3703_v29 }
 0x445   : > { %v3917_v10 = vld [vmem:[#allocation2 + $0x5c] sm:$0xff] }
 0x446   : > { %v10183_v2 = vld [vmem:[#allocation2 + $0x5b] sm:$0xff]  ;;  %3869 = vst.msk [vmem:[#allocation2 + $0x70] sm:$0xff] %vm3407_vm2, %v3829_v34  ;;  %v3929_v33 = vpack.c.bf16 %v3917_v10, %v3916_v7 }
 0x447   : > { %v3898_v30 = vpack.c.bf16 %v10183_v2, %v10168_v14  ;;  %v10196_v40 = vld [vmem:[#allocation2 + $0x5d] sm:$0xff] }
 0x449   : > { %7753 = vmatmul.mubr.msk.bf16.gmra.mxu0 %vm3407_vm2, %v3929_v33  ;;  %7793 = vmatmul.mubr.msk.bf16.gmra.mxu1 %vm3407_vm2, %v3898_v30  ;;  %v10190_v25 = vld [vmem:[#allocation2 + $0x63] sm:$0xff] }
 0x44a   : > { %7756 = vmatprep.mubr.msk.bf16.mxu0 %vm8383_vm0, %v8382_v1  ;;  %7796 = vmatprep.mubr.msk.bf16.mxu1 %vm8383_vm0, %v8382_v1  ;;  %v10198_v55 = vld [vmem:[#allocation2 + $0x65] sm:$0xff] }
 0x44b   : > { %v3918_v27 = vld [vmem:[#allocation2 + $0x64] sm:$0xff] }
 0x44d   : > { %v3919_v32 = vld [vmem:[#allocation2 + $0x6c] sm:$0xff] }
 0x44e   : > { %v10204_v18 = vld [vmem:[#allocation2 + $0x6b] sm:$0xff]  ;;  %v3930_v37 = vpack.c.bf16 %v3919_v32, %v3918_v27 }
 0x44f   : > { %v3899_v24 = vpack.c.bf16 %v10204_v18, %v10190_v25 }
 0x451   : > { %7757 = vmatmul.mubr.msk.bf16.gmra.mxu0 %vm3407_vm2, %v3930_v37  ;;  %7797 = vmatmul.mubr.msk.bf16.gmra.mxu1 %vm3407_vm2, %v3899_v24 }
 0x452   : > { %7760 = vmatprep.mubr.msk.bf16.mxu0 %vm8383_vm0, %v8382_v1  ;;  %7800 = vmatprep.mubr.msk.bf16.mxu1 %vm8383_vm0, %v8382_v1 }
 0x45e   : > { %v3561_v16 = vpop.xlane.xlu0 %3560 }
 0x45f   : > { %v3585_v15 = vmul.f32 0.03125, %v3561_v16 }
 0x461   : > { %v3603_v63 = vadd.f32 1e-05, %v3585_v15 }
 0x462   : > { %v3567_v49 = vpop.xlane.xlu0 %3566 }
 0x463   : > { %8271 = vrsqrt.f32 %v3603_v63  ;;  %v3587_v45 = vmul.f32 0.03125, %v3567_v49 }
 0x465   : > { %v3605_v5 = vadd.f32 1e-05, %v3587_v45 }
 0x466   : > { %v3558_v54 = vpop.xlane.xlu1 %3557 }
 0x467   : > { %8273 = vrsqrt.f32 %v3605_v5  ;;  %v3584_v60 = vmul.f32 0.03125, %v3558_v54 }
 0x469   : > { %v3602_v58 = vadd.f32 1e-05, %v3584_v60 }
 0x46a   : > { %v3564_v19 = vpop.xlane.xlu1 %3563  ;;  %v3795_v54 = vpop.permute.xlu0 %3794 }
 0x46b   : > { %8275 = vrsqrt.f32 %v3602_v58  ;;  %v3586_v50 = vmul.f32 0.03125, %v3564_v19 }
 0x46d   : > { %v3604_v47 = vadd.f32 1e-05, %v3586_v50 }
 0x46e   : > { %v3800_v33 = vpop.permute.xlu1 %3799 }
 0x46f   : > { %8277 = vrsqrt.f32 %v3604_v47  ;;  %v3805_v47 = vpop.permute.xlu0 %3804 }
 0x470   : > { %v8272_v17 = vpop.eup %8271 }
 0x471   : > { %v3639_v29 = vmul.f32 %v8272_v17, %v9969_v0 }
 0x472   : > { %v3810_v49 = vpop.permute.xlu1 %3809 }
 0x473   : > { %v3663_v41 = vmul.f32 %v10007_v38, %v3639_v29 }
 0x474   : > { %v8274_v34 = vpop.eup %8273 }
 0x475   : > { %v3687_v7 = vadd.f32 %v10013_v57, %v3663_v41  ;;  %v3641_v10 = vmul.f32 %v8274_v34, %v9977_v22 }
 0x477   : > { %v3705_v30 = vmax.f32 %v3687_v7, 0.0  ;;  %v3665_v27 = vmul.f32 %v10007_v38, %v3641_v10 }
 0x478   : > { %v8276_v32 = vpop.eup %8275 }
 0x479   : > { %v3638_v37 = vmul.f32 %v8276_v32, %v9974_v23  ;;  %v3831_v24 = vmul.f32 %v3800_v33, %v3705_v30  ;;  %v3689_v16 = vadd.f32 %v10013_v57, %v3665_v27 }
 0x47b   : > { %v3662_v15 = vmul.f32 %v10007_v38, %v3638_v37  ;;  %3871 = vst.msk [vmem:[#allocation2 + $0x80] sm:$0xff] %vm3407_vm2, %v3831_v24  ;;  %v3707_v0 = vmax.f32 %v3689_v16, 0.0 }
 0x47c   : > { %v8278_v63 = vpop.eup %8277 }
 0x47d   : > { %v3686_v45 = vadd.f32 %v10013_v57, %v3662_v15  ;;  %v3640_v22 = vmul.f32 %v8278_v63, %v9983_v62  ;;  %v3833_v5 = vmul.f32 %v3810_v49, %v3707_v0 }
 0x47f   : > { %v3704_v60 = vmax.f32 %v3686_v45, 0.0  ;;  %v3664_v58 = vmul.f32 %v10007_v38, %v3640_v22  ;;  %3873 = vst.msk [vmem:[#allocation2 + $0x90] sm:$0xff] %vm3407_vm2, %v3833_v5  ;;  %v10234_v38 = vld [vmem:[#allocation2 + $0x6d] sm:$0xff]  ;;  %v4226_v22 = vld [vmem:[#allocation2 + $0x5] sm:$0xff] }
 0x480   : > { %v4227_v5 = vld [vmem:[#allocation2 + $0xd] sm:$0xff] }
 0x481   : > { %v3830_v23 = vmul.f32 %v3795_v54, %v3704_v60  ;;  %v3688_v19 = vadd.f32 %v10013_v57, %v3664_v58  ;;  %v4421_v54 = vld [vmem:[#allocation2 + $0x17] sm:$0xff]  ;;  %v4244_v58 = vpack.c.bf16 %v4227_v5, %v4226_v22  ;;  %v4246_v22 = vpack.c.bf16 %v10121_v56, %v10092_v3  ;;  %v4424_v5 = vld [vmem:[#allocation2 + $0x2f] sm:$0xff] }
 0x483   : > { %3870 = vst.msk [vmem:[#allocation2 + $0x78] sm:$0xff] %vm3407_vm2, %v3830_v23  ;;  %v3706_v50 = vmax.f32 %v3688_v19, 0.0  ;;  %v4420_v23 = vld [vmem:[#allocation2 + $0xf] sm:$0xff] }
 0x484   : > { %v8207_v19 = vld [vmem:[%s11252_s5 + $0x48] sm:$0xff]  }
 0x485   : > { %v3832_v17 = vmul.f32 %v3805_v47, %v3706_v50  ;;  %v4438_v47 = vpack.c.bf16 %v4421_v54, %v4420_v23  ;;  %v4426_v23 = vld [vmem:[#allocation2 + $0x3f] sm:$0xff] }
 0x487   : > { %3872 = vst.msk [vmem:[#allocation2 + $0x88] sm:$0xff] %vm3407_vm2, %v3832_v17 }
 0x48a   : > { %v3920_v29 = vld [vmem:[#allocation2 + $0x74] sm:$0xff]  ;;  %v3921_v41 = vld [vmem:[#allocation2 + $0x7c] sm:$0xff] }
 0x48b   : > { %v10230_v62 = vld [vmem:[#allocation2 + $0x73] sm:$0xff]  ;;  %v3931_v34 = vpack.c.bf16 %v3921_v41, %v3920_v29  ;;  %v10232_v7 = vld [vmem:[#allocation2 + $0x7b] sm:$0xff] }
 0x48c   : > { %v10236_v10 = vld [vmem:[#allocation2 + $0x75] sm:$0xff]  ;;  %v3900_v33 = vpack.c.bf16 %v10232_v7, %v10230_v62  ;;  %v10252_v32 = vld [vmem:[#allocation2 + $0x7d] sm:$0xff] }
 0x48d   : > { %7761 = vmatmul.mubr.msk.bf16.gmra.mxu0 %vm3407_vm2, %v3931_v34  ;;  %v8208_v29 = vld [vmem:[%s11252_s5 + $0x40] sm:$0xff]  }
 0x48e   : > { %7801 = vmatmul.mubr.msk.bf16.gmra.mxu1 %vm3407_vm2, %v3900_v33  ;;  %7764 = vmatprep.mubr.msk.bf16.mxu0 %vm8383_vm0, %v8382_v1  ;;  %v10248_v27 = vld [vmem:[#allocation2 + $0x83] sm:$0xff]  ;;  %v3923_v15 = vld [vmem:[#allocation2 + $0x8c] sm:$0xff]  ;;  %v4228_v33 = vld [vmem:[#allocation2 + $0x15] sm:$0xff] }
 0x48f   : > { %7804 = vmatprep.mubr.msk.bf16.mxu1 %vm8383_vm0, %v8382_v1  ;;  %v10254_v37 = vld [vmem:[#allocation2 + $0x85] sm:$0xff] }
 0x490   : > { %v3922_v16 = vld [vmem:[#allocation2 + $0x84] sm:$0xff] }
 0x491   : > { %v10260_v63 = vld [vmem:[#allocation2 + $0x8b] sm:$0xff]  ;;  %v3932_v49 = vpack.c.bf16 %v3923_v15, %v3922_v16  ;;  %v4245_v16 = vpack.c.bf16 %v10090_v52, %v4228_v33  ;;  %v4422_v15 = vld [vmem:[#allocation2 + $0x1f] sm:$0xff] }
 0x492   : > { %v3901_v45 = vpack.c.bf16 %v10260_v63, %v10248_v27  ;;  %v4430_v33 = vld [vmem:[#allocation2 + $0x5f] sm:$0xff] }
 0x495   : > { %7765 = vmatmul.mubr.msk.bf16.gmra.mxu0 %vm3407_vm2, %v3932_v49 }
 0x496   : > { %7805 = vmatmul.mubr.msk.bf16.gmra.mxu1 %vm3407_vm2, %v3901_v45  ;;  %7812 = vmatprep.mubr.msk.bf16.mxu0 %vm8383_vm0, %v8382_v1  ;;  %v4425_v45 = vld [vmem:[#allocation2 + $0x37] sm:$0xff] }
 0x497   : > { %7852 = vmatprep.mubr.msk.bf16.mxu1 %vm8383_vm0, %v8382_v1  ;;  %v4440_v54 = vpack.c.bf16 %v4425_v45, %v4424_v5  ;;  %v4250_v45 = vpack.c.bf16 %v10234_v38, %v10198_v55 }
 0x49b   : > { %v3461_v60 = vpop.xlane.xlu0 %3460 }
 0x49c   : > { %v3480_v50 = vmul.f32 0.03125, %v3461_v60  ;;  %v4427_v60 = vld [vmem:[#allocation2 + $0x47] sm:$0xff] }
 0x49d   : > { %7813 = vmatmul.mubr.msk.bf16.vlgmr.msra.gmra.mxu0 %vm3407_vm2, %v4244_v58  ;;  %v4247_v58 = vpack.c.bf16 %v10149_v42, %v10123_v51 }
 0x49e   : > { %v10275_v17 = vsub.f32 %v10017_v6, %v3480_v50  ;;  %7853 = vmatmul.mubr.msk.bf16.vlgmr.msra.gmra.mxu1 %vm3407_vm2, %v4438_v47  ;;  %7816 = vmatprep.mubr.msk.bf16.mxu0 %vm8383_vm0, %v8382_v1  ;;  %v4423_v6 = vld [vmem:[#allocation2 + $0x27] sm:$0xff]  ;;  %v4429_v50 = vld [vmem:[#allocation2 + $0x57] sm:$0xff]  ;;  %v4248_v47 = vpack.c.bf16 %v10175_v4, %v10151_v53 }
 0x49f   : > { %7856 = vmatprep.mubr.msk.bf16.mxu1 %vm8383_vm0, %v8382_v1  ;;  %7889 = vmatpush3.bf16.msra.mxu0 %v8207_v19  ;;  %v4439_v49 = vpack.c.bf16 %v4423_v6, %v4422_v15  ;;  %v4441_v19 = vpack.c.bf16 %v4427_v60, %v4426_v23  ;;  %v4431_v6 = vld [vmem:[#allocation2 + $0x67] sm:$0xff]  ;;  %v4433_v15 = vld [vmem:[#allocation2 + $0x77] sm:$0xff]  ;;  %v4251_v60 = vpack.c.bf16 %v10252_v32, %v10236_v10 }
 0x4a0   : > { %v3516_v41 = vmul.f32 %v10275_v17, %v10275_v17  ;;  %7890 = vmatprep.subr.bf16.mxu0 %v8382_v1 }
 0x4a2   : > { %v3568_v34 = vsel %vm3407_vm2, %v3516_v41, 0.0 }
 0x4a3   : > { %3569 = vadd.xlane.f32.xlu1 %v3568_v34  ;;  %7891 = vmatpush3.bf16.msra.mxu0 %v8208_v29  ;;  %v4428_v29 = vld [vmem:[#allocation2 + $0x4f] sm:$0xff]  ;;  %v4249_v34 = vpack.c.bf16 %v10196_v40, %v10177_v26 }
 0x4a4   : > { %7968 = vmatprep.subr.bf16.mxu0 %v8382_v1  ;;  %v4442_v41 = vpack.c.bf16 %v4429_v50, %v4428_v29  ;;  %v8211_v50 = vld [vmem:[%s11252_s5 + $0x50] sm:$0xff]   ;;  %v4615_v29 = vld [vmem:[#allocation2 + $0x18] sm:$0xff] }
 0x4a5   : > { %7817 = vmatmul.mubr.msk.bf16.gmra.mxu0 %vm3407_vm2, %v4245_v16  ;;  %v4443_v16 = vpack.c.bf16 %v4431_v6, %v4430_v33  ;;  %v4614_v33 = vld [vmem:[#allocation2 + $0x10] sm:$0xff] }
 0x4a6   : > { %7857 = vmatmul.mubr.msk.bf16.gmra.mxu1 %vm3407_vm2, %v4439_v49  ;;  %7820 = vmatprep.mubr.msk.bf16.mxu0 %vm8383_vm0, %v8382_v1  ;;  %v8209_v49 = vld [vmem:[%s11252_s5 + $0x58] sm:$0xff]  }
 0x4a7   : > { %7860 = vmatprep.mubr.msk.bf16.mxu1 %vm8383_vm0, %v8382_v1  ;;  %7929 = vmatpush3.bf16.msra.mxu1 %v8209_v49 }
 0x4a8   : > { %7930 = vmatprep.subr.bf16.mxu1 %v8382_v1 }
 0x4ab   : > { %7931 = vmatpush3.bf16.msra.mxu1 %v8211_v50 }
 0x4ac   : > { %8008 = vmatprep.subr.bf16.mxu1 %v8382_v1 }
 0x4ad   : > { %7821 = vmatmul.mubr.msk.bf16.gmra.mxu0 %vm3407_vm2, %v4246_v22  ;;  %v4432_v22 = vld [vmem:[#allocation2 + $0x6f] sm:$0xff] }
 0x4ae   : > { %7861 = vmatmul.mubr.msk.bf16.gmra.mxu1 %vm3407_vm2, %v4440_v54  ;;  %7824 = vmatprep.mubr.msk.bf16.mxu0 %vm8383_vm0, %v8382_v1  ;;  %v4444_v5 = vpack.c.bf16 %v4433_v15, %v4432_v22  ;;  %v4435_v54 = vld [vmem:[#allocation2 + $0x87] sm:$0xff] }
 0x4af   : > { %7864 = vmatprep.mubr.msk.bf16.mxu1 %vm8383_vm0, %v8382_v1 }
 0x4b5   : > { %7825 = vmatmul.mubr.msk.bf16.gmra.mxu0 %vm3407_vm2, %v4247_v58  ;;  %v4434_v58 = vld [vmem:[#allocation2 + $0x7f] sm:$0xff] }
 0x4b6   : > { %7865 = vmatmul.mubr.msk.bf16.gmra.mxu1 %vm3407_vm2, %v4441_v19  ;;  %7828 = vmatprep.mubr.msk.bf16.mxu0 %vm8383_vm0, %v8382_v1  ;;  %v4445_v23 = vpack.c.bf16 %v4435_v54, %v4434_v58  ;;  %v4243_v19 = vld [vmem:[#allocation2 + $0x8d] sm:$0xff] }
 0x4b7   : > { %7868 = vmatprep.mubr.msk.bf16.mxu1 %vm8383_vm0, %v8382_v1 }
 0x4bd   : > { %7829 = vmatmul.mubr.msk.bf16.gmra.mxu0 %vm3407_vm2, %v4248_v47  ;;  %v4252_v47 = vpack.c.bf16 %v4243_v19, %v10254_v37  ;;  %v4617_v19 = vld [vmem:[#allocation2 + $0x28] sm:$0xff] }
 0x4be   : > { %7869 = vmatmul.mubr.msk.bf16.gmra.mxu1 %vm3407_vm2, %v4442_v41  ;;  %7832 = vmatprep.mubr.msk.bf16.mxu0 %vm8383_vm0, %v8382_v1 }
 0x4bf   : > { %7872 = vmatprep.mubr.msk.bf16.mxu1 %vm8383_vm0, %v8382_v1 }
 0x4c5   : > { %7833 = vmatmul.mubr.msk.bf16.gmra.mxu0 %vm3407_vm2, %v4249_v34 }
 0x4c6   : > { %7873 = vmatmul.mubr.msk.bf16.gmra.mxu1 %vm3407_vm2, %v4443_v16  ;;  %7836 = vmatprep.mubr.msk.bf16.mxu0 %vm8383_vm0, %v8382_v1  ;;  %v8210_v16 = vld [vmem:[%s11252_s5 + $0x68] sm:$0xff]  }
 0x4c7   : > { %7876 = vmatprep.mubr.msk.bf16.mxu1 %vm8383_vm0, %v8382_v1 }
 0x4cd   : > { %7837 = vmatmul.mubr.msk.bf16.gmra.mxu0 %vm3407_vm2, %v4250_v45  ;;  %v4632_v45 = vpack.c.bf16 %v4615_v29, %v4614_v33 }
 0x4ce   : > { %7877 = vmatmul.mubr.msk.bf16.gmra.mxu1 %vm3407_vm2, %v4444_v5  ;;  %7840 = vmatprep.mubr.msk.bf16.mxu0 %vm8383_vm0, %v8382_v1 }
 0x4cf   : > { %7880 = vmatprep.mubr.msk.bf16.mxu1 %vm8383_vm0, %v8382_v1 }
 0x4d5   : > { %7841 = vmatmul.mubr.msk.bf16.gmra.mxu0 %vm3407_vm2, %v4251_v60  ;;  %v8212_v60 = vld [vmem:[%s11252_s5 + $0x60] sm:$0xff]  }
 0x4d6   : > { %7881 = vmatmul.mubr.msk.bf16.gmra.mxu1 %vm3407_vm2, %v4445_v23  ;;  %7844 = vmatprep.mubr.msk.bf16.mxu0 %vm8383_vm0, %v8382_v1 }
 0x4d7   : > { %7884 = vmatprep.mubr.msk.bf16.mxu1 %vm8383_vm0, %v8382_v1 }
 0x4dd   : > { %7845 = vmatmul.mubr.msk.bf16.gmra.mxu0 %vm3407_vm2, %v4252_v47 }
 0x4de   : > { %7892 = vmatprep.mubr.msk.bf16.mxu0 %vm8383_vm0, %v8382_v1 }
 0x4e1   : > { %v4011_v41 = vpop.f32.mrf.mxu0  ;;  %v4155_v6 = vpop.f32.mrf.mxu1 }
 0x4e2   : > { %v10357_v34 = vadd.f32 %v4155_v6, %v4011_v41  ;;  %v4616_v41 = vld [vmem:[#allocation2 + $0x20] sm:$0xff] }
 0x4e3   : > { %v7734_v15 = vpop.f32.mrf.mxu0  ;;  %v7774_v49 = vpop.f32.mrf.mxu1 }
 0x4e4   : > { %v4633_v15 = vpack.c.bf16 %v4617_v19, %v4616_v41 }
 0x4e5   : > { %v4014_v22 = vpop.f32.mrf.mxu0  ;;  %v4158_v5 = vpop.f32.mrf.mxu1  ;;  %7893 = vmatmul.mubr.msk.bf16.vlgmr.msra.gmra.mxu0 %vm3407_vm2, %v4632_v45 }
 0x4e6   : > { %v10363_v54 = vadd.f32 %v4158_v5, %v4014_v22  ;;  %7896 = vmatprep.mubr.msk.bf16.mxu0 %vm8383_vm0, %v8382_v1  ;;  %7969 = vmatpush3.bf16.msra.mxu0 %v8210_v16 }
 0x4e7   : > { %v7735_v58 = vpop.f32.mrf.mxu0  ;;  %v7775_v23 = vpop.f32.mrf.mxu1  ;;  %7970 = vmatprep.subr.bf16.mxu0 %v8382_v1 }
 0x4e8   : > { %v4619_v58 = vld [vmem:[#allocation2 + $0x38] sm:$0xff] }
 0x4e9   : > { %v4019_v50 = vpop.f32.mrf.mxu0  ;;  %v4163_v47 = vpop.f32.mrf.mxu1 }
 0x4ea   : > { %v10371_v29 = vadd.f32 %v4163_v47, %v4019_v50  ;;  %7971 = vmatpush3.bf16.msra.mxu0 %v8212_v60  ;;  %v4618_v47 = vld [vmem:[#allocation2 + $0x30] sm:$0xff] }
 0x4eb   : > { %v7738_v6 = vpop.f32.mrf.mxu0  ;;  %v7778_v33 = vpop.f32.mrf.mxu1  ;;  %8048 = vmatprep.subr.bf16.mxu0 %v8382_v1 }
 0x4ec   : > { %v4634_v6 = vpack.c.bf16 %v4619_v58, %v4618_v47 }
 0x4ed   : > { %v4022_v16 = vpop.f32.mrf.mxu0  ;;  %v4166_v49 = vpop.f32.mrf.mxu1  ;;  %7897 = vmatmul.mubr.msk.bf16.gmra.mxu0 %vm3407_vm2, %v4633_v15 }
 0x4ee   : > { %v10375_v45 = vadd.f32 %v4166_v49, %v4022_v16  ;;  %7900 = vmatprep.mubr.msk.bf16.mxu0 %vm8383_vm0, %v8382_v1 }
 0x4ef   : > { %v7739_v22 = vpop.f32.mrf.mxu0  ;;  %v7779_v5 = vpop.f32.mrf.mxu1 }
 0x4f0   : > { %v4621_v22 = vld [vmem:[#allocation2 + $0x48] sm:$0xff] }
 0x4f1   : > { %v4027_v23 = vpop.f32.mrf.mxu0  ;;  %v4171_v50 = vpop.f32.mrf.mxu1 }
 0x4f2   : > { %v10379_v60 = vadd.f32 %v4171_v50, %v4027_v23  ;;  %v4620_v50 = vld [vmem:[#allocation2 + $0x40] sm:$0xff] }
 0x4f3   : > { %v7742_v19 = vpop.f32.mrf.mxu0  ;;  %v7782_v41 = vpop.f32.mrf.mxu1  ;;  %v4635_v58 = vpack.c.bf16 %v4621_v22, %v4620_v50 }
 0x4f5   : > { %v4030_v33 = vpop.f32.mrf.mxu0  ;;  %v4174_v0 = vpop.f32.mrf.mxu1  ;;  %7901 = vmatmul.mubr.msk.bf16.gmra.mxu0 %vm3407_vm2, %v4634_v6 }
 0x4f6   : > { %v10382_v15 = vadd.f32 %v4174_v0, %v4030_v33  ;;  %7904 = vmatprep.mubr.msk.bf16.mxu0 %vm8383_vm0, %v8382_v1 }
 0x4f7   : > { %v7743_v16 = vpop.f32.mrf.mxu0  ;;  %v7783_v49 = vpop.f32.mrf.mxu1 }
 0x4f8   : > { %v4623_v16 = vld [vmem:[#allocation2 + $0x58] sm:$0xff] }
 0x4f9   : > { %v4035_v5 = vpop.f32.mrf.mxu0  ;;  %v4179_v30 = vpop.f32.mrf.mxu1 }
 0x4fa   : > { %v10386_v23 = vadd.f32 %v4179_v30, %v4035_v5  ;;  %v4622_v5 = vld [vmem:[#allocation2 + $0x50] sm:$0xff] }
 0x4fb   : > { %v7746_v19 = vpop.f32.mrf.mxu0  ;;  %v7786_v41 = vpop.f32.mrf.mxu1  ;;  %v4636_v22 = vpack.c.bf16 %v4623_v16, %v4622_v5 }
 0x4fd   : > { %v4038_v47 = vpop.f32.mrf.mxu0  ;;  %v4182_v39 = vpop.f32.mrf.mxu1  ;;  %7905 = vmatmul.mubr.msk.bf16.gmra.mxu0 %vm3407_vm2, %v4635_v58 }
 0x4fe   : > { %v10389_v0 = vadd.f32 %v4182_v39, %v4038_v47  ;;  %7908 = vmatprep.mubr.msk.bf16.mxu0 %vm8383_vm0, %v8382_v1 }
 0x4ff   : > { %v7747_v6 = vpop.f32.mrf.mxu0  ;;  %v7787_v33 = vpop.f32.mrf.mxu1 }
 0x500   : > { %v4625_v6 = vld [vmem:[#allocation2 + $0x68] sm:$0xff] }
 0x501   : > { %v4043_v49 = vpop.f32.mrf.mxu0  ;;  %v4187_v9 = vpop.f32.mrf.mxu1 }
 0x502   : > { %v10393_v30 = vadd.f32 %v4187_v9, %v4043_v49  ;;  %v4624_v49 = vld [vmem:[#allocation2 + $0x60] sm:$0xff] }
 0x503   : > { %v7750_v19 = vpop.f32.mrf.mxu0  ;;  %v7790_v41 = vpop.f32.mrf.mxu1  ;;  %v4637_v16 = vpack.c.bf16 %v4625_v6, %v4624_v49 }
 0x505   : > { %v4046_v50 = vpop.f32.mrf.mxu0  ;;  %v4190_v59 = vpop.f32.mrf.mxu1  ;;  %7909 = vmatmul.mubr.msk.bf16.gmra.mxu0 %vm3407_vm2, %v4636_v22 }
 0x506   : > { %v10396_v39 = vadd.f32 %v4190_v59, %v4046_v50  ;;  %7912 = vmatprep.mubr.msk.bf16.mxu0 %vm8383_vm0, %v8382_v1 }
 0x507   : > { %v7751_v58 = vpop.f32.mrf.mxu0  ;;  %v7791_v47 = vpop.f32.mrf.mxu1 }
 0x508   : > { %v4627_v58 = vld [vmem:[#allocation2 + $0x78] sm:$0xff] }
 0x509   : > { %v4051_v33 = vpop.f32.mrf.mxu0  ;;  %v4195_v35 = vpop.f32.mrf.mxu1 }
 0x50a   : > { %v10400_v9 = vadd.f32 %v4195_v35, %v4051_v33  ;;  %v4626_v33 = vld [vmem:[#allocation2 + $0x70] sm:$0xff] }
 0x50b   : > { %v7754_v19 = vpop.f32.mrf.mxu0  ;;  %v7794_v41 = vpop.f32.mrf.mxu1  ;;  %v4638_v6 = vpack.c.bf16 %v4627_v58, %v4626_v33 }
 0x50d   : > { %v4054_v5 = vpop.f32.mrf.mxu0  ;;  %v4198_v36 = vpop.f32.mrf.mxu1  ;;  %7913 = vmatmul.mubr.msk.bf16.gmra.mxu0 %vm3407_vm2, %v4637_v16 }
 0x50e   : > { %v10403_v59 = vadd.f32 %v4198_v36, %v4054_v5  ;;  %7916 = vmatprep.mubr.msk.bf16.mxu0 %vm8383_vm0, %v8382_v1 }
 0x50f   : > { %v7755_v22 = vpop.f32.mrf.mxu0  ;;  %v7795_v50 = vpop.f32.mrf.mxu1 }
 0x510   : > { %v4629_v22 = vld [vmem:[#allocation2 + $0x88] sm:$0xff]  ;;  %v4628_v50 = vld [vmem:[#allocation2 + $0x80] sm:$0xff] }
 0x511   : > { %v4059_v47 = vpop.f32.mrf.mxu0  ;;  %v4203_v24 = vpop.f32.mrf.mxu1  ;;  %v4639_v12 = vpack.c.bf16 %v4629_v22, %v4628_v50 }
 0x512   : > { %v10407_v35 = vadd.f32 %v4203_v24, %v4059_v47 }
 0x513   : > { %v7758_v19 = vpop.f32.mrf.mxu0  ;;  %v7798_v41 = vpop.f32.mrf.mxu1 }
 0x514   : > { %v8318_v19 = vld [vmem:[%s11250_s3] ss:$0 sm:$0xff] }
 0x515   : > { %v4062_v49 = vpop.f32.mrf.mxu0  ;;  %v4206_v57 = vpop.f32.mrf.mxu1  ;;  %7917 = vmatmul.mubr.msk.bf16.gmra.mxu0 %vm3407_vm2, %v4638_v6  ;;  %v8319_v6 = vld [vmem:[%s11251_s4] ss:$0 sm:$0xff] }
 0x516   : > { %v10410_v36 = vadd.f32 %v4206_v57, %v4062_v49  ;;  %7920 = vmatprep.mubr.msk.bf16.mxu0 %vm8383_vm0, %v8382_v1 }
 0x517   : > { %v7759_v16 = vpop.f32.mrf.mxu0  ;;  %v7799_v5 = vpop.f32.mrf.mxu1 }
 0x518   : > { %v3815_v16 = vpop.permute.xlu0 %3814 }
 0x51d   : > { %7921 = vmatmul.mubr.msk.bf16.gmra.mxu0 %vm3407_vm2, %v4639_v12 }
 0x51e   : > { %7924 = vmatprep.mubr.msk.bf16.mxu0 %vm8383_vm0, %v8382_v1 }
 0x52c   : > { %v3570_v24 = vpop.xlane.xlu1 %3569 }
 0x52d   : > { %v3588_v58 = vmul.f32 0.03125, %v3570_v24 }
 0x52f   : > { %v3606_v47 = vadd.f32 1e-05, %v3588_v58  ;;  %v4630_v58 = vld [vmem:[#allocation2 + $0x90] sm:$0xff] }
 0x531   : > { %8279 = vrsqrt.f32 %v3606_v47 }
 0x53e   : > { %v8280_v33 = vpop.eup %8279 }
 0x53f   : > { %v3642_v57 = vmul.f32 %v8280_v33, %v10275_v17  ;;  %v4436_v33 = vld [vmem:[#allocation2 + $0x8f] sm:$0xff] }
 0x541   : > { %v3666_v41 = vmul.f32 %v8318_v19, %v3642_v57 }
 0x543   : > { %v3690_v12 = vadd.f32 %v8319_v6, %v3666_v41 }
 0x545   : > { %v3708_v49 = vmax.f32 %v3690_v12, 0.0 }
 0x547   : > { %v3834_v5 = vmul.f32 %v3815_v16, %v3708_v49 }
 0x549   : > { %3874 = vst.msk [vmem:[#allocation2 + $0x98] sm:$0xff] %vm3407_vm2, %v3834_v5  ;;  %v4809_v5 = vld [vmem:[#allocation2 + $0x19] sm:$0xff] }
 0x54d   : > { %v4067_v22 = vpop.f32.mrf.mxu0 }
 0x54e   : > { %v4211_v50 = vpop.f32.mrf.mxu1 }
 0x54f   : > { %v10425_v24 = vadd.f32 %v4211_v50, %v4067_v22  ;;  %v7762_v17 = vpop.f32.mrf.mxu0  ;;  %v4808_v50 = vld [vmem:[#allocation2 + $0x11] sm:$0xff] }
 0x550   : > { %v7802_v47 = vpop.f32.mrf.mxu1  ;;  %v4437_v61 = vld [vmem:[#allocation2 + $0x97] sm:$0xff] }
 0x551   : > { %v4631_v57 = vld [vmem:[#allocation2 + $0x98] sm:$0xff]  ;;  %v4070_v19 = vpop.f32.mrf.mxu0  ;;  %v4446_v21 = vpack.c.bf16 %v4437_v61, %v4436_v33 }
 0x552   : > { %v4640_v44 = vpack.c.bf16 %v4631_v57, %v4630_v58  ;;  %v4214_v48 = vpop.f32.mrf.mxu1  ;;  %v4826_v58 = vpack.c.bf16 %v4809_v5, %v4808_v50 }
 0x553   : > { %v10427_v41 = vadd.f32 %v4214_v48, %v4070_v19  ;;  %v7763_v6 = vpop.f32.mrf.mxu0  ;;  %7885 = vmatmul.mubr.msk.bf16.gmra.mxu1 %vm3407_vm2, %v4446_v21  ;;  %v8214_v21 = vld [vmem:[%s11252_s5 + $0x88] sm:$0xff]  }
 0x554   : > { %7925 = vmatmul.mubr.msk.bf16.gmra.mxu0 %vm3407_vm2, %v4640_v44  ;;  %v7803_v12 = vpop.f32.mrf.mxu1  ;;  %7932 = vmatprep.mubr.msk.bf16.mxu1 %vm8383_vm0, %v8382_v1  ;;  %v8213_v44 = vld [vmem:[%s11252_s5 + $0x78] sm:$0xff]  }
 0x555   : > { %7972 = vmatprep.mubr.msk.bf16.mxu0 %vm8383_vm0, %v8382_v1  ;;  %v4075_v49 = vpop.f32.mrf.mxu0  ;;  %v8215_v12 = vld [vmem:[%s11252_s5 + $0x70] sm:$0xff]  }
 0x556   : > { %v4219_v16 = vpop.f32.mrf.mxu1 }
 0x557   : > { %v10435_v61 = vadd.f32 %v4219_v16, %v4075_v49  ;;  %v7766_v22 = vpop.f32.mrf.mxu0  ;;  %v4811_v49 = vld [vmem:[#allocation2 + $0x29] sm:$0xff] }
 0x558   : > { %v7806_v48 = vpop.f32.mrf.mxu1 }
 0x559   : > { %v4078_v17 = vpop.f32.mrf.mxu0  ;;  %v4810_v48 = vld [vmem:[#allocation2 + $0x21] sm:$0xff] }
 0x55a   : > { %v4222_v47 = vpop.f32.mrf.mxu1 }
 0x55b   : > { %v10443_v33 = vadd.f32 %v4222_v47, %v4078_v17  ;;  %v7767_v57 = vpop.f32.mrf.mxu0  ;;  %7933 = vmatmul.mubr.msk.bf16.vlgmr.msra.gmra.mxu1 %vm3407_vm2, %v4826_v58  ;;  %v4827_v17 = vpack.c.bf16 %v4811_v49, %v4810_v48  ;;  %v11272_v47 = vpack.c.bf16 %v10113_v28, %v10102_v31  ;;  %v4812_v28 = vld [vmem:[#allocation2 + $0x31] sm:$0xff] }
 0x55c   : > { %7973 = vmatmul.mubr.msk.bf16.vlgmr.msra.gmra.mxu0 %vm3407_vm2, %v5020_v11  ;;  %v7807_v19 = vpop.f32.mrf.mxu1  ;;  %7936 = vmatprep.mubr.msk.bf16.mxu1 %vm8383_vm0, %v8382_v1 }
 0x55d   : > { %7976 = vmatprep.mubr.msk.bf16.mxu0 %vm8383_vm0, %v8382_v1  ;;  %v4331_v6 = vpop.f32.mrf.mxu0  ;;  %8009 = vmatpush3.bf16.msra.mxu1 %v8213_v44 }
 0x55e   : > { %8049 = vmatpush3.bf16.msra.mxu0 %v8214_v21  ;;  %v4402_v8 = vadd.f32 %v4331_v6, %v10357_v34  ;;  %v4525_v11 = vpop.f32.mrf.mxu1  ;;  %8010 = vmatprep.subr.bf16.mxu1 %v8382_v1  ;;  %v11271_v21 = vmov 0  }
 0x55f   : > { %8050 = vmatprep.subr.bf16.mxu0 %v8382_v1  ;;  %v7814_v16 = vpop.f32.mrf.mxu0 }
 0x560   : > { %v10463_v5 = vadd.f32 %v4525_v11, %v4402_v8  ;;  %v7854_v22 = vpop.f32.mrf.mxu1 }
 0x561   : > { %v4334_v50 = vpop.f32.mrf.mxu0  ;;  %8011 = vmatpush3.bf16.msra.mxu1 %v8215_v12 }
 0x562   : > { %8051 = vmatpush3.bf16.msra.mxu0 %v8216_v43  ;;  %v4403_v58 = vadd.f32 %v4334_v50, %v10363_v54  ;;  %v4528_v44 = vpop.f32.mrf.mxu1  ;;  %5978 = vmatprep.subr.bf16.mxu1 %v11271_v21  ;;  %v4813_v43 = vld [vmem:[#allocation2 + $0x39] sm:$0xff] }
 0x563   : > { %8124 = vmatprep.subr.bf16.mxu0 %v8382_v1  ;;  %v7815_v34 = vpop.f32.mrf.mxu0  ;;  %7937 = vmatmul.mubr.msk.bf16.gmra.mxu1 %vm3407_vm2, %v4827_v17  ;;  %v4828_v16 = vpack.c.bf16 %v4813_v43, %v4812_v28  ;;  %v11273_v17 = vpack.c.bf16 %v10141_v20, %v10131_v46  ;;  %v4814_v20 = vld [vmem:[#allocation2 + $0x41] sm:$0xff]  ;;  %v11274_v28 = vpack.c.bf16 %v10168_v14, %v10161_v13  ;;  %v4816_v14 = vld [vmem:[#allocation2 + $0x51] sm:$0xff] }
 0x564   : > { %7977 = vmatmul.mubr.msk.bf16.gmra.mxu0 %vm3407_vm2, %v11272_v47  ;;  %v10473_v57 = vadd.f32 %v4528_v44, %v4403_v58  ;;  %v7855_v19 = vpop.f32.mrf.mxu1  ;;  %7940 = vmatprep.mubr.msk.bf16.mxu1 %vm8383_vm0, %v8382_v1  ;;  %v4815_v47 = vld [vmem:[#allocation2 + $0x49] sm:$0xff] }
 0x565   : > { %7980 = vmatprep.mubr.msk.bf16.mxu0 %vm8383_vm0, %v8382_v1  ;;  %v4339_v54 = vpop.f32.mrf.mxu0 }
 0x566   : > { %v4404_v6 = vadd.f32 %v4339_v54, %v10371_v29  ;;  %v4533_v12 = vpop.f32.mrf.mxu1 }
 0x567   : > { %v7818_v8 = vpop.f32.mrf.mxu0 }
 0x568   : > { %v10480_v11 = vadd.f32 %v4533_v12, %v4404_v6  ;;  %v7858_v31 = vpop.f32.mrf.mxu1  ;;  %v4829_v12 = vpack.c.bf16 %v4815_v47, %v4814_v20 }
 0x569   : > { %v4342_v49 = vpop.f32.mrf.mxu0 }
 0x56a   : > { %v4405_v22 = vadd.f32 %v4342_v49, %v10375_v45  ;;  %v4536_v48 = vpop.f32.mrf.mxu1 }
 0x56b   : > { %v7819_v50 = vpop.f32.mrf.mxu0  ;;  %7941 = vmatmul.mubr.msk.bf16.gmra.mxu1 %vm3407_vm2, %v4828_v16 }
 0x56c   : > { %7981 = vmatmul.mubr.msk.bf16.gmra.mxu0 %vm3407_vm2, %v11273_v17  ;;  %v10488_v29 = vadd.f32 %v4536_v48, %v4405_v22  ;;  %v7859_v58 = vpop.f32.mrf.mxu1  ;;  %7944 = vmatprep.mubr.msk.bf16.mxu1 %vm8383_vm0, %v8382_v1  ;;  %v4817_v48 = vld [vmem:[#allocation2 + $0x59] sm:$0xff] }
 0x56d   : > { %7984 = vmatprep.mubr.msk.bf16.mxu0 %vm8383_vm0, %v8382_v1  ;;  %v4347_v44 = vpop.f32.mrf.mxu0 }
 0x56e   : > { %v4406_v45 = vadd.f32 %v4347_v44, %v10379_v60  ;;  %v4541_v34 = vpop.f32.mrf.mxu1  ;;  %v4830_v44 = vpack.c.bf16 %v4817_v48, %v4816_v14  ;;  %v4820_v14 = vld [vmem:[#allocation2 + $0x71] sm:$0xff] }
 0x56f   : > { %v7822_v19 = vpop.f32.mrf.mxu0 }
 0x570   : > { %v10495_v54 = vadd.f32 %v4541_v34, %v4406_v45  ;;  %v7862_v46 = vpop.f32.mrf.mxu1  ;;  %v11275_v19 = vpack.c.bf16 %v10190_v25, %v10183_v2  ;;  %v4818_v25 = vld [vmem:[#allocation2 + $0x61] sm:$0xff] }
 0x571   : > { %v4350_v6 = vpop.f32.mrf.mxu0 }
 0x572   : > { %v4407_v43 = vadd.f32 %v4350_v6, %v10382_v15  ;;  %v4544_v8 = vpop.f32.mrf.mxu1 }
 0x573   : > { %v7823_v31 = vpop.f32.mrf.mxu0  ;;  %7945 = vmatmul.mubr.msk.bf16.gmra.mxu1 %vm3407_vm2, %v4829_v12  ;;  %v4819_v12 = vld [vmem:[#allocation2 + $0x69] sm:$0xff] }
 0x574   : > { %7985 = vmatmul.mubr.msk.bf16.gmra.mxu0 %vm3407_vm2, %v11274_v28  ;;  %v10503_v60 = vadd.f32 %v4544_v8, %v4407_v43  ;;  %v7863_v49 = vpop.f32.mrf.mxu1  ;;  %7948 = vmatprep.mubr.msk.bf16.mxu1 %vm8383_vm0, %v8382_v1  ;;  %v4831_v28 = vpack.c.bf16 %v4819_v12, %v4818_v25  ;;  %v5017_v25 = vld [vmem:[#allocation2 + $0x93] sm:$0xff] }
 0x575   : > { %7988 = vmatprep.mubr.msk.bf16.mxu0 %vm8383_vm0, %v8382_v1  ;;  %v4355_v16 = vpop.f32.mrf.mxu0 }
 0x576   : > { %v4408_v15 = vadd.f32 %v4355_v16, %v10386_v23  ;;  %v4549_v22 = vpop.f32.mrf.mxu1 }
 0x577   : > { %v7826_v50 = vpop.f32.mrf.mxu0 }
 0x578   : > { %v10510_v17 = vadd.f32 %v4549_v22, %v4408_v15  ;;  %v7866_v13 = vpop.f32.mrf.mxu1  ;;  %v11276_v22 = vpack.c.bf16 %v10230_v62, %v10204_v18 }
 0x579   : > { %v4358_v58 = vpop.f32.mrf.mxu0 }
 0x57a   : > { %v4409_v45 = vadd.f32 %v4358_v58, %v10389_v0  ;;  %v4552_v34 = vpop.f32.mrf.mxu1  ;;  %v4821_v58 = vld [vmem:[#allocation2 + $0x79] sm:$0xff] }
 0x57b   : > { %v7827_v47 = vpop.f32.mrf.mxu0  ;;  %7949 = vmatmul.mubr.msk.bf16.gmra.mxu1 %vm3407_vm2, %v4830_v44 }
 0x57c   : > { %7989 = vmatmul.mubr.msk.bf16.gmra.mxu0 %vm3407_vm2, %v11275_v19  ;;  %v10518_v23 = vadd.f32 %v4552_v34, %v4409_v45  ;;  %v7867_v46 = vpop.f32.mrf.mxu1  ;;  %7952 = vmatprep.mubr.msk.bf16.mxu1 %vm8383_vm0, %v8382_v1  ;;  %v4832_v34 = vpack.c.bf16 %v4821_v58, %v4820_v14  ;;  %v4824_v14 = vld [vmem:[#allocation2 + $0x91] sm:$0xff]  ;;  %v4825_v58 = vld [vmem:[#allocation2 + $0x99] sm:$0xff] }
 0x57d   : > { %7992 = vmatprep.mubr.msk.bf16.mxu0 %vm8383_vm0, %v8382_v1  ;;  %v4363_v20 = vpop.f32.mrf.mxu0 }
 0x57e   : > { %v4410_v0 = vadd.f32 %v4363_v20, %v10393_v30  ;;  %v4557_v6 = vpop.f32.mrf.mxu1  ;;  %v11277_v20 = vpack.c.bf16 %v10248_v27, %v10232_v7 }
 0x57f   : > { %v7830_v43 = vpop.f32.mrf.mxu0 }
 0x580   : > { %v10525_v8 = vadd.f32 %v4557_v6, %v4410_v0  ;;  %v7870_v2 = vpop.f32.mrf.mxu1  ;;  %v4822_v43 = vld [vmem:[#allocation2 + $0x81] sm:$0xff] }
 0x581   : > { %v4366_v31 = vpop.f32.mrf.mxu0  ;;  %v4823_v2 = vld [vmem:[#allocation2 + $0x89] sm:$0xff] }
 0x582   : > { %v4411_v49 = vadd.f32 %v4366_v31, %v10396_v39  ;;  %v4560_v16 = vpop.f32.mrf.mxu1 }
 0x583   : > { %v7831_v15 = vpop.f32.mrf.mxu0  ;;  %7953 = vmatmul.mubr.msk.bf16.gmra.mxu1 %vm3407_vm2, %v4831_v28 }
 0x584   : > { %7993 = vmatmul.mubr.msk.bf16.gmra.mxu0 %vm3407_vm2, %v11276_v22  ;;  %v10533_v30 = vadd.f32 %v4560_v16, %v4411_v49  ;;  %v7871_v48 = vpop.f32.mrf.mxu1  ;;  %7956 = vmatprep.mubr.msk.bf16.mxu1 %vm8383_vm0, %v8382_v1  ;;  %v4833_v49 = vpack.c.bf16 %v4823_v2, %v4822_v43  ;;  %v5027_v16 = vpack.c.bf16 %v5017_v25, %v10260_v63  ;;  %v5196_v25 = vld [vmem:[#allocation2 + $0x1c] sm:$0xff] }
 0x585   : > { %7996 = vmatprep.mubr.msk.bf16.mxu0 %vm8383_vm0, %v8382_v1  ;;  %v4371_v50 = vpop.f32.mrf.mxu0 }
 0x586   : > { %v4412_v39 = vadd.f32 %v4371_v50, %v10400_v9  ;;  %v4565_v13 = vpop.f32.mrf.mxu1 }
 0x587   : > { %v7834_v44 = vpop.f32.mrf.mxu0 }
 0x588   : > { %v10540_v45 = vadd.f32 %v4565_v13, %v4412_v39  ;;  %v7874_v18 = vpop.f32.mrf.mxu1  ;;  %v5019_v13 = vld [vmem:[#allocation2 + $0xa3] sm:$0xff]  ;;  %v5018_v44 = vld [vmem:[#allocation2 + $0x9b] sm:$0xff] }
 0x589   : > { %v4374_v62 = vpop.f32.mrf.mxu0 }
 0x58a   : > { %v4413_v47 = vadd.f32 %v4374_v62, %v10403_v59  ;;  %v4568_v19 = vpop.f32.mrf.mxu1 }
 0x58b   : > { %v7835_v46 = vpop.f32.mrf.mxu0  ;;  %7957 = vmatmul.mubr.msk.bf16.gmra.mxu1 %vm3407_vm2, %v4832_v34 }
 0x58c   : > { %7997 = vmatmul.mubr.msk.bf16.gmra.mxu0 %vm3407_vm2, %v11277_v20  ;;  %v10548_v9 = vadd.f32 %v4568_v19, %v4413_v47  ;;  %v7875_v0 = vpop.f32.mrf.mxu1  ;;  %7960 = vmatprep.mubr.msk.bf16.mxu1 %vm8383_vm0, %v8382_v1  ;;  %v4834_v19 = vpack.c.bf16 %v4825_v58, %v4824_v14  ;;  %v5028_v46 = vpack.c.bf16 %v5019_v13, %v5018_v44  ;;  %v5200_v14 = vld [vmem:[#allocation2 + $0x3c] sm:$0xff] }
 0x58d   : > { %8000 = vmatprep.mubr.msk.bf16.mxu0 %vm8383_vm0, %v8382_v1  ;;  %v4379_v6 = vpop.f32.mrf.mxu0 }
 0x58e   : > { %v4414_v59 = vadd.f32 %v4379_v6, %v10407_v35  ;;  %v4573_v12 = vpop.f32.mrf.mxu1 }
 0x58f   : > { %v7838_v31 = vpop.f32.mrf.mxu0 }
 0x590   : > { %v10555_v7 = vadd.f32 %v4573_v12, %v4414_v59  ;;  %v7878_v27 = vpop.f32.mrf.mxu1 }
 0x591   : > { %v4382_v28 = vpop.f32.mrf.mxu0 }
 0x592   : > { %v4415_v15 = vadd.f32 %v4382_v28, %v10410_v36  ;;  %v4576_v22 = vpop.f32.mrf.mxu1 }
 0x593   : > { %v7839_v48 = vpop.f32.mrf.mxu0  ;;  %7961 = vmatmul.mubr.msk.bf16.gmra.mxu1 %vm3407_vm2, %v4833_v49 }
 0x594   : > { %8001 = vmatmul.mubr.msk.bf16.gmra.mxu0 %vm3407_vm2, %v5027_v16  ;;  %v10561_v35 = vadd.f32 %v4576_v22, %v4415_v15  ;;  %v7879_v50 = vpop.f32.mrf.mxu1  ;;  %7964 = vmatprep.mubr.msk.bf16.mxu1 %vm8383_vm0, %v8382_v1  ;;  %v11278_v16 = vpack.c.bf16 %v10092_v3, %v10090_v52  ;;  %v5198_v48 = vld [vmem:[#allocation2 + $0x2c] sm:$0xff]  ;;  %v11279_v3 = vpack.c.bf16 %v10123_v51, %v10121_v56 }
 0x595   : > { %8004 = vmatprep.mubr.msk.bf16.mxu0 %vm8383_vm0, %v8382_v1  ;;  %v4387_v39 = vpop.f32.mrf.mxu0  ;;  %v11280_v51 = vpack.c.bf16 %v10151_v53, %v10149_v42  ;;  %v11281_v53 = vpack.c.bf16 %v10177_v26, %v10175_v4  ;;  %v11282_v26 = vpack.c.bf16 %v10198_v55, %v10196_v40  ;;  %v11283_v55 = vpack.c.bf16 %v10236_v10, %v10234_v38 }
 0x596   : > { %v4416_v63 = vadd.f32 %v4387_v39, %v10425_v24  ;;  %v4581_v36 = vpop.f32.mrf.mxu1  ;;  %v11284_v10 = vpack.c.bf16 %v10254_v37, %v10252_v32 }
 0x597   : > { %v7842_v18 = vpop.f32.mrf.mxu0 }
 0x598   : > { %v10568_v62 = vadd.f32 %v4581_v36, %v4416_v63  ;;  %v7882_v34 = vpop.f32.mrf.mxu1 }
 0x599   : > { %v4390_v47 = vpop.f32.mrf.mxu0 }
 0x59a   : > { %v4417_v20 = vadd.f32 %v4390_v47, %v10427_v41  ;;  %v4584_v0 = vpop.f32.mrf.mxu1  ;;  %v5197_v41 = vld [vmem:[#allocation2 + $0x24] sm:$0xff] }
 0x59b   : > { %v7843_v6 = vpop.f32.mrf.mxu0  ;;  %7965 = vmatmul.mubr.msk.bf16.gmra.mxu1 %vm3407_vm2, %v4834_v19  ;;  %v5214_v27 = vpack.c.bf16 %v5197_v41, %v5196_v25  ;;  %v5202_v19 = vld [vmem:[#allocation2 + $0x4c] sm:$0xff] }
 0x59c   : > { %8005 = vmatmul.mubr.msk.bf16.gmra.mxu0 %vm3407_vm2, %v5028_v46  ;;  %v10573_v24 = vadd.f32 %v4584_v0, %v4417_v20  ;;  %v7883_v59 = vpop.f32.mrf.mxu1  ;;  %8012 = vmatprep.mubr.msk.bf16.mxu1 %vm8383_vm0, %v8382_v1 }
 0x59d   : > { %8052 = vmatprep.mubr.msk.bf16.mxu0 %vm8383_vm0, %v8382_v1  ;;  %v4395_v12 = vpop.f32.mrf.mxu0 }
 0x59e   : > { %v10580_v43 = vadd.f32 %v4395_v12, %v10435_v61  ;;  %v5204_v12 = vld [vmem:[#allocation2 + $0x5c] sm:$0xff] }
 0x59f   : > { %v7846_v2 = vpop.f32.mrf.mxu0 }
 0x5a1   : > { %v4398_v31 = vpop.f32.mrf.mxu0 }
 0x5a2   : > { %v10583_v28 = vadd.f32 %v4398_v31, %v10443_v33  ;;  %v5199_v33 = vld [vmem:[#allocation2 + $0x34] sm:$0xff] }
 0x5a3   : > { %v7847_v49 = vpop.f32.mrf.mxu0  ;;  %8013 = vmatmul.mubr.msk.bf16.vlgmr.msra.gmra.mxu1 %vm3407_vm2, %v5214_v27  ;;  %v5215_v39 = vpack.c.bf16 %v5199_v33, %v5198_v48 }
 0x5a4   : > { %8053 = vmatmul.mubr.msk.bf16.vlgmr.msra.gmra.mxu0 %vm3407_vm2, %v11278_v16  ;;  %8016 = vmatprep.mubr.msk.bf16.mxu1 %vm8383_vm0, %v8382_v1  ;;  %v5206_v49 = vld [vmem:[#allocation2 + $0x6c] sm:$0xff] }
 0x5a5   : > { %8056 = vmatprep.mubr.msk.bf16.mxu0 %vm8383_vm0, %v8382_v1  ;;  %v4719_v61 = vpop.f32.mrf.mxu0 }
 0x5a6   : > { %v10595_v15 = vadd.f32 %v4719_v61, %v10463_v5 }
 0x5a7   : > { %v7894_v22 = vpop.f32.mrf.mxu0 }
 0x5a9   : > { %v4722_v50 = vpop.f32.mrf.mxu0 }
 0x5aa   : > { %v10598_v13 = vadd.f32 %v4722_v50, %v10473_v57  ;;  %v5201_v57 = vld [vmem:[#allocation2 + $0x44] sm:$0xff]  ;;  %v5208_v50 = vld [vmem:[#allocation2 + $0x7c] sm:$0xff] }
 0x5ab   : > { %v7895_v52 = vpop.f32.mrf.mxu0  ;;  %8017 = vmatmul.mubr.msk.bf16.gmra.mxu1 %vm3407_vm2, %v5215_v39  ;;  %v5216_v44 = vpack.c.bf16 %v5201_v57, %v5200_v14  ;;  %v5405_v57 = vld [vmem:[#allocation2 + $0x95] sm:$0xff]  ;;  %v5210_v14 = vld [vmem:[#allocation2 + $0x8c] sm:$0xff] }
 0x5ac   : > { %8057 = vmatmul.mubr.msk.bf16.gmra.mxu0 %vm3407_vm2, %v11279_v3  ;;  %8020 = vmatprep.mubr.msk.bf16.mxu1 %vm8383_vm0, %v8382_v1 }
 0x5ad   : > { %8060 = vmatprep.mubr.msk.bf16.mxu0 %vm8383_vm0, %v8382_v1  ;;  %v4727_v5 = vpop.f32.mrf.mxu0 }
 0x5ae   : > { %v10610_v63 = vadd.f32 %v4727_v5, %v10480_v11 }
 0x5af   : > { %v7898_v36 = vpop.f32.mrf.mxu0 }
 0x5b1   : > { %v4730_v58 = vpop.f32.mrf.mxu0 }
 0x5b2   : > { %v10613_v18 = vadd.f32 %v4730_v58, %v10488_v29  ;;  %v5203_v29 = vld [vmem:[#allocation2 + $0x54] sm:$0xff] }
 0x5b3   : > { %v7899_v56 = vpop.f32.mrf.mxu0  ;;  %8021 = vmatmul.mubr.msk.bf16.gmra.mxu1 %vm3407_vm2, %v5216_v44  ;;  %v5217_v20 = vpack.c.bf16 %v5203_v29, %v5202_v19  ;;  %v5404_v58 = vld [vmem:[#allocation2 + $0x8d] sm:$0xff]  ;;  %v5406_v19 = vld [vmem:[#allocation2 + $0x9d] sm:$0xff] }
 0x5b4   : > { %8061 = vmatmul.mubr.msk.bf16.gmra.mxu0 %vm3407_vm2, %v11280_v51  ;;  %8024 = vmatprep.mubr.msk.bf16.mxu1 %vm8383_vm0, %v8382_v1  ;;  %v5415_v32 = vpack.c.bf16 %v5405_v57, %v5404_v58 }
 0x5b5   : > { %8064 = vmatprep.mubr.msk.bf16.mxu0 %vm8383_vm0, %v8382_v1  ;;  %v4735_v11 = vpop.f32.mrf.mxu0 }
 0x5b6   : > { %v10625_v34 = vadd.f32 %v4735_v11, %v10495_v54  ;;  %v5213_v11 = vld [vmem:[#allocation2 + $0xa4] sm:$0xff] }
 0x5b7   : > { %v7902_v47 = vpop.f32.mrf.mxu0 }
 0x5b8   : > { %v5212_v47 = vld [vmem:[#allocation2 + $0x9c] sm:$0xff] }
 0x5b9   : > { %v4738_v46 = vpop.f32.mrf.mxu0 }
 0x5ba   : > { %v10628_v0 = vadd.f32 %v4738_v46, %v10503_v60  ;;  %v5205_v60 = vld [vmem:[#allocation2 + $0x64] sm:$0xff] }
 0x5bb   : > { %v7903_v42 = vpop.f32.mrf.mxu0  ;;  %8025 = vmatmul.mubr.msk.bf16.gmra.mxu1 %vm3407_vm2, %v5217_v20  ;;  %v5218_v2 = vpack.c.bf16 %v5205_v60, %v5204_v12 }
 0x5bc   : > { %8065 = vmatmul.mubr.msk.bf16.gmra.mxu0 %vm3407_vm2, %v11281_v53  ;;  %8028 = vmatprep.mubr.msk.bf16.mxu1 %vm8383_vm0, %v8382_v1  ;;  %v5222_v42 = vpack.c.bf16 %v5213_v11, %v5212_v47 }
 0x5bd   : > { %8068 = vmatprep.mubr.msk.bf16.mxu0 %vm8383_vm0, %v8382_v1  ;;  %v4743_v54 = vpop.f32.mrf.mxu0 }
 0x5be   : > { %v10640_v6 = vadd.f32 %v4743_v54, %v10510_v17 }
 0x5bf   : > { %v7906_v59 = vpop.f32.mrf.mxu0 }
 0x5c1   : > { %v4746_v41 = vpop.f32.mrf.mxu0 }
 0x5c2   : > { %v10643_v25 = vadd.f32 %v4746_v41, %v10518_v23  ;;  %v5207_v23 = vld [vmem:[#allocation2 + $0x74] sm:$0xff] }
 0x5c3   : > { %v7907_v4 = vpop.f32.mrf.mxu0  ;;  %8029 = vmatmul.mubr.msk.bf16.gmra.mxu1 %vm3407_vm2, %v5218_v2  ;;  %v5219_v61 = vpack.c.bf16 %v5207_v23, %v5206_v49 }
 0x5c4   : > { %8069 = vmatmul.mubr.msk.bf16.gmra.mxu0 %vm3407_vm2, %v11282_v26  ;;  %8032 = vmatprep.mubr.msk.bf16.mxu1 %vm8383_vm0, %v8382_v1 }
 0x5c5   : > { %8072 = vmatprep.mubr.msk.bf16.mxu0 %vm8383_vm0, %v8382_v1  ;;  %v4751_v17 = vpop.f32.mrf.mxu0 }
 0x5c6   : > { %v10655_v31 = vadd.f32 %v4751_v17, %v10525_v8 }
 0x5c7   : > { %v7910_v27 = vpop.f32.mrf.mxu0 }
 0x5c9   : > { %v4754_v16 = vpop.f32.mrf.mxu0 }
 0x5ca   : > { %v10658_v33 = vadd.f32 %v4754_v16, %v10533_v30  ;;  %v5209_v30 = vld [vmem:[#allocation2 + $0x84] sm:$0xff] }
 0x5cb   : > { %v7911_v40 = vpop.f32.mrf.mxu0  ;;  %8033 = vmatmul.mubr.msk.bf16.gmra.mxu1 %vm3407_vm2, %v5219_v61  ;;  %v5220_v52 = vpack.c.bf16 %v5209_v30, %v5208_v50 }
 0x5cc   : > { %8073 = vmatmul.mubr.msk.bf16.gmra.mxu0 %vm3407_vm2, %v11283_v55  ;;  %8036 = vmatprep.mubr.msk.bf16.mxu1 %vm8383_vm0, %v8382_v1 }
 0x5cd   : > { %8076 = vmatprep.mubr.msk.bf16.mxu0 %vm8383_vm0, %v8382_v1  ;;  %v4759_v8 = vpop.f32.mrf.mxu0 }
 0x5ce   : > { %v10670_v22 = vadd.f32 %v4759_v8, %v10540_v45 }
 0x5cf   : > { %v7914_v48 = vpop.f32.mrf.mxu0 }
 0x5d1   : > { %v4762_v39 = vpop.f32.mrf.mxu0 }
 0x5d2   : > { %v10673_v3 = vadd.f32 %v4762_v39, %v10548_v9  ;;  %v5211_v9 = vld [vmem:[#allocation2 + $0x94] sm:$0xff] }
 0x5d3   : > { %v7915_v38 = vpop.f32.mrf.mxu0  ;;  %8037 = vmatmul.mubr.msk.bf16.gmra.mxu1 %vm3407_vm2, %v5220_v52  ;;  %v5221_v56 = vpack.c.bf16 %v5211_v9, %v5210_v14 }
 0x5d4   : > { %8077 = vmatmul.mubr.msk.bf16.gmra.mxu0 %vm3407_vm2, %v11284_v10  ;;  %8040 = vmatprep.mubr.msk.bf16.mxu1 %vm8383_vm0, %v8382_v1 }
 0x5d5   : > { %8080 = vmatprep.mubr.msk.bf16.mxu0 %vm8383_vm0, %v8382_v1  ;;  %v4767_v45 = vpop.f32.mrf.mxu0 }
 0x5d6   : > { %v10685_v5 = vadd.f32 %v4767_v45, %v10555_v7 }
 0x5d7   : > { %v7918_v36 = vpop.f32.mrf.mxu0 }
 0x5d9   : > { %v4770_v44 = vpop.f32.mrf.mxu0 }
 0x5da   : > { %v10688_v37 = vadd.f32 %v4770_v44, %v10561_v35  ;;  %v5407_v35 = vld [vmem:[#allocation2 + $0xa5] sm:$0xff] }
 0x5db   : > { %v7919_v51 = vpop.f32.mrf.mxu0  ;;  %8041 = vmatmul.mubr.msk.bf16.gmra.mxu1 %vm3407_vm2, %v5221_v56  ;;  %v5416_v53 = vpack.c.bf16 %v5407_v35, %v5406_v19 }
 0x5dc   : > { %8081 = vmatmul.mubr.msk.bf16.gmra.mxu0 %vm3407_vm2, %v5415_v32  ;;  %8044 = vmatprep.mubr.msk.bf16.mxu1 %vm8383_vm0, %v8382_v1 }
 0x5dd   : > { %8084 = vmatprep.mubr.msk.bf16.mxu0 %vm8383_vm0, %v8382_v1  ;;  %v4775_v7 = vpop.f32.mrf.mxu0 }
 0x5de   : > { %v10697_v29 = vadd.f32 %v4775_v7, %v10568_v62 }
 0x5df   : > { %v7922_v46 = vpop.f32.mrf.mxu0 }
 0x5e1   : > { %v4778_v20 = vpop.f32.mrf.mxu0 }
 0x5e2   : > { %v10700_v54 = vadd.f32 %v4778_v20, %v10573_v24 }
 0x5e3   : > { %v7923_v60 = vpop.f32.mrf.mxu0  ;;  %8045 = vmatmul.mubr.msk.bf16.gmra.mxu1 %vm3407_vm2, %v5222_v42 }
 0x5e4   : > { %8085 = vmatmul.mubr.msk.bf16.gmra.mxu0 %vm3407_vm2, %v5416_v53 }
 0x5e5   : > { %8132 = vmatprep.mubr.msk.bf16.mxu0 %vm8383_vm0, %v8382_v1 }
 0x613   : > { %v4589_v62 = vpop.f32.mrf.mxu1 }
 0x614   : > { %v4783_v59 = vpop.f32.mrf.mxu0  ;;  %v4612_v12 = vadd.f32 %v4589_v62, %v10580_v43 }
 0x615   : > { %v7886_v41 = vpop.f32.mrf.mxu1 }
 0x616   : > { %v7926_v2 = vpop.f32.mrf.mxu0  ;;  %v10707_v4 = vadd.f32 %v4783_v59, %v4612_v12 }
 0x617   : > { %v4592_v26 = vpop.f32.mrf.mxu1 }
 0x618   : > { %v4786_v17 = vpop.f32.mrf.mxu0  ;;  %v4613_v24 = vadd.f32 %v4592_v26, %v10583_v28 }
 0x619   : > { %v7887_v23 = vpop.f32.mrf.mxu1 }
 0x61a   : > { %v7927_v27 = vpop.f32.mrf.mxu0  ;;  %v10710_v49 = vadd.f32 %v4786_v17, %v4613_v24 }
 0x61b   : > { %v4913_v16 = vpop.f32.mrf.mxu1 }
 0x61c   : > { %v5107_v61 = vpop.f32.mrf.mxu0  ;;  %v4984_v40 = vadd.f32 %v4913_v16, %v10595_v15 }
 0x61d   : > { %v7934_v55 = vpop.f32.mrf.mxu1 }
 0x61e   : > { %v7974_v8 = vpop.f32.mrf.mxu0  ;;  %v10713_v30 = vadd.f32 %v5107_v61, %v4984_v40 }
 0x61f   : > { %v4916_v43 = vpop.f32.mrf.mxu1 }
 0x620   : > { %v5110_v48 = vpop.f32.mrf.mxu0  ;;  %v4985_v50 = vadd.f32 %v4916_v43, %v10598_v13 }
 0x621   : > { %v7935_v39 = vpop.f32.mrf.mxu1 }
 0x622   : > { %v7975_v52 = vpop.f32.mrf.mxu0  ;;  %v10716_v38 = vadd.f32 %v5110_v48, %v4985_v50 }
 0x623   : > { %v4921_v28 = vpop.f32.mrf.mxu1 }
 0x624   : > { %v5115_v10 = vpop.f32.mrf.mxu0  ;;  %v4986_v45 = vadd.f32 %v4921_v28, %v10610_v63 }
 0x625   : > { %v7938_v9 = vpop.f32.mrf.mxu1 }
 0x626   : > { %v7978_v57 = vpop.f32.mrf.mxu0  ;;  %v10719_v36 = vadd.f32 %v5115_v10, %v4986_v45 }
 0x627   : > { %v4924_v15 = vpop.f32.mrf.mxu1 }
 0x628   : > { %v5118_v14 = vpop.f32.mrf.mxu0  ;;  %v4987_v58 = vadd.f32 %v4924_v15, %v10613_v18 }
 0x629   : > { %v7939_v44 = vpop.f32.mrf.mxu1 }
 0x62a   : > { %v7979_v56 = vpop.f32.mrf.mxu0  ;;  %v10722_v32 = vadd.f32 %v5118_v14, %v4987_v58 }
 0x62b   : > { %v4929_v13 = vpop.f32.mrf.mxu1 }
 0x62c   : > { %v5123_v51 = vpop.f32.mrf.mxu0  ;;  %v4988_v7 = vadd.f32 %v4929_v13, %v10625_v34 }
 0x62d   : > { %v7942_v11 = vpop.f32.mrf.mxu1 }
 0x62e   : > { %v7982_v47 = vpop.f32.mrf.mxu0  ;;  %v10725_v19 = vadd.f32 %v5123_v51, %v4988_v7 }
 0x62f   : > { %v4932_v63 = vpop.f32.mrf.mxu1 }
 0x630   : > { %v5126_v35 = vpop.f32.mrf.mxu0  ;;  %v4989_v46 = vadd.f32 %v4932_v63, %v10628_v0 }
 0x631   : > { %v7943_v20 = vpop.f32.mrf.mxu1 }
 0x632   : > { %v7983_v42 = vpop.f32.mrf.mxu0  ;;  %v10728_v53 = vadd.f32 %v5126_v35, %v4989_v46 }
 0x633   : > { %v4937_v18 = vpop.f32.mrf.mxu1 }
 0x634   : > { %v5131_v60 = vpop.f32.mrf.mxu0  ;;  %v4990_v62 = vadd.f32 %v4937_v18, %v10640_v6 }
 0x635   : > { %v7946_v59 = vpop.f32.mrf.mxu1 }
 0x636   : > { %v7986_v12 = vpop.f32.mrf.mxu0  ;;  %v10731_v41 = vadd.f32 %v5131_v60, %v4990_v62 }
 0x637   : > { %v4940_v34 = vpop.f32.mrf.mxu1 }
 0x638   : > { %v5134_v2 = vpop.f32.mrf.mxu0  ;;  %v4991_v26 = vadd.f32 %v4940_v34, %v10643_v25 }
 0x639   : > { %v7947_v17 = vpop.f32.mrf.mxu1 }
 0x63a   : > { %v7987_v24 = vpop.f32.mrf.mxu0  ;;  %v10734_v23 = vadd.f32 %v5134_v2, %v4991_v26 }
 0x63b   : > { %v4945_v0 = vpop.f32.mrf.mxu1 }
 0x63c   : > { %v5139_v27 = vpop.f32.mrf.mxu0  ;;  %v4992_v16 = vadd.f32 %v4945_v0, %v10655_v31 }
 0x63d   : > { %v7950_v61 = vpop.f32.mrf.mxu1 }
 0x63e   : > { %v7990_v40 = vpop.f32.mrf.mxu0  ;;  %v10737_v55 = vadd.f32 %v5139_v27, %v4992_v16 }
 0x63f   : > { %v4948_v6 = vpop.f32.mrf.mxu1 }
 0x640   : > { %v5142_v8 = vpop.f32.mrf.mxu0  ;;  %v4993_v43 = vadd.f32 %v4948_v6, %v10658_v33 }
 0x641   : > { %v7951_v48 = vpop.f32.mrf.mxu1 }
 0x642   : > { %v7991_v50 = vpop.f32.mrf.mxu0  ;;  %v10740_v39 = vadd.f32 %v5142_v8, %v4993_v43 }
 0x643   : > { %v4953_v25 = vpop.f32.mrf.mxu1 }
 0x644   : > { %v5147_v52 = vpop.f32.mrf.mxu0  ;;  %v4994_v28 = vadd.f32 %v4953_v25, %v10670_v22 }
 0x645   : > { %v7954_v10 = vpop.f32.mrf.mxu1 }
 0x646   : > { %v7994_v45 = vpop.f32.mrf.mxu0  ;;  %v10743_v9 = vadd.f32 %v5147_v52, %v4994_v28 }
 0x647   : > { %v4956_v31 = vpop.f32.mrf.mxu1 }
 0x648   : > { %v5150_v57 = vpop.f32.mrf.mxu0  ;;  %v4995_v15 = vadd.f32 %v4956_v31, %v10673_v3 }
 0x649   : > { %v7955_v14 = vpop.f32.mrf.mxu1 }
 0x64a   : > { %v7995_v58 = vpop.f32.mrf.mxu0  ;;  %v10746_v44 = vadd.f32 %v5150_v57, %v4995_v15 }
 0x64b   : > { %v4961_v33 = vpop.f32.mrf.mxu1 }
 0x64c   : > { %v5155_v56 = vpop.f32.mrf.mxu0  ;;  %v4996_v13 = vadd.f32 %v4961_v33, %v10685_v5 }
 0x64d   : > { %v7958_v51 = vpop.f32.mrf.mxu1 }
 0x64e   : > { %v7998_v7 = vpop.f32.mrf.mxu0  ;;  %v10749_v11 = vadd.f32 %v5155_v56, %v4996_v13 }
 0x64f   : > { %v4964_v22 = vpop.f32.mrf.mxu1 }
 0x650   : > { %v5158_v47 = vpop.f32.mrf.mxu0  ;;  %v4997_v63 = vadd.f32 %v4964_v22, %v10688_v37 }
 0x651   : > { %v7959_v35 = vpop.f32.mrf.mxu1 }
 0x652   : > { %v7999_v46 = vpop.f32.mrf.mxu0  ;;  %v10752_v20 = vadd.f32 %v5158_v47, %v4997_v63 }
 0x653   : > { %v4969_v3 = vpop.f32.mrf.mxu1 }
 0x654   : > { %v5163_v42 = vpop.f32.mrf.mxu0  ;;  %v4998_v18 = vadd.f32 %v4969_v3, %v10697_v29 }
 0x655   : > { %v7962_v60 = vpop.f32.mrf.mxu1 }
 0x656   : > { %v8002_v62 = vpop.f32.mrf.mxu0  ;;  %v10755_v59 = vadd.f32 %v5163_v42, %v4998_v18 }
 0x657   : > { %v4972_v5 = vpop.f32.mrf.mxu1 }
 0x658   : > { %v5166_v12 = vpop.f32.mrf.mxu0  ;;  %v4999_v34 = vadd.f32 %v4972_v5, %v10700_v54 }
 0x659   : > { %v7963_v2 = vpop.f32.mrf.mxu1 }
 0x65a   : > { %v8003_v26 = vpop.f32.mrf.mxu0  ;;  %v10758_v17 = vadd.f32 %v5166_v12, %v4999_v34 }
 0x65b   : > { %v4977_v37 = vpop.f32.mrf.mxu1 }
 0x65c   : > { %v5171_v24 = vpop.f32.mrf.mxu0  ;;  %v5000_v0 = vadd.f32 %v4977_v37, %v10707_v4 }
 0x65d   : > { %v7966_v27 = vpop.f32.mrf.mxu1 }
 0x65e   : > { %v8006_v16 = vpop.f32.mrf.mxu0  ;;  %v10761_v61 = vadd.f32 %v5171_v24, %v5000_v0 }
 0x65f   : > { %v4980_v29 = vpop.f32.mrf.mxu1 }
 0x660   : > { %v5174_v40 = vpop.f32.mrf.mxu0  ;;  %v5001_v6 = vadd.f32 %v4980_v29, %v10710_v49 }
 0x661   : > { %v7967_v8 = vpop.f32.mrf.mxu1 }
 0x662   : > { %v8007_v43 = vpop.f32.mrf.mxu0  ;;  %v10764_v48 = vadd.f32 %v5174_v40, %v5001_v6  ;;  %v10794_v8 = vld [vmem:[%s11253_s6] ss:$0 sm:$0xff] }
 0x663   : > { %v5301_v54 = vpop.f32.mrf.mxu1 }
 0x664   : > { %v5495_v50 = vpop.f32.mrf.mxu0  ;;  %v5372_v25 = vadd.f32 %v5301_v54, %v10713_v30 }
 0x665   : > { %v8014_v52 = vpop.f32.mrf.mxu1 }
 0x666   : > { %v8054_v28 = vpop.f32.mrf.mxu0  ;;  %v10767_v10 = vadd.f32 %v5495_v50, %v5372_v25 }
 0x667   : > { %v5304_v4 = vpop.f32.mrf.mxu1 }
 0x668   : > { %v5498_v45 = vpop.f32.mrf.mxu0 }
 0x669   : > { %v8015_v31 = vpop.f32.mrf.mxu1 }
 0x66a   : > { %v8055_v57 = vpop.f32.mrf.mxu0 }
 0x66b   : > { %v5309_v15 = vpop.f32.mrf.mxu1 }
 0x66c   : > { %v5503_v14 = vpop.f32.mrf.mxu0  ;;  %v5374_v49 = vadd.f32 %v5309_v15, %v10719_v36 }
 0x66d   : > { %v8018_v58 = vpop.f32.mrf.mxu1 }
 0x66e   : > { %v8058_v33 = vpop.f32.mrf.mxu0  ;;  %v10770_v56 = vadd.f32 %v5503_v14, %v5374_v49  ;;  %v5373_v14 = vadd.f32 %v5304_v4, %v10716_v38 }
 0x66f   : > { %v5312_v13 = vpop.f32.mrf.mxu1 }
 0x670   : > { %v5506_v51 = vpop.f32.mrf.mxu0  ;;  %v5375_v25 = vadd.f32 %v5312_v13, %v10722_v32 }
 0x671   : > { %v8019_v7 = vpop.f32.mrf.mxu1 }
 0x672   : > { %v8059_v30 = vpop.f32.mrf.mxu0  ;;  %v5569_v49 = vadd.f32 %v5506_v51, %v5375_v25 }
 0x673   : > { %v10772_v22 = vpop.f32.mrf.mxu1 }
 0x674   : > { %v10774_v47 = vpop.f32.mrf.mxu0 }
 0x675   : > { %v8022_v63 = vpop.f32.mrf.mxu1 }
 0x676   : > { %v8062_v35 = vpop.f32.mrf.mxu0 }
 0x677   : > { %v10776_v46 = vpop.f32.mrf.mxu1  ;;  %v5567_v35 = vadd.f32 %v5498_v45, %v5373_v14 }
 0x678   : > { %v10778_v3 = vpop.f32.mrf.mxu0 }
 0x679   : > { %v8023_v42 = vpop.f32.mrf.mxu1 }
 0x67a   : > { %v8063_v36 = vpop.f32.mrf.mxu0 }
 0x67b   : > { %v10780_v18 = vpop.f32.mrf.mxu1  ;;  %v10811_v36 = vadd.f32 %v10794_v8, %v5569_v49 }
 0x67c   : > { %v10782_v60 = vpop.f32.mrf.mxu0 }
 0x67d   : > { %v8026_v62 = vpop.f32.mrf.mxu1  ;;  %v5621_v45 = vsel %vm5611_vm3, %v10811_v36, 0.0 }
 0x67e   : > { %v8066_v5 = vpop.f32.mrf.mxu0 }
 0x67f   : > { %v10784_v12 = vpop.f32.mrf.mxu1 }
 0x680   : > { %v10786_v34 = vpop.f32.mrf.mxu0 }
 0x681   : > { %v8027_v2 = vpop.f32.mrf.mxu1 }
 0x682   : > { %v8067_v26 = vpop.f32.mrf.mxu0 }
 0x683   : > { %v5333_v37 = vpop.f32.mrf.mxu1 }
 0x684   : > { %v5527_v24 = vpop.f32.mrf.mxu0  ;;  %v5380_v0 = vadd.f32 %v5333_v37, %v10737_v55  ;;  %v10822_v37 = vadd.f32 %v10794_v8, %v5567_v35 }
 0x685   : > { %v8030_v27 = vpop.f32.mrf.mxu1 }
 0x686   : > { %v8070_v16 = vpop.f32.mrf.mxu0  ;;  %v5574_v29 = vadd.f32 %v5527_v24, %v5380_v0 }
 0x687   : > { %v5336_v40 = vpop.f32.mrf.mxu1 }
 0x688   : > { %v10789_v6 = vpop.f32.mrf.mxu0  ;;  %v10797_v43 = vadd.f32 %v10794_v8, %v5574_v29 }
 0x689   : > { %v8031_v54 = vpop.f32.mrf.mxu1 }
 0x68a   : > { %v8071_v50 = vpop.f32.mrf.mxu0  ;;  %v5636_v55 = vsel %vm5611_vm3, %v10797_v43, 0.0 }
 0x68b   : > { %5637 = vadd.xlane.f32.xlu1 %v5636_v55  ;;  %v5341_v28 = vpop.f32.mrf.mxu1  ;;  %v5615_v50 = vsel %vm5611_vm3, %v10822_v37, 0.0 }
 0x68c   : > { %v5535_v52 = vpop.f32.mrf.mxu0  ;;  %v5382_v31 = vadd.f32 %v5341_v28, %v10743_v9 }
 0x68d   : > { %v8034_v57 = vpop.f32.mrf.mxu1 }
 0x68e   : > { %v8074_v15 = vpop.f32.mrf.mxu0  ;;  %v5576_v58 = vadd.f32 %v5535_v52, %v5382_v31 }
 0x68f   : > { %v5344_v33 = vpop.f32.mrf.mxu1  ;;  %v5381_v15 = vadd.f32 %v5336_v40, %v10740_v39 }
 0x690   : > { %v5538_v7 = vpop.f32.mrf.mxu0  ;;  %v5383_v30 = vadd.f32 %v5344_v33, %v10746_v44  ;;  %v10806_v32 = vadd.f32 %v10794_v8, %v5576_v58 }
 0x691   : > { %v8035_v13 = vpop.f32.mrf.mxu1  ;;  %v5575_v35 = vadd.f32 %v10789_v6, %v5381_v15 }
 0x692   : > { %v8075_v63 = vpop.f32.mrf.mxu0  ;;  %v5577_v42 = vadd.f32 %v5538_v7, %v5383_v30  ;;  %v5642_v9 = vsel %vm5611_vm3, %v10806_v32, 0.0 }
 0x693   : > { %5643 = vadd.xlane.f32.xlu0 %v5642_v9  ;;  %v5349_v4 = vpop.f32.mrf.mxu1  ;;  %v5378_v63 = vadd.f32 %v10780_v18, %v10731_v41  ;;  %v10857_v18 = vadd.f32 %v10794_v8, %v5575_v35 }
 0x694   : > { %v5543_v38 = vpop.f32.mrf.mxu0  ;;  %v5384_v51 = vadd.f32 %v5349_v4, %v10749_v11  ;;  %v10815_v44 = vadd.f32 %v10794_v8, %v5577_v42 }
 0x695   : > { %v8038_v62 = vpop.f32.mrf.mxu1 }
 0x696   : > { %v8078_v5 = vpop.f32.mrf.mxu0  ;;  %v5578_v2 = vadd.f32 %v5543_v38, %v5384_v51  ;;  %v5645_v26 = vsel %vm5611_vm3, %v10815_v44, 0.0  ;;  %v5572_v51 = vadd.f32 %v10782_v60, %v5378_v63  ;;  %v5379_v62 = vadd.f32 %v10784_v12, %v10734_v23 }
 0x697   : > { %5622 = vadd.xlane.f32.xlu0 %v5621_v45  ;;  %5646 = vadd.xlane.f32.xlu1 %v5645_v26  ;;  %v5352_v0 = vpop.f32.mrf.mxu1  ;;  %v5376_v45 = vadd.f32 %v10772_v22, %v10725_v19  ;;  %v5639_v23 = vsel %vm5611_vm3, %v10857_v18, 0.0  ;;  %v5377_v19 = vadd.f32 %v10776_v46, %v10728_v53 }
 0x698   : > { %v5546_v24 = vpop.f32.mrf.mxu0  ;;  %v5385_v11 = vadd.f32 %v5352_v0, %v10752_v20  ;;  %v10826_v27 = vadd.f32 %v10794_v8, %v5578_v2  ;;  %v5573_v60 = vadd.f32 %v10786_v34, %v5379_v62  ;;  %v10866_v12 = vadd.f32 %v10794_v8, %v5572_v51 }
 0x699   : > { %v8039_v16 = vpop.f32.mrf.mxu1 }
 0x69a   : > { %v8079_v29 = vpop.f32.mrf.mxu0  ;;  %v5579_v54 = vadd.f32 %v5546_v24, %v5385_v11  ;;  %v5648_v25 = vsel %vm5611_vm3, %v10826_v27, 0.0  ;;  %v5630_v22 = vsel %vm5611_vm3, %v10866_v12, 0.0  ;;  %v10879_v16 = vadd.f32 %v10794_v8, %v5573_v60 }
 0x69b   : > { %5616 = vadd.xlane.f32.xlu0 %v5615_v50  ;;  %5649 = vadd.xlane.f32.xlu1 %v5648_v25  ;;  %v5357_v52 = vpop.f32.mrf.mxu1  ;;  %v5571_v29 = vadd.f32 %v10778_v3, %v5377_v19  ;;  %v10897_v3 = vadd.f32 %v10794_v8, %v10770_v56 }
 0x69c   : > { %v5551_v55 = vpop.f32.mrf.mxu0  ;;  %v5386_v28 = vadd.f32 %v5357_v52, %v10755_v59  ;;  %v10834_v20 = vadd.f32 %v10794_v8, %v5579_v54  ;;  %v5633_v54 = vsel %vm5611_vm3, %v10879_v16, 0.0 }
 0x69d   : > { %v8042_v31 = vpop.f32.mrf.mxu1  ;;  %v10890_v46 = vadd.f32 %v10794_v8, %v5571_v29  ;;  %v5618_v52 = vsel %vm5611_vm3, %v10897_v3, 0.0 }
 0x69e   : > { %v8082_v57 = vpop.f32.mrf.mxu0  ;;  %v5580_v14 = vadd.f32 %v5551_v55, %v5386_v28  ;;  %v5651_v49 = vsel %vm5611_vm3, %v10834_v20, 0.0  ;;  %v10903_v28 = vadd.f32 %v10794_v8, %v10767_v10 }
 0x69f   : > { %5652 = vadd.xlane.f32.xlu1 %v5651_v49  ;;  %v5360_v33 = vpop.f32.mrf.mxu1  ;;  %v5627_v25 = vsel %vm5611_vm3, %v10890_v46, 0.0 }
 0x6a0   : > { %v5554_v58 = vpop.f32.mrf.mxu0  ;;  %v5387_v7 = vadd.f32 %v5360_v33, %v10758_v17  ;;  %v10841_v30 = vadd.f32 %v10794_v8, %v5580_v14 }
 0x6a1   : > { %v8043_v59 = vpop.f32.mrf.mxu1 }
 0x6a2   : > { %v8083_v13 = vpop.f32.mrf.mxu0  ;;  %v5581_v39 = vadd.f32 %v5554_v58, %v5387_v7  ;;  %v5654_v40 = vsel %vm5611_vm3, %v10841_v30, 0.0 }
 0x6a3   : > { %5655 = vadd.xlane.f32.xlu1 %v5654_v40  ;;  %v5365_v9 = vpop.f32.mrf.mxu1 }
 0x6a4   : > { %v5559_v42 = vpop.f32.mrf.mxu0  ;;  %v10849_v38 = vadd.f32 %v10794_v8, %v5581_v39  ;;  %v5388_v50 = vadd.f32 %v5365_v9, %v10761_v61  ;;  %v5612_v61 = vsel %vm5611_vm3, %v10903_v28, 0.0 }
 0x6a5   : > { %v8046_v17 = vpop.f32.mrf.mxu1 }
 0x6a6   : > { %v8086_v4 = vpop.f32.mrf.mxu0  ;;  %v5657_v41 = vsel %vm5611_vm3, %v10849_v38, 0.0  ;;  %v5582_v55 = vadd.f32 %v5559_v42, %v5388_v50 }
 0x6a7   : > { %5658 = vadd.xlane.f32.xlu1 %v5657_v41  ;;  %v5368_v5 = vpop.f32.mrf.mxu1 }
 0x6a8   : > { %v5562_v6 = vpop.f32.mrf.mxu0  ;;  %v5389_v2 = vadd.f32 %v5368_v5, %v10764_v48  ;;  %v5570_v48 = vadd.f32 %v10774_v47, %v5376_v45  ;;  %v10908_v31 = vadd.f32 %v10794_v8, %v5582_v55 }
 0x6a9   : > { %v8047_v26 = vpop.f32.mrf.mxu1 }
 0x6aa   : > { %v8087_v24 = vpop.f32.mrf.mxu0  ;;  %v5583_v0 = vadd.f32 %v5562_v6, %v5389_v2  ;;  %v10885_v47 = vadd.f32 %v10794_v8, %v5570_v48  ;;  %v5660_v56 = vsel %vm5611_vm3, %v10908_v31, 0.0 }
 0x6ab   : > { %5640 = vadd.xlane.f32.xlu1 %v5639_v23 }
 0x6ac   : > { %v10869_v11 = vadd.f32 %v10794_v8, %v5583_v0  ;;  %v5624_v53 = vsel %vm5611_vm3, %v10885_v47, 0.0 }
 0x6ae   : > { %v5663_v34 = vsel %vm5611_vm3, %v10869_v11, 0.0 }
 0x6af   : > { %5631 = vadd.xlane.f32.xlu1 %v5630_v22  ;;  %5664 = vadd.xlane.f32.xlu0 %v5663_v34 }
 0x6b3   : > { %5634 = vadd.xlane.f32.xlu1 %v5633_v54 }
 0x6b7   : > { %5625 = vadd.xlane.f32.xlu1 %v5624_v53 }
 0x6bb   : > { %5628 = vadd.xlane.f32.xlu1 %v5627_v25 }
 0x6bf   : > { %5619 = vadd.xlane.f32.xlu1 %v5618_v52 }
 0x6c3   : > { %5613 = vadd.xlane.f32.xlu1 %v5612_v61 }
 0x6c7   : > { %5661 = vadd.xlane.f32.xlu1 %v5660_v56 }
 0x714   : > { %v5638_v57 = vpop.xlane.xlu1 %5637 }
 0x715   : > { %v5675_v42 = vmul.f32 0.015625, %v5638_v57 }
 0x71c   : > { %v5644_v58 = vpop.xlane.xlu0 %5643 }
 0x71d   : > { %v5677_v59 = vmul.f32 0.015625, %v5644_v58 }
 0x71f   : > { %v10921_v9 = vsub.f32 %v10806_v32, %v5677_v59  ;;  %v10935_v32 = vsub.f32 %v10797_v43, %v5675_v42 }
 0x720   : > { %v5647_v15 = vpop.xlane.xlu1 %5646  ;;  %v5623_v34 = vpop.xlane.xlu0 %5622 }
 0x721   : > { %v5678_v17 = vmul.f32 0.015625, %v5647_v15  ;;  %v5670_v55 = vmul.f32 0.015625, %v5623_v34 }
 0x723   : > { %v10938_v6 = vsub.f32 %v10815_v44, %v5678_v17  ;;  %v5711_v44 = vmul.f32 %v10935_v32, %v10935_v32  ;;  %v10977_v58 = vsub.f32 %v10811_v36, %v5670_v55 }
 0x724   : > { %v5650_v14 = vpop.xlane.xlu1 %5649  ;;  %v5617_v57 = vpop.xlane.xlu0 %5616 }
 0x725   : > { %v5679_v33 = vmul.f32 0.015625, %v5650_v14  ;;  %v5714_v48 = vmul.f32 %v10938_v6, %v10938_v6  ;;  %v5745_v29 = vsel %vm5611_vm3, %v5711_v44, 0.0  ;;  %v5706_v36 = vmul.f32 %v10977_v58, %v10977_v58 }
 0x727   : > { %v10913_v13 = vsub.f32 %v10826_v27, %v5679_v33 }
 0x728   : > { %v5653_v49 = vpop.xlane.xlu1 %5652 }
 0x729   : > { %v5680_v63 = vmul.f32 0.015625, %v5653_v49 }
 0x72b   : > { %v10924_v4 = vsub.f32 %v10834_v20, %v5680_v63  ;;  %v5713_v20 = vmul.f32 %v10921_v9, %v10921_v9 }
 0x72c   : > { %v5656_v10 = vpop.xlane.xlu1 %5655 }
 0x72d   : > { %v5681_v7 = vmul.f32 0.015625, %v5656_v10  ;;  %v5716_v45 = vmul.f32 %v10924_v4, %v10924_v4  ;;  %v5751_v43 = vsel %vm5611_vm3, %v5713_v20, 0.0 }
 0x72f   : > { %v10916_v8 = vsub.f32 %v10841_v30, %v5681_v7  ;;  %v5715_v30 = vmul.f32 %v10913_v13, %v10913_v13  ;;  %v5760_v23 = vsel %vm5611_vm3, %v5716_v45, 0.0 }
 0x730   : > { %v5659_v35 = vpop.xlane.xlu1 %5658 }
 0x731   : > { %v5682_v39 = vmul.f32 0.015625, %v5659_v35  ;;  %v5717_v40 = vmul.f32 %v10916_v8, %v10916_v8  ;;  %v5757_v5 = vsel %vm5611_vm3, %v5715_v30, 0.0 }
 0x733   : > { %v10927_v27 = vsub.f32 %v10849_v38, %v5682_v39  ;;  %v5763_v51 = vsel %vm5611_vm3, %v5717_v40, 0.0 }
 0x734   : > { %v5641_v62 = vpop.xlane.xlu1 %5640  ;;  %5764 = vadd.xlane.f32.xlu1 %v5763_v51 }
 0x735   : > { %v5718_v41 = vmul.f32 %v10927_v27, %v10927_v27  ;;  %v5676_v38 = vmul.f32 0.015625, %v5641_v62 }
 0x737   : > { %v5766_v2 = vsel %vm5611_vm3, %v5718_v41, 0.0  ;;  %v10950_v60 = vsub.f32 %v10857_v18, %v5676_v38  ;;  %v5754_v18 = vsel %vm5611_vm3, %v5714_v48, 0.0  ;;  %v5730_v41 = vsel %vm5611_vm3, %v5706_v36, 0.0 }
 0x738   : > { %v5632_v26 = vpop.xlane.xlu1 %5631  ;;  %5758 = vadd.xlane.f32.xlu1 %v5757_v5  ;;  %5767 = vadd.xlane.f32.xlu0 %v5766_v2  ;;  %v5665_v59 = vpop.xlane.xlu0 %5664 }
 0x739   : > { %v5673_v24 = vmul.f32 0.015625, %v5632_v26  ;;  %v5712_v53 = vmul.f32 %v10950_v60, %v10950_v60 }
 0x73b   : > { %v10953_v0 = vsub.f32 %v10866_v12, %v5673_v24 }
 0x73c   : > { %v5635_v19 = vpop.xlane.xlu1 %5634  ;;  %5752 = vadd.xlane.f32.xlu1 %v5751_v43  ;;  %5761 = vadd.xlane.f32.xlu0 %v5760_v23 }
 0x73d   : > { %v5674_v22 = vmul.f32 0.015625, %v5635_v19  ;;  %v5709_v12 = vmul.f32 %v10953_v0, %v10953_v0 }
 0x73f   : > { %v10960_v54 = vsub.f32 %v10879_v16, %v5674_v22  ;;  %v5739_v61 = vsel %vm5611_vm3, %v5709_v12, 0.0  ;;  %v5748_v16 = vsel %vm5611_vm3, %v5712_v53, 0.0 }
 0x740   : > { %v5626_v50 = vpop.xlane.xlu1 %5625  ;;  %5746 = vadd.xlane.f32.xlu1 %v5745_v29  ;;  %5755 = vadd.xlane.f32.xlu0 %v5754_v18 }
 0x741   : > { %v5671_v25 = vmul.f32 0.015625, %v5626_v50  ;;  %v5710_v56 = vmul.f32 %v10960_v54, %v10960_v54 }
 0x743   : > { %v10968_v52 = vsub.f32 %v10885_v47, %v5671_v25  ;;  %v5668_v47 = vmul.f32 0.015625, %v5617_v57  ;;  %v5742_v7 = vsel %vm5611_vm3, %v5710_v56, 0.0 }
 0x744   : > { %v5629_v15 = vpop.xlane.xlu1 %5628  ;;  %5740 = vadd.xlane.f32.xlu1 %v5739_v61  ;;  %5749 = vadd.xlane.f32.xlu0 %v5748_v16 }
 0x745   : > { %v5672_v14 = vmul.f32 0.015625, %v5629_v15  ;;  %v5707_v49 = vmul.f32 %v10968_v52, %v10968_v52  ;;  %v10989_v40 = vsub.f32 %v10822_v37, %v5668_v47 }
 0x747   : > { %v10980_v33 = vsub.f32 %v10890_v46, %v5672_v14  ;;  %v5733_v10 = vsel %vm5611_vm3, %v5707_v49, 0.0  ;;  %v5684_v46 = vmul.f32 0.015625, %v5665_v59 }
 0x748   : > { %v5620_v63 = vpop.xlane.xlu1 %5619  ;;  %5734 = vadd.xlane.f32.xlu1 %v5733_v10  ;;  %5743 = vadd.xlane.f32.xlu0 %v5742_v7 }
 0x749   : > { %v5669_v35 = vmul.f32 0.015625, %v5620_v63  ;;  %v5708_v39 = vmul.f32 %v10980_v33, %v10980_v33  ;;  %v10999_v20 = vsub.f32 %v10869_v11, %v5684_v46  ;;  %v11027_v46 = vld [vmem:[%s11254_s7] ss:$0 sm:$0xff] }
 0x74b   : > { %v10992_v42 = vsub.f32 %v10897_v3, %v5669_v35  ;;  %v5736_v17 = vsel %vm5611_vm3, %v5708_v39, 0.0  ;;  %v5704_v3 = vmul.f32 %v10989_v40, %v10989_v40  ;;  %v5720_v24 = vmul.f32 %v10999_v20, %v10999_v20 }
 0x74c   : > { %v5614_v51 = vpop.xlane.xlu1 %5613  ;;  %5737 = vadd.xlane.f32.xlu0 %v5736_v17 }
 0x74d   : > { %v5667_v30 = vmul.f32 0.015625, %v5614_v51  ;;  %v5705_v62 = vmul.f32 %v10992_v42, %v10992_v42  ;;  %v5772_v23 = vsel %vm5611_vm3, %v5720_v24, 0.0 }
 0x74f   : > { %v11002_v37 = vsub.f32 %v10903_v28, %v5667_v30  ;;  %v5727_v38 = vsel %vm5611_vm3, %v5705_v62, 0.0  ;;  %v5724_v28 = vsel %vm5611_vm3, %v5704_v3, 0.0 }
 0x750   : > { %5728 = vadd.xlane.f32.xlu1 %v5727_v38  ;;  %v5662_v5 = vpop.xlane.xlu1 %5661  ;;  %5731 = vadd.xlane.f32.xlu0 %v5730_v41 }
 0x751   : > { %v5683_v2 = vmul.f32 0.015625, %v5662_v5  ;;  %v5703_v45 = vmul.f32 %v11002_v37, %v11002_v37 }
 0x753   : > { %v11010_v26 = vsub.f32 %v10908_v31, %v5683_v2  ;;  %v5721_v11 = vsel %vm5611_vm3, %v5703_v45, 0.0  ;;  %v8219_v31 = vld [vmem:[%s11259_s12 + $0x4] ss:$8 sps:$4 sm:$0xff]   ;;  %v11034_v45 = vld [vmem:[%s11255_s8] ss:$0 sm:$0xff] }
 0x754   : > { %5722 = vadd.xlane.f32.xlu1 %v5721_v11  ;;  %5725 = vadd.xlane.f32.xlu0 %v5724_v28 }
 0x755   : > { %v5719_v43 = vmul.f32 %v11010_v26, %v11010_v26  ;;  %6786 = vmatprep.mubr.msk.bf16.mxu1 %vm505_vm1, %v8219_v31 }
 0x757   : > { %v5769_v44 = vsel %vm5611_vm3, %v5719_v43, 0.0 }
 0x758   : > { %5770 = vadd.xlane.f32.xlu1 %v5769_v44  ;;  %5773 = vadd.xlane.f32.xlu0 %v5772_v23 }
 0x7bd   : > { %v5765_v48 = vpop.xlane.xlu1 %5764 }
 0x7be   : > { %v5789_v19 = vmul.f32 0.015625, %v5765_v48 }
 0x7c0   : > { %v5807_v22 = vadd.f32 1e-05, %v5789_v19 }
 0x7c1   : > { %v5759_v34 = vpop.xlane.xlu1 %5758  ;;  %v5768_v29 = vpop.xlane.xlu0 %5767 }
 0x7c2   : > { %8281 = vrsqrt.f32 %v5807_v22  ;;  %v5787_v18 = vmul.f32 0.015625, %v5759_v34  ;;  %v5790_v12 = vmul.f32 0.015625, %v5768_v29 }
 0x7c4   : > { %v5805_v53 = vadd.f32 1e-05, %v5787_v18  ;;  %v5808_v50 = vadd.f32 1e-05, %v5790_v12 }
 0x7c5   : > { %v5753_v25 = vpop.xlane.xlu1 %5752  ;;  %v5762_v55 = vpop.xlane.xlu0 %5761 }
 0x7c6   : > { %8283 = vrsqrt.f32 %v5805_v53  ;;  %v5785_v61 = vmul.f32 0.015625, %v5753_v25  ;;  %v5788_v16 = vmul.f32 0.015625, %v5762_v55 }
 0x7c7   : > { %8285 = vrsqrt.f32 %v5808_v50 }
 0x7c8   : > { %v5803_v56 = vadd.f32 1e-05, %v5785_v61  ;;  %v5806_v57 = vadd.f32 1e-05, %v5788_v16 }
 0x7c9   : > { %v5747_v15 = vpop.xlane.xlu1 %5746  ;;  %v5756_v14 = vpop.xlane.xlu0 %5755 }
 0x7ca   : > { %8287 = vrsqrt.f32 %v5803_v56  ;;  %v5783_v49 = vmul.f32 0.015625, %v5747_v15  ;;  %v5786_v47 = vmul.f32 0.015625, %v5756_v14 }
 0x7cb   : > { %8289 = vrsqrt.f32 %v5806_v57 }
 0x7cc   : > { %v5801_v10 = vadd.f32 1e-05, %v5783_v49  ;;  %v5804_v7 = vadd.f32 1e-05, %v5786_v47 }
 0x7cd   : > { %v5741_v59 = vpop.xlane.xlu1 %5740  ;;  %v5750_v63 = vpop.xlane.xlu0 %5749 }
 0x7ce   : > { %8291 = vrsqrt.f32 %v5801_v10  ;;  %v5781_v35 = vmul.f32 0.015625, %v5741_v59  ;;  %v5784_v39 = vmul.f32 0.015625, %v5750_v63 }
 0x7cf   : > { %v8282_v36 = vpop.eup %8281  ;;  %8293 = vrsqrt.f32 %v5804_v7 }
 0x7d0   : > { %v5799_v17 = vadd.f32 1e-05, %v5781_v35  ;;  %v5802_v51 = vadd.f32 1e-05, %v5784_v39  ;;  %v5843_v30 = vmul.f32 %v8282_v36, %v10916_v8 }
 0x7d1   : > { %v5735_v62 = vpop.xlane.xlu1 %5734  ;;  %v5744_v41 = vpop.xlane.xlu0 %5743 }
 0x7d2   : > { %8295 = vrsqrt.f32 %v5799_v17  ;;  %v5779_v38 = vmul.f32 0.015625, %v5735_v62  ;;  %v5782_v3 = vmul.f32 0.015625, %v5744_v41  ;;  %v5867_v5 = vmul.f32 %v11027_v46, %v5843_v30 }
 0x7d3   : > { %v8284_v2 = vpop.eup %8283  ;;  %8297 = vrsqrt.f32 %v5802_v51 }
 0x7d4   : > { %v8286_v11 = vpop.eup %8285  ;;  %v5797_v28 = vadd.f32 1e-05, %v5779_v38  ;;  %v5800_v24 = vadd.f32 1e-05, %v5782_v3  ;;  %v5841_v43 = vmul.f32 %v8284_v2, %v10913_v13  ;;  %v5891_v31 = vadd.f32 %v11034_v45, %v5867_v5 }
 0x7d5   : > { %v5738_v8 = vpop.xlane.xlu0 %5737  ;;  %v5844_v44 = vmul.f32 %v8286_v11, %v10927_v27 }
 0x7d6   : > { %8299 = vrsqrt.f32 %v5797_v28  ;;  %v5780_v23 = vmul.f32 0.015625, %v5738_v8  ;;  %v5865_v22 = vmul.f32 %v11027_v46, %v5841_v43  ;;  %v5909_v55 = vmax.f32 %v5891_v31, 0.0 }
 0x7d7   : > { %v8288_v48 = vpop.eup %8287  ;;  %8301 = vrsqrt.f32 %v5800_v24  ;;  %v5868_v19 = vmul.f32 %v11027_v46, %v5844_v44 }
 0x7d8   : > { %v8290_v34 = vpop.eup %8289  ;;  %v5798_v29 = vadd.f32 1e-05, %v5780_v23  ;;  %v5839_v18 = vmul.f32 %v8288_v48, %v10921_v9  ;;  %v5889_v57 = vadd.f32 %v11034_v45, %v5865_v22 }
 0x7d9   : > { %v5729_v12 = vpop.xlane.xlu1 %5728  ;;  %v5732_v53 = vpop.xlane.xlu0 %5731  ;;  %v5892_v13 = vadd.f32 %v11034_v45, %v5868_v19  ;;  %v5842_v27 = vmul.f32 %v8290_v34, %v10924_v4 }
 0x7da   : > { %8303 = vrsqrt.f32 %v5798_v29  ;;  %v5777_v50 = vmul.f32 0.015625, %v5729_v12  ;;  %v5778_v25 = vmul.f32 0.015625, %v5732_v53  ;;  %v5863_v15 = vmul.f32 %v11027_v46, %v5839_v18 }
 0x7db   : > { %v8292_v61 = vpop.eup %8291  ;;  %v5910_v16 = vmax.f32 %v5892_v13, 0.0  ;;  %v5866_v56 = vmul.f32 %v11027_v46, %v5842_v27  ;;  %v5907_v30 = vmax.f32 %v5889_v57, 0.0 }
 0x7dc   : > { %v8294_v14 = vpop.eup %8293  ;;  %v5795_v9 = vadd.f32 1e-05, %v5777_v50  ;;  %v5796_v49 = vadd.f32 1e-05, %v5778_v25  ;;  %v5837_v47 = vmul.f32 %v8292_v61, %v10935_v32  ;;  %v5887_v35 = vadd.f32 %v11034_v45, %v5863_v15 }
 0x7dd   : > { %v5723_v10 = vpop.xlane.xlu1 %5722  ;;  %v5726_v7 = vpop.xlane.xlu0 %5725  ;;  %v5920_v4 = vpack.c.bf16 %v5910_v16, %v5909_v55  ;;  %v5890_v59 = vadd.f32 %v11034_v45, %v5866_v56  ;;  %v5840_v63 = vmul.f32 %v8294_v14, %v10938_v6 }
 0x7de   : > { %8305 = vrsqrt.f32 %v5795_v9  ;;  %v5775_v39 = vmul.f32 0.015625, %v5723_v10  ;;  %v5776_v36 = vmul.f32 0.015625, %v5726_v7  ;;  %v5861_v17 = vmul.f32 %v11027_v46, %v5837_v47 }
 0x7df   : > { %v8296_v51 = vpop.eup %8295  ;;  %8307 = vrsqrt.f32 %v5796_v49  ;;  %5979 = vmatpush1.bf16.msra.mxu1 %v5920_v4  ;;  %v5908_v62 = vmax.f32 %v5890_v59, 0.0  ;;  %v5864_v32 = vmul.f32 %v11027_v46, %v5840_v63  ;;  %v5905_v24 = vmax.f32 %v5887_v35, 0.0 }
 0x7e0   : > { %v8298_v41 = vpop.eup %8297  ;;  %v5793_v38 = vadd.f32 1e-05, %v5775_v39  ;;  %v5794_v3 = vadd.f32 1e-05, %v5776_v36  ;;  %5980 = vmatprep.subr.bf16.mxu1 %v11271_v21  ;;  %v5835_v6 = vmul.f32 %v8296_v51, %v10953_v0  ;;  %v5885_v23 = vadd.f32 %v11034_v45, %v5861_v17 }
 0x7e1   : > { %v5771_v5 = vpop.xlane.xlu1 %5770  ;;  %v5774_v2 = vpop.xlane.xlu0 %5773  ;;  %v5919_v11 = vpack.c.bf16 %v5908_v62, %v5907_v30  ;;  %v5888_v28 = vadd.f32 %v11034_v45, %v5864_v32  ;;  %v5838_v43 = vmul.f32 %v8298_v41, %v10950_v60 }
 0x7e2   : > { %8309 = vrsqrt.f32 %v5793_v38  ;;  %v5791_v8 = vmul.f32 0.015625, %v5771_v5  ;;  %v5792_v44 = vmul.f32 0.015625, %v5774_v2  ;;  %v5859_v0 = vmul.f32 %v11027_v46, %v5835_v6 }
 0x7e3   : > { %v8300_v31 = vpop.eup %8299  ;;  %8311 = vrsqrt.f32 %v5794_v3  ;;  %5981 = vmatpush1.bf16.msra.mxu1 %v5919_v11  ;;  %v5906_v48 = vmax.f32 %v5888_v28, 0.0  ;;  %v5862_v19 = vmul.f32 %v11027_v46, %v5838_v43  ;;  %v5903_v13 = vmax.f32 %v5885_v23, 0.0 }
 0x7e4   : > { %v8302_v22 = vpop.eup %8301  ;;  %v5809_v34 = vadd.f32 1e-05, %v5791_v8  ;;  %v5810_v29 = vadd.f32 1e-05, %v5792_v44  ;;  %5982 = vmatprep.subr.bf16.mxu1 %v11271_v21  ;;  %v5833_v60 = vmul.f32 %v8300_v31, %v10968_v52  ;;  %v5883_v61 = vadd.f32 %v11034_v45, %v5859_v0  ;;  %v8229_v0 = vld [vmem:[%s11256_s9 + $0x38] sm:$0xff]  }
 0x7e5   : > { %v5918_v18 = vpack.c.bf16 %v5906_v48, %v5905_v24  ;;  %v5886_v12 = vadd.f32 %v11034_v45, %v5862_v19  ;;  %v5836_v53 = vmul.f32 %v8302_v22, %v10960_v54  ;;  %v8217_v19 = vld [vmem:[%s11259_s12] ss:$8 sps:$4 sm:$0xff]  }
 0x7e6   : > { %8313 = vrsqrt.f32 %v5809_v34  ;;  %v5857_v27 = vmul.f32 %v11027_v46, %v5833_v60  ;;  %v5901_v14 = vmax.f32 %v5883_v61, 0.0  ;;  %v8225_v22 = vld [vmem:[%s11259_s12 + $0x20] ss:$8 sps:$4 sm:$0xff]   ;;  %v8226_v34 = vld [vmem:[%s11259_s12 + $0x34] ss:$8 sps:$4 sm:$0xff]  }
 0x7e7   : > { %v8304_v50 = vpop.eup %8303  ;;  %8315 = vrsqrt.f32 %v5810_v29  ;;  %5983 = vmatpush1.bf16.msra.mxu1 %v5918_v18  ;;  %v5904_v25 = vmax.f32 %v5886_v12, 0.0  ;;  %v5860_v55 = vmul.f32 %v11027_v46, %v5836_v53  ;;  %v8228_v29 = vld [vmem:[%s11259_s12 + $0x30] ss:$8 sps:$4 sm:$0xff]   ;;  %v8231_v18 = vld [vmem:[%s11256_s9 + $0x28] sm:$0xff]   ;;  %v8232_v12 = vld [vmem:[%s11256_s9 + $0x20] sm:$0xff]  }
 0x7e8   : > { %5984 = vmatprep.subr.bf16.mxu1 %v11271_v21  ;;  %v5834_v52 = vmul.f32 %v8304_v50, %v10980_v33  ;;  %v5881_v57 = vadd.f32 %v11034_v45, %v5857_v27  ;;  %v8230_v60 = vld [vmem:[%s11256_s9 + $0x30] sm:$0xff]   ;;  %v8233_v53 = vld [vmem:[%s11256_s9 + $0x78] sm:$0xff]   ;;  %v8242_v27 = vld [vmem:[%s11256_s9 + $0x68] sm:$0xff]  }
 0x7e9   : > { %v5917_v16 = vpack.c.bf16 %v5904_v25, %v5903_v13  ;;  %v5884_v56 = vadd.f32 %v11034_v45, %v5860_v55  ;;  %8125 = vmatpush3.bf16.msra.mxu0 %v8233_v53  ;;  %v8239_v13 = vld [vmem:[%s11256_s9 + $0x70] sm:$0xff]   ;;  %v8244_v50 = vld [vmem:[%s11256_s9 + $0x60] sm:$0xff]  }
 0x7ea   : > { %v5858_v54 = vmul.f32 %v11027_v46, %v5834_v52  ;;  %v5899_v4 = vmax.f32 %v5881_v57, 0.0  ;;  %8126 = vmatprep.subr.bf16.mxu0 %v8382_v1  ;;  %v8234_v57 = vld [vmem:[%s11256_s9 + $0x18] sm:$0xff]  }
 0x7eb   : > { %v8306_v15 = vpop.eup %8305  ;;  %5985 = vmatpush1.bf16.msra.mxu1 %v5917_v16  ;;  %v5902_v9 = vmax.f32 %v5884_v56, 0.0 }
 0x7ec   : > { %v8308_v49 = vpop.eup %8307  ;;  %5986 = vmatprep.subr.bf16.mxu1 %v11271_v21  ;;  %v5882_v47 = vadd.f32 %v11034_v45, %v5858_v54  ;;  %v5831_v10 = vmul.f32 %v8306_v15, %v10992_v42 }
 0x7ed   : > { %v5916_v7 = vpack.c.bf16 %v5902_v9, %v5901_v14  ;;  %v5832_v33 = vmul.f32 %v8308_v49, %v10977_v58  ;;  %8127 = vmatpush3.bf16.msra.mxu0 %v8239_v13  ;;  %v8235_v9 = vld [vmem:[%s11256_s9 + $0x10] sm:$0xff]  }
 0x7ee   : > { %v5900_v59 = vmax.f32 %v5882_v47, 0.0  ;;  %v5855_v63 = vmul.f32 %v11027_v46, %v5831_v10  ;;  %8128 = vmatprep.subr.bf16.mxu0 %v8382_v1  ;;  %v8236_v10 = vld [vmem:[%s11256_s9 + $0x8] sm:$0xff]  }
 0x7ef   : > { %v8310_v35 = vpop.eup %8309  ;;  %5987 = vmatpush1.bf16.msra.mxu1 %v5916_v7  ;;  %v5856_v39 = vmul.f32 %v11027_v46, %v5832_v33 }
 0x7f0   : > { %v8312_v36 = vpop.eup %8311  ;;  %5988 = vmatprep.subr.bf16.mxu1 %v11271_v21  ;;  %v5915_v17 = vpack.c.bf16 %v5900_v59, %v5899_v4  ;;  %v5879_v51 = vadd.f32 %v11034_v45, %v5855_v63  ;;  %v5829_v30 = vmul.f32 %v8310_v35, %v11002_v37  ;;  %v8237_v4 = vld [vmem:[%s11256_s9] sm:$0xff]   ;;  %v8238_v35 = vld [vmem:[%s11256_s9 + $0x58] sm:$0xff]  }
 0x7f1   : > { %v5880_v42 = vadd.f32 %v11034_v45, %v5856_v39  ;;  %v5830_v58 = vmul.f32 %v8312_v36, %v10989_v40  ;;  %8129 = vmatpush3.bf16.msra.mxu0 %v8242_v27 }
 0x7f2   : > { %v5897_v62 = vmax.f32 %v5879_v51, 0.0  ;;  %v5853_v32 = vmul.f32 %v11027_v46, %v5829_v30  ;;  %8130 = vmatprep.subr.bf16.mxu0 %v8382_v1  ;;  %v8240_v30 = vld [vmem:[%s11256_s9 + $0x50] sm:$0xff]  }
 0x7f3   : > { %v8314_v41 = vpop.eup %8313  ;;  %5989 = vmatpush1.bf16.msra.mxu1 %v5915_v17  ;;  %v5898_v38 = vmax.f32 %v5880_v42, 0.0  ;;  %v5854_v3 = vmul.f32 %v11027_v46, %v5830_v58  ;;  %v8241_v42 = vld [vmem:[%s11256_s9 + $0x48] sm:$0xff]   ;;  %v8243_v58 = vld [vmem:[%s11256_s9 + $0x40] sm:$0xff]  }
 0x7f4   : > { %v8316_v6 = vpop.eup %8315  ;;  %5990 = vmatprep.subr.bf16.mxu1 %v11271_v21  ;;  %v5877_v5 = vadd.f32 %v11034_v45, %v5853_v32  ;;  %v5845_v2 = vmul.f32 %v8314_v41, %v11010_v26 }
 0x7f5   : > { %v5914_v37 = vpack.c.bf16 %v5898_v38, %v5897_v62  ;;  %v5878_v11 = vadd.f32 %v11034_v45, %v5854_v3  ;;  %v5846_v40 = vmul.f32 %v8316_v6, %v10999_v20  ;;  %8131 = vmatpush3.bf16.msra.mxu0 %v8244_v50 }
 0x7f6   : > { %v5895_v28 = vmax.f32 %v5877_v5, 0.0  ;;  %v5869_v24 = vmul.f32 %v11027_v46, %v5845_v2 }
 0x7f7   : > { %5991 = vmatpush1.bf16.msra.mxu1 %v5914_v37  ;;  %v5896_v43 = vmax.f32 %v5878_v11, 0.0  ;;  %v5870_v8 = vmul.f32 %v11027_v46, %v5846_v40  ;;  %v8220_v46 = vld [vmem:[%s11259_s12 + $0x14] ss:$8 sps:$4 sm:$0xff]  }
 0x7f8   : > { %5992 = vmatprep.subr.bf16.mxu1 %v11271_v21  ;;  %v5893_v44 = vadd.f32 %v11034_v45, %v5869_v24 }
 0x7f9   : > { %v5913_v23 = vpack.c.bf16 %v5896_v43, %v5895_v28  ;;  %v5894_v31 = vadd.f32 %v11034_v45, %v5870_v8  ;;  %v8223_v45 = vld [vmem:[%s11259_s12 + $0x24] ss:$8 sps:$4 sm:$0xff]  }
 0x7fa   : > { %v5911_v26 = vmax.f32 %v5893_v44, 0.0 }
 0x7fb   : > { %5993 = vmatpush1.bf16.msra.mxu1 %v5913_v23  ;;  %v5912_v48 = vmax.f32 %v5894_v31, 0.0  ;;  %v6834_v23 = vld [vmem:[%s11257_s10] ss:$0 sm:$0xff] }
 0x7fc   : > { %6008 = vmatprep.subr.bf16.mxu1 %v11271_v21  ;;  %v8222_v21 = vld [vmem:[%s11259_s12 + $0x10] ss:$8 sps:$4 sm:$0xff]  }
 0x7fd   : > { %v5921_v20 = vpack.c.bf16 %v5912_v48, %v5911_v26 }
 0x7ff   : > { %6009 = vmatpush2.bf16.msra.mxu1 %v5921_v20 }
 0x800   : > { %8088 = vmatprep.subr.bf16.mxu1 %v8382_v1 }
 0x802   : > { %6011 = vmatmul.mubr.bf16.vlgmr.msra.gmra.mxu1 %v8217_v19 }
 0x803   : > { %6787 = vmatprep.mubr.msk.bf16.mxu1 %vm505_vm1, %v8220_v46  ;;  %8089 = vmatpush3.bf16.msra.mxu1 %v8229_v0 }
 0x804   : > { %8090 = vmatprep.subr.bf16.mxu1 %v8382_v1 }
 0x807   : > { %8091 = vmatpush3.bf16.msra.mxu1 %v8230_v60 }
 0x808   : > { %8092 = vmatprep.subr.bf16.mxu1 %v8382_v1 }
 0x80a   : > { %6019 = vmatmul.mubr.bf16.gmra.mxu1 %v8222_v21 }
 0x80b   : > { %6788 = vmatprep.mubr.msk.bf16.mxu1 %vm505_vm1, %v8223_v45  ;;  %8093 = vmatpush3.bf16.msra.mxu1 %v8231_v18 }
 0x80c   : > { %8094 = vmatprep.subr.bf16.mxu1 %v8382_v1 }
 0x80f   : > { %8095 = vmatpush3.bf16.msra.mxu1 %v8232_v12 }
 0x810   : > { %8100 = vmatprep.subr.bf16.mxu1 %v8382_v1 }
 0x812   : > { %6027 = vmatmul.mubr.bf16.gmra.mxu1 %v8225_v22 }
 0x813   : > { %6789 = vmatprep.mubr.msk.bf16.mxu1 %vm505_vm1, %v8226_v34 }
 0x81a   : > { %6035 = vmatmul.mubr.bf16.gmra.mxu1 %v8228_v29 }
 0x81b   : > { %8096 = vmatprep.mubr.msk.bf16.mxu1 %vm8383_vm0, %v8382_v1 }
 0x8c2   : > { %v6012_v25 = vpop.f32.mrf.mxu1 }
 0x8c4   : > { %v6014_v55 = vpop.f32.mrf.mxu1 }
 0x8c6   : > { %v6015_v61 = vpop.f32.mrf.mxu1 }
 0x8c7   : > { %v6043_v36 = vpack.c.bf16 %v6015_v61, %v6012_v25 }
 0x8c8   : > { %v6017_v52 = vpop.f32.mrf.mxu1 }
 0x8ca   : > { %v6020_v16 = vpop.f32.mrf.mxu1 }
 0x8cc   : > { %v6022_v56 = vpop.f32.mrf.mxu1 }
 0x8ce   : > { %v6023_v54 = vpop.f32.mrf.mxu1 }
 0x8cf   : > { %v6044_v15 = vpack.c.bf16 %v6023_v54, %v6020_v16 }
 0x8d0   : > { %v6025_v14 = vpop.f32.mrf.mxu1 }
 0x8d1   : > { %8097 = vmatmul.mubr.msk.bf16.vlgmr.msra.gmra.mxu1 %vm5611_vm3, %v6044_v15 }
 0x8d2   : > { %8101 = vmatpush3.bf16.msra.mxu1 %v8234_v57  ;;  %8108 = vmatprep.mubr.msk.bf16.mxu1 %vm8383_vm0, %v8382_v1  ;;  %v6028_v49 = vpop.f32.mrf.mxu1 }
 0x8d3   : > { %8102 = vmatprep.subr.bf16.mxu1 %v8382_v1 }
 0x8d4   : > { %v6030_v47 = vpop.f32.mrf.mxu1 }
 0x8d6   : > { %8103 = vmatpush3.bf16.msra.mxu1 %v8235_v9  ;;  %v6031_v7 = vpop.f32.mrf.mxu1 }
 0x8d7   : > { %8104 = vmatprep.subr.bf16.mxu1 %v8382_v1  ;;  %v6045_v62 = vpack.c.bf16 %v6031_v7, %v6028_v49 }
 0x8d8   : > { %v6033_v33 = vpop.f32.mrf.mxu1 }
 0x8da   : > { %8105 = vmatpush3.bf16.msra.mxu1 %v8236_v10  ;;  %v6036_v59 = vpop.f32.mrf.mxu1 }
 0x8db   : > { %8106 = vmatprep.subr.bf16.mxu1 %v8382_v1 }
 0x8dc   : > { %v6038_v63 = vpop.f32.mrf.mxu1 }
 0x8de   : > { %8107 = vmatpush3.bf16.msra.mxu1 %v8237_v4  ;;  %v6039_v39 = vpop.f32.mrf.mxu1 }
 0x8df   : > { %8112 = vmatprep.subr.bf16.mxu1 %v8382_v1  ;;  %v6046_v17 = vpack.c.bf16 %v6039_v39, %v6036_v59 }
 0x8e0   : > { %v6041_v51 = vpop.f32.mrf.mxu1 }
 0x8e1   : > { %8109 = vmatmul.mubr.msk.bf16.vlgmr.msra.gmra.mxu1 %vm5611_vm3, %v6043_v36  ;;  %8133 = vmatmul.mubr.msk.bf16.vlgmr.msra.gmra.mxu0 %vm5611_vm3, %v6046_v17 }
 0x8e2   : > { %8113 = vmatpush3.bf16.msra.mxu1 %v8238_v35  ;;  %8120 = vmatprep.mubr.msk.bf16.mxu1 %vm8383_vm0, %v8382_v1 }
 0x8e3   : > { %8114 = vmatprep.subr.bf16.mxu1 %v8382_v1 }
 0x8e6   : > { %8115 = vmatpush3.bf16.msra.mxu1 %v8240_v30 }
 0x8e7   : > { %8116 = vmatprep.subr.bf16.mxu1 %v8382_v1 }
 0x8ea   : > { %8117 = vmatpush3.bf16.msra.mxu1 %v8241_v42 }
 0x8eb   : > { %8118 = vmatprep.subr.bf16.mxu1 %v8382_v1 }
 0x8ee   : > { %8119 = vmatpush3.bf16.msra.mxu1 %v8243_v58 }
 0x8f1   : > { %8121 = vmatmul.mubr.msk.bf16.vlgmr.msra.gmra.mxu1 %vm5611_vm3, %v6045_v62 }
 0x991   : > { %v6125_v32 = vpop.f32.mrf.mxu1 }
 0x993   : > { %v8098_v41 = vpop.f32.mrf.mxu1 }
 0x995   : > { %v6128_v38 = vpop.f32.mrf.mxu1 }
 0x997   : > { %v8099_v3 = vpop.f32.mrf.mxu1 }
 0x9a1   : > { %v6193_v6 = vpop.f32.mrf.mxu1  ;;  %v6349_v5 = vpop.f32.mrf.mxu0 }
 0x9a2   : > { %v6194_v1 = vadd.f32 %v6193_v6, %v6125_v32 }
 0x9a3   : > { %v8110_v2 = vpop.f32.mrf.mxu1  ;;  %v8134_v37 = vpop.f32.mrf.mxu0 }
 0x9a5   : > { %v6196_v11 = vpop.f32.mrf.mxu1  ;;  %v6352_v40 = vpop.f32.mrf.mxu0 }
 0x9a6   : > { %v6197_v31 = vadd.f32 %v6196_v11, %v6128_v38 }
 0x9a7   : > { %v8111_v28 = vpop.f32.mrf.mxu1  ;;  %v8135_v24 = vpop.f32.mrf.mxu0 }
 0x9b1   : > { %v6270_v43 = vpop.f32.mrf.mxu1 }
 0x9b2   : > { %v6277_v8 = vadd.f32 %v6270_v43, %v6194_v1 }
 0x9b3   : > { %v8122_v44 = vpop.f32.mrf.mxu1 }
 0x9b4   : > { %v6356_v26 = vadd.f32 %v6349_v5, %v6277_v8 }
 0x9b5   : > { %v6273_v48 = vpop.f32.mrf.mxu1 }
 0x9b6   : > { %v6365_v20 = vadd.f32 %v6834_v23, %v6356_v26  ;;  %v6278_v19 = vadd.f32 %v6273_v48, %v6197_v31 }
 0x9b7   : > { %v8123_v46 = vpop.f32.mrf.mxu1 }
 0x9b8   : > { %6367 = vst.msk [vmem:[%s433_s20] sm:$0xff] %vm3407_vm2, %v6365_v20  ;;  %v6357_v0 = vadd.f32 %v6352_v40, %v6278_v19 }
 0x9ba   : > { %v6366_v21 = vadd.f32 %v6834_v23, %v6357_v0 }
 0x9bc   : > { %6368 = vst.msk [vmem:[%s433_s20 + $0x8] sm:$0xff] %vm3407_vm2, %v6366_v21 }
 0x9bd   : > { %8333 = shalt.err (!%p8330_p3)
}
 0x9be   : > { %s8334_s0 = scalar_lea.hbm %s11202_s23, 256  ;;  %s8338_s22 = scalar_lea.hbm %s11260_s13, 512 }
 0x9bf   : > { %p8335_p4 = scmp.ne.s32.totalorder %s11202_s23, %s8334_s0  ;;  %p8339_p9 = scmp.lt.s32.totalorder %s11202_s23, %s11260_s13 }
 0x9c0   : > { %p8340_p10 = scmp.lt.s32.totalorder %s8338_s22, %s8334_s0 }
 0x9c1   : > { %p8336_p7 = pnand %p8335_p4, %p8496_p5 }
 0x9c2   : > { %p8341_p11 = por %p8340_p10, %p8339_p9 }
 0x9c3   : > { %p8337_p8 = pneg %p8336_p7 }
 0x9c5   : > { %p8342_p12 = pnand %p8341_p11, %p8337_p8 }
 0x9c7   : > { %8345 = shalt.err (!%p8342_p12)
}
 0x9c8   : > { %s8386_s29 = smov 128   ;;  %s8387_s30 = smov 8  }
 0x9c9   : > { %8137 = dma.vmem_to_hbm [thread:$0]  (%p8496_p5), %s11204_s15, 256, %s11202_s23, %s11207_s1, %s8386_s29, %s8386_s29, %s8387_s30  }
 0x9ca PF: > { %p8143_p13 = scmp.ge.s32.totalorder %s8380_s28, 2  ;;  %s6398_s16 = sand.u32 1, %s8368_s25  }
 0x9cb   : > { %s6399_s2 = scalar_lea.sflag [#allocation4], %s6398_s16 }
 0x9cc   : > { %p8140_p0 = pnand %p8143_p13, %p8500_p6 }
 0x9ce   : > { %p8141_p1 = pneg %p8140_p0 }
 0x9d0   : > { %8363 = dma.done.wait (%p8141_p1), %s6399_s2, 256  }
 0x9d1   : > { %8365 = vsyncadd (%p8141_p1), %s6399_s2, 4294967040  ;;  %p23_p2 = scmp.ge.s32.totalorder %s8483_s14, 4   ;;  %s11285_s25 = smov %s8372_s26 }
 0x9d2   : > { %s11286_s26 = smov %s8376_s27  ;;  %s11287_s27 = smov %s8494_s17 }
 0x9d3   : > { %s11288_s28 = smov %s8483_s14  ;;  %25 = sbr.rel (!%p23_p2) target bundleno = 7 (0x7), region = 133 }
 0x9d8   :  { %6404 = vsyncpa [#allocation4], 1 }
 0x9d9   :  { %6406 = vsyncpa [#allocation4 + $0x1], 1 }

</bundles_post_ra>
